<compile_context>
chip_gen: v5e
topology: v5e:2x2
jax: 0.10.0
libtpu: 0.0.40
codegen_flags: <defaults>
</compile_context>

<pallas_src>
import functools
import math

import jax
import jax.numpy as jnp
from jax.experimental import pallas as pl
from jax.experimental.pallas import tpu as pltpu


D_EMB = 128      # TokenEmbedding output features
D_MODEL = 126    # encoder model dim (128 - kernel_size + 1 from ODConv)
D_PAD = 128      # lane-padded model dim used inside the encoder
D_FF = 2048
N_HEADS = 6
DH = D_MODEL // N_HEADS          # 21 (real head dim, used for the softmax scale)
DH_PAD = 32                      # lane-aligned padded head dim


# --------------------------- in-kernel math helpers ---------------------------


def _ln(x, g, b):
    """LayerNorm over the last axis; only the first D_MODEL lanes are real (pad lanes
    are zero and gamma/beta are zero-padded, so pad lanes stay exactly zero)."""
    inv_n = 1.0 / D_MODEL
    mu = jnp.sum(x, axis=-1, keepdims=True) * inv_n
    var = jnp.sum(x * x, axis=-1, keepdims=True) * inv_n - mu * mu
    return (x - mu) * jax.lax.rsqrt(var + 1e-5) * g + b


def _gelu(y):
    """Exact (erf) GELU via the Abramowitz-Stegun erf polynomial (|err| < 1.5e-7), so
    only exp is required inside the Mosaic kernel (EUP slot)."""
    z = jnp.abs(y) * 0.7071067811865476
    t = 1.0 / (1.0 + 0.3275911 * z)
    poly = t * (0.254829592 + t * (-0.284496736 + t * (1.421413741
             + t * (-1.453152027 + t * 1.061405429))))
    erf_abs = 1.0 - poly * jnp.exp(-z * z)
    erf = jnp.where(y >= 0.0, erf_abs, -erf_abs)
    return 0.5 * y * (1.0 + erf)


# ---------------------------- the single fused kernel ----------------------------


def _fused_kernel(*refs, Bt, L, L2, n_heads, dh_pad, scale):
    (xcat_ref, embed_w, embed_b, pe_ref,
     od_fc_w, od_fc_b, od_gate_w, od_gate_b, od_w) = refs[:9]
    enc1 = refs[9:21]
    conv_w, conv_b = refs[21:23]
    enc2 = refs[23:35]
    norm_g, norm_b, fc_w, fc_b = refs[35:39]
    o_ref = refs[39]

    f32, bf16 = jnp.float32, jnp.bfloat16
    E = L                                                   # env_days == encoder seq len

    # ---- 1. DataEmbedding: token circular conv (im2col) + time-feature linear + PE ----
    xcat = xcat_ref[...]                                    # (Bt, E, 3*c_in + 3)
    m0 = Bt * E
    emb = jnp.dot(xcat.reshape(m0, xcat.shape[-1]).astype(bf16), embed_w[...],
                  preferred_element_type=f32) + embed_b[...]
    emb = emb.reshape(Bt, E, D_EMB) + pe_ref[...]           # (Bt, E, 128), dropout = id

    # ---- 2. ODConv1d: gating heads + dynamic per-sample conv over the feature axis ----
    pooled = jnp.sum(emb, axis=-1) * (1.0 / D_EMB)                          # (Bt, E)
    hid = jnp.maximum(
        jnp.dot(pooled, od_fc_w[...], preferred_element_type=f32) + od_fc_b[...], 0.0)
    gates = jnp.dot(hid, od_gate_w[...], preferred_element_type=f32) + od_gate_b[...]
    ca = 1.0 / (1.0 + jnp.exp(-gates[:, :E]))                               # channel attn
    fa = 1.0 / (1.0 + jnp.exp(-gates[:, E:2 * E]))                          # filter  attn
    sa = 1.0 / (1.0 + jnp.exp(-gates[:, 2 * E:2 * E + 3]))                  # spatial attn
    kl = gates[:, 2 * E + 3:2 * E + 7]                                      # kernel attn
    ke = jnp.exp(kl - jnp.max(kl, axis=-1, keepdims=True))
    ka = ke * pl.reciprocal(jnp.sum(ke, axis=-1, keepdims=True), approx=True)

    xs = emb * ca[:, :, None]                                               # (Bt, E, 128)
    odw = od_w[...]                                                         # (4, E, 3E)
    od_rows = []
    for b in range(Bt):                 # dynamic (per-sample) weights -> per-sample matmul
        xb = xs[b]                                                          # (E, 128)
        taps = []
        for k in range(3):              # xb[:, t+k]; wrapped lanes (>=126) are masked below
            xk = xb if k == 0 else jnp.roll(xb, -k, axis=1)
            taps.append(xk * sa[b:b + 1, k:k + 1])
        xcol = jnp.concatenate(taps, axis=0)                                # (3E, 128)
        comb = odw[0] * ka[b:b + 1, 0:1]
        for n in range(1, 4):
            comb = comb + odw[n] * ka[b:b + 1, n:n + 1]                     # (E, 3E)
        od_rows.append(jnp.dot(comb.astype(bf16), xcol.astype(bf16),
                               preferred_element_type=f32))                 # (E, 128)
    lane = jax.lax.broadcasted_iota(jnp.int32, (1, 1, D_PAD), 2)
    valid = (lane < D_MODEL).astype(f32)                    # zero the 2 lane-pad channels
    od = jnp.stack(od_rows, axis=0) * fa[:, :, None] * valid                # (Bt, E, 128)

    # ---- fused encoder layer (all-head attention + out-proj + LN1 + FFN + LN2) ----
    hsz = n_heads * dh_pad

    def enc_layer(x3, prm):
        (wqkv, bqkv, wo, bo, ln1g, ln1b, w1, bf1, w2, bf2, ln2g, ln2b) = prm
        bt, ll, _ = x3.shape
        m = bt * ll                                          # batch flattened into MXU rows
        xf = x3.reshape(m, D_PAD)
        qkv = jnp.dot(xf.astype(bf16), wqkv[...],
                      preferred_element_type=f32) + bqkv[...]               # (m, 3*H*32)
        qkv3 = qkv.reshape(bt, ll, 3 * hsz)
        wo_all = wo[...]                                                    # (H*32, 128)
        ao = jnp.zeros((m, D_PAD), f32)
        # TODO(synk): for large env_days, tile this over the KV axis flash-style (needed
        # for v7x's 64 MiB VMEM); here L<=8 so the full score matrices are tiny.
        for h in range(n_heads):
            q = qkv3[:, :, h * dh_pad:(h + 1) * dh_pad]
            k = qkv3[:, :, hsz + h * dh_pad:hsz + (h + 1) * dh_pad]
            v = qkv3[:, :, 2 * hsz + h * dh_pad:2 * hsz + (h + 1) * dh_pad]
            # ProbAttention with factor*ceil(ln(L)) >= L == exact full softmax attention.
            s = jnp.einsum('bqd,bkd->bqk', q, k, preferred_element_type=f32) * scale
            p = jnp.exp(s - jnp.max(s, axis=-1, keepdims=True))
            p = p * pl.reciprocal(jnp.sum(p, axis=-1, keepdims=True), approx=True)
            ctx = jnp.einsum('bqk,bkd->bqd', p, v, preferred_element_type=f32)
            # fold the output projection per head: no cross-head lane concatenation
            ao = ao + jnp.dot(ctx.reshape(m, dh_pad).astype(bf16),
                              wo_all[h * dh_pad:(h + 1) * dh_pad, :],
                              preferred_element_type=f32)
        x1 = xf + ao + bo[...]                                              # dropout = id
        x2 = _ln(x1, ln1g[...], ln1b[...])
        y = jnp.dot(x2.astype(bf16), w1[...], preferred_element_type=f32) + bf1[...]
        y = _gelu(y)
        y = jnp.dot(y.astype(bf16), w2[...], preferred_element_type=f32) + bf2[...]
        return _ln(x2 + y, ln2g[...], ln2b[...]).reshape(bt, ll, D_PAD)

    # ---- 3. encoder layer 1 ----
    h1 = enc_layer(od, enc1)                                                # (Bt, L, 128)

    # ---- 4. ConvLayer: circular conv(k=3, BN folded) + ELU + MaxPool1d(3, 2, pad=1) ----
    rsel = (jax.lax.broadcasted_iota(jnp.int32, (L2, L), 1) ==
            2 * jax.lax.broadcasted_iota(jnp.int32, (L2, L), 0)).astype(f32)
    cw = conv_w[...]
    cbias = conv_b[...]
    pooled_rows = []
    for b in range(Bt):
        yb = h1[b]                                                          # (L, 128)
        # in-kernel im2col over the VMEM tile (no (B, L, 384) HBM intermediate)
        xcol = jnp.concatenate(
            [jnp.roll(yb, 1, axis=0), yb, jnp.roll(yb, -1, axis=0)], axis=1)  # (L, 384)
        y = jnp.dot(xcol.astype(bf16), cw, preferred_element_type=f32) + cbias
        # ELU(alpha=1); exp argument clamped at 0 so the unselected branch cannot overflow
        y = jnp.where(y > 0.0, y, jnp.exp(jnp.minimum(y, 0.0)) - 1.0)
        # MaxPool via +-1 shifted copies + exact one-hot stride-2 row selection (matmul)
        prev = jnp.roll(y, 1, axis=0)
        nxt = jnp.roll(y, -1, axis=0)
        row = jax.lax.broadcasted_iota(jnp.int32, (L, 1), 0)
        prev = jnp.where(row == 0, y, prev)            # left -inf pad: drop wrapped row
        nxt = jnp.where(row == L - 1, y, nxt)          # right -inf pad: drop wrapped row
        mx = jnp.maximum(jnp.maximum(prev, y), nxt)
        pooled_rows.append(jnp.dot(rsel, mx, preferred_element_type=f32))   # (L2, 128)
    hp = jnp.stack(pooled_rows, axis=0)                                     # (Bt, L2, 128)

    # ---- 5. encoder layer 2 ----
    h2 = enc_layer(hp, enc2)                                                # (Bt, L2, 128)

    # ---- 6. final LayerNorm + Linear(L2 -> 1) over the sequence axis ----
    hn = _ln(h2.reshape(Bt * L2, D_PAD), norm_g[...], norm_b[...]).reshape(Bt, L2, D_PAD)
    out = jnp.sum(hn * fc_w[...][None, :, :], axis=1) + fc_b[...]           # (Bt, 128)
    o_ref[...] = out.reshape(Bt, 1, D_PAD)


# ------------------------------ pallas_call wrapper ------------------------------


def _choose_batch_tile(B, L):
    """Target >=128 MXU rows per step, but keep >=2 parallel grid blocks so v7x's two
    TensorCores both get work; always divide B exactly."""
    bt = min(B, max(1, -(-128 // L)))
    if B >= 2:
        while bt > 1 and B // bt < 2:
            bt -= 1
    while B % bt:
        bt -= 1
    return bt


def _layer_list(lp):
    return [lp["wqkv"], lp["bqkv"], lp["wo"], lp["bo"], lp["ln1_g"], lp["ln1_b"],
            lp["w1"], lp["b1"], lp["w2"], lp["b2"], lp["ln2_g"], lp["ln2_b"]]


def _const_index_map(nd):
    def imap(i):
        return (0,) * nd
    return imap


def pallas_time_feature_block(xcat, pp):
    B, E, Kin = xcat.shape
    L = E
    L2 = (L + 2 - 3) // 2 + 1
    Bt = _choose_batch_tile(B, L)
    T = B // Bt

    weights = [pp["embed_w"], pp["embed_b"], pp["pe"],
               pp["od_fc_w"], pp["od_fc_b"], pp["od_gate_w"], pp["od_gate_b"], pp["od_w"]]
    weights += _layer_list(pp["enc_layers"][0])
    weights += [pp["conv_w"], pp["conv_b"]]
    weights += _layer_list(pp["enc_layers"][1])
    weights += [pp["norm_g"], pp["norm_b"], pp["fc_w"], pp["fc_b"]]

    in_specs = [pl.BlockSpec((Bt, E, Kin), lambda i: (i, 0, 0))]
    in_specs += [pl.BlockSpec(w.shape, _const_index_map(w.ndim)) for w in weights]

    kernel = functools.partial(_fused_kernel, Bt=Bt, L=L, L2=L2, n_heads=N_HEADS,
                               dh_pad=DH_PAD, scale=1.0 / math.sqrt(DH))
    return pl.pallas_call(
        kernel,
        out_shape=jax.ShapeDtypeStruct((B, 1, D_PAD), jnp.float32),
        grid=(T,),
        in_specs=in_specs,
        out_specs=pl.BlockSpec((Bt, 1, D_PAD), lambda i: (i, 0, 0)),
        compiler_params=pltpu.CompilerParams(dimension_semantics=("parallel",)),
    )(xcat, *weights)


# ------------------------------ parameter setup --------------------------------


def init_params(key, enc_in, env_days):
    d_emb, d_model, d_ff = D_EMB, D_MODEL, D_FF
    att_ch = max(int(env_days * 0.0625), 16)
    keys = iter(jax.random.split(key, 128))

    def nrm(shape, scale=0.05):
        return scale * jax.random.normal(next(keys), shape, dtype=jnp.float32)

    def gamma(shape):
        return 1.0 + 0.02 * jax.random.normal(next(keys), shape, dtype=jnp.float32)

    p = {
        "token_w": nrm((d_emb, enc_in, 3), 0.2),    # Conv1d(c_in->128, k=3, circular)
        "token_b": nrm((d_emb,), 0.1),
        "temp_w": nrm((3, d_emb), 0.2),             # Linear(3->128), stored (in, out)
        "temp_b": nrm((d_emb,), 0.1),
        "od_fc_w": nrm((att_ch, env_days), 0.2),    # Conv1d(E->att_ch, 1, bias=False)
        "od_bn_g": gamma((att_ch,)),
        "od_bn_b": nrm((att_ch,), 0.02),
        "od_bn_rm": jnp.zeros((att_ch,), jnp.float32),
        "od_bn_rv": jnp.ones((att_ch,), jnp.float32),
        "od_channel_w": nrm((env_days, att_ch), 0.2), "od_channel_b": nrm((env_days,), 0.05),
        "od_filter_w": nrm((env_days, att_ch), 0.2),  "od_filter_b": nrm((env_days,), 0.05),
        "od_spatial_w": nrm((3, att_ch), 0.2),        "od_spatial_b": nrm((3,), 0.05),
        "od_kernel_w": nrm((4, att_ch), 0.2),         "od_kernel_b": nrm((4,), 0.05),
        "od_weight": nrm((4, env_days, env_days, 3), 0.2),
    }

    layers = []
    for _ in range(2):
        layers.append({
            "wq": nrm((d_model, d_model)), "bq": nrm((d_model,), 0.02),
            "wk": nrm((d_model, d_model)), "bk": nrm((d_model,), 0.02),
            "wv": nrm((d_model, d_model)), "bv": nrm((d_model,), 0.02),
            "wo": nrm((d_model, d_model)), "bo": nrm((d_model,), 0.02),
            "w1": nrm((d_model, d_ff)), "b1": nrm((d_ff,), 0.02),
            "w2": nrm((d_ff, d_model), 0.02), "b2": nrm((d_model,), 0.02),
            "ln1_g": gamma((d_model,)), "ln1_b": nrm((d_model,), 0.02),
            "ln2_g": gamma((d_model,)), "ln2_b": nrm((d_model,), 0.02),
        })
    p["enc_layers"] = layers

    p["conv_layer"] = {
        "down_w": nrm((d_model, d_model, 3)),       # Conv1d(126->126, k=3, circular)
        "down_b": nrm((d_model,), 0.02),
        "bn_g": gamma((d_model,)),
        "bn_b": nrm((d_model,), 0.02),
        "bn_rm": jnp.zeros((d_model,), jnp.float32),
        "bn_rv": jnp.ones((d_model,), jnp.float32),
    }
    p["enc_norm_g"] = gamma((d_model,))
    p["enc_norm_b"] = nrm((d_model,), 0.02)

    p["fc_w"] = nrm((math.ceil(env_days / 2), 1), 0.2)   # Linear(ceil(E/2) -> 1)
    p["fc_b"] = nrm((1,), 0.05)
    return p


def _pad_last(a, n):
    pad = [(0, 0)] * (a.ndim - 1) + [(0, n - a.shape[-1])]
    return jnp.pad(a, pad)


def prepare_params(p):
    """One-time (outside jit) fuse / 128-pad / bf16-cast / repack of the raw parameters."""
    f32, bf16 = jnp.float32, jnp.bfloat16
    c_in = p["token_w"].shape[1]
    E = p["od_channel_b"].shape[0]
    pp = {}

    # embedding: fused [token circular-conv im2col | time-feature linear] weight, bf16
    w_tok = p["token_w"].transpose(2, 1, 0).reshape(3 * c_in, D_EMB)
    pp["embed_w"] = jnp.concatenate([w_tok, p["temp_w"]], axis=0).astype(bf16)
    pp["embed_b"] = (p["token_b"] + p["temp_b"]).reshape(1, D_EMB).astype(f32)

    # positional-encoding table (constant) precomputed here, not per forward call
    pos = jnp.arange(E, dtype=f32)[:, None]
    div = jnp.exp(jnp.arange(0, D_EMB, 2, dtype=f32) * (-math.log(10000.0) / D_EMB))
    pe = jnp.zeros((E, D_EMB), f32)
    pe = pe.at[:, 0::2].set(jnp.sin(pos * div))
    pe = pe.at[:, 1::2].set(jnp.cos(pos * div))
    pp["pe"] = pe

    # ODConv gating: BN folded into the 1x1 squeeze conv; all four heads packed together
    bn_scale = p["od_bn_g"] * jax.lax.rsqrt(p["od_bn_rv"] + 1e-5)
    pp["od_fc_w"] = (p["od_fc_w"].T * bn_scale[None, :]).astype(f32)            # (E, att)
    pp["od_fc_b"] = (p["od_bn_b"] - p["od_bn_rm"] * bn_scale).reshape(1, -1).astype(f32)
    pp["od_gate_w"] = jnp.concatenate(
        [p["od_channel_w"].T, p["od_filter_w"].T,
         p["od_spatial_w"].T, p["od_kernel_w"].T], axis=1).astype(f32)          # (att, 2E+7)
    pp["od_gate_b"] = jnp.concatenate(
        [p["od_channel_b"], p["od_filter_b"],
         p["od_spatial_b"], p["od_kernel_b"]]).reshape(1, -1).astype(f32)
    # candidate kernels laid out (n, out, k*E + in) for the per-sample dynamic-conv matmul
    pp["od_w"] = p["od_weight"].transpose(0, 1, 3, 2).reshape(4, E, 3 * E).astype(f32)

    # encoder layers: fused Q|K|V (heads padded 21->32), 126->128 lane padding, bf16
    def head_pad(w, b):
        w3 = w.reshape(D_MODEL, N_HEADS, DH)
        w3 = jnp.pad(w3, ((0, D_PAD - D_MODEL), (0, 0), (0, DH_PAD - DH)))
        b2 = jnp.pad(b.reshape(N_HEADS, DH), ((0, 0), (0, DH_PAD - DH)))
        return w3.reshape(D_PAD, N_HEADS * DH_PAD), b2.reshape(N_HEADS * DH_PAD)

    layers = []
    for lp in p["enc_layers"]:
        wq, bq = head_pad(lp["wq"], lp["bq"])
        wk, bk = head_pad(lp["wk"], lp["bk"])
        wv, bv = head_pad(lp["wv"], lp["bv"])
        wo3 = lp["wo"].reshape(N_HEADS, DH, D_MODEL)
        wo3 = jnp.pad(wo3, ((0, 0), (0, DH_PAD - DH), (0, D_PAD - D_MODEL)))
        layers.append({
            "wqkv": jnp.concatenate([wq, wk, wv], axis=1).astype(bf16),
            "bqkv": jnp.concatenate([bq, bk, bv], axis=0).reshape(1, -1).astype(f32),
            "wo": wo3.reshape(N_HEADS * DH_PAD, D_PAD).astype(bf16),
            "bo": _pad_last(lp["bo"], D_PAD).reshape(1, D_PAD).astype(f32),
            "w1": jnp.pad(lp["w1"], ((0, D_PAD - D_MODEL), (0, 0))).astype(bf16),
            "b1": lp["b1"].reshape(1, D_FF).astype(f32),
            "w2": _pad_last(lp["w2"], D_PAD).astype(bf16),
            "b2": _pad_last(lp["b2"], D_PAD).reshape(1, D_PAD).astype(f32),
            "ln1_g": _pad_last(lp["ln1_g"], D_PAD).reshape(1, D_PAD).astype(f32),
            "ln1_b": _pad_last(lp["ln1_b"], D_PAD).reshape(1, D_PAD).astype(f32),
            "ln2_g": _pad_last(lp["ln2_g"], D_PAD).reshape(1, D_PAD).astype(f32),
            "ln2_b": _pad_last(lp["ln2_b"], D_PAD).reshape(1, D_PAD).astype(f32),
        })
    pp["enc_layers"] = layers

    # conv layer: BN folded into conv weights, padded to 128 channels, bf16
    cp = p["conv_layer"]
    scale = cp["bn_g"] * jax.lax.rsqrt(cp["bn_rv"] + 1e-5)
    w3 = cp["down_w"].transpose(2, 1, 0) * scale[None, None, :]          # (k, in, out)
    w3 = jnp.pad(w3, ((0, 0), (0, D_PAD - D_MODEL), (0, D_PAD - D_MODEL)))
    pp["conv_w"] = w3.reshape(3 * D_PAD, D_PAD).astype(bf16)
    conv_b = (cp["down_b"] - cp["bn_rm"]) * scale + cp["bn_b"]
    pp["conv_b"] = _pad_last(conv_b, D_PAD).reshape(1, D_PAD).astype(f32)

    # final norm + fc (Linear over the pooled sequence axis)
    pp["norm_g"] = _pad_last(p["enc_norm_g"], D_PAD).reshape(1, D_PAD).astype(f32)
    pp["norm_b"] = _pad_last(p["enc_norm_b"], D_PAD).reshape(1, D_PAD).astype(f32)
    pp["fc_w"] = p["fc_w"].astype(f32)                                    # (L2, 1)
    pp["fc_b"] = p["fc_b"].reshape(1, 1).astype(f32)
    return pp


# -------------------------------- forward pass ----------------------------------


def time_feature_block_forward(pp, x_enc, x_mark_enc):
    x = x_enc.astype(jnp.float32)
    # im2col for the circular token conv + time marks (tiny (B, E, 3*c_in+3) tensor)
    xcat = jnp.concatenate([jnp.roll(x, 1, axis=1), x, jnp.roll(x, -1, axis=1),
                            x_mark_enc.astype(jnp.float32)], axis=-1)
    out = pallas_time_feature_block(xcat, pp)                # (B, 1, 128), one pallas_call
    return out[:, :, :D_MODEL]                               # strip the 2 lane-pad channels


# ------------------------------------ main ---------------------------------------


if __name__ == "__main__":
    B, env_days, enc_in = 2, 8, 7

    # ProbAttention == full softmax attention only when factor*ceil(ln(L)) >= L for every
    # encoder sequence length (holds here for L=8 and L=4).
    # TODO(synk): general-L ProbAttention uses torch.randint top-u subsampling, which has
    # no deterministic Pallas equivalent; not reproduced outside this regime.
    for seq_len in (env_days, math.ceil(env_days / 2)):
        assert min(5 * math.ceil(math.log(seq_len)), seq_len) == seq_len

    key = jax.random.PRNGKey(0)
    kp, kx, km = jax.random.split(key, 3)
    params = init_params(kp, enc_in, env_days)
    prepared = prepare_params(params)          # one-time pad / fuse / bf16 cast / repack
    x_enc = jax.random.normal(kx, (B, env_days, enc_in), dtype=jnp.float32)
    x_mark_enc = jax.random.normal(km, (B, env_days, 3), dtype=jnp.float32)

    fwd = jax.jit(time_feature_block_forward)
    out = jax.block_until_ready(fwd(prepared, x_enc, x_mark_enc))
    assert out.shape == (B, 1, 126), out.shape
    assert bool(jnp.all(jnp.isfinite(out)))
    print("KERNEL_OK")
</pallas_src>

<mosaic_0001>
module attributes {stable_mosaic.version = 11 : i64} {
  func.func @_fused_kernel(%arg0: i32, %arg1: memref<1x8x24xf32, #tpu.memory_space<vmem>>, %arg2: memref<24x128xbf16, #tpu.memory_space<vmem>>, %arg3: memref<1x128xf32, #tpu.memory_space<vmem>>, %arg4: memref<8x128xf32, #tpu.memory_space<vmem>>, %arg5: memref<8x16xf32, #tpu.memory_space<vmem>>, %arg6: memref<1x16xf32, #tpu.memory_space<vmem>>, %arg7: memref<16x23xf32, #tpu.memory_space<vmem>>, %arg8: memref<1x23xf32, #tpu.memory_space<vmem>>, %arg9: memref<4x8x24xf32, #tpu.memory_space<vmem>>, %arg10: memref<128x576xbf16, #tpu.memory_space<vmem>>, %arg11: memref<1x576xf32, #tpu.memory_space<vmem>>, %arg12: memref<192x128xbf16, #tpu.memory_space<vmem>>, %arg13: memref<1x128xf32, #tpu.memory_space<vmem>>, %arg14: memref<1x128xf32, #tpu.memory_space<vmem>>, %arg15: memref<1x128xf32, #tpu.memory_space<vmem>>, %arg16: memref<128x2048xbf16, #tpu.memory_space<vmem>>, %arg17: memref<1x2048xf32, #tpu.memory_space<vmem>>, %arg18: memref<2048x128xbf16, #tpu.memory_space<vmem>>, %arg19: memref<1x128xf32, #tpu.memory_space<vmem>>, %arg20: memref<1x128xf32, #tpu.memory_space<vmem>>, %arg21: memref<1x128xf32, #tpu.memory_space<vmem>>, %arg22: memref<384x128xbf16, #tpu.memory_space<vmem>>, %arg23: memref<1x128xf32, #tpu.memory_space<vmem>>, %arg24: memref<128x576xbf16, #tpu.memory_space<vmem>>, %arg25: memref<1x576xf32, #tpu.memory_space<vmem>>, %arg26: memref<192x128xbf16, #tpu.memory_space<vmem>>, %arg27: memref<1x128xf32, #tpu.memory_space<vmem>>, %arg28: memref<1x128xf32, #tpu.memory_space<vmem>>, %arg29: memref<1x128xf32, #tpu.memory_space<vmem>>, %arg30: memref<128x2048xbf16, #tpu.memory_space<vmem>>, %arg31: memref<1x2048xf32, #tpu.memory_space<vmem>>, %arg32: memref<2048x128xbf16, #tpu.memory_space<vmem>>, %arg33: memref<1x128xf32, #tpu.memory_space<vmem>>, %arg34: memref<1x128xf32, #tpu.memory_space<vmem>>, %arg35: memref<1x128xf32, #tpu.memory_space<vmem>>, %arg36: memref<1x128xf32, #tpu.memory_space<vmem>>, %arg37: memref<1x128xf32, #tpu.memory_space<vmem>>, %arg38: memref<4x1xf32, #tpu.memory_space<vmem>>, %arg39: memref<1x1xf32, #tpu.memory_space<vmem>>, %arg40: memref<1x1x128xf32, #tpu.memory_space<vmem>>) attributes {dimension_semantics = [#tpu.dimension_semantics<parallel>], iteration_bounds = array<i64: 2>, scalar_prefetch = 0 : i64, scratch_operands = 0 : i64, tpu.core_type = #tpu.core_type<tc>, window_params = [{transform_indices = @transform_0, window_bounds = array<i64: 1, 8, 24>}, {pipeline_mode = #tpu.pipeline_mode<synchronous>, transform_indices = @transform_1, window_bounds = array<i64: 24, 128>}, {pipeline_mode = #tpu.pipeline_mode<synchronous>, transform_indices = @transform_2, window_bounds = array<i64: 1, 128>}, {pipeline_mode = #tpu.pipeline_mode<synchronous>, transform_indices = @transform_3, window_bounds = array<i64: 8, 128>}, {pipeline_mode = #tpu.pipeline_mode<synchronous>, transform_indices = @transform_4, window_bounds = array<i64: 8, 16>}, {pipeline_mode = #tpu.pipeline_mode<synchronous>, transform_indices = @transform_5, window_bounds = array<i64: 1, 16>}, {pipeline_mode = #tpu.pipeline_mode<synchronous>, transform_indices = @transform_6, window_bounds = array<i64: 16, 23>}, {pipeline_mode = #tpu.pipeline_mode<synchronous>, transform_indices = @transform_7, window_bounds = array<i64: 1, 23>}, {pipeline_mode = #tpu.pipeline_mode<synchronous>, transform_indices = @transform_8, window_bounds = array<i64: 4, 8, 24>}, {pipeline_mode = #tpu.pipeline_mode<synchronous>, transform_indices = @transform_9, window_bounds = array<i64: 128, 576>}, {pipeline_mode = #tpu.pipeline_mode<synchronous>, transform_indices = @transform_10, window_bounds = array<i64: 1, 576>}, {pipeline_mode = #tpu.pipeline_mode<synchronous>, transform_indices = @transform_11, window_bounds = array<i64: 192, 128>}, {pipeline_mode = #tpu.pipeline_mode<synchronous>, transform_indices = @transform_12, window_bounds = array<i64: 1, 128>}, {pipeline_mode = #tpu.pipeline_mode<synchronous>, transform_indices = @transform_13, window_bounds = array<i64: 1, 128>}, {pipeline_mode = #tpu.pipeline_mode<synchronous>, transform_indices = @transform_14, window_bounds = array<i64: 1, 128>}, {pipeline_mode = #tpu.pipeline_mode<synchronous>, transform_indices = @transform_15, window_bounds = array<i64: 128, 2048>}, {pipeline_mode = #tpu.pipeline_mode<synchronous>, transform_indices = @transform_16, window_bounds = array<i64: 1, 2048>}, {pipeline_mode = #tpu.pipeline_mode<synchronous>, transform_indices = @transform_17, window_bounds = array<i64: 2048, 128>}, {pipeline_mode = #tpu.pipeline_mode<synchronous>, transform_indices = @transform_18, window_bounds = array<i64: 1, 128>}, {pipeline_mode = #tpu.pipeline_mode<synchronous>, transform_indices = @transform_19, window_bounds = array<i64: 1, 128>}, {pipeline_mode = #tpu.pipeline_mode<synchronous>, transform_indices = @transform_20, window_bounds = array<i64: 1, 128>}, {pipeline_mode = #tpu.pipeline_mode<synchronous>, transform_indices = @transform_21, window_bounds = array<i64: 384, 128>}, {pipeline_mode = #tpu.pipeline_mode<synchronous>, transform_indices = @transform_22, window_bounds = array<i64: 1, 128>}, {pipeline_mode = #tpu.pipeline_mode<synchronous>, transform_indices = @transform_23, window_bounds = array<i64: 128, 576>}, {pipeline_mode = #tpu.pipeline_mode<synchronous>, transform_indices = @transform_24, window_bounds = array<i64: 1, 576>}, {pipeline_mode = #tpu.pipeline_mode<synchronous>, transform_indices = @transform_25, window_bounds = array<i64: 192, 128>}, {pipeline_mode = #tpu.pipeline_mode<synchronous>, transform_indices = @transform_26, window_bounds = array<i64: 1, 128>}, {pipeline_mode = #tpu.pipeline_mode<synchronous>, transform_indices = @transform_27, window_bounds = array<i64: 1, 128>}, {pipeline_mode = #tpu.pipeline_mode<synchronous>, transform_indices = @transform_28, window_bounds = array<i64: 1, 128>}, {pipeline_mode = #tpu.pipeline_mode<synchronous>, transform_indices = @transform_29, window_bounds = array<i64: 128, 2048>}, {pipeline_mode = #tpu.pipeline_mode<synchronous>, transform_indices = @transform_30, window_bounds = array<i64: 1, 2048>}, {pipeline_mode = #tpu.pipeline_mode<synchronous>, transform_indices = @transform_31, window_bounds = array<i64: 2048, 128>}, {pipeline_mode = #tpu.pipeline_mode<synchronous>, transform_indices = @transform_32, window_bounds = array<i64: 1, 128>}, {pipeline_mode = #tpu.pipeline_mode<synchronous>, transform_indices = @transform_33, window_bounds = array<i64: 1, 128>}, {pipeline_mode = #tpu.pipeline_mode<synchronous>, transform_indices = @transform_34, window_bounds = array<i64: 1, 128>}, {pipeline_mode = #tpu.pipeline_mode<synchronous>, transform_indices = @transform_35, window_bounds = array<i64: 1, 128>}, {pipeline_mode = #tpu.pipeline_mode<synchronous>, transform_indices = @transform_36, window_bounds = array<i64: 1, 128>}, {pipeline_mode = #tpu.pipeline_mode<synchronous>, transform_indices = @transform_37, window_bounds = array<i64: 4, 1>}, {pipeline_mode = #tpu.pipeline_mode<synchronous>, transform_indices = @transform_38, window_bounds = array<i64: 1, 1>}, {transform_indices = @transform_39, window_bounds = array<i64: 1, 1, 128>}]} {
    %c0 = arith.constant 0 : index
    %c0_0 = arith.constant 0 : index
    %c0_1 = arith.constant 0 : index
    %0 = vector.load %arg1[%c0, %c0_0, %c0_1] : memref<1x8x24xf32, #tpu.memory_space<vmem>>, vector<1x8x24xf32>
    %1 = vector.shape_cast %0 : vector<1x8x24xf32> to vector<8x24xf32>
    %2 = arith.truncf %1 : vector<8x24xf32> to vector<8x24xbf16>
    %c0_2 = arith.constant 0 : index
    %c0_3 = arith.constant 0 : index
    %3 = vector.load %arg2[%c0_2, %c0_3] : memref<24x128xbf16, #tpu.memory_space<vmem>>, vector<24x128xbf16>
    %cst = arith.constant dense<0.000000e+00> : vector<8x128xf32>
    %4 = tpu.matmul %2, %3, %cst {dimension_numbers = #tpu.dot_dimension_numbers<[1], [0], [0], [1], [0, 0, 1, 1], [], []>} : vector<8x24xbf16>, vector<24x128xbf16>, vector<8x128xf32> -> vector<8x128xf32>
    %c0_4 = arith.constant 0 : index
    %c0_5 = arith.constant 0 : index
    %5 = vector.load %arg3[%c0_4, %c0_5] : memref<1x128xf32, #tpu.memory_space<vmem>>, vector<1x128xf32>
    %6 = vector.broadcast %5 : vector<1x128xf32> to vector<8x128xf32>
    %7 = arith.addf %4, %6 : vector<8x128xf32>
    %8 = vector.shape_cast %7 : vector<8x128xf32> to vector<1x8x128xf32>
    %c0_6 = arith.constant 0 : index
    %c0_7 = arith.constant 0 : index
    %9 = vector.load %arg4[%c0_6, %c0_7] : memref<8x128xf32, #tpu.memory_space<vmem>>, vector<8x128xf32>
    %10 = vector.shape_cast %9 : vector<8x128xf32> to vector<1x8x128xf32>
    %11 = arith.addf %8, %10 : vector<1x8x128xf32>
    %cst_8 = arith.constant dense<0.000000e+00> : vector<1x8xf32>
    %12 = vector.multi_reduction <add>, %11, %cst_8 [2] : vector<1x8x128xf32> to vector<1x8xf32>
    %cst_9 = arith.constant 7.812500e-03 : f32
    %13 = vector.broadcast %cst_9 : f32 to vector<1x8xf32>
    %14 = arith.mulf %12, %13 : vector<1x8xf32>
    %c0_10 = arith.constant 0 : index
    %c0_11 = arith.constant 0 : index
    %15 = vector.load %arg5[%c0_10, %c0_11] : memref<8x16xf32, #tpu.memory_space<vmem>>, vector<8x16xf32>
    %cst_12 = arith.constant dense<0.000000e+00> : vector<1x16xf32>
    %16 = tpu.matmul %14, %15, %cst_12 {dimension_numbers = #tpu.dot_dimension_numbers<[1], [0], [0], [1], [0, 0, 1, 1], [], []>} : vector<1x8xf32>, vector<8x16xf32>, vector<1x16xf32> -> vector<1x16xf32>
    %c0_13 = arith.constant 0 : index
    %c0_14 = arith.constant 0 : index
    %17 = vector.load %arg6[%c0_13, %c0_14] : memref<1x16xf32, #tpu.memory_space<vmem>>, vector<1x16xf32>
    %18 = arith.addf %16, %17 : vector<1x16xf32>
    %cst_15 = arith.constant 0.000000e+00 : f32
    %19 = vector.broadcast %cst_15 : f32 to vector<1x16xf32>
    %20 = arith.maximumf %18, %19 : vector<1x16xf32>
    %c0_16 = arith.constant 0 : index
    %c0_17 = arith.constant 0 : index
    %21 = vector.load %arg7[%c0_16, %c0_17] : memref<16x23xf32, #tpu.memory_space<vmem>>, vector<16x23xf32>
    %cst_18 = arith.constant dense<0.000000e+00> : vector<1x23xf32>
    %22 = tpu.matmul %20, %21, %cst_18 {dimension_numbers = #tpu.dot_dimension_numbers<[1], [0], [0], [1], [0, 0, 1, 1], [], []>} : vector<1x16xf32>, vector<16x23xf32>, vector<1x23xf32> -> vector<1x23xf32>
    %c0_19 = arith.constant 0 : index
    %c0_20 = arith.constant 0 : index
    %23 = vector.load %arg8[%c0_19, %c0_20] : memref<1x23xf32, #tpu.memory_space<vmem>>, vector<1x23xf32>
    %24 = arith.addf %22, %23 : vector<1x23xf32>
    %25 = vector.extract_strided_slice %24 {offsets = [0, 0], sizes = [1, 8], strides = [1, 1]} : vector<1x23xf32> to vector<1x8xf32>
    %cst_21 = arith.constant 0.000000e+00 : f32
    %26 = vector.broadcast %cst_21 : f32 to vector<1x8xf32>
    %27 = arith.subf %26, %25 : vector<1x8xf32>
    %28 = math.exp %27 : vector<1x8xf32>
    %cst_22 = arith.constant 1.000000e+00 : f32
    %29 = vector.broadcast %cst_22 : f32 to vector<1x8xf32>
    %30 = arith.addf %29, %28 : vector<1x8xf32>
    %cst_23 = arith.constant 1.000000e+00 : f32
    %31 = vector.broadcast %cst_23 : f32 to vector<1x8xf32>
    %32 = arith.divf %31, %30 : vector<1x8xf32>
    %33 = vector.extract_strided_slice %24 {offsets = [0, 8], sizes = [1, 8], strides = [1, 1]} : vector<1x23xf32> to vector<1x8xf32>
    %cst_24 = arith.constant 0.000000e+00 : f32
    %34 = vector.broadcast %cst_24 : f32 to vector<1x8xf32>
    %35 = arith.subf %34, %33 : vector<1x8xf32>
    %36 = math.exp %35 : vector<1x8xf32>
    %cst_25 = arith.constant 1.000000e+00 : f32
    %37 = vector.broadcast %cst_25 : f32 to vector<1x8xf32>
    %38 = arith.addf %37, %36 : vector<1x8xf32>
    %cst_26 = arith.constant 1.000000e+00 : f32
    %39 = vector.broadcast %cst_26 : f32 to vector<1x8xf32>
    %40 = arith.divf %39, %38 : vector<1x8xf32>
    %41 = vector.extract_strided_slice %24 {offsets = [0, 16], sizes = [1, 3], strides = [1, 1]} : vector<1x23xf32> to vector<1x3xf32>
    %cst_27 = arith.constant 0.000000e+00 : f32
    %42 = vector.broadcast %cst_27 : f32 to vector<1x3xf32>
    %43 = arith.subf %42, %41 : vector<1x3xf32>
    %44 = math.exp %43 : vector<1x3xf32>
    %cst_28 = arith.constant 1.000000e+00 : f32
    %45 = vector.broadcast %cst_28 : f32 to vector<1x3xf32>
    %46 = arith.addf %45, %44 : vector<1x3xf32>
    %cst_29 = arith.constant 1.000000e+00 : f32
    %47 = vector.broadcast %cst_29 : f32 to vector<1x3xf32>
    %48 = arith.divf %47, %46 : vector<1x3xf32>
    %49 = vector.extract_strided_slice %24 {offsets = [0, 19], sizes = [1, 4], strides = [1, 1]} : vector<1x23xf32> to vector<1x4xf32>
    %cst_30 = arith.constant dense<0xFF800000> : vector<1xf32>
    %50 = vector.multi_reduction <maximumf>, %49, %cst_30 [1] : vector<1x4xf32> to vector<1xf32>
    %51 = vector.shape_cast %50 : vector<1xf32> to vector<1x1xf32>
    %52 = vector.broadcast %51 : vector<1x1xf32> to vector<1x4xf32>
    %53 = arith.subf %49, %52 : vector<1x4xf32>
    %54 = math.exp %53 : vector<1x4xf32>
    %cst_31 = arith.constant dense<0.000000e+00> : vector<1xf32>
    %55 = vector.multi_reduction <add>, %54, %cst_31 [1] : vector<1x4xf32> to vector<1xf32>
    %56 = vector.shape_cast %55 : vector<1xf32> to vector<1x1xf32>
    %57 = tpu.reciprocal %56 {approx = true} : vector<1x1xf32> -> vector<1x1xf32>
    %58 = vector.broadcast %57 : vector<1x1xf32> to vector<1x4xf32>
    %59 = arith.mulf %54, %58 : vector<1x4xf32>
    %60 = vector.shape_cast %32 : vector<1x8xf32> to vector<1x8x1xf32>
    %61 = vector.broadcast %60 : vector<1x8x1xf32> to vector<1x8x128xf32>
    %62 = arith.mulf %11, %61 : vector<1x8x128xf32>
    %c0_32 = arith.constant 0 : index
    %c0_33 = arith.constant 0 : index
    %c0_34 = arith.constant 0 : index
    %63 = vector.load %arg9[%c0_32, %c0_33, %c0_34] : memref<4x8x24xf32, #tpu.memory_space<vmem>>, vector<4x8x24xf32>
    %64 = vector.shape_cast %62 : vector<1x8x128xf32> to vector<8x128xf32>
    %65 = vector.extract_strided_slice %48 {offsets = [0, 0], sizes = [1, 1], strides = [1, 1]} : vector<1x3xf32> to vector<1x1xf32>
    %66 = vector.broadcast %65 : vector<1x1xf32> to vector<8x128xf32>
    %67 = arith.mulf %64, %66 : vector<8x128xf32>
    %68 = vector.extract_strided_slice %64 {offsets = [0, 1], sizes = [8, 127], strides = [1, 1]} : vector<8x128xf32> to vector<8x127xf32>
    %69 = vector.extract_strided_slice %64 {offsets = [0, 0], sizes = [8, 1], strides = [1, 1]} : vector<8x128xf32> to vector<8x1xf32>
    %70 = tpu.concatenate %68, %69 in 1 : vector<8x127xf32>, vector<8x1xf32> -> vector<8x128xf32>
    %71 = vector.extract_strided_slice %48 {offsets = [0, 1], sizes = [1, 1], strides = [1, 1]} : vector<1x3xf32> to vector<1x1xf32>
    %72 = vector.broadcast %71 : vector<1x1xf32> to vector<8x128xf32>
    %73 = arith.mulf %70, %72 : vector<8x128xf32>
    %74 = vector.extract_strided_slice %64 {offsets = [0, 2], sizes = [8, 126], strides = [1, 1]} : vector<8x128xf32> to vector<8x126xf32>
    %75 = vector.extract_strided_slice %64 {offsets = [0, 0], sizes = [8, 2], strides = [1, 1]} : vector<8x128xf32> to vector<8x2xf32>
    %76 = tpu.concatenate %74, %75 in 1 : vector<8x126xf32>, vector<8x2xf32> -> vector<8x128xf32>
    %77 = vector.extract_strided_slice %48 {offsets = [0, 2], sizes = [1, 1], strides = [1, 1]} : vector<1x3xf32> to vector<1x1xf32>
    %78 = vector.broadcast %77 : vector<1x1xf32> to vector<8x128xf32>
    %79 = arith.mulf %76, %78 : vector<8x128xf32>
    %80 = tpu.concatenate %67, %73, %79 in 0 : vector<8x128xf32>, vector<8x128xf32>, vector<8x128xf32> -> vector<24x128xf32>
    %81 = vector.extract_strided_slice %63 {offsets = [0, 0, 0], sizes = [1, 8, 24], strides = [1, 1, 1]} : vector<4x8x24xf32> to vector<1x8x24xf32>
    %82 = vector.shape_cast %81 : vector<1x8x24xf32> to vector<8x24xf32>
    %83 = vector.extract_strided_slice %59 {offsets = [0, 0], sizes = [1, 1], strides = [1, 1]} : vector<1x4xf32> to vector<1x1xf32>
    %84 = vector.broadcast %83 : vector<1x1xf32> to vector<8x24xf32>
    %85 = arith.mulf %82, %84 : vector<8x24xf32>
    %86 = vector.extract_strided_slice %63 {offsets = [1, 0, 0], sizes = [1, 8, 24], strides = [1, 1, 1]} : vector<4x8x24xf32> to vector<1x8x24xf32>
    %87 = vector.shape_cast %86 : vector<1x8x24xf32> to vector<8x24xf32>
    %88 = vector.extract_strided_slice %59 {offsets = [0, 1], sizes = [1, 1], strides = [1, 1]} : vector<1x4xf32> to vector<1x1xf32>
    %89 = vector.broadcast %88 : vector<1x1xf32> to vector<8x24xf32>
    %90 = arith.mulf %87, %89 : vector<8x24xf32>
    %91 = arith.addf %85, %90 : vector<8x24xf32>
    %92 = vector.extract_strided_slice %63 {offsets = [2, 0, 0], sizes = [1, 8, 24], strides = [1, 1, 1]} : vector<4x8x24xf32> to vector<1x8x24xf32>
    %93 = vector.shape_cast %92 : vector<1x8x24xf32> to vector<8x24xf32>
    %94 = vector.extract_strided_slice %59 {offsets = [0, 2], sizes = [1, 1], strides = [1, 1]} : vector<1x4xf32> to vector<1x1xf32>
    %95 = vector.broadcast %94 : vector<1x1xf32> to vector<8x24xf32>
    %96 = arith.mulf %93, %95 : vector<8x24xf32>
    %97 = arith.addf %91, %96 : vector<8x24xf32>
    %98 = vector.extract_strided_slice %63 {offsets = [3, 0, 0], sizes = [1, 8, 24], strides = [1, 1, 1]} : vector<4x8x24xf32> to vector<1x8x24xf32>
    %99 = vector.shape_cast %98 : vector<1x8x24xf32> to vector<8x24xf32>
    %100 = vector.extract_strided_slice %59 {offsets = [0, 3], sizes = [1, 1], strides = [1, 1]} : vector<1x4xf32> to vector<1x1xf32>
    %101 = vector.broadcast %100 : vector<1x1xf32> to vector<8x24xf32>
    %102 = arith.mulf %99, %101 : vector<8x24xf32>
    %103 = arith.addf %97, %102 : vector<8x24xf32>
    %104 = arith.truncf %103 : vector<8x24xf32> to vector<8x24xbf16>
    %105 = arith.truncf %80 : vector<24x128xf32> to vector<24x128xbf16>
    %cst_35 = arith.constant dense<0.000000e+00> : vector<8x128xf32>
    %106 = tpu.matmul %104, %105, %cst_35 {dimension_numbers = #tpu.dot_dimension_numbers<[1], [0], [0], [1], [0, 0, 1, 1], [], []>} : vector<8x24xbf16>, vector<24x128xbf16>, vector<8x128xf32> -> vector<8x128xf32>
    %107 = tpu.iota {dimensions = array<i32: 2>} : vector<1x1x128xi32>
    %c126_i32 = arith.constant 126 : i32
    %108 = vector.broadcast %c126_i32 : i32 to vector<1x1x128xi32>
    %109 = arith.cmpi slt, %107, %108 : vector<1x1x128xi32>
    %110 = arith.extui %109 : vector<1x1x128xi1> to vector<1x1x128xi32>
    %111 = arith.sitofp %110 : vector<1x1x128xi32> to vector<1x1x128xf32>
    %112 = vector.shape_cast %106 : vector<8x128xf32> to vector<1x8x128xf32>
    %113 = vector.shape_cast %40 : vector<1x8xf32> to vector<1x8x1xf32>
    %114 = vector.broadcast %113 : vector<1x8x1xf32> to vector<1x8x128xf32>
    %115 = arith.mulf %112, %114 : vector<1x8x128xf32>
    %116 = vector.broadcast %111 : vector<1x1x128xf32> to vector<1x8x128xf32>
    %117 = arith.mulf %115, %116 : vector<1x8x128xf32>
    %118 = vector.shape_cast %117 : vector<1x8x128xf32> to vector<8x128xf32>
    %119 = arith.truncf %118 : vector<8x128xf32> to vector<8x128xbf16>
    %c0_36 = arith.constant 0 : index
    %c0_37 = arith.constant 0 : index
    %120 = vector.load %arg10[%c0_36, %c0_37] : memref<128x576xbf16, #tpu.memory_space<vmem>>, vector<128x576xbf16>
    %cst_38 = arith.constant dense<0.000000e+00> : vector<8x576xf32>
    %121 = tpu.matmul %119, %120, %cst_38 {dimension_numbers = #tpu.dot_dimension_numbers<[1], [0], [0], [1], [0, 0, 1, 1], [], []>} : vector<8x128xbf16>, vector<128x576xbf16>, vector<8x576xf32> -> vector<8x576xf32>
    %c0_39 = arith.constant 0 : index
    %c0_40 = arith.constant 0 : index
    %122 = vector.load %arg11[%c0_39, %c0_40] : memref<1x576xf32, #tpu.memory_space<vmem>>, vector<1x576xf32>
    %123 = vector.broadcast %122 : vector<1x576xf32> to vector<8x576xf32>
    %124 = arith.addf %121, %123 : vector<8x576xf32>
    %125 = vector.shape_cast %124 : vector<8x576xf32> to vector<1x8x576xf32>
    %c0_41 = arith.constant 0 : index
    %c0_42 = arith.constant 0 : index
    %126 = vector.load %arg12[%c0_41, %c0_42] : memref<192x128xbf16, #tpu.memory_space<vmem>>, vector<192x128xbf16>
    %cst_43 = arith.constant 0.000000e+00 : f32
    %127 = vector.broadcast %cst_43 : f32 to vector<8x128xf32>
    %128 = vector.extract_strided_slice %125 {offsets = [0, 0, 0], sizes = [1, 8, 32], strides = [1, 1, 1]} : vector<1x8x576xf32> to vector<1x8x32xf32>
    %129 = vector.extract_strided_slice %125 {offsets = [0, 0, 192], sizes = [1, 8, 32], strides = [1, 1, 1]} : vector<1x8x576xf32> to vector<1x8x32xf32>
    %130 = vector.extract_strided_slice %125 {offsets = [0, 0, 384], sizes = [1, 8, 32], strides = [1, 1, 1]} : vector<1x8x576xf32> to vector<1x8x32xf32>
    "tpu.trace_start"() <{level = 10 : i32, message = "bqd,bkd->bqk"}> : () -> ()
    %cst_44 = arith.constant dense<0.000000e+00> : vector<1x8x8xf32>
    %131 = tpu.matmul %128, %129, %cst_44 {dimension_numbers = #tpu.dot_dimension_numbers<[2], [2], [1], [1], [0, 0, 0, 1, 1, 1], [0], [0]>} : vector<1x8x32xf32>, vector<1x8x32xf32>, vector<1x8x8xf32> -> vector<1x8x8xf32>
    "tpu.trace_stop"() : () -> ()
    %cst_45 = arith.constant 0.218217894 : f32
    %132 = vector.broadcast %cst_45 : f32 to vector<1x8x8xf32>
    %133 = arith.mulf %131, %132 : vector<1x8x8xf32>
    %cst_46 = arith.constant dense<0xFF800000> : vector<1x8xf32>
    %134 = vector.multi_reduction <maximumf>, %133, %cst_46 [2] : vector<1x8x8xf32> to vector<1x8xf32>
    %135 = vector.shape_cast %134 : vector<1x8xf32> to vector<1x8x1xf32>
    %136 = vector.broadcast %135 : vector<1x8x1xf32> to vector<1x8x8xf32>
    %137 = arith.subf %133, %136 : vector<1x8x8xf32>
    %138 = math.exp %137 : vector<1x8x8xf32>
    %cst_47 = arith.constant dense<0.000000e+00> : vector<1x8xf32>
    %139 = vector.multi_reduction <add>, %138, %cst_47 [2] : vector<1x8x8xf32> to vector<1x8xf32>
    %140 = vector.shape_cast %139 : vector<1x8xf32> to vector<1x8x1xf32>
    %141 = tpu.reciprocal %140 {approx = true} : vector<1x8x1xf32> -> vector<1x8x1xf32>
    %142 = vector.broadcast %141 : vector<1x8x1xf32> to vector<1x8x8xf32>
    %143 = arith.mulf %138, %142 : vector<1x8x8xf32>
    "tpu.trace_start"() <{level = 10 : i32, message = "bqk,bkd->bqd"}> : () -> ()
    %cst_48 = arith.constant dense<0.000000e+00> : vector<1x8x32xf32>
    %144 = tpu.matmul %143, %130, %cst_48 {dimension_numbers = #tpu.dot_dimension_numbers<[2], [1], [1], [2], [0, 0, 0, 1, 1, 2], [0], [0]>} : vector<1x8x8xf32>, vector<1x8x32xf32>, vector<1x8x32xf32> -> vector<1x8x32xf32>
    "tpu.trace_stop"() : () -> ()
    %145 = vector.shape_cast %144 : vector<1x8x32xf32> to vector<8x32xf32>
    %146 = arith.truncf %145 : vector<8x32xf32> to vector<8x32xbf16>
    %147 = vector.extract_strided_slice %126 {offsets = [0, 0], sizes = [32, 128], strides = [1, 1]} : vector<192x128xbf16> to vector<32x128xbf16>
    %cst_49 = arith.constant dense<0.000000e+00> : vector<8x128xf32>
    %148 = tpu.matmul %146, %147, %cst_49 {dimension_numbers = #tpu.dot_dimension_numbers<[1], [0], [0], [1], [0, 0, 1, 1], [], []>} : vector<8x32xbf16>, vector<32x128xbf16>, vector<8x128xf32> -> vector<8x128xf32>
    %149 = arith.addf %127, %148 : vector<8x128xf32>
    %150 = vector.extract_strided_slice %125 {offsets = [0, 0, 32], sizes = [1, 8, 32], strides = [1, 1, 1]} : vector<1x8x576xf32> to vector<1x8x32xf32>
    %151 = vector.extract_strided_slice %125 {offsets = [0, 0, 224], sizes = [1, 8, 32], strides = [1, 1, 1]} : vector<1x8x576xf32> to vector<1x8x32xf32>
    %152 = vector.extract_strided_slice %125 {offsets = [0, 0, 416], sizes = [1, 8, 32], strides = [1, 1, 1]} : vector<1x8x576xf32> to vector<1x8x32xf32>
    "tpu.trace_start"() <{level = 10 : i32, message = "bqd,bkd->bqk"}> : () -> ()
    %cst_50 = arith.constant dense<0.000000e+00> : vector<1x8x8xf32>
    %153 = tpu.matmul %150, %151, %cst_50 {dimension_numbers = #tpu.dot_dimension_numbers<[2], [2], [1], [1], [0, 0, 0, 1, 1, 1], [0], [0]>} : vector<1x8x32xf32>, vector<1x8x32xf32>, vector<1x8x8xf32> -> vector<1x8x8xf32>
    "tpu.trace_stop"() : () -> ()
    %cst_51 = arith.constant 0.218217894 : f32
    %154 = vector.broadcast %cst_51 : f32 to vector<1x8x8xf32>
    %155 = arith.mulf %153, %154 : vector<1x8x8xf32>
    %cst_52 = arith.constant dense<0xFF800000> : vector<1x8xf32>
    %156 = vector.multi_reduction <maximumf>, %155, %cst_52 [2] : vector<1x8x8xf32> to vector<1x8xf32>
    %157 = vector.shape_cast %156 : vector<1x8xf32> to vector<1x8x1xf32>
    %158 = vector.broadcast %157 : vector<1x8x1xf32> to vector<1x8x8xf32>
    %159 = arith.subf %155, %158 : vector<1x8x8xf32>
    %160 = math.exp %159 : vector<1x8x8xf32>
    %cst_53 = arith.constant dense<0.000000e+00> : vector<1x8xf32>
    %161 = vector.multi_reduction <add>, %160, %cst_53 [2] : vector<1x8x8xf32> to vector<1x8xf32>
    %162 = vector.shape_cast %161 : vector<1x8xf32> to vector<1x8x1xf32>
    %163 = tpu.reciprocal %162 {approx = true} : vector<1x8x1xf32> -> vector<1x8x1xf32>
    %164 = vector.broadcast %163 : vector<1x8x1xf32> to vector<1x8x8xf32>
    %165 = arith.mulf %160, %164 : vector<1x8x8xf32>
    "tpu.trace_start"() <{level = 10 : i32, message = "bqk,bkd->bqd"}> : () -> ()
    %cst_54 = arith.constant dense<0.000000e+00> : vector<1x8x32xf32>
    %166 = tpu.matmul %165, %152, %cst_54 {dimension_numbers = #tpu.dot_dimension_numbers<[2], [1], [1], [2], [0, 0, 0, 1, 1, 2], [0], [0]>} : vector<1x8x8xf32>, vector<1x8x32xf32>, vector<1x8x32xf32> -> vector<1x8x32xf32>
    "tpu.trace_stop"() : () -> ()
    %167 = vector.shape_cast %166 : vector<1x8x32xf32> to vector<8x32xf32>
    %168 = arith.truncf %167 : vector<8x32xf32> to vector<8x32xbf16>
    %169 = vector.extract_strided_slice %126 {offsets = [32, 0], sizes = [32, 128], strides = [1, 1]} : vector<192x128xbf16> to vector<32x128xbf16>
    %cst_55 = arith.constant dense<0.000000e+00> : vector<8x128xf32>
    %170 = tpu.matmul %168, %169, %cst_55 {dimension_numbers = #tpu.dot_dimension_numbers<[1], [0], [0], [1], [0, 0, 1, 1], [], []>} : vector<8x32xbf16>, vector<32x128xbf16>, vector<8x128xf32> -> vector<8x128xf32>
    %171 = arith.addf %149, %170 : vector<8x128xf32>
    %172 = vector.extract_strided_slice %125 {offsets = [0, 0, 64], sizes = [1, 8, 32], strides = [1, 1, 1]} : vector<1x8x576xf32> to vector<1x8x32xf32>
    %173 = vector.extract_strided_slice %125 {offsets = [0, 0, 256], sizes = [1, 8, 32], strides = [1, 1, 1]} : vector<1x8x576xf32> to vector<1x8x32xf32>
    %174 = vector.extract_strided_slice %125 {offsets = [0, 0, 448], sizes = [1, 8, 32], strides = [1, 1, 1]} : vector<1x8x576xf32> to vector<1x8x32xf32>
    "tpu.trace_start"() <{level = 10 : i32, message = "bqd,bkd->bqk"}> : () -> ()
    %cst_56 = arith.constant dense<0.000000e+00> : vector<1x8x8xf32>
    %175 = tpu.matmul %172, %173, %cst_56 {dimension_numbers = #tpu.dot_dimension_numbers<[2], [2], [1], [1], [0, 0, 0, 1, 1, 1], [0], [0]>} : vector<1x8x32xf32>, vector<1x8x32xf32>, vector<1x8x8xf32> -> vector<1x8x8xf32>
    "tpu.trace_stop"() : () -> ()
    %cst_57 = arith.constant 0.218217894 : f32
    %176 = vector.broadcast %cst_57 : f32 to vector<1x8x8xf32>
    %177 = arith.mulf %175, %176 : vector<1x8x8xf32>
    %cst_58 = arith.constant dense<0xFF800000> : vector<1x8xf32>
    %178 = vector.multi_reduction <maximumf>, %177, %cst_58 [2] : vector<1x8x8xf32> to vector<1x8xf32>
    %179 = vector.shape_cast %178 : vector<1x8xf32> to vector<1x8x1xf32>
    %180 = vector.broadcast %179 : vector<1x8x1xf32> to vector<1x8x8xf32>
    %181 = arith.subf %177, %180 : vector<1x8x8xf32>
    %182 = math.exp %181 : vector<1x8x8xf32>
    %cst_59 = arith.constant dense<0.000000e+00> : vector<1x8xf32>
    %183 = vector.multi_reduction <add>, %182, %cst_59 [2] : vector<1x8x8xf32> to vector<1x8xf32>
    %184 = vector.shape_cast %183 : vector<1x8xf32> to vector<1x8x1xf32>
    %185 = tpu.reciprocal %184 {approx = true} : vector<1x8x1xf32> -> vector<1x8x1xf32>
    %186 = vector.broadcast %185 : vector<1x8x1xf32> to vector<1x8x8xf32>
    %187 = arith.mulf %182, %186 : vector<1x8x8xf32>
    "tpu.trace_start"() <{level = 10 : i32, message = "bqk,bkd->bqd"}> : () -> ()
    %cst_60 = arith.constant dense<0.000000e+00> : vector<1x8x32xf32>
    %188 = tpu.matmul %187, %174, %cst_60 {dimension_numbers = #tpu.dot_dimension_numbers<[2], [1], [1], [2], [0, 0, 0, 1, 1, 2], [0], [0]>} : vector<1x8x8xf32>, vector<1x8x32xf32>, vector<1x8x32xf32> -> vector<1x8x32xf32>
    "tpu.trace_stop"() : () -> ()
    %189 = vector.shape_cast %188 : vector<1x8x32xf32> to vector<8x32xf32>
    %190 = arith.truncf %189 : vector<8x32xf32> to vector<8x32xbf16>
    %191 = vector.extract_strided_slice %126 {offsets = [64, 0], sizes = [32, 128], strides = [1, 1]} : vector<192x128xbf16> to vector<32x128xbf16>
    %cst_61 = arith.constant dense<0.000000e+00> : vector<8x128xf32>
    %192 = tpu.matmul %190, %191, %cst_61 {dimension_numbers = #tpu.dot_dimension_numbers<[1], [0], [0], [1], [0, 0, 1, 1], [], []>} : vector<8x32xbf16>, vector<32x128xbf16>, vector<8x128xf32> -> vector<8x128xf32>
    %193 = arith.addf %171, %192 : vector<8x128xf32>
    %194 = vector.extract_strided_slice %125 {offsets = [0, 0, 96], sizes = [1, 8, 32], strides = [1, 1, 1]} : vector<1x8x576xf32> to vector<1x8x32xf32>
    %195 = vector.extract_strided_slice %125 {offsets = [0, 0, 288], sizes = [1, 8, 32], strides = [1, 1, 1]} : vector<1x8x576xf32> to vector<1x8x32xf32>
    %196 = vector.extract_strided_slice %125 {offsets = [0, 0, 480], sizes = [1, 8, 32], strides = [1, 1, 1]} : vector<1x8x576xf32> to vector<1x8x32xf32>
    "tpu.trace_start"() <{level = 10 : i32, message = "bqd,bkd->bqk"}> : () -> ()
    %cst_62 = arith.constant dense<0.000000e+00> : vector<1x8x8xf32>
    %197 = tpu.matmul %194, %195, %cst_62 {dimension_numbers = #tpu.dot_dimension_numbers<[2], [2], [1], [1], [0, 0, 0, 1, 1, 1], [0], [0]>} : vector<1x8x32xf32>, vector<1x8x32xf32>, vector<1x8x8xf32> -> vector<1x8x8xf32>
    "tpu.trace_stop"() : () -> ()
    %cst_63 = arith.constant 0.218217894 : f32
    %198 = vector.broadcast %cst_63 : f32 to vector<1x8x8xf32>
    %199 = arith.mulf %197, %198 : vector<1x8x8xf32>
    %cst_64 = arith.constant dense<0xFF800000> : vector<1x8xf32>
    %200 = vector.multi_reduction <maximumf>, %199, %cst_64 [2] : vector<1x8x8xf32> to vector<1x8xf32>
    %201 = vector.shape_cast %200 : vector<1x8xf32> to vector<1x8x1xf32>
    %202 = vector.broadcast %201 : vector<1x8x1xf32> to vector<1x8x8xf32>
    %203 = arith.subf %199, %202 : vector<1x8x8xf32>
    %204 = math.exp %203 : vector<1x8x8xf32>
    %cst_65 = arith.constant dense<0.000000e+00> : vector<1x8xf32>
    %205 = vector.multi_reduction <add>, %204, %cst_65 [2] : vector<1x8x8xf32> to vector<1x8xf32>
    %206 = vector.shape_cast %205 : vector<1x8xf32> to vector<1x8x1xf32>
    %207 = tpu.reciprocal %206 {approx = true} : vector<1x8x1xf32> -> vector<1x8x1xf32>
    %208 = vector.broadcast %207 : vector<1x8x1xf32> to vector<1x8x8xf32>
    %209 = arith.mulf %204, %208 : vector<1x8x8xf32>
    "tpu.trace_start"() <{level = 10 : i32, message = "bqk,bkd->bqd"}> : () -> ()
    %cst_66 = arith.constant dense<0.000000e+00> : vector<1x8x32xf32>
    %210 = tpu.matmul %209, %196, %cst_66 {dimension_numbers = #tpu.dot_dimension_numbers<[2], [1], [1], [2], [0, 0, 0, 1, 1, 2], [0], [0]>} : vector<1x8x8xf32>, vector<1x8x32xf32>, vector<1x8x32xf32> -> vector<1x8x32xf32>
    "tpu.trace_stop"() : () -> ()
    %211 = vector.shape_cast %210 : vector<1x8x32xf32> to vector<8x32xf32>
    %212 = arith.truncf %211 : vector<8x32xf32> to vector<8x32xbf16>
    %213 = vector.extract_strided_slice %126 {offsets = [96, 0], sizes = [32, 128], strides = [1, 1]} : vector<192x128xbf16> to vector<32x128xbf16>
    %cst_67 = arith.constant dense<0.000000e+00> : vector<8x128xf32>
    %214 = tpu.matmul %212, %213, %cst_67 {dimension_numbers = #tpu.dot_dimension_numbers<[1], [0], [0], [1], [0, 0, 1, 1], [], []>} : vector<8x32xbf16>, vector<32x128xbf16>, vector<8x128xf32> -> vector<8x128xf32>
    %215 = arith.addf %193, %214 : vector<8x128xf32>
    %216 = vector.extract_strided_slice %125 {offsets = [0, 0, 128], sizes = [1, 8, 32], strides = [1, 1, 1]} : vector<1x8x576xf32> to vector<1x8x32xf32>
    %217 = vector.extract_strided_slice %125 {offsets = [0, 0, 320], sizes = [1, 8, 32], strides = [1, 1, 1]} : vector<1x8x576xf32> to vector<1x8x32xf32>
    %218 = vector.extract_strided_slice %125 {offsets = [0, 0, 512], sizes = [1, 8, 32], strides = [1, 1, 1]} : vector<1x8x576xf32> to vector<1x8x32xf32>
    "tpu.trace_start"() <{level = 10 : i32, message = "bqd,bkd->bqk"}> : () -> ()
    %cst_68 = arith.constant dense<0.000000e+00> : vector<1x8x8xf32>
    %219 = tpu.matmul %216, %217, %cst_68 {dimension_numbers = #tpu.dot_dimension_numbers<[2], [2], [1], [1], [0, 0, 0, 1, 1, 1], [0], [0]>} : vector<1x8x32xf32>, vector<1x8x32xf32>, vector<1x8x8xf32> -> vector<1x8x8xf32>
    "tpu.trace_stop"() : () -> ()
    %cst_69 = arith.constant 0.218217894 : f32
    %220 = vector.broadcast %cst_69 : f32 to vector<1x8x8xf32>
    %221 = arith.mulf %219, %220 : vector<1x8x8xf32>
    %cst_70 = arith.constant dense<0xFF800000> : vector<1x8xf32>
    %222 = vector.multi_reduction <maximumf>, %221, %cst_70 [2] : vector<1x8x8xf32> to vector<1x8xf32>
    %223 = vector.shape_cast %222 : vector<1x8xf32> to vector<1x8x1xf32>
    %224 = vector.broadcast %223 : vector<1x8x1xf32> to vector<1x8x8xf32>
    %225 = arith.subf %221, %224 : vector<1x8x8xf32>
    %226 = math.exp %225 : vector<1x8x8xf32>
    %cst_71 = arith.constant dense<0.000000e+00> : vector<1x8xf32>
    %227 = vector.multi_reduction <add>, %226, %cst_71 [2] : vector<1x8x8xf32> to vector<1x8xf32>
    %228 = vector.shape_cast %227 : vector<1x8xf32> to vector<1x8x1xf32>
    %229 = tpu.reciprocal %228 {approx = true} : vector<1x8x1xf32> -> vector<1x8x1xf32>
    %230 = vector.broadcast %229 : vector<1x8x1xf32> to vector<1x8x8xf32>
    %231 = arith.mulf %226, %230 : vector<1x8x8xf32>
    "tpu.trace_start"() <{level = 10 : i32, message = "bqk,bkd->bqd"}> : () -> ()
    %cst_72 = arith.constant dense<0.000000e+00> : vector<1x8x32xf32>
    %232 = tpu.matmul %231, %218, %cst_72 {dimension_numbers = #tpu.dot_dimension_numbers<[2], [1], [1], [2], [0, 0, 0, 1, 1, 2], [0], [0]>} : vector<1x8x8xf32>, vector<1x8x32xf32>, vector<1x8x32xf32> -> vector<1x8x32xf32>
    "tpu.trace_stop"() : () -> ()
    %233 = vector.shape_cast %232 : vector<1x8x32xf32> to vector<8x32xf32>
    %234 = arith.truncf %233 : vector<8x32xf32> to vector<8x32xbf16>
    %235 = vector.extract_strided_slice %126 {offsets = [128, 0], sizes = [32, 128], strides = [1, 1]} : vector<192x128xbf16> to vector<32x128xbf16>
    %cst_73 = arith.constant dense<0.000000e+00> : vector<8x128xf32>
    %236 = tpu.matmul %234, %235, %cst_73 {dimension_numbers = #tpu.dot_dimension_numbers<[1], [0], [0], [1], [0, 0, 1, 1], [], []>} : vector<8x32xbf16>, vector<32x128xbf16>, vector<8x128xf32> -> vector<8x128xf32>
    %237 = arith.addf %215, %236 : vector<8x128xf32>
    %238 = vector.extract_strided_slice %125 {offsets = [0, 0, 160], sizes = [1, 8, 32], strides = [1, 1, 1]} : vector<1x8x576xf32> to vector<1x8x32xf32>
    %239 = vector.extract_strided_slice %125 {offsets = [0, 0, 352], sizes = [1, 8, 32], strides = [1, 1, 1]} : vector<1x8x576xf32> to vector<1x8x32xf32>
    %240 = vector.extract_strided_slice %125 {offsets = [0, 0, 544], sizes = [1, 8, 32], strides = [1, 1, 1]} : vector<1x8x576xf32> to vector<1x8x32xf32>
    "tpu.trace_start"() <{level = 10 : i32, message = "bqd,bkd->bqk"}> : () -> ()
    %cst_74 = arith.constant dense<0.000000e+00> : vector<1x8x8xf32>
    %241 = tpu.matmul %238, %239, %cst_74 {dimension_numbers = #tpu.dot_dimension_numbers<[2], [2], [1], [1], [0, 0, 0, 1, 1, 1], [0], [0]>} : vector<1x8x32xf32>, vector<1x8x32xf32>, vector<1x8x8xf32> -> vector<1x8x8xf32>
    "tpu.trace_stop"() : () -> ()
    %cst_75 = arith.constant 0.218217894 : f32
    %242 = vector.broadcast %cst_75 : f32 to vector<1x8x8xf32>
    %243 = arith.mulf %241, %242 : vector<1x8x8xf32>
    %cst_76 = arith.constant dense<0xFF800000> : vector<1x8xf32>
    %244 = vector.multi_reduction <maximumf>, %243, %cst_76 [2] : vector<1x8x8xf32> to vector<1x8xf32>
    %245 = vector.shape_cast %244 : vector<1x8xf32> to vector<1x8x1xf32>
    %246 = vector.broadcast %245 : vector<1x8x1xf32> to vector<1x8x8xf32>
    %247 = arith.subf %243, %246 : vector<1x8x8xf32>
    %248 = math.exp %247 : vector<1x8x8xf32>
    %cst_77 = arith.constant dense<0.000000e+00> : vector<1x8xf32>
    %249 = vector.multi_reduction <add>, %248, %cst_77 [2] : vector<1x8x8xf32> to vector<1x8xf32>
    %250 = vector.shape_cast %249 : vector<1x8xf32> to vector<1x8x1xf32>
    %251 = tpu.reciprocal %250 {approx = true} : vector<1x8x1xf32> -> vector<1x8x1xf32>
    %252 = vector.broadcast %251 : vector<1x8x1xf32> to vector<1x8x8xf32>
    %253 = arith.mulf %248, %252 : vector<1x8x8xf32>
    "tpu.trace_start"() <{level = 10 : i32, message = "bqk,bkd->bqd"}> : () -> ()
    %cst_78 = arith.constant dense<0.000000e+00> : vector<1x8x32xf32>
    %254 = tpu.matmul %253, %240, %cst_78 {dimension_numbers = #tpu.dot_dimension_numbers<[2], [1], [1], [2], [0, 0, 0, 1, 1, 2], [0], [0]>} : vector<1x8x8xf32>, vector<1x8x32xf32>, vector<1x8x32xf32> -> vector<1x8x32xf32>
    "tpu.trace_stop"() : () -> ()
    %255 = vector.shape_cast %254 : vector<1x8x32xf32> to vector<8x32xf32>
    %256 = arith.truncf %255 : vector<8x32xf32> to vector<8x32xbf16>
    %257 = vector.extract_strided_slice %126 {offsets = [160, 0], sizes = [32, 128], strides = [1, 1]} : vector<192x128xbf16> to vector<32x128xbf16>
    %cst_79 = arith.constant dense<0.000000e+00> : vector<8x128xf32>
    %258 = tpu.matmul %256, %257, %cst_79 {dimension_numbers = #tpu.dot_dimension_numbers<[1], [0], [0], [1], [0, 0, 1, 1], [], []>} : vector<8x32xbf16>, vector<32x128xbf16>, vector<8x128xf32> -> vector<8x128xf32>
    %259 = arith.addf %237, %258 : vector<8x128xf32>
    %260 = arith.addf %118, %259 : vector<8x128xf32>
    %c0_80 = arith.constant 0 : index
    %c0_81 = arith.constant 0 : index
    %261 = vector.load %arg13[%c0_80, %c0_81] : memref<1x128xf32, #tpu.memory_space<vmem>>, vector<1x128xf32>
    %262 = vector.broadcast %261 : vector<1x128xf32> to vector<8x128xf32>
    %263 = arith.addf %260, %262 : vector<8x128xf32>
    %c0_82 = arith.constant 0 : index
    %c0_83 = arith.constant 0 : index
    %264 = vector.load %arg14[%c0_82, %c0_83] : memref<1x128xf32, #tpu.memory_space<vmem>>, vector<1x128xf32>
    %c0_84 = arith.constant 0 : index
    %c0_85 = arith.constant 0 : index
    %265 = vector.load %arg15[%c0_84, %c0_85] : memref<1x128xf32, #tpu.memory_space<vmem>>, vector<1x128xf32>
    %cst_86 = arith.constant dense<0.000000e+00> : vector<8xf32>
    %266 = vector.multi_reduction <add>, %263, %cst_86 [1] : vector<8x128xf32> to vector<8xf32>
    %267 = vector.shape_cast %266 : vector<8xf32> to vector<8x1xf32>
    %cst_87 = arith.constant 0.00793650839 : f32
    %268 = vector.broadcast %cst_87 : f32 to vector<8x1xf32>
    %269 = arith.mulf %267, %268 : vector<8x1xf32>
    %270 = arith.mulf %263, %263 : vector<8x128xf32>
    %cst_88 = arith.constant dense<0.000000e+00> : vector<8xf32>
    %271 = vector.multi_reduction <add>, %270, %cst_88 [1] : vector<8x128xf32> to vector<8xf32>
    %272 = vector.shape_cast %271 : vector<8xf32> to vector<8x1xf32>
    %cst_89 = arith.constant 0.00793650839 : f32
    %273 = vector.broadcast %cst_89 : f32 to vector<8x1xf32>
    %274 = arith.mulf %272, %273 : vector<8x1xf32>
    %275 = arith.mulf %269, %269 : vector<8x1xf32>
    %276 = arith.subf %274, %275 : vector<8x1xf32>
    %277 = vector.broadcast %269 : vector<8x1xf32> to vector<8x128xf32>
    %278 = arith.subf %263, %277 : vector<8x128xf32>
    %cst_90 = arith.constant 9.99999974E-6 : f32
    %279 = vector.broadcast %cst_90 : f32 to vector<8x1xf32>
    %280 = arith.addf %276, %279 : vector<8x1xf32>
    %281 = math.rsqrt %280 : vector<8x1xf32>
    %282 = vector.broadcast %281 : vector<8x1xf32> to vector<8x128xf32>
    %283 = arith.mulf %278, %282 : vector<8x128xf32>
    %284 = vector.broadcast %264 : vector<1x128xf32> to vector<8x128xf32>
    %285 = arith.mulf %283, %284 : vector<8x128xf32>
    %286 = vector.broadcast %265 : vector<1x128xf32> to vector<8x128xf32>
    %287 = arith.addf %285, %286 : vector<8x128xf32>
    %288 = arith.truncf %287 : vector<8x128xf32> to vector<8x128xbf16>
    %c0_91 = arith.constant 0 : index
    %c0_92 = arith.constant 0 : index
    %289 = vector.load %arg16[%c0_91, %c0_92] : memref<128x2048xbf16, #tpu.memory_space<vmem>>, vector<128x2048xbf16>
    %cst_93 = arith.constant dense<0.000000e+00> : vector<8x2048xf32>
    %290 = tpu.matmul %288, %289, %cst_93 {dimension_numbers = #tpu.dot_dimension_numbers<[1], [0], [0], [1], [0, 0, 1, 1], [], []>} : vector<8x128xbf16>, vector<128x2048xbf16>, vector<8x2048xf32> -> vector<8x2048xf32>
    %c0_94 = arith.constant 0 : index
    %c0_95 = arith.constant 0 : index
    %291 = vector.load %arg17[%c0_94, %c0_95] : memref<1x2048xf32, #tpu.memory_space<vmem>>, vector<1x2048xf32>
    %292 = vector.broadcast %291 : vector<1x2048xf32> to vector<8x2048xf32>
    %293 = arith.addf %290, %292 : vector<8x2048xf32>
    %294 = math.absf %293 : vector<8x2048xf32>
    %cst_96 = arith.constant 0.707106769 : f32
    %295 = vector.broadcast %cst_96 : f32 to vector<8x2048xf32>
    %296 = arith.mulf %294, %295 : vector<8x2048xf32>
    %cst_97 = arith.constant 0.327591091 : f32
    %297 = vector.broadcast %cst_97 : f32 to vector<8x2048xf32>
    %298 = arith.mulf %297, %296 : vector<8x2048xf32>
    %cst_98 = arith.constant 1.000000e+00 : f32
    %299 = vector.broadcast %cst_98 : f32 to vector<8x2048xf32>
    %300 = arith.addf %299, %298 : vector<8x2048xf32>
    %cst_99 = arith.constant 1.000000e+00 : f32
    %301 = vector.broadcast %cst_99 : f32 to vector<8x2048xf32>
    %302 = arith.divf %301, %300 : vector<8x2048xf32>
    %cst_100 = arith.constant 1.06140542 : f32
    %303 = vector.broadcast %cst_100 : f32 to vector<8x2048xf32>
    %304 = arith.mulf %302, %303 : vector<8x2048xf32>
    %cst_101 = arith.constant -1.45315206 : f32
    %305 = vector.broadcast %cst_101 : f32 to vector<8x2048xf32>
    %306 = arith.addf %305, %304 : vector<8x2048xf32>
    %307 = arith.mulf %302, %306 : vector<8x2048xf32>
    %cst_102 = arith.constant 1.42141378 : f32
    %308 = vector.broadcast %cst_102 : f32 to vector<8x2048xf32>
    %309 = arith.addf %308, %307 : vector<8x2048xf32>
    %310 = arith.mulf %302, %309 : vector<8x2048xf32>
    %cst_103 = arith.constant -0.284496725 : f32
    %311 = vector.broadcast %cst_103 : f32 to vector<8x2048xf32>
    %312 = arith.addf %311, %310 : vector<8x2048xf32>
    %313 = arith.mulf %302, %312 : vector<8x2048xf32>
    %cst_104 = arith.constant 0.254829586 : f32
    %314 = vector.broadcast %cst_104 : f32 to vector<8x2048xf32>
    %315 = arith.addf %314, %313 : vector<8x2048xf32>
    %316 = arith.mulf %302, %315 : vector<8x2048xf32>
    %cst_105 = arith.constant 0.000000e+00 : f32
    %317 = vector.broadcast %cst_105 : f32 to vector<8x2048xf32>
    %318 = arith.subf %317, %296 : vector<8x2048xf32>
    %319 = arith.mulf %318, %296 : vector<8x2048xf32>
    %320 = math.exp %319 : vector<8x2048xf32>
    %321 = arith.mulf %316, %320 : vector<8x2048xf32>
    %cst_106 = arith.constant 1.000000e+00 : f32
    %322 = vector.broadcast %cst_106 : f32 to vector<8x2048xf32>
    %323 = arith.subf %322, %321 : vector<8x2048xf32>
    %cst_107 = arith.constant 0.000000e+00 : f32
    %324 = vector.broadcast %cst_107 : f32 to vector<8x2048xf32>
    %325 = arith.cmpf oge, %293, %324 : vector<8x2048xf32>
    %cst_108 = arith.constant 0.000000e+00 : f32
    %326 = vector.broadcast %cst_108 : f32 to vector<8x2048xf32>
    %327 = arith.subf %326, %323 : vector<8x2048xf32>
    %328 = arith.select %325, %323, %327 : vector<8x2048xi1>, vector<8x2048xf32>
    %cst_109 = arith.constant 5.000000e-01 : f32
    %329 = vector.broadcast %cst_109 : f32 to vector<8x2048xf32>
    %330 = arith.mulf %329, %293 : vector<8x2048xf32>
    %cst_110 = arith.constant 1.000000e+00 : f32
    %331 = vector.broadcast %cst_110 : f32 to vector<8x2048xf32>
    %332 = arith.addf %331, %328 : vector<8x2048xf32>
    %333 = arith.mulf %330, %332 : vector<8x2048xf32>
    %334 = arith.truncf %333 : vector<8x2048xf32> to vector<8x2048xbf16>
    %c0_111 = arith.constant 0 : index
    %c0_112 = arith.constant 0 : index
    %335 = vector.load %arg18[%c0_111, %c0_112] : memref<2048x128xbf16, #tpu.memory_space<vmem>>, vector<2048x128xbf16>
    %cst_113 = arith.constant dense<0.000000e+00> : vector<8x128xf32>
    %336 = tpu.matmul %334, %335, %cst_113 {dimension_numbers = #tpu.dot_dimension_numbers<[1], [0], [0], [1], [0, 0, 1, 1], [], []>} : vector<8x2048xbf16>, vector<2048x128xbf16>, vector<8x128xf32> -> vector<8x128xf32>
    %c0_114 = arith.constant 0 : index
    %c0_115 = arith.constant 0 : index
    %337 = vector.load %arg19[%c0_114, %c0_115] : memref<1x128xf32, #tpu.memory_space<vmem>>, vector<1x128xf32>
    %338 = vector.broadcast %337 : vector<1x128xf32> to vector<8x128xf32>
    %339 = arith.addf %336, %338 : vector<8x128xf32>
    %340 = arith.addf %287, %339 : vector<8x128xf32>
    %c0_116 = arith.constant 0 : index
    %c0_117 = arith.constant 0 : index
    %341 = vector.load %arg20[%c0_116, %c0_117] : memref<1x128xf32, #tpu.memory_space<vmem>>, vector<1x128xf32>
    %c0_118 = arith.constant 0 : index
    %c0_119 = arith.constant 0 : index
    %342 = vector.load %arg21[%c0_118, %c0_119] : memref<1x128xf32, #tpu.memory_space<vmem>>, vector<1x128xf32>
    %cst_120 = arith.constant dense<0.000000e+00> : vector<8xf32>
    %343 = vector.multi_reduction <add>, %340, %cst_120 [1] : vector<8x128xf32> to vector<8xf32>
    %344 = vector.shape_cast %343 : vector<8xf32> to vector<8x1xf32>
    %cst_121 = arith.constant 0.00793650839 : f32
    %345 = vector.broadcast %cst_121 : f32 to vector<8x1xf32>
    %346 = arith.mulf %344, %345 : vector<8x1xf32>
    %347 = arith.mulf %340, %340 : vector<8x128xf32>
    %cst_122 = arith.constant dense<0.000000e+00> : vector<8xf32>
    %348 = vector.multi_reduction <add>, %347, %cst_122 [1] : vector<8x128xf32> to vector<8xf32>
    %349 = vector.shape_cast %348 : vector<8xf32> to vector<8x1xf32>
    %cst_123 = arith.constant 0.00793650839 : f32
    %350 = vector.broadcast %cst_123 : f32 to vector<8x1xf32>
    %351 = arith.mulf %349, %350 : vector<8x1xf32>
    %352 = arith.mulf %346, %346 : vector<8x1xf32>
    %353 = arith.subf %351, %352 : vector<8x1xf32>
    %354 = vector.broadcast %346 : vector<8x1xf32> to vector<8x128xf32>
    %355 = arith.subf %340, %354 : vector<8x128xf32>
    %cst_124 = arith.constant 9.99999974E-6 : f32
    %356 = vector.broadcast %cst_124 : f32 to vector<8x1xf32>
    %357 = arith.addf %353, %356 : vector<8x1xf32>
    %358 = math.rsqrt %357 : vector<8x1xf32>
    %359 = vector.broadcast %358 : vector<8x1xf32> to vector<8x128xf32>
    %360 = arith.mulf %355, %359 : vector<8x128xf32>
    %361 = vector.broadcast %341 : vector<1x128xf32> to vector<8x128xf32>
    %362 = arith.mulf %360, %361 : vector<8x128xf32>
    %363 = vector.broadcast %342 : vector<1x128xf32> to vector<8x128xf32>
    %364 = arith.addf %362, %363 : vector<8x128xf32>
    %365 = vector.shape_cast %364 : vector<8x128xf32> to vector<1x8x128xf32>
    %366 = tpu.iota {dimensions = array<i32: 1>} : vector<4x8xi32>
    %367 = tpu.iota {dimensions = array<i32: 0>} : vector<4x8xi32>
    %c2_i32 = arith.constant 2 : i32
    %368 = vector.broadcast %c2_i32 : i32 to vector<4x8xi32>
    %369 = arith.muli %368, %367 : vector<4x8xi32>
    %370 = arith.cmpi eq, %366, %369 : vector<4x8xi32>
    %371 = arith.extui %370 : vector<4x8xi1> to vector<4x8xi32>
    %372 = arith.sitofp %371 : vector<4x8xi32> to vector<4x8xf32>
    %c0_125 = arith.constant 0 : index
    %c0_126 = arith.constant 0 : index
    %373 = vector.load %arg22[%c0_125, %c0_126] : memref<384x128xbf16, #tpu.memory_space<vmem>>, vector<384x128xbf16>
    %c0_127 = arith.constant 0 : index
    %c0_128 = arith.constant 0 : index
    %374 = vector.load %arg23[%c0_127, %c0_128] : memref<1x128xf32, #tpu.memory_space<vmem>>, vector<1x128xf32>
    %375 = vector.shape_cast %365 : vector<1x8x128xf32> to vector<8x128xf32>
    %376 = vector.extract_strided_slice %375 {offsets = [7, 0], sizes = [1, 128], strides = [1, 1]} : vector<8x128xf32> to vector<1x128xf32>
    %377 = vector.extract_strided_slice %375 {offsets = [0, 0], sizes = [7, 128], strides = [1, 1]} : vector<8x128xf32> to vector<7x128xf32>
    %378 = tpu.concatenate %376, %377 in 0 : vector<1x128xf32>, vector<7x128xf32> -> vector<8x128xf32>
    %379 = vector.extract_strided_slice %375 {offsets = [1, 0], sizes = [7, 128], strides = [1, 1]} : vector<8x128xf32> to vector<7x128xf32>
    %380 = vector.extract_strided_slice %375 {offsets = [0, 0], sizes = [1, 128], strides = [1, 1]} : vector<8x128xf32> to vector<1x128xf32>
    %381 = tpu.concatenate %379, %380 in 0 : vector<7x128xf32>, vector<1x128xf32> -> vector<8x128xf32>
    %382 = tpu.concatenate %378, %375, %381 in 1 : vector<8x128xf32>, vector<8x128xf32>, vector<8x128xf32> -> vector<8x384xf32>
    %383 = arith.truncf %382 : vector<8x384xf32> to vector<8x384xbf16>
    %cst_129 = arith.constant dense<0.000000e+00> : vector<8x128xf32>
    %384 = tpu.matmul %383, %373, %cst_129 {dimension_numbers = #tpu.dot_dimension_numbers<[1], [0], [0], [1], [0, 0, 1, 1], [], []>} : vector<8x384xbf16>, vector<384x128xbf16>, vector<8x128xf32> -> vector<8x128xf32>
    %385 = vector.broadcast %374 : vector<1x128xf32> to vector<8x128xf32>
    %386 = arith.addf %384, %385 : vector<8x128xf32>
    %cst_130 = arith.constant 0.000000e+00 : f32
    %387 = vector.broadcast %cst_130 : f32 to vector<8x128xf32>
    %388 = arith.cmpf ogt, %386, %387 : vector<8x128xf32>
    %cst_131 = arith.constant 0.000000e+00 : f32
    %389 = vector.broadcast %cst_131 : f32 to vector<8x128xf32>
    %390 = arith.minimumf %386, %389 : vector<8x128xf32>
    %391 = math.exp %390 : vector<8x128xf32>
    %cst_132 = arith.constant 1.000000e+00 : f32
    %392 = vector.broadcast %cst_132 : f32 to vector<8x128xf32>
    %393 = arith.subf %391, %392 : vector<8x128xf32>
    %394 = arith.select %388, %386, %393 : vector<8x128xi1>, vector<8x128xf32>
    %395 = vector.extract_strided_slice %394 {offsets = [7, 0], sizes = [1, 128], strides = [1, 1]} : vector<8x128xf32> to vector<1x128xf32>
    %396 = vector.extract_strided_slice %394 {offsets = [0, 0], sizes = [7, 128], strides = [1, 1]} : vector<8x128xf32> to vector<7x128xf32>
    %397 = tpu.concatenate %395, %396 in 0 : vector<1x128xf32>, vector<7x128xf32> -> vector<8x128xf32>
    %398 = vector.extract_strided_slice %394 {offsets = [1, 0], sizes = [7, 128], strides = [1, 1]} : vector<8x128xf32> to vector<7x128xf32>
    %399 = vector.extract_strided_slice %394 {offsets = [0, 0], sizes = [1, 128], strides = [1, 1]} : vector<8x128xf32> to vector<1x128xf32>
    %400 = tpu.concatenate %398, %399 in 0 : vector<7x128xf32>, vector<1x128xf32> -> vector<8x128xf32>
    %401 = tpu.iota {dimensions = array<i32: 0>} : vector<8x1xi32>
    %c0_i32 = arith.constant 0 : i32
    %402 = vector.broadcast %c0_i32 : i32 to vector<8x1xi32>
    %403 = arith.cmpi eq, %401, %402 : vector<8x1xi32>
    %404 = vector.shape_cast %403 : vector<8x1xi1> to vector<8x1xi1>
    %405 = vector.broadcast %404 : vector<8x1xi1> to vector<8x128xi1>
    %406 = arith.select %405, %394, %397 : vector<8x128xi1>, vector<8x128xf32>
    %c7_i32 = arith.constant 7 : i32
    %407 = vector.broadcast %c7_i32 : i32 to vector<8x1xi32>
    %408 = arith.cmpi eq, %401, %407 : vector<8x1xi32>
    %409 = vector.shape_cast %408 : vector<8x1xi1> to vector<8x1xi1>
    %410 = vector.broadcast %409 : vector<8x1xi1> to vector<8x128xi1>
    %411 = arith.select %410, %394, %400 : vector<8x128xi1>, vector<8x128xf32>
    %412 = arith.maximumf %406, %394 : vector<8x128xf32>
    %413 = arith.maximumf %412, %411 : vector<8x128xf32>
    %cst_133 = arith.constant dense<0.000000e+00> : vector<4x128xf32>
    %414 = tpu.matmul %372, %413, %cst_133 {dimension_numbers = #tpu.dot_dimension_numbers<[1], [0], [0], [1], [0, 0, 1, 1], [], []>} : vector<4x8xf32>, vector<8x128xf32>, vector<4x128xf32> -> vector<4x128xf32>
    %415 = vector.shape_cast %414 : vector<4x128xf32> to vector<1x4x128xf32>
    %416 = vector.shape_cast %415 : vector<1x4x128xf32> to vector<4x128xf32>
    %417 = arith.truncf %416 : vector<4x128xf32> to vector<4x128xbf16>
    %c0_134 = arith.constant 0 : index
    %c0_135 = arith.constant 0 : index
    %418 = vector.load %arg24[%c0_134, %c0_135] : memref<128x576xbf16, #tpu.memory_space<vmem>>, vector<128x576xbf16>
    %cst_136 = arith.constant dense<0.000000e+00> : vector<4x576xf32>
    %419 = tpu.matmul %417, %418, %cst_136 {dimension_numbers = #tpu.dot_dimension_numbers<[1], [0], [0], [1], [0, 0, 1, 1], [], []>} : vector<4x128xbf16>, vector<128x576xbf16>, vector<4x576xf32> -> vector<4x576xf32>
    %c0_137 = arith.constant 0 : index
    %c0_138 = arith.constant 0 : index
    %420 = vector.load %arg25[%c0_137, %c0_138] : memref<1x576xf32, #tpu.memory_space<vmem>>, vector<1x576xf32>
    %421 = vector.broadcast %420 : vector<1x576xf32> to vector<4x576xf32>
    %422 = arith.addf %419, %421 : vector<4x576xf32>
    %423 = vector.shape_cast %422 : vector<4x576xf32> to vector<1x4x576xf32>
    %c0_139 = arith.constant 0 : index
    %c0_140 = arith.constant 0 : index
    %424 = vector.load %arg26[%c0_139, %c0_140] : memref<192x128xbf16, #tpu.memory_space<vmem>>, vector<192x128xbf16>
    %cst_141 = arith.constant 0.000000e+00 : f32
    %425 = vector.broadcast %cst_141 : f32 to vector<4x128xf32>
    %426 = vector.extract_strided_slice %423 {offsets = [0, 0, 0], sizes = [1, 4, 32], strides = [1, 1, 1]} : vector<1x4x576xf32> to vector<1x4x32xf32>
    %427 = vector.extract_strided_slice %423 {offsets = [0, 0, 192], sizes = [1, 4, 32], strides = [1, 1, 1]} : vector<1x4x576xf32> to vector<1x4x32xf32>
    %428 = vector.extract_strided_slice %423 {offsets = [0, 0, 384], sizes = [1, 4, 32], strides = [1, 1, 1]} : vector<1x4x576xf32> to vector<1x4x32xf32>
    "tpu.trace_start"() <{level = 10 : i32, message = "bqd,bkd->bqk"}> : () -> ()
    %cst_142 = arith.constant dense<0.000000e+00> : vector<1x4x4xf32>
    %429 = tpu.matmul %426, %427, %cst_142 {dimension_numbers = #tpu.dot_dimension_numbers<[2], [2], [1], [1], [0, 0, 0, 1, 1, 1], [0], [0]>} : vector<1x4x32xf32>, vector<1x4x32xf32>, vector<1x4x4xf32> -> vector<1x4x4xf32>
    "tpu.trace_stop"() : () -> ()
    %cst_143 = arith.constant 0.218217894 : f32
    %430 = vector.broadcast %cst_143 : f32 to vector<1x4x4xf32>
    %431 = arith.mulf %429, %430 : vector<1x4x4xf32>
    %cst_144 = arith.constant dense<0xFF800000> : vector<1x4xf32>
    %432 = vector.multi_reduction <maximumf>, %431, %cst_144 [2] : vector<1x4x4xf32> to vector<1x4xf32>
    %433 = vector.shape_cast %432 : vector<1x4xf32> to vector<1x4x1xf32>
    %434 = vector.broadcast %433 : vector<1x4x1xf32> to vector<1x4x4xf32>
    %435 = arith.subf %431, %434 : vector<1x4x4xf32>
    %436 = math.exp %435 : vector<1x4x4xf32>
    %cst_145 = arith.constant dense<0.000000e+00> : vector<1x4xf32>
    %437 = vector.multi_reduction <add>, %436, %cst_145 [2] : vector<1x4x4xf32> to vector<1x4xf32>
    %438 = vector.shape_cast %437 : vector<1x4xf32> to vector<1x4x1xf32>
    %439 = tpu.reciprocal %438 {approx = true} : vector<1x4x1xf32> -> vector<1x4x1xf32>
    %440 = vector.broadcast %439 : vector<1x4x1xf32> to vector<1x4x4xf32>
    %441 = arith.mulf %436, %440 : vector<1x4x4xf32>
    "tpu.trace_start"() <{level = 10 : i32, message = "bqk,bkd->bqd"}> : () -> ()
    %cst_146 = arith.constant dense<0.000000e+00> : vector<1x4x32xf32>
    %442 = tpu.matmul %441, %428, %cst_146 {dimension_numbers = #tpu.dot_dimension_numbers<[2], [1], [1], [2], [0, 0, 0, 1, 1, 2], [0], [0]>} : vector<1x4x4xf32>, vector<1x4x32xf32>, vector<1x4x32xf32> -> vector<1x4x32xf32>
    "tpu.trace_stop"() : () -> ()
    %443 = vector.shape_cast %442 : vector<1x4x32xf32> to vector<4x32xf32>
    %444 = arith.truncf %443 : vector<4x32xf32> to vector<4x32xbf16>
    %445 = vector.extract_strided_slice %424 {offsets = [0, 0], sizes = [32, 128], strides = [1, 1]} : vector<192x128xbf16> to vector<32x128xbf16>
    %cst_147 = arith.constant dense<0.000000e+00> : vector<4x128xf32>
    %446 = tpu.matmul %444, %445, %cst_147 {dimension_numbers = #tpu.dot_dimension_numbers<[1], [0], [0], [1], [0, 0, 1, 1], [], []>} : vector<4x32xbf16>, vector<32x128xbf16>, vector<4x128xf32> -> vector<4x128xf32>
    %447 = arith.addf %425, %446 : vector<4x128xf32>
    %448 = vector.extract_strided_slice %423 {offsets = [0, 0, 32], sizes = [1, 4, 32], strides = [1, 1, 1]} : vector<1x4x576xf32> to vector<1x4x32xf32>
    %449 = vector.extract_strided_slice %423 {offsets = [0, 0, 224], sizes = [1, 4, 32], strides = [1, 1, 1]} : vector<1x4x576xf32> to vector<1x4x32xf32>
    %450 = vector.extract_strided_slice %423 {offsets = [0, 0, 416], sizes = [1, 4, 32], strides = [1, 1, 1]} : vector<1x4x576xf32> to vector<1x4x32xf32>
    "tpu.trace_start"() <{level = 10 : i32, message = "bqd,bkd->bqk"}> : () -> ()
    %cst_148 = arith.constant dense<0.000000e+00> : vector<1x4x4xf32>
    %451 = tpu.matmul %448, %449, %cst_148 {dimension_numbers = #tpu.dot_dimension_numbers<[2], [2], [1], [1], [0, 0, 0, 1, 1, 1], [0], [0]>} : vector<1x4x32xf32>, vector<1x4x32xf32>, vector<1x4x4xf32> -> vector<1x4x4xf32>
    "tpu.trace_stop"() : () -> ()
    %cst_149 = arith.constant 0.218217894 : f32
    %452 = vector.broadcast %cst_149 : f32 to vector<1x4x4xf32>
    %453 = arith.mulf %451, %452 : vector<1x4x4xf32>
    %cst_150 = arith.constant dense<0xFF800000> : vector<1x4xf32>
    %454 = vector.multi_reduction <maximumf>, %453, %cst_150 [2] : vector<1x4x4xf32> to vector<1x4xf32>
    %455 = vector.shape_cast %454 : vector<1x4xf32> to vector<1x4x1xf32>
    %456 = vector.broadcast %455 : vector<1x4x1xf32> to vector<1x4x4xf32>
    %457 = arith.subf %453, %456 : vector<1x4x4xf32>
    %458 = math.exp %457 : vector<1x4x4xf32>
    %cst_151 = arith.constant dense<0.000000e+00> : vector<1x4xf32>
    %459 = vector.multi_reduction <add>, %458, %cst_151 [2] : vector<1x4x4xf32> to vector<1x4xf32>
    %460 = vector.shape_cast %459 : vector<1x4xf32> to vector<1x4x1xf32>
    %461 = tpu.reciprocal %460 {approx = true} : vector<1x4x1xf32> -> vector<1x4x1xf32>
    %462 = vector.broadcast %461 : vector<1x4x1xf32> to vector<1x4x4xf32>
    %463 = arith.mulf %458, %462 : vector<1x4x4xf32>
    "tpu.trace_start"() <{level = 10 : i32, message = "bqk,bkd->bqd"}> : () -> ()
    %cst_152 = arith.constant dense<0.000000e+00> : vector<1x4x32xf32>
    %464 = tpu.matmul %463, %450, %cst_152 {dimension_numbers = #tpu.dot_dimension_numbers<[2], [1], [1], [2], [0, 0, 0, 1, 1, 2], [0], [0]>} : vector<1x4x4xf32>, vector<1x4x32xf32>, vector<1x4x32xf32> -> vector<1x4x32xf32>
    "tpu.trace_stop"() : () -> ()
    %465 = vector.shape_cast %464 : vector<1x4x32xf32> to vector<4x32xf32>
    %466 = arith.truncf %465 : vector<4x32xf32> to vector<4x32xbf16>
    %467 = vector.extract_strided_slice %424 {offsets = [32, 0], sizes = [32, 128], strides = [1, 1]} : vector<192x128xbf16> to vector<32x128xbf16>
    %cst_153 = arith.constant dense<0.000000e+00> : vector<4x128xf32>
    %468 = tpu.matmul %466, %467, %cst_153 {dimension_numbers = #tpu.dot_dimension_numbers<[1], [0], [0], [1], [0, 0, 1, 1], [], []>} : vector<4x32xbf16>, vector<32x128xbf16>, vector<4x128xf32> -> vector<4x128xf32>
    %469 = arith.addf %447, %468 : vector<4x128xf32>
    %470 = vector.extract_strided_slice %423 {offsets = [0, 0, 64], sizes = [1, 4, 32], strides = [1, 1, 1]} : vector<1x4x576xf32> to vector<1x4x32xf32>
    %471 = vector.extract_strided_slice %423 {offsets = [0, 0, 256], sizes = [1, 4, 32], strides = [1, 1, 1]} : vector<1x4x576xf32> to vector<1x4x32xf32>
    %472 = vector.extract_strided_slice %423 {offsets = [0, 0, 448], sizes = [1, 4, 32], strides = [1, 1, 1]} : vector<1x4x576xf32> to vector<1x4x32xf32>
    "tpu.trace_start"() <{level = 10 : i32, message = "bqd,bkd->bqk"}> : () -> ()
    %cst_154 = arith.constant dense<0.000000e+00> : vector<1x4x4xf32>
    %473 = tpu.matmul %470, %471, %cst_154 {dimension_numbers = #tpu.dot_dimension_numbers<[2], [2], [1], [1], [0, 0, 0, 1, 1, 1], [0], [0]>} : vector<1x4x32xf32>, vector<1x4x32xf32>, vector<1x4x4xf32> -> vector<1x4x4xf32>
    "tpu.trace_stop"() : () -> ()
    %cst_155 = arith.constant 0.218217894 : f32
    %474 = vector.broadcast %cst_155 : f32 to vector<1x4x4xf32>
    %475 = arith.mulf %473, %474 : vector<1x4x4xf32>
    %cst_156 = arith.constant dense<0xFF800000> : vector<1x4xf32>
    %476 = vector.multi_reduction <maximumf>, %475, %cst_156 [2] : vector<1x4x4xf32> to vector<1x4xf32>
    %477 = vector.shape_cast %476 : vector<1x4xf32> to vector<1x4x1xf32>
    %478 = vector.broadcast %477 : vector<1x4x1xf32> to vector<1x4x4xf32>
    %479 = arith.subf %475, %478 : vector<1x4x4xf32>
    %480 = math.exp %479 : vector<1x4x4xf32>
    %cst_157 = arith.constant dense<0.000000e+00> : vector<1x4xf32>
    %481 = vector.multi_reduction <add>, %480, %cst_157 [2] : vector<1x4x4xf32> to vector<1x4xf32>
    %482 = vector.shape_cast %481 : vector<1x4xf32> to vector<1x4x1xf32>
    %483 = tpu.reciprocal %482 {approx = true} : vector<1x4x1xf32> -> vector<1x4x1xf32>
    %484 = vector.broadcast %483 : vector<1x4x1xf32> to vector<1x4x4xf32>
    %485 = arith.mulf %480, %484 : vector<1x4x4xf32>
    "tpu.trace_start"() <{level = 10 : i32, message = "bqk,bkd->bqd"}> : () -> ()
    %cst_158 = arith.constant dense<0.000000e+00> : vector<1x4x32xf32>
    %486 = tpu.matmul %485, %472, %cst_158 {dimension_numbers = #tpu.dot_dimension_numbers<[2], [1], [1], [2], [0, 0, 0, 1, 1, 2], [0], [0]>} : vector<1x4x4xf32>, vector<1x4x32xf32>, vector<1x4x32xf32> -> vector<1x4x32xf32>
    "tpu.trace_stop"() : () -> ()
    %487 = vector.shape_cast %486 : vector<1x4x32xf32> to vector<4x32xf32>
    %488 = arith.truncf %487 : vector<4x32xf32> to vector<4x32xbf16>
    %489 = vector.extract_strided_slice %424 {offsets = [64, 0], sizes = [32, 128], strides = [1, 1]} : vector<192x128xbf16> to vector<32x128xbf16>
    %cst_159 = arith.constant dense<0.000000e+00> : vector<4x128xf32>
    %490 = tpu.matmul %488, %489, %cst_159 {dimension_numbers = #tpu.dot_dimension_numbers<[1], [0], [0], [1], [0, 0, 1, 1], [], []>} : vector<4x32xbf16>, vector<32x128xbf16>, vector<4x128xf32> -> vector<4x128xf32>
    %491 = arith.addf %469, %490 : vector<4x128xf32>
    %492 = vector.extract_strided_slice %423 {offsets = [0, 0, 96], sizes = [1, 4, 32], strides = [1, 1, 1]} : vector<1x4x576xf32> to vector<1x4x32xf32>
    %493 = vector.extract_strided_slice %423 {offsets = [0, 0, 288], sizes = [1, 4, 32], strides = [1, 1, 1]} : vector<1x4x576xf32> to vector<1x4x32xf32>
    %494 = vector.extract_strided_slice %423 {offsets = [0, 0, 480], sizes = [1, 4, 32], strides = [1, 1, 1]} : vector<1x4x576xf32> to vector<1x4x32xf32>
    "tpu.trace_start"() <{level = 10 : i32, message = "bqd,bkd->bqk"}> : () -> ()
    %cst_160 = arith.constant dense<0.000000e+00> : vector<1x4x4xf32>
    %495 = tpu.matmul %492, %493, %cst_160 {dimension_numbers = #tpu.dot_dimension_numbers<[2], [2], [1], [1], [0, 0, 0, 1, 1, 1], [0], [0]>} : vector<1x4x32xf32>, vector<1x4x32xf32>, vector<1x4x4xf32> -> vector<1x4x4xf32>
    "tpu.trace_stop"() : () -> ()
    %cst_161 = arith.constant 0.218217894 : f32
    %496 = vector.broadcast %cst_161 : f32 to vector<1x4x4xf32>
    %497 = arith.mulf %495, %496 : vector<1x4x4xf32>
    %cst_162 = arith.constant dense<0xFF800000> : vector<1x4xf32>
    %498 = vector.multi_reduction <maximumf>, %497, %cst_162 [2] : vector<1x4x4xf32> to vector<1x4xf32>
    %499 = vector.shape_cast %498 : vector<1x4xf32> to vector<1x4x1xf32>
    %500 = vector.broadcast %499 : vector<1x4x1xf32> to vector<1x4x4xf32>
    %501 = arith.subf %497, %500 : vector<1x4x4xf32>
    %502 = math.exp %501 : vector<1x4x4xf32>
    %cst_163 = arith.constant dense<0.000000e+00> : vector<1x4xf32>
    %503 = vector.multi_reduction <add>, %502, %cst_163 [2] : vector<1x4x4xf32> to vector<1x4xf32>
    %504 = vector.shape_cast %503 : vector<1x4xf32> to vector<1x4x1xf32>
    %505 = tpu.reciprocal %504 {approx = true} : vector<1x4x1xf32> -> vector<1x4x1xf32>
    %506 = vector.broadcast %505 : vector<1x4x1xf32> to vector<1x4x4xf32>
    %507 = arith.mulf %502, %506 : vector<1x4x4xf32>
    "tpu.trace_start"() <{level = 10 : i32, message = "bqk,bkd->bqd"}> : () -> ()
    %cst_164 = arith.constant dense<0.000000e+00> : vector<1x4x32xf32>
    %508 = tpu.matmul %507, %494, %cst_164 {dimension_numbers = #tpu.dot_dimension_numbers<[2], [1], [1], [2], [0, 0, 0, 1, 1, 2], [0], [0]>} : vector<1x4x4xf32>, vector<1x4x32xf32>, vector<1x4x32xf32> -> vector<1x4x32xf32>
    "tpu.trace_stop"() : () -> ()
    %509 = vector.shape_cast %508 : vector<1x4x32xf32> to vector<4x32xf32>
    %510 = arith.truncf %509 : vector<4x32xf32> to vector<4x32xbf16>
    %511 = vector.extract_strided_slice %424 {offsets = [96, 0], sizes = [32, 128], strides = [1, 1]} : vector<192x128xbf16> to vector<32x128xbf16>
    %cst_165 = arith.constant dense<0.000000e+00> : vector<4x128xf32>
    %512 = tpu.matmul %510, %511, %cst_165 {dimension_numbers = #tpu.dot_dimension_numbers<[1], [0], [0], [1], [0, 0, 1, 1], [], []>} : vector<4x32xbf16>, vector<32x128xbf16>, vector<4x128xf32> -> vector<4x128xf32>
    %513 = arith.addf %491, %512 : vector<4x128xf32>
    %514 = vector.extract_strided_slice %423 {offsets = [0, 0, 128], sizes = [1, 4, 32], strides = [1, 1, 1]} : vector<1x4x576xf32> to vector<1x4x32xf32>
    %515 = vector.extract_strided_slice %423 {offsets = [0, 0, 320], sizes = [1, 4, 32], strides = [1, 1, 1]} : vector<1x4x576xf32> to vector<1x4x32xf32>
    %516 = vector.extract_strided_slice %423 {offsets = [0, 0, 512], sizes = [1, 4, 32], strides = [1, 1, 1]} : vector<1x4x576xf32> to vector<1x4x32xf32>
    "tpu.trace_start"() <{level = 10 : i32, message = "bqd,bkd->bqk"}> : () -> ()
    %cst_166 = arith.constant dense<0.000000e+00> : vector<1x4x4xf32>
    %517 = tpu.matmul %514, %515, %cst_166 {dimension_numbers = #tpu.dot_dimension_numbers<[2], [2], [1], [1], [0, 0, 0, 1, 1, 1], [0], [0]>} : vector<1x4x32xf32>, vector<1x4x32xf32>, vector<1x4x4xf32> -> vector<1x4x4xf32>
    "tpu.trace_stop"() : () -> ()
    %cst_167 = arith.constant 0.218217894 : f32
    %518 = vector.broadcast %cst_167 : f32 to vector<1x4x4xf32>
    %519 = arith.mulf %517, %518 : vector<1x4x4xf32>
    %cst_168 = arith.constant dense<0xFF800000> : vector<1x4xf32>
    %520 = vector.multi_reduction <maximumf>, %519, %cst_168 [2] : vector<1x4x4xf32> to vector<1x4xf32>
    %521 = vector.shape_cast %520 : vector<1x4xf32> to vector<1x4x1xf32>
    %522 = vector.broadcast %521 : vector<1x4x1xf32> to vector<1x4x4xf32>
    %523 = arith.subf %519, %522 : vector<1x4x4xf32>
    %524 = math.exp %523 : vector<1x4x4xf32>
    %cst_169 = arith.constant dense<0.000000e+00> : vector<1x4xf32>
    %525 = vector.multi_reduction <add>, %524, %cst_169 [2] : vector<1x4x4xf32> to vector<1x4xf32>
    %526 = vector.shape_cast %525 : vector<1x4xf32> to vector<1x4x1xf32>
    %527 = tpu.reciprocal %526 {approx = true} : vector<1x4x1xf32> -> vector<1x4x1xf32>
    %528 = vector.broadcast %527 : vector<1x4x1xf32> to vector<1x4x4xf32>
    %529 = arith.mulf %524, %528 : vector<1x4x4xf32>
    "tpu.trace_start"() <{level = 10 : i32, message = "bqk,bkd->bqd"}> : () -> ()
    %cst_170 = arith.constant dense<0.000000e+00> : vector<1x4x32xf32>
    %530 = tpu.matmul %529, %516, %cst_170 {dimension_numbers = #tpu.dot_dimension_numbers<[2], [1], [1], [2], [0, 0, 0, 1, 1, 2], [0], [0]>} : vector<1x4x4xf32>, vector<1x4x32xf32>, vector<1x4x32xf32> -> vector<1x4x32xf32>
    "tpu.trace_stop"() : () -> ()
    %531 = vector.shape_cast %530 : vector<1x4x32xf32> to vector<4x32xf32>
    %532 = arith.truncf %531 : vector<4x32xf32> to vector<4x32xbf16>
    %533 = vector.extract_strided_slice %424 {offsets = [128, 0], sizes = [32, 128], strides = [1, 1]} : vector<192x128xbf16> to vector<32x128xbf16>
    %cst_171 = arith.constant dense<0.000000e+00> : vector<4x128xf32>
    %534 = tpu.matmul %532, %533, %cst_171 {dimension_numbers = #tpu.dot_dimension_numbers<[1], [0], [0], [1], [0, 0, 1, 1], [], []>} : vector<4x32xbf16>, vector<32x128xbf16>, vector<4x128xf32> -> vector<4x128xf32>
    %535 = arith.addf %513, %534 : vector<4x128xf32>
    %536 = vector.extract_strided_slice %423 {offsets = [0, 0, 160], sizes = [1, 4, 32], strides = [1, 1, 1]} : vector<1x4x576xf32> to vector<1x4x32xf32>
    %537 = vector.extract_strided_slice %423 {offsets = [0, 0, 352], sizes = [1, 4, 32], strides = [1, 1, 1]} : vector<1x4x576xf32> to vector<1x4x32xf32>
    %538 = vector.extract_strided_slice %423 {offsets = [0, 0, 544], sizes = [1, 4, 32], strides = [1, 1, 1]} : vector<1x4x576xf32> to vector<1x4x32xf32>
    "tpu.trace_start"() <{level = 10 : i32, message = "bqd,bkd->bqk"}> : () -> ()
    %cst_172 = arith.constant dense<0.000000e+00> : vector<1x4x4xf32>
    %539 = tpu.matmul %536, %537, %cst_172 {dimension_numbers = #tpu.dot_dimension_numbers<[2], [2], [1], [1], [0, 0, 0, 1, 1, 1], [0], [0]>} : vector<1x4x32xf32>, vector<1x4x32xf32>, vector<1x4x4xf32> -> vector<1x4x4xf32>
    "tpu.trace_stop"() : () -> ()
    %cst_173 = arith.constant 0.218217894 : f32
    %540 = vector.broadcast %cst_173 : f32 to vector<1x4x4xf32>
    %541 = arith.mulf %539, %540 : vector<1x4x4xf32>
    %cst_174 = arith.constant dense<0xFF800000> : vector<1x4xf32>
    %542 = vector.multi_reduction <maximumf>, %541, %cst_174 [2] : vector<1x4x4xf32> to vector<1x4xf32>
    %543 = vector.shape_cast %542 : vector<1x4xf32> to vector<1x4x1xf32>
    %544 = vector.broadcast %543 : vector<1x4x1xf32> to vector<1x4x4xf32>
    %545 = arith.subf %541, %544 : vector<1x4x4xf32>
    %546 = math.exp %545 : vector<1x4x4xf32>
    %cst_175 = arith.constant dense<0.000000e+00> : vector<1x4xf32>
    %547 = vector.multi_reduction <add>, %546, %cst_175 [2] : vector<1x4x4xf32> to vector<1x4xf32>
    %548 = vector.shape_cast %547 : vector<1x4xf32> to vector<1x4x1xf32>
    %549 = tpu.reciprocal %548 {approx = true} : vector<1x4x1xf32> -> vector<1x4x1xf32>
    %550 = vector.broadcast %549 : vector<1x4x1xf32> to vector<1x4x4xf32>
    %551 = arith.mulf %546, %550 : vector<1x4x4xf32>
    "tpu.trace_start"() <{level = 10 : i32, message = "bqk,bkd->bqd"}> : () -> ()
    %cst_176 = arith.constant dense<0.000000e+00> : vector<1x4x32xf32>
    %552 = tpu.matmul %551, %538, %cst_176 {dimension_numbers = #tpu.dot_dimension_numbers<[2], [1], [1], [2], [0, 0, 0, 1, 1, 2], [0], [0]>} : vector<1x4x4xf32>, vector<1x4x32xf32>, vector<1x4x32xf32> -> vector<1x4x32xf32>
    "tpu.trace_stop"() : () -> ()
    %553 = vector.shape_cast %552 : vector<1x4x32xf32> to vector<4x32xf32>
    %554 = arith.truncf %553 : vector<4x32xf32> to vector<4x32xbf16>
    %555 = vector.extract_strided_slice %424 {offsets = [160, 0], sizes = [32, 128], strides = [1, 1]} : vector<192x128xbf16> to vector<32x128xbf16>
    %cst_177 = arith.constant dense<0.000000e+00> : vector<4x128xf32>
    %556 = tpu.matmul %554, %555, %cst_177 {dimension_numbers = #tpu.dot_dimension_numbers<[1], [0], [0], [1], [0, 0, 1, 1], [], []>} : vector<4x32xbf16>, vector<32x128xbf16>, vector<4x128xf32> -> vector<4x128xf32>
    %557 = arith.addf %535, %556 : vector<4x128xf32>
    %558 = arith.addf %416, %557 : vector<4x128xf32>
    %c0_178 = arith.constant 0 : index
    %c0_179 = arith.constant 0 : index
    %559 = vector.load %arg27[%c0_178, %c0_179] : memref<1x128xf32, #tpu.memory_space<vmem>>, vector<1x128xf32>
    %560 = vector.broadcast %559 : vector<1x128xf32> to vector<4x128xf32>
    %561 = arith.addf %558, %560 : vector<4x128xf32>
    %c0_180 = arith.constant 0 : index
    %c0_181 = arith.constant 0 : index
    %562 = vector.load %arg28[%c0_180, %c0_181] : memref<1x128xf32, #tpu.memory_space<vmem>>, vector<1x128xf32>
    %c0_182 = arith.constant 0 : index
    %c0_183 = arith.constant 0 : index
    %563 = vector.load %arg29[%c0_182, %c0_183] : memref<1x128xf32, #tpu.memory_space<vmem>>, vector<1x128xf32>
    %cst_184 = arith.constant dense<0.000000e+00> : vector<4xf32>
    %564 = vector.multi_reduction <add>, %561, %cst_184 [1] : vector<4x128xf32> to vector<4xf32>
    %565 = vector.shape_cast %564 : vector<4xf32> to vector<4x1xf32>
    %cst_185 = arith.constant 0.00793650839 : f32
    %566 = vector.broadcast %cst_185 : f32 to vector<4x1xf32>
    %567 = arith.mulf %565, %566 : vector<4x1xf32>
    %568 = arith.mulf %561, %561 : vector<4x128xf32>
    %cst_186 = arith.constant dense<0.000000e+00> : vector<4xf32>
    %569 = vector.multi_reduction <add>, %568, %cst_186 [1] : vector<4x128xf32> to vector<4xf32>
    %570 = vector.shape_cast %569 : vector<4xf32> to vector<4x1xf32>
    %cst_187 = arith.constant 0.00793650839 : f32
    %571 = vector.broadcast %cst_187 : f32 to vector<4x1xf32>
    %572 = arith.mulf %570, %571 : vector<4x1xf32>
    %573 = arith.mulf %567, %567 : vector<4x1xf32>
    %574 = arith.subf %572, %573 : vector<4x1xf32>
    %575 = vector.broadcast %567 : vector<4x1xf32> to vector<4x128xf32>
    %576 = arith.subf %561, %575 : vector<4x128xf32>
    %cst_188 = arith.constant 9.99999974E-6 : f32
    %577 = vector.broadcast %cst_188 : f32 to vector<4x1xf32>
    %578 = arith.addf %574, %577 : vector<4x1xf32>
    %579 = math.rsqrt %578 : vector<4x1xf32>
    %580 = vector.broadcast %579 : vector<4x1xf32> to vector<4x128xf32>
    %581 = arith.mulf %576, %580 : vector<4x128xf32>
    %582 = vector.broadcast %562 : vector<1x128xf32> to vector<4x128xf32>
    %583 = arith.mulf %581, %582 : vector<4x128xf32>
    %584 = vector.broadcast %563 : vector<1x128xf32> to vector<4x128xf32>
    %585 = arith.addf %583, %584 : vector<4x128xf32>
    %586 = arith.truncf %585 : vector<4x128xf32> to vector<4x128xbf16>
    %c0_189 = arith.constant 0 : index
    %c0_190 = arith.constant 0 : index
    %587 = vector.load %arg30[%c0_189, %c0_190] : memref<128x2048xbf16, #tpu.memory_space<vmem>>, vector<128x2048xbf16>
    %cst_191 = arith.constant dense<0.000000e+00> : vector<4x2048xf32>
    %588 = tpu.matmul %586, %587, %cst_191 {dimension_numbers = #tpu.dot_dimension_numbers<[1], [0], [0], [1], [0, 0, 1, 1], [], []>} : vector<4x128xbf16>, vector<128x2048xbf16>, vector<4x2048xf32> -> vector<4x2048xf32>
    %c0_192 = arith.constant 0 : index
    %c0_193 = arith.constant 0 : index
    %589 = vector.load %arg31[%c0_192, %c0_193] : memref<1x2048xf32, #tpu.memory_space<vmem>>, vector<1x2048xf32>
    %590 = vector.broadcast %589 : vector<1x2048xf32> to vector<4x2048xf32>
    %591 = arith.addf %588, %590 : vector<4x2048xf32>
    %592 = math.absf %591 : vector<4x2048xf32>
    %cst_194 = arith.constant 0.707106769 : f32
    %593 = vector.broadcast %cst_194 : f32 to vector<4x2048xf32>
    %594 = arith.mulf %592, %593 : vector<4x2048xf32>
    %cst_195 = arith.constant 0.327591091 : f32
    %595 = vector.broadcast %cst_195 : f32 to vector<4x2048xf32>
    %596 = arith.mulf %595, %594 : vector<4x2048xf32>
    %cst_196 = arith.constant 1.000000e+00 : f32
    %597 = vector.broadcast %cst_196 : f32 to vector<4x2048xf32>
    %598 = arith.addf %597, %596 : vector<4x2048xf32>
    %cst_197 = arith.constant 1.000000e+00 : f32
    %599 = vector.broadcast %cst_197 : f32 to vector<4x2048xf32>
    %600 = arith.divf %599, %598 : vector<4x2048xf32>
    %cst_198 = arith.constant 1.06140542 : f32
    %601 = vector.broadcast %cst_198 : f32 to vector<4x2048xf32>
    %602 = arith.mulf %600, %601 : vector<4x2048xf32>
    %cst_199 = arith.constant -1.45315206 : f32
    %603 = vector.broadcast %cst_199 : f32 to vector<4x2048xf32>
    %604 = arith.addf %603, %602 : vector<4x2048xf32>
    %605 = arith.mulf %600, %604 : vector<4x2048xf32>
    %cst_200 = arith.constant 1.42141378 : f32
    %606 = vector.broadcast %cst_200 : f32 to vector<4x2048xf32>
    %607 = arith.addf %606, %605 : vector<4x2048xf32>
    %608 = arith.mulf %600, %607 : vector<4x2048xf32>
    %cst_201 = arith.constant -0.284496725 : f32
    %609 = vector.broadcast %cst_201 : f32 to vector<4x2048xf32>
    %610 = arith.addf %609, %608 : vector<4x2048xf32>
    %611 = arith.mulf %600, %610 : vector<4x2048xf32>
    %cst_202 = arith.constant 0.254829586 : f32
    %612 = vector.broadcast %cst_202 : f32 to vector<4x2048xf32>
    %613 = arith.addf %612, %611 : vector<4x2048xf32>
    %614 = arith.mulf %600, %613 : vector<4x2048xf32>
    %cst_203 = arith.constant 0.000000e+00 : f32
    %615 = vector.broadcast %cst_203 : f32 to vector<4x2048xf32>
    %616 = arith.subf %615, %594 : vector<4x2048xf32>
    %617 = arith.mulf %616, %594 : vector<4x2048xf32>
    %618 = math.exp %617 : vector<4x2048xf32>
    %619 = arith.mulf %614, %618 : vector<4x2048xf32>
    %cst_204 = arith.constant 1.000000e+00 : f32
    %620 = vector.broadcast %cst_204 : f32 to vector<4x2048xf32>
    %621 = arith.subf %620, %619 : vector<4x2048xf32>
    %cst_205 = arith.constant 0.000000e+00 : f32
    %622 = vector.broadcast %cst_205 : f32 to vector<4x2048xf32>
    %623 = arith.cmpf oge, %591, %622 : vector<4x2048xf32>
    %cst_206 = arith.constant 0.000000e+00 : f32
    %624 = vector.broadcast %cst_206 : f32 to vector<4x2048xf32>
    %625 = arith.subf %624, %621 : vector<4x2048xf32>
    %626 = arith.select %623, %621, %625 : vector<4x2048xi1>, vector<4x2048xf32>
    %cst_207 = arith.constant 5.000000e-01 : f32
    %627 = vector.broadcast %cst_207 : f32 to vector<4x2048xf32>
    %628 = arith.mulf %627, %591 : vector<4x2048xf32>
    %cst_208 = arith.constant 1.000000e+00 : f32
    %629 = vector.broadcast %cst_208 : f32 to vector<4x2048xf32>
    %630 = arith.addf %629, %626 : vector<4x2048xf32>
    %631 = arith.mulf %628, %630 : vector<4x2048xf32>
    %632 = arith.truncf %631 : vector<4x2048xf32> to vector<4x2048xbf16>
    %c0_209 = arith.constant 0 : index
    %c0_210 = arith.constant 0 : index
    %633 = vector.load %arg32[%c0_209, %c0_210] : memref<2048x128xbf16, #tpu.memory_space<vmem>>, vector<2048x128xbf16>
    %cst_211 = arith.constant dense<0.000000e+00> : vector<4x128xf32>
    %634 = tpu.matmul %632, %633, %cst_211 {dimension_numbers = #tpu.dot_dimension_numbers<[1], [0], [0], [1], [0, 0, 1, 1], [], []>} : vector<4x2048xbf16>, vector<2048x128xbf16>, vector<4x128xf32> -> vector<4x128xf32>
    %c0_212 = arith.constant 0 : index
    %c0_213 = arith.constant 0 : index
    %635 = vector.load %arg33[%c0_212, %c0_213] : memref<1x128xf32, #tpu.memory_space<vmem>>, vector<1x128xf32>
    %636 = vector.broadcast %635 : vector<1x128xf32> to vector<4x128xf32>
    %637 = arith.addf %634, %636 : vector<4x128xf32>
    %638 = arith.addf %585, %637 : vector<4x128xf32>
    %c0_214 = arith.constant 0 : index
    %c0_215 = arith.constant 0 : index
    %639 = vector.load %arg34[%c0_214, %c0_215] : memref<1x128xf32, #tpu.memory_space<vmem>>, vector<1x128xf32>
    %c0_216 = arith.constant 0 : index
    %c0_217 = arith.constant 0 : index
    %640 = vector.load %arg35[%c0_216, %c0_217] : memref<1x128xf32, #tpu.memory_space<vmem>>, vector<1x128xf32>
    %cst_218 = arith.constant dense<0.000000e+00> : vector<4xf32>
    %641 = vector.multi_reduction <add>, %638, %cst_218 [1] : vector<4x128xf32> to vector<4xf32>
    %642 = vector.shape_cast %641 : vector<4xf32> to vector<4x1xf32>
    %cst_219 = arith.constant 0.00793650839 : f32
    %643 = vector.broadcast %cst_219 : f32 to vector<4x1xf32>
    %644 = arith.mulf %642, %643 : vector<4x1xf32>
    %645 = arith.mulf %638, %638 : vector<4x128xf32>
    %cst_220 = arith.constant dense<0.000000e+00> : vector<4xf32>
    %646 = vector.multi_reduction <add>, %645, %cst_220 [1] : vector<4x128xf32> to vector<4xf32>
    %647 = vector.shape_cast %646 : vector<4xf32> to vector<4x1xf32>
    %cst_221 = arith.constant 0.00793650839 : f32
    %648 = vector.broadcast %cst_221 : f32 to vector<4x1xf32>
    %649 = arith.mulf %647, %648 : vector<4x1xf32>
    %650 = arith.mulf %644, %644 : vector<4x1xf32>
    %651 = arith.subf %649, %650 : vector<4x1xf32>
    %652 = vector.broadcast %644 : vector<4x1xf32> to vector<4x128xf32>
    %653 = arith.subf %638, %652 : vector<4x128xf32>
    %cst_222 = arith.constant 9.99999974E-6 : f32
    %654 = vector.broadcast %cst_222 : f32 to vector<4x1xf32>
    %655 = arith.addf %651, %654 : vector<4x1xf32>
    %656 = math.rsqrt %655 : vector<4x1xf32>
    %657 = vector.broadcast %656 : vector<4x1xf32> to vector<4x128xf32>
    %658 = arith.mulf %653, %657 : vector<4x128xf32>
    %659 = vector.broadcast %639 : vector<1x128xf32> to vector<4x128xf32>
    %660 = arith.mulf %658, %659 : vector<4x128xf32>
    %661 = vector.broadcast %640 : vector<1x128xf32> to vector<4x128xf32>
    %662 = arith.addf %660, %661 : vector<4x128xf32>
    %663 = vector.shape_cast %662 : vector<4x128xf32> to vector<1x4x128xf32>
    %664 = vector.shape_cast %663 : vector<1x4x128xf32> to vector<4x128xf32>
    %c0_223 = arith.constant 0 : index
    %c0_224 = arith.constant 0 : index
    %665 = vector.load %arg36[%c0_223, %c0_224] : memref<1x128xf32, #tpu.memory_space<vmem>>, vector<1x128xf32>
    %c0_225 = arith.constant 0 : index
    %c0_226 = arith.constant 0 : index
    %666 = vector.load %arg37[%c0_225, %c0_226] : memref<1x128xf32, #tpu.memory_space<vmem>>, vector<1x128xf32>
    %cst_227 = arith.constant dense<0.000000e+00> : vector<4xf32>
    %667 = vector.multi_reduction <add>, %664, %cst_227 [1] : vector<4x128xf32> to vector<4xf32>
    %668 = vector.shape_cast %667 : vector<4xf32> to vector<4x1xf32>
    %cst_228 = arith.constant 0.00793650839 : f32
    %669 = vector.broadcast %cst_228 : f32 to vector<4x1xf32>
    %670 = arith.mulf %668, %669 : vector<4x1xf32>
    %671 = arith.mulf %664, %664 : vector<4x128xf32>
    %cst_229 = arith.constant dense<0.000000e+00> : vector<4xf32>
    %672 = vector.multi_reduction <add>, %671, %cst_229 [1] : vector<4x128xf32> to vector<4xf32>
    %673 = vector.shape_cast %672 : vector<4xf32> to vector<4x1xf32>
    %cst_230 = arith.constant 0.00793650839 : f32
    %674 = vector.broadcast %cst_230 : f32 to vector<4x1xf32>
    %675 = arith.mulf %673, %674 : vector<4x1xf32>
    %676 = arith.mulf %670, %670 : vector<4x1xf32>
    %677 = arith.subf %675, %676 : vector<4x1xf32>
    %678 = vector.broadcast %670 : vector<4x1xf32> to vector<4x128xf32>
    %679 = arith.subf %664, %678 : vector<4x128xf32>
    %cst_231 = arith.constant 9.99999974E-6 : f32
    %680 = vector.broadcast %cst_231 : f32 to vector<4x1xf32>
    %681 = arith.addf %677, %680 : vector<4x1xf32>
    %682 = math.rsqrt %681 : vector<4x1xf32>
    %683 = vector.broadcast %682 : vector<4x1xf32> to vector<4x128xf32>
    %684 = arith.mulf %679, %683 : vector<4x128xf32>
    %685 = vector.broadcast %665 : vector<1x128xf32> to vector<4x128xf32>
    %686 = arith.mulf %684, %685 : vector<4x128xf32>
    %687 = vector.broadcast %666 : vector<1x128xf32> to vector<4x128xf32>
    %688 = arith.addf %686, %687 : vector<4x128xf32>
    %689 = vector.shape_cast %688 : vector<4x128xf32> to vector<1x4x128xf32>
    %c0_232 = arith.constant 0 : index
    %c0_233 = arith.constant 0 : index
    %690 = vector.load %arg38[%c0_232, %c0_233] : memref<4x1xf32, #tpu.memory_space<vmem>>, vector<4x1xf32>
    %691 = vector.shape_cast %690 : vector<4x1xf32> to vector<1x4x1xf32>
    %692 = vector.broadcast %691 : vector<1x4x1xf32> to vector<1x4x128xf32>
    %693 = arith.mulf %689, %692 : vector<1x4x128xf32>
    %cst_234 = arith.constant dense<0.000000e+00> : vector<1x128xf32>
    %694 = vector.multi_reduction <add>, %693, %cst_234 [1] : vector<1x4x128xf32> to vector<1x128xf32>
    %c0_235 = arith.constant 0 : index
    %c0_236 = arith.constant 0 : index
    %695 = vector.load %arg39[%c0_235, %c0_236] : memref<1x1xf32, #tpu.memory_space<vmem>>, vector<1x1xf32>
    %696 = vector.broadcast %695 : vector<1x1xf32> to vector<1x128xf32>
    %697 = arith.addf %694, %696 : vector<1x128xf32>
    %698 = vector.shape_cast %697 : vector<1x128xf32> to vector<1x1x128xf32>
    %c0_237 = arith.constant 0 : index
    %c0_238 = arith.constant 0 : index
    %c0_239 = arith.constant 0 : index
    %699 = vector.load %arg40[%c0_237, %c0_238, %c0_239] : memref<1x1x128xf32, #tpu.memory_space<vmem>>, vector<1x1x128xf32>
    tpu.vector_store %arg40[%c0_237, %c0_238, %c0_239], %698 {strides = array<i32>} : memref<1x1x128xf32, #tpu.memory_space<vmem>>, vector<1x1x128xf32>,
    return
  }
  func.func @transform_0(%arg0: i32) -> (i32, i32, i32) {
    %c0_i32 = arith.constant 0 : i32
    %c0_i32_0 = arith.constant 0 : i32
    %c0_i32_1 = arith.constant 0 : i32
    return %arg0, %c0_i32, %c0_i32_0 : i32, i32, i32
  }
  func.func @transform_1(%arg0: i32) -> (i32, i32) {
    %c0_i32 = arith.constant 0 : i32
    %c0_i32_0 = arith.constant 0 : i32
    %c0_i32_1 = arith.constant 0 : i32
    return %c0_i32, %c0_i32_0 : i32, i32
  }
  func.func @transform_2(%arg0: i32) -> (i32, i32) {
    %c0_i32 = arith.constant 0 : i32
    %c0_i32_0 = arith.constant 0 : i32
    %c0_i32_1 = arith.constant 0 : i32
    return %c0_i32, %c0_i32_0 : i32, i32
  }
  func.func @transform_3(%arg0: i32) -> (i32, i32) {
    %c0_i32 = arith.constant 0 : i32
    %c0_i32_0 = arith.constant 0 : i32
    %c0_i32_1 = arith.constant 0 : i32
    return %c0_i32, %c0_i32_0 : i32, i32
  }
  func.func @transform_4(%arg0: i32) -> (i32, i32) {
    %c0_i32 = arith.constant 0 : i32
    %c0_i32_0 = arith.constant 0 : i32
    %c0_i32_1 = arith.constant 0 : i32
    return %c0_i32, %c0_i32_0 : i32, i32
  }
  func.func @transform_5(%arg0: i32) -> (i32, i32) {
    %c0_i32 = arith.constant 0 : i32
    %c0_i32_0 = arith.constant 0 : i32
    %c0_i32_1 = arith.constant 0 : i32
    return %c0_i32, %c0_i32_0 : i32, i32
  }
  func.func @transform_6(%arg0: i32) -> (i32, i32) {
    %c0_i32 = arith.constant 0 : i32
    %c0_i32_0 = arith.constant 0 : i32
    %c0_i32_1 = arith.constant 0 : i32
    return %c0_i32, %c0_i32_0 : i32, i32
  }
  func.func @transform_7(%arg0: i32) -> (i32, i32) {
    %c0_i32 = arith.constant 0 : i32
    %c0_i32_0 = arith.constant 0 : i32
    %c0_i32_1 = arith.constant 0 : i32
    return %c0_i32, %c0_i32_0 : i32, i32
  }
  func.func @transform_8(%arg0: i32) -> (i32, i32, i32) {
    %c0_i32 = arith.constant 0 : i32
    %c0_i32_0 = arith.constant 0 : i32
    %c0_i32_1 = arith.constant 0 : i32
    %c0_i32_2 = arith.constant 0 : i32
    return %c0_i32, %c0_i32_0, %c0_i32_1 : i32, i32, i32
  }
  func.func @transform_9(%arg0: i32) -> (i32, i32) {
    %c0_i32 = arith.constant 0 : i32
    %c0_i32_0 = arith.constant 0 : i32
    %c0_i32_1 = arith.constant 0 : i32
    return %c0_i32, %c0_i32_0 : i32, i32
  }
  func.func @transform_10(%arg0: i32) -> (i32, i32) {
    %c0_i32 = arith.constant 0 : i32
    %c0_i32_0 = arith.constant 0 : i32
    %c0_i32_1 = arith.constant 0 : i32
    return %c0_i32, %c0_i32_0 : i32, i32
  }
  func.func @transform_11(%arg0: i32) -> (i32, i32) {
    %c0_i32 = arith.constant 0 : i32
    %c0_i32_0 = arith.constant 0 : i32
    %c0_i32_1 = arith.constant 0 : i32
    return %c0_i32, %c0_i32_0 : i32, i32
  }
  func.func @transform_12(%arg0: i32) -> (i32, i32) {
    %c0_i32 = arith.constant 0 : i32
    %c0_i32_0 = arith.constant 0 : i32
    %c0_i32_1 = arith.constant 0 : i32
    return %c0_i32, %c0_i32_0 : i32, i32
  }
  func.func @transform_13(%arg0: i32) -> (i32, i32) {
    %c0_i32 = arith.constant 0 : i32
    %c0_i32_0 = arith.constant 0 : i32
    %c0_i32_1 = arith.constant 0 : i32
    return %c0_i32, %c0_i32_0 : i32, i32
  }
  func.func @transform_14(%arg0: i32) -> (i32, i32) {
    %c0_i32 = arith.constant 0 : i32
    %c0_i32_0 = arith.constant 0 : i32
    %c0_i32_1 = arith.constant 0 : i32
    return %c0_i32, %c0_i32_0 : i32, i32
  }
  func.func @transform_15(%arg0: i32) -> (i32, i32) {
    %c0_i32 = arith.constant 0 : i32
    %c0_i32_0 = arith.constant 0 : i32
    %c0_i32_1 = arith.constant 0 : i32
    return %c0_i32, %c0_i32_0 : i32, i32
  }
  func.func @transform_16(%arg0: i32) -> (i32, i32) {
    %c0_i32 = arith.constant 0 : i32
    %c0_i32_0 = arith.constant 0 : i32
    %c0_i32_1 = arith.constant 0 : i32
    return %c0_i32, %c0_i32_0 : i32, i32
  }
  func.func @transform_17(%arg0: i32) -> (i32, i32) {
    %c0_i32 = arith.constant 0 : i32
    %c0_i32_0 = arith.constant 0 : i32
    %c0_i32_1 = arith.constant 0 : i32
    return %c0_i32, %c0_i32_0 : i32, i32
  }
  func.func @transform_18(%arg0: i32) -> (i32, i32) {
    %c0_i32 = arith.constant 0 : i32
    %c0_i32_0 = arith.constant 0 : i32
    %c0_i32_1 = arith.constant 0 : i32
    return %c0_i32, %c0_i32_0 : i32, i32
  }
  func.func @transform_19(%arg0: i32) -> (i32, i32) {
    %c0_i32 = arith.constant 0 : i32
    %c0_i32_0 = arith.constant 0 : i32
    %c0_i32_1 = arith.constant 0 : i32
    return %c0_i32, %c0_i32_0 : i32, i32
  }
  func.func @transform_20(%arg0: i32) -> (i32, i32) {
    %c0_i32 = arith.constant 0 : i32
    %c0_i32_0 = arith.constant 0 : i32
    %c0_i32_1 = arith.constant 0 : i32
    return %c0_i32, %c0_i32_0 : i32, i32
  }
  func.func @transform_21(%arg0: i32) -> (i32, i32) {
    %c0_i32 = arith.constant 0 : i32
    %c0_i32_0 = arith.constant 0 : i32
    %c0_i32_1 = arith.constant 0 : i32
    return %c0_i32, %c0_i32_0 : i32, i32
  }
  func.func @transform_22(%arg0: i32) -> (i32, i32) {
    %c0_i32 = arith.constant 0 : i32
    %c0_i32_0 = arith.constant 0 : i32
    %c0_i32_1 = arith.constant 0 : i32
    return %c0_i32, %c0_i32_0 : i32, i32
  }
  func.func @transform_23(%arg0: i32) -> (i32, i32) {
    %c0_i32 = arith.constant 0 : i32
    %c0_i32_0 = arith.constant 0 : i32
    %c0_i32_1 = arith.constant 0 : i32
    return %c0_i32, %c0_i32_0 : i32, i32
  }
  func.func @transform_24(%arg0: i32) -> (i32, i32) {
    %c0_i32 = arith.constant 0 : i32
    %c0_i32_0 = arith.constant 0 : i32
    %c0_i32_1 = arith.constant 0 : i32
    return %c0_i32, %c0_i32_0 : i32, i32
  }
  func.func @transform_25(%arg0: i32) -> (i32, i32) {
    %c0_i32 = arith.constant 0 : i32
    %c0_i32_0 = arith.constant 0 : i32
    %c0_i32_1 = arith.constant 0 : i32
    return %c0_i32, %c0_i32_0 : i32, i32
  }
  func.func @transform_26(%arg0: i32) -> (i32, i32) {
    %c0_i32 = arith.constant 0 : i32
    %c0_i32_0 = arith.constant 0 : i32
    %c0_i32_1 = arith.constant 0 : i32
    return %c0_i32, %c0_i32_0 : i32, i32
  }
  func.func @transform_27(%arg0: i32) -> (i32, i32) {
    %c0_i32 = arith.constant 0 : i32
    %c0_i32_0 = arith.constant 0 : i32
    %c0_i32_1 = arith.constant 0 : i32
    return %c0_i32, %c0_i32_0 : i32, i32
  }
  func.func @transform_28(%arg0: i32) -> (i32, i32) {
    %c0_i32 = arith.constant 0 : i32
    %c0_i32_0 = arith.constant 0 : i32
    %c0_i32_1 = arith.constant 0 : i32
    return %c0_i32, %c0_i32_0 : i32, i32
  }
  func.func @transform_29(%arg0: i32) -> (i32, i32) {
    %c0_i32 = arith.constant 0 : i32
    %c0_i32_0 = arith.constant 0 : i32
    %c0_i32_1 = arith.constant 0 : i32
    return %c0_i32, %c0_i32_0 : i32, i32
  }
  func.func @transform_30(%arg0: i32) -> (i32, i32) {
    %c0_i32 = arith.constant 0 : i32
    %c0_i32_0 = arith.constant 0 : i32
    %c0_i32_1 = arith.constant 0 : i32
    return %c0_i32, %c0_i32_0 : i32, i32
  }
  func.func @transform_31(%arg0: i32) -> (i32, i32) {
    %c0_i32 = arith.constant 0 : i32
    %c0_i32_0 = arith.constant 0 : i32
    %c0_i32_1 = arith.constant 0 : i32
    return %c0_i32, %c0_i32_0 : i32, i32
  }
  func.func @transform_32(%arg0: i32) -> (i32, i32) {
    %c0_i32 = arith.constant 0 : i32
    %c0_i32_0 = arith.constant 0 : i32
    %c0_i32_1 = arith.constant 0 : i32
    return %c0_i32, %c0_i32_0 : i32, i32
  }
  func.func @transform_33(%arg0: i32) -> (i32, i32) {
    %c0_i32 = arith.constant 0 : i32
    %c0_i32_0 = arith.constant 0 : i32
    %c0_i32_1 = arith.constant 0 : i32
    return %c0_i32, %c0_i32_0 : i32, i32
  }
  func.func @transform_34(%arg0: i32) -> (i32, i32) {
    %c0_i32 = arith.constant 0 : i32
    %c0_i32_0 = arith.constant 0 : i32
    %c0_i32_1 = arith.constant 0 : i32
    return %c0_i32, %c0_i32_0 : i32, i32
  }
  func.func @transform_35(%arg0: i32) -> (i32, i32) {
    %c0_i32 = arith.constant 0 : i32
    %c0_i32_0 = arith.constant 0 : i32
    %c0_i32_1 = arith.constant 0 : i32
    return %c0_i32, %c0_i32_0 : i32, i32
  }
  func.func @transform_36(%arg0: i32) -> (i32, i32) {
    %c0_i32 = arith.constant 0 : i32
    %c0_i32_0 = arith.constant 0 : i32
    %c0_i32_1 = arith.constant 0 : i32
    return %c0_i32, %c0_i32_0 : i32, i32
  }
  func.func @transform_37(%arg0: i32) -> (i32, i32) {
    %c0_i32 = arith.constant 0 : i32
    %c0_i32_0 = arith.constant 0 : i32
    %c0_i32_1 = arith.constant 0 : i32
    return %c0_i32, %c0_i32_0 : i32, i32
  }
  func.func @transform_38(%arg0: i32) -> (i32, i32) {
    %c0_i32 = arith.constant 0 : i32
    %c0_i32_0 = arith.constant 0 : i32
    %c0_i32_1 = arith.constant 0 : i32
    return %c0_i32, %c0_i32_0 : i32, i32
  }
  func.func @transform_39(%arg0: i32) -> (i32, i32, i32) {
    %c0_i32 = arith.constant 0 : i32
    %c0_i32_0 = arith.constant 0 : i32
    %c0_i32_1 = arith.constant 0 : i32
    return %arg0, %c0_i32, %c0_i32_0 : i32, i32, i32
  }
}

</mosaic_0001>

<bundles_post_ra>
// kernel: time_feature_block_forward.1
= control target key start
LH: loop header
LB: loop body
LE: loop exit
PB: predicated region body
PF: predicated region fallthrough
CT: control target
= control target key end

     0   :  { %s13648_s6 = smov 1   ;;  %s13649_s10 = smov 2   ;;  %s15886_s0 = inlined_call_operand.smem [shape: u32[40], index: -1, kind: input, shape index: {}] }
   0x1   :  { %s13716_s5 = sld [smem:[%s15886_s0]]   ;;  %s13650_s14 = smov 3  }
   0x2   :  { %s13721_s9 = sld [smem:[%s15886_s0 + %s13648_s6]]   ;;  %s13651_s18 = smov 4  }
   0x3   :  { %s13726_s13 = sld [smem:[%s15886_s0 + %s13649_s10]]   ;;  %s13652_s22 = smov 5  }
   0x4   :  { %s13731_s17 = sld [smem:[%s15886_s0 + %s13650_s14]]   ;;  %s13653_s26 = smov 6  }
   0x5   :  { %s13736_s21 = sld [smem:[%s15886_s0 + %s13651_s18]]   ;;  %s13654_s30 = smov 7  }
   0x6   :  { %s13741_s25 = sld [smem:[%s15886_s0 + %s13652_s22]]   ;;  %s13655_s4 = smov 8  }
   0x7   :  { %15906 = sst [smem:[#allocation16_spill]] %s13716_s5  ;;  %s13656_s10 = smov 9  }
   0x8   :  { %s13746_s29 = sld [smem:[%s15886_s0 + %s13653_s26]]   ;;  %s13657_s15 = smov 10  }
   0x9   :  { %s13751_s3 = sld [smem:[%s15886_s0 + %s13654_s30]]   ;;  %s13658_s20 = smov 11  }
   0xa   :  { %s13756_s8 = sld [smem:[%s15886_s0 + %s13655_s4]]   ;;  %s13659_s26 = smov 12  }
   0xb   :  { %s13761_s14 = sld [smem:[%s15886_s0 + %s13656_s10]]   ;;  %s13660_s1 = smov 13  }
   0xc   :  { %s13766_s19 = sld [smem:[%s15886_s0 + %s13657_s15]]   ;;  %s13661_s7 = smov 14  }
   0xd   :  { %s13771_s24 = sld [smem:[%s15886_s0 + %s13658_s20]]   ;;  %s13662_s15 = smov 15  }
   0xe   :  { %s13776_s30 = sld [smem:[%s15886_s0 + %s13659_s26]]   ;;  %s13663_s22 = smov 16  }
   0xf   :  { %15907 = sst [smem:[#allocation17_spill]] %s13751_s3  ;;  %s13664_s28 = smov 17  }
  0x10   :  { %s13781_s6 = sld [smem:[%s15886_s0 + %s13660_s1]]   ;;  %s13686_s16 = smov 39  }
  0x11   :  { %s13786_s12 = sld [smem:[%s15886_s0 + %s13661_s7]]   ;;  %s13665_s7 = smov 18  }
  0x12   :  { %15908 = sst [smem:[#allocation18_spill]] %s13766_s19 }
  0x13   :  { %15909 = sst [smem:[#allocation19_spill]] %s13771_s24 }
  0x14   :  { %15910 = sst [smem:[#allocation20_spill]] %s13776_s30 }
  0x15   :  { %s13791_s20 = sld [smem:[%s15886_s0 + %s13662_s15]]   ;;  %s13666_s15 = smov 19  }
  0x16   :  { %15911 = sst [smem:[#allocation21_spill]] %s13781_s6 }
  0x17   :  { %15912 = sst [smem:[#allocation22_spill]] %s13786_s12 }
  0x18   :  { %s13796_s27 = sld [smem:[%s15886_s0 + %s13663_s22]]   ;;  %s13667_s22 = smov 20  }
  0x19   :  { %s13801_s4 = sld [smem:[%s15886_s0 + %s13664_s28]]   ;;  %s13668_s28 = smov 21  }
  0x1a   :  { %s13806_s12 = sld [smem:[%s15886_s0 + %s13665_s7]]   ;;  %s13669_s7 = smov 22  }
  0x1b   :  { %s13811_s6 = sld [smem:[%s15886_s0 + %s13666_s15]]   ;;  %s13670_s15 = smov 23  }
  0x1c   :  { %s13821_s30 = sld [smem:[%s15886_s0 + %s13668_s28]]   ;;  %s13672_s28 = smov 25  }
  0x1e   :  { %15913 = sst [smem:[#allocation23_spill]] %s13796_s27 }
  0x1f   :  { %15914 = sst [smem:[#allocation24_spill]] %s13801_s4 }
  0x20   :  { %15915 = sst [smem:[#allocation25_spill]] %s13806_s12 }
  0x21   :  { %15916 = sst [smem:[#allocation26_spill]] %s13811_s6 }
  0x22   :  { %s13816_s27 = sld [smem:[%s15886_s0 + %s13667_s22]]   ;;  %s13671_s22 = smov 24  }
  0x23   :  { %15918 = sst [smem:[#allocation28_spill]] %s13821_s30 }
  0x24   :  { %s13826_s12 = sld [smem:[%s15886_s0 + %s13669_s7]]   ;;  %s13673_s7 = smov 26  }
  0x25   :  { %s13831_s6 = sld [smem:[%s15886_s0 + %s13670_s15]]   ;;  %s13674_s15 = smov 27  }
  0x26   :  { %s13841_s30 = sld [smem:[%s15886_s0 + %s13672_s28]]   ;;  %s13676_s28 = smov 29  }
  0x28   :  { %15917 = sst [smem:[#allocation27_spill]] %s13816_s27 }
  0x29   :  { %s13836_s27 = sld [smem:[%s15886_s0 + %s13671_s22]]   ;;  %s13675_s22 = smov 28  }
  0x2a   :  { %15919 = sst [smem:[#allocation29_spill]] %s13826_s12 }
  0x2b   :  { %15920 = sst [smem:[#allocation30_spill]] %s13831_s6 }
  0x2c   :  { %15922 = sst [smem:[#allocation32_spill]] %s13841_s30 }
  0x2d   :  { %s13846_s12 = sld [smem:[%s15886_s0 + %s13673_s7]]   ;;  %s13677_s7 = smov 30  }
  0x2e   :  { %s13851_s6 = sld [smem:[%s15886_s0 + %s13674_s15]]   ;;  %s13678_s15 = smov 31  }
  0x2f   :  { %15921 = sst [smem:[#allocation31_spill]] %s13836_s27 }
  0x30   :  { %s13856_s27 = sld [smem:[%s15886_s0 + %s13675_s22]]   ;;  %s13679_s22 = smov 32  }
  0x31   :  { %s13861_s30 = sld [smem:[%s15886_s0 + %s13676_s28]]   ;;  %s13680_s28 = smov 33  }
  0x32   :  { %s13881_s24 = sld [smem:[%s15886_s0 + %s13680_s28]]   ;;  %s13684_s28 = smov 37  }
  0x33   :  { %15923 = sst [smem:[#allocation33_spill]] %s13846_s12 }
  0x34   :  { %15924 = sst [smem:[#allocation34_spill]] %s13851_s6 }
  0x35   :  { %s13866_s12 = sld [smem:[%s15886_s0 + %s13677_s7]]   ;;  %s13681_s7 = smov 34  }
  0x36   :  { %15925 = sst [smem:[#allocation35_spill]] %s13856_s27 }
  0x37   :  { %s13871_s6 = sld [smem:[%s15886_s0 + %s13678_s15]]   ;;  %s13682_s15 = smov 35  }
  0x38   :  { %s13876_s27 = sld [smem:[%s15886_s0 + %s13679_s22]]   ;;  %s13683_s22 = smov 36  }
  0x39   :  { %15929 = sst [smem:[#allocation39_spill]] %s13881_s24 }
  0x3a   :  { %s13891_s19 = sld [smem:[%s15886_s0 + %s13682_s15]]  }
  0x3b   :  { %15926 = sst [smem:[#allocation36_spill]] %s13866_s12 }
  0x3c   :  { %s13886_s12 = sld [smem:[%s15886_s0 + %s13681_s7]]   ;;  %s13685_s7 = smov 38  }
  0x3d   :  { %15927 = sst [smem:[#allocation37_spill]] %s13871_s6 }
  0x3e   :  { %15928 = sst [smem:[#allocation38_spill]] %s13876_s27 }
  0x3f   :  { %s13896_s27 = sld [smem:[%s15886_s0 + %s13683_s22]]  }
  0x40   :  { %15931 = sst [smem:[#allocation41_spill]] %s13891_s19 }
  0x41   :  { %s13901_s24 = sld [smem:[%s15886_s0 + %s13684_s28]]  }
  0x42   :  { %15930 = sst [smem:[#allocation40_spill]] %s13886_s12 }
  0x43   :  { %s9801_s12 = sld [smem:[%s15886_s0 + %s13685_s7]]  }
  0x44   :  { %s13909_s19 = sld [smem:[%s15886_s0 + %s13686_s16]]  }
  0x49   :  { %v84_v0 = vstv %s9801_s12 }
  0x4a   :  { %15932 = sst [smem:[#allocation42_spill]] %s13909_s19  ;;  %85 = vst [vmem:[#allocation2] sm:$0x1] %v84_v0 }
  0x4b   :  { %86 = vsyncpa [#allocation4], 0 }
  0x4c   :  { %87 = vsyncpa [#allocation7], 0 }
  0x4d   :  { %88 = vsyncpa [#allocation10], 0 }
  0x4e   :  { %89 = vsyncpa [#allocation5], 0 }
  0x4f   :  { %91 = vsyncpa [#allocation5 + $0x1], 0  ;;  %s13911_s22 = smov 0   ;;  %s13913_s23 = smov 0  }
  0x50   :  { %s13915_s26 = smov 0   ;;  %s13917_s28 = smov 0  }
  0x51 LB: > { %s15933_s6 = sld [smem:[#allocation37_spill]]  ;;  %s13932_s0 = sadd.s32 4294967295, %s13646_s28   ;;  %s13638_s23 = sphi %s13913_s23, %s16006_s23   ;;  %s13634_s22 = sphi %s13911_s22, %s16005_s22   ;;  %s13646_s28 = sphi %s13917_s28, %s16002_s28   ;;  %s13642_s26 = sphi %s13915_s26, %s16004_s26  }
  0x52   : > { %s15934_s4 = sld [smem:[#allocation24_spill]]  ;;  %s9804_s12 = sadd.s32 4294967294, %s13646_s28  }
  0x53   : > { %15935 = sst [smem:[#allocation43_spill]] %s13634_s22  ;;  %s13936_s1 = sadd.s32 1, %s13646_s28  }
  0x54   : > { %15936 = sst [smem:[#allocation44_spill]] %s13642_s26  ;;  %s928_s2 = sadd.s32 1, %s13642_s26 }
  0x55   : > { %15937 = sst [smem:[#allocation45_spill]] %s13646_s28  ;;  %s925_s7 = ssub.s32 %s13646_s28, %s13936_s1 }
  0x56   : > { %15938 = sst [smem:[#allocation46_spill]] %s13936_s1  ;;  %p938_p0 = scmp.ne.s32.totalorder %s13642_s26, %s13638_s23 }
  0x57   : > { %p926_p1 = scmp.eq.s32.totalorder %s925_s7, 0  ;;  %p939_p2 = scmp.eq.s32.totalorder %s13932_s0, 1 }
  0x58   : > { %p944_p3 = scmp.ne.s32.totalorder %s13638_s23, %s13634_s22  ;;  %p945_p4 = scmp.eq.s32.totalorder %s9804_s12, 1 }
  0x59   : > { %s13947_s10 = scalar_select %p926_p1, %s13642_s26, %s928_s2  }
  0x5a   : > { %p13949_p5 = por %p939_p2, %p938_p0  ;;  %p13953_p6 = por %p945_p4, %p944_p3 }
  0x5b   : > { %15939 = sst [smem:[#allocation47_spill]] %s13947_s10  ;;  %p9805_p7 = scmp.ge.s32.totalorder %s13646_s28, 1 }
  0x5c   : > { %s15940_s11 = scalar_select %p13949_p5, 1, 0 }
  0x5d   : > { %s15942_s16 = scalar_select %p13953_p6, 1, 0 }
  0x5e   : > { %15941 = sst [smem:[#allocation48_spill]] %s15940_s11  ;;  %p952_p8 = scmp.lt.s32.totalorder %s13646_s28, 3 }
  0x5f   : > { %15943 = sst [smem:[#allocation49_spill]] %s15942_s16  ;;  %p13135_p9 = scmp.eq.s32.totalorder %s13932_s0, 0 }
  0x60   : > { %p13960_p10 = pnand %p9805_p7, %p952_p8  ;;  %s1022_s18 = sshll.u32 %s15934_s4, 4  ;;  %s1023_s18 = int_to_ptr.hbm [resolvable:$true] %s1022_s18 }
  0x61   : > { %s13687_s12 = smov [#allocation6]   ;;  %s1005_s10 = sshll.u32 %s13791_s20, 4  ;;  %s13974_s10 = int_to_ptr.hbm [resolvable:$true] %s1005_s10 }
  0x62   : > { %p13118_p11 = pneg %p13960_p10  ;;  %s1024_s2 = sshll.u32 %s13687_s12, 4  ;;  %s1025_s2 = int_to_ptr.vmem [resolvable:$true] %s1024_s2 }
  0x63   : > { %s13452_s26 = sshra.s32 %s1023_s18, 4  ;;  %s13459_s12 = scalar_lea.hbm %s15934_s4, 1024  ;;  %s13453_s26 = int_to_ptr.hbm [resolvable:$true] %s13452_s26 }
  0x64   : > { %p13969_p12 = pnand %p13135_p9, %p13118_p11  ;;  %s13454_s1 = scalar_lea.hbm %s13453_s26, 1024 }
  0x65   : > { %p13455_p13 = scmp.ne.s32.totalorder %s13453_s26, %s13454_s1  ;;  %p13460_p3 = scmp.lt.s32.totalorder %s13453_s26, %s15934_s4 }
  0x66   : > { %p13456_p0 = pneg %p13969_p12  ;;  %p13461_p4 = scmp.lt.s32.totalorder %s13459_s12, %s13454_s1 }
  0x68   : > { %p13457_p1 = pnand %p13456_p0, %p13455_p13  ;;  %p13462_p7 = por %p13461_p4, %p13460_p3 }
  0x6a   : > { %p13458_p2 = pneg %p13457_p1 }
  0x6c   : > { %p13463_p8 = pnand %p13462_p7, %p13458_p2 }
  0x6e   : > { %13466 = shalt.err (!%p13463_p8)
}
  0x6f   : > { %s13688_s16 = smov 64   ;;  %s15903_s22 = smov 4  }
  0x70   : > { %13124 = dma.hbm_to_vmem [thread:$0]  (!%p13969_p12), %s1023_s18, 16384, %s1025_s2, [#allocation7], %s13688_s16, %s13688_s16, %s15903_s22  }
  0x71   : > { %s13690_s28 = smov [#allocation3]   ;;  %s1069_s26 = sshll.u32 %s13861_s30, 4  ;;  %s1070_s26 = int_to_ptr.hbm [resolvable:$true] %s1069_s26 }
  0x72   : > { %s1007_s11 = sshll.u32 %s13690_s28, 4  ;;  %s13482_s1 = sshra.s32 %s13974_s10, 4  ;;  %s1008_s11 = int_to_ptr.vmem [resolvable:$true] %s1007_s11  ;;  %s13483_s1 = int_to_ptr.hbm [resolvable:$true] %s13482_s1 }
  0x73   : > { %s13484_s12 = scalar_lea.hbm %s13483_s1, 1024  ;;  %s13489_s4 = scalar_lea.hbm %s13791_s20, 1024 }
  0x74   : > { %p13485_p11 = scmp.ne.s32.totalorder %s13483_s1, %s13484_s12  ;;  %p13490_p2 = scmp.lt.s32.totalorder %s13483_s1, %s13791_s20 }
  0x75   : > { %p13491_p3 = scmp.lt.s32.totalorder %s13489_s4, %s13484_s12 }
  0x76   : > { %p13487_p13 = pnand %p13485_p11, %p13456_p0 }
  0x77   : > { %p13492_p4 = por %p13491_p3, %p13490_p2 }
  0x78   : > { %p13488_p1 = pneg %p13487_p13 }
  0x7a   : > { %p13493_p7 = pnand %p13492_p4, %p13488_p1 }
  0x7c   : > { %13496 = shalt.err (!%p13493_p7)
}
  0x7d   : > { %s13691_s19 = smov 1024   ;;  %s13692_s28 = smov [#allocation8]  }
  0x7e   : > { %13121 = dma.hbm_to_vmem [thread:$0]  (!%p13969_p12), %s13974_s10, 16384, %s1008_s11, [#allocation4], %s13691_s19, %s13691_s19, %s13688_s16  }
  0x7f   : > { %s1071_s18 = sshll.u32 %s13692_s28, 4  ;;  %s1086_s2 = sshll.u32 %s15933_s6, 4  ;;  %s1072_s18 = int_to_ptr.vmem [resolvable:$true] %s1071_s18  ;;  %s1087_s2 = int_to_ptr.hbm [resolvable:$true] %s1086_s2 }
  0x80   : > { %s13512_s1 = sshra.s32 %s1070_s26, 4  ;;  %s13519_s12 = scalar_lea.hbm %s13861_s30, 1024  ;;  %s13513_s1 = int_to_ptr.hbm [resolvable:$true] %s13512_s1 }
  0x81   : > { %s13514_s4 = scalar_lea.hbm %s13513_s1, 1024  ;;  %p13520_p1 = scmp.lt.s32.totalorder %s13513_s1, %s13861_s30 }
  0x82   : > { %p13515_p8 = scmp.ne.s32.totalorder %s13513_s1, %s13514_s4  ;;  %p13521_p2 = scmp.lt.s32.totalorder %s13519_s12, %s13514_s4 }
  0x84   : > { %p13517_p11 = pnand %p13515_p8, %p13456_p0  ;;  %p13522_p3 = por %p13521_p2, %p13520_p1 }
  0x86   : > { %p13518_p13 = pneg %p13517_p11 }
  0x88   : > { %p13523_p4 = pnand %p13522_p3, %p13518_p13 }
  0x8a   : > { %13526 = shalt.err (!%p13523_p4)
}
  0x8b   : > { %13127 = dma.hbm_to_vmem [thread:$0]  (!%p13969_p12), %s1070_s26, 16384, %s1072_s18, [#allocation7], %s13691_s19, %s13691_s19, %s13688_s16  }
  0x8c   : > { %s13693_s10 = smov [#allocation9]   ;;  %s13542_s28 = sshra.s32 %s1087_s2, 4  ;;  %s13543_s28 = int_to_ptr.hbm [resolvable:$true] %s13542_s28 }
  0x8d   : > { %s1088_s11 = sshll.u32 %s13693_s10, 4  ;;  %s13544_s22 = scalar_lea.hbm %s13543_s28, 1024  ;;  %s1089_s11 = int_to_ptr.vmem [resolvable:$true] %s1088_s11 }
  0x8e   : > { %p13545_p7 = scmp.ne.s32.totalorder %s13543_s28, %s13544_s22  ;;  %s13549_s1 = scalar_lea.hbm %s15933_s6, 1024 }
  0x8f   : > { %p13550_p13 = scmp.lt.s32.totalorder %s13543_s28, %s15933_s6  ;;  %p13551_p1 = scmp.lt.s32.totalorder %s13549_s1, %s13544_s22 }
  0x90   : > { %p13547_p8 = pnand %p13545_p7, %p13456_p0 }
  0x91   : > { %p13552_p2 = por %p13551_p1, %p13550_p13 }
  0x92   : > { %p13548_p11 = pneg %p13547_p8 }
  0x94   : > { %p13553_p3 = pnand %p13552_p2, %p13548_p11 }
  0x96   : > { %13556 = shalt.err (!%p13553_p3)
}
  0x97   : > { %s15946_s19 = smov 4   ;;  %1132 = sbr.rel (%p13960_p10) target bundleno = 6328 (0x18b8), region = 176 }
  0x98   : > { %13130 = dma.hbm_to_vmem [thread:$0]  (!%p13969_p12), %s1087_s2, 16384, %s1089_s11, [#allocation10], %s13688_s16, %s13688_s16, %s15946_s19  }
  0x9c   : > { %13617 = dma.done.wait (%p13135_p9), [#allocation4], 16384  }
  0x9d   : > { %13619 = vsyncadd (%p13135_p9), [#allocation4], 4294950912 }
  0x9e   : > { %13621 = dma.done.wait (%p13135_p9), [#allocation7], 32768  }
  0x9f   : > { %13623 = vsyncadd (%p13135_p9), [#allocation7], 4294934528 }
  0xa0   : > { %13625 = dma.done.wait (%p13135_p9), [#allocation10], 16384  }
  0xa1   : > { %13627 = vsyncadd (%p13135_p9), [#allocation10], 4294950912  ;;  %s15947_s5 = sld [smem:[#allocation16_spill]]  ;;  %p1242_p10 = scmp.lt.s32.totalorder %s13932_s0, 1  ;;  %v1251_v1 = vld [vmem:[%s13721_s9 + $0x8] sm:$0xf]  ;;  %v1294_v8 = vlaneseq }
  0xa2   : > { %v1261_v2 = vunpack.c.l.b16 %v1251_v1  ;;  %vm1269_vm0 = vcmask 1043456   ;;  %v12445_v4 = vld [vmem:[%s13721_s9] sm:$0xff]  ;;  %vm1265_vm1 = vcmask 195584   ;;  %s15948_s3 = sld [smem:[#allocation17_spill]]  ;;  %vm1297_vm2 = vcmask 64512   ;;  %v1322_v21 = vld [vmem:[%s13746_s29 + $0x8] sm:$0xff] }
  0xa3   : > { %s1243_s22 = scalar_select %p1242_p10, %s13932_s0, 1  ;;  %v14039_v9 = vshrl.u32 %v1294_v8, 7  ;;  %v13240_v10 = vld [vmem:[%s13726_s13] ss:$0 sm:$0xff]  ;;  %v14048_v17 = vand.u32 127, %v1294_v8  ;;  %1342 = vmatpush.msra.mxu2 %v1322_v21  ;;  %vm1324_vm3 = vcmask 130048  }
  0xa4   : > { %v1263_v3 = vpack.c.b16 %v1261_v2, %v1261_v2  ;;  %v1286_v12 = vld [vmem:[%s13731_s17] sm:$0xff]  ;;  %vm1367_vm4 = vcmask 180376   ;;  %s13694_s7 = smov 110   ;;  %s13695_s26 = smov 112   ;;  %vm1378_vm9 = vcmask 24576   ;;  %vm1844_vm11 = vcmask 261120  }
  0xa5   : > { %s9816_s16 = sshll.u32 %s1243_s22, 3  ;;  %13236 = vset.pattern.permute.xlu2 %v14039_v9  ;;  %v1291_v16 = vld [vmem:[%s13736_s21] sm:$0xff]  ;;  %s13696_s18 = smov 111   ;;  %v1477_v52 = vadd.s32 8, %v14039_v9  ;;  %v9968_v1 = vld [vmem:[%s13761_s14 + $0x118] sm:$0xf] }
  0xa6   : > { %v1271_v5 = vsel %vm1269_vm0, %v1263_v3, 0  ;;  %1315 = vmatpush.msra.mxu1 %v1291_v16  ;;  %v1321_v22 = vld [vmem:[%s13746_s29] sm:$0xff]  ;;  %s13697_s2 = smov 109   ;;  %s13698_s4 = smov 106   ;;  %v12483_v2 = vld [vmem:[%s13761_s14 + $0x128] sm:$0xf0] }
  0xa7   : > { %s1245_s15 = scalar_lea.vmem %s15947_s5, %s9816_s16  ;;  %1279 = vmatpush.bf16.msra.mxu0 %v1271_v5  ;;  %1343 = vmatpush.msra.mxu2 %v1321_v22  ;;  %v1292_v23 = vld [vmem:[%s13741_s25] sm:$0x1]  ;;  %s13699_s12 = smov 108   ;;  %v9948_v3 = vld [vmem:[%s13761_s14 + $0xf0] sm:$0xf]  ;;  %vm1472_vm10 = vcmp.lt.s32.totalorder %v14048_v17, 126 }
  0xa8   : > { %v1247_v6 = vld [vmem:[%s1245_s15] sm:$0xff]  ;;  %13237 = vset.pattern.permute.xlu1 %v1477_v52  ;;  %s13700_s10 = smov 107   ;;  %s13701_s11 = smov 127   ;;  %v9970_v8 = vld [vmem:[%s13761_s14 + $0x12c] sm:$0xf0] }
  0xa9   : > { %v1248_v7 = vpack.c.bf16 %v1247_v6, %v1247_v6  ;;  %v1323_v27 = vld [vmem:[%s15948_s3] sm:$0x1]  ;;  %s13702_s28 = smov 126   ;;  %v12478_v5 = vld [vmem:[%s13761_s14 + $0x100] sm:$0xf0] }
  0xaa   : > { %v12481_v6 = vld [vmem:[%s13761_s14 + $0x11c] sm:$0xf]  ;;  %v12476_v16 = vld [vmem:[%s13761_s14 + $0xf4] sm:$0xf]  ;;  %v12479_v21 = vld [vmem:[%s13761_s14 + $0x108] sm:$0xf0] }
  0xab   : > { %1280 = vmatpush.bf16.msra.mxu0 %v12445_v4  ;;  %v9969_v4 = vor.u32 %v12483_v2, %v9968_v1  ;;  %v9870_v1 = vld [vmem:[%s13761_s14 + $0x64] sm:$0xf0]  ;;  %v9876_v2 = vld [vmem:[%s13761_s14 + $0x58] sm:$0xf] }
  0xad   : > { %1752 = vmatpush.bf16.msrb.mxu1 %v9969_v4 }
  0xae   : > { %9821 = vmatmul.msk.bf16.vlgmr.msra.gmra.mxu0 %vm1265_vm1, %v1248_v7  ;;  %v9949_v7 = vor.u32 %v12478_v5, %v9948_v3  ;;  %v12459_v3 = vld [vmem:[%s13761_s14 + $0x68] sm:$0xf0] }
  0xb1   : > { %1753 = vmatpush.bf16.msrb.mxu1 %v9949_v7  ;;  %v9848_v7 = vld [vmem:[%s13761_s14 + $0x28] sm:$0xf] }
 0x12b   : > { %v1282_v11 = vpop.f32.mrf.mxu0 }
 0x12c   : > { %v1283_v13 = vadd.f32 %v13240_v10, %v1282_v11  ;;  %v9976_v10 = vld [vmem:[%s13761_s14 + $0x120] sm:$0xf]  ;;  %v12484_v11 = vld [vmem:[%s13761_s14 + $0x130] sm:$0xf0] }
 0x12e   : > { %v14044_v14 = vadd.f32 %v1286_v12, %v1283_v13  ;;  %v9928_v12 = vld [vmem:[%s13761_s14 + $0xc8] sm:$0xf]  ;;  %v12473_v13 = vld [vmem:[%s13761_s14 + $0xd8] sm:$0xf0] }
 0x12f   : > { %v9929_v22 = vor.u32 %v12473_v13, %v9928_v12 }
 0x130   : > { %1288 = vadd.xlane.f32.xlu0 %v14044_v14 }
 0x131   : > { %1754 = vmatpush.bf16.msrb.mxu1 %v9929_v22 }
 0x133   : > { %v1284_v15 = vpop.f32.mrf.mxu0 }
 0x134   : > { %v9977_v15 = vor.u32 %v12484_v11, %v9976_v10 }
 0x136   : > { %1778 = vmatpush.bf16.msrb.mxu0 %v9977_v15  ;;  %v9877_v15 = vor.u32 %v12459_v3, %v9876_v2  ;;  %v9830_v2 = vld [vmem:[%s13761_s14 + $0x14] sm:$0xf0] }
 0x1a3   : > { %v1289_v18 = vpop.xlane.xlu0 %1288 }
 0x1a4   : > { %v1290_v19 = vmul.f32 0.0078125, %v1289_v18  ;;  %v9950_v18 = vld [vmem:[%s13761_s14 + $0x104] sm:$0xf0] }
 0x1a6   : > { %v1296_v20 = vperm.slane %v1290_v19, %v14048_v17  ;;  %v9953_v19 = vor.u32 %v12476_v16, %v9950_v18  ;;  %v12482_v18 = vld [vmem:[%s13761_s14 + $0x124] sm:$0xf] }
 0x1a8   : > { %9822 = vmatmul.msk.f32.vlgmr.msra.gmra.mxu1 %vm1297_vm2, %v1296_v20  ;;  %v9956_v20 = vld [vmem:[%s13761_s14 + $0xf8] sm:$0xf] }
 0x225   : > { %v1317_v24 = vpop.f32.mrf.mxu1 }
 0x226   : > { %v1318_v25 = vadd.f32 %v1317_v24, %v1292_v23  ;;  %v9908_v23 = vld [vmem:[%s13761_s14 + $0xa0] sm:$0xf]  ;;  %v12468_v24 = vld [vmem:[%s13761_s14 + $0xb0] sm:$0xf0] }
 0x228   : > { %v1320_v26 = vmax.f32 %v1318_v25, 0.0  ;;  %v9957_v25 = vor.u32 %v12479_v21, %v9956_v20 }
 0x22a   : > { %9823 = vmatmul.msk.f32.vlgmr.msra.gmra.mxu2 %vm1324_vm3, %v1320_v26  ;;  %v12471_v26 = vld [vmem:[%s13761_s14 + $0xcc] sm:$0xf]  ;;  %1779 = vmatpush.bf16.msrb.mxu0 %v9957_v25  ;;  %v12448_v25 = vld [vmem:[%s13761_s14 + $0x10] sm:$0xf0] }
 0x2ad   : > { %v1345_v28 = vpop.f32.mrf.mxu2 }
 0x2ae   : > { %v1346_v29 = vadd.f32 %v1345_v28, %v1323_v27  ;;  %v9930_v27 = vld [vmem:[%s13761_s14 + $0xdc] sm:$0xf0]  ;;  %v9936_v28 = vld [vmem:[%s13761_s14 + $0xd0] sm:$0xf] }
 0x2b0   : > { %v1348_v30 = vsub.f32 0.0, %v1346_v29  ;;  %v1368_v31 = vsel %vm1367_vm4, %v1346_v29, -inf }
 0x2b1   : > { %1369 = vmax.xlane.f32.xlu0 %v1368_v31 }
 0x2b2   : > { %v1349_v32 = vmul.f32 1.442695, %v1348_v30  ;;  %v9933_v30 = vor.u32 %v12471_v26, %v9930_v27  ;;  %v9984_v27 = vld [vmem:[%s13761_s14 + $0x128] sm:$0xf] }
 0x2b4   : > { %13256 = vpow2.f32 %v1349_v32  ;;  %v12466_v32 = vld [vmem:[%s13761_s14 + $0xa4] sm:$0xf] }
 0x2ba   : > { %v13257_v33 = vpop.eup %13256 }
 0x2bb   : > { %v1351_v34 = vadd.f32 1.0, %v13257_v33  ;;  %v9909_v33 = vor.u32 %v12468_v24, %v9908_v23  ;;  %v9828_v24 = vld [vmem:[%s13761_s14] sm:$0xf] }
 0x2bd   : > { %13258 = vrcp.f32 %v1351_v34  ;;  %v1363_v38 = vand.u32 2147483648, %v1351_v34  ;;  %v1361_v40 = vand.u32 2147483647, %v1351_v34  ;;  %vm1357_vm6 = vweird.f32 %v1351_v34  ;;  %1755 = vmatpush.bf16.msrb.mxu1 %v9909_v33  ;;  %v9958_v33 = vld [vmem:[%s13761_s14 + $0x10c] sm:$0xf0] }
 0x2bf   : > { %v1364_v42 = vor.u32 1.1754944e-38, %v1363_v38  ;;  %vm1362_vm8 = vcmp.eq.f32.partialorder %v1361_v40, 8.507059e+37  ;;  %v12463_v38 = vld [vmem:[%s13761_s14 + $0x88] sm:$0xf0] }
 0x2c3   : > { %v13259_v35 = vpop.eup %13258 }
 0x2c4   : > { %v1353_v36 = vmul.f32 %v13259_v35, %v1351_v34  ;;  %vm1358_vm5 = vweird.f32 %v13259_v35  ;;  %v9910_v34 = vld [vmem:[%s13761_s14 + $0xb4] sm:$0xf0] }
 0x2c5   : > { %vm1359_vm7 = vmor %vm1357_vm6, %vm1358_vm5 }
 0x2c6   : > { %v1354_v37 = vsub.f32 1.0, %v1353_v36  ;;  %v12469_v36 = vld [vmem:[%s13761_s14 + $0xb8] sm:$0xf0] }
 0x2c8   : > { %v1355_v39 = vmul.f32 %v13259_v35, %v1354_v37  ;;  %v9888_v37 = vld [vmem:[%s13761_s14 + $0x78] sm:$0xf] }
 0x2ca   : > { %v1356_v41 = vadd.f32 %v13259_v35, %v1355_v39  ;;  %v1393_v39 = vld [vmem:[%s13756_s8 + $0x8] sm:$0xff] }
 0x2cc   : > { %v1360_v43 = vsel %vm1359_vm7, %v13259_v35, %v1356_v41  ;;  %v9916_v35 = vld [vmem:[%s13761_s14 + $0xa8] sm:$0xf]  ;;  %v9913_v41 = vor.u32 %v12466_v32, %v9910_v34  ;;  %v12477_v32 = vld [vmem:[%s13761_s14 + $0xfc] sm:$0xf]  ;;  %v9829_v34 = vor.u32 %v12448_v25, %v9828_v24  ;;  %v9844_v24 = vld [vmem:[%s13761_s14 + $0x10] sm:$0xf] }
 0x2cd   : > { %v1365_v44 = vsel %vm1362_vm8, %v1364_v42, %v1360_v43  ;;  %v9917_v42 = vor.u32 %v12469_v36, %v9916_v35  ;;  %v12461_v43 = vld [vmem:[%s13761_s14 + $0x7c] sm:$0xf]  ;;  %v9964_v36 = vld [vmem:[%s13761_s14 + $0x100] sm:$0xf]  ;;  %v12450_v25 = vld [vmem:[%s13761_s14 + $0x20] sm:$0xf0] }
 0x2ce   : > { %1416 = vrot.lane.b32.xlu0 %v1365_v44, %s13694_s7  ;;  %1397 = vrot.lane.b32.xlu2 %v1365_v44, %s13695_s26  ;;  %v1384_v55 = vperm.slane %v1365_v44, 0 }
 0x2d6   : > { %1407 = vrot.lane.b32.xlu2 %v1365_v44, %s13696_s18  ;;  %v9889_v44 = vor.u32 %v12463_v38, %v9888_v37  ;;  %v12480_v37 = vld [vmem:[%s13761_s14 + $0x110] sm:$0xf0]  ;;  %v9961_v38 = vor.u32 %v12477_v32, %v9958_v33  ;;  %s15949_s18 = sld [smem:[#allocation18_spill]] }
 0x2d8   : > { %1756 = vmatpush.bf16.msrb.mxu1 %v9889_v44  ;;  %v9918_v44 = vld [vmem:[%s13761_s14 + $0xbc] sm:$0xf0] }
 0x324   : > { %v1370_v45 = vpop.xlane.xlu0 %1369 }
 0x325   : > { %v1371_v46 = vsub.f32 %v1346_v29, %v1370_v45  ;;  %v12474_v29 = vld [vmem:[%s13761_s14 + $0xe0] sm:$0xf0]  ;;  %v9890_v45 = vld [vmem:[%s13761_s14 + $0x8c] sm:$0xf0] }
 0x326   : > { %v9937_v31 = vor.u32 %v12474_v29, %v9936_v28  ;;  %v12485_v28 = vld [vmem:[%s13761_s14 + $0x138] sm:$0xf0] }
 0x327   : > { %v1372_v47 = vmul.f32 1.442695, %v1371_v46  ;;  %v9896_v46 = vld [vmem:[%s13761_s14 + $0x80] sm:$0xf]  ;;  %v9985_v35 = vor.u32 %v12485_v28, %v9984_v27 }
 0x328   : > { %v1398_v48 = vpop.permute.xlu2 %1397  ;;  %1780 = vmatpush.bf16.msrb.mxu0 %v9937_v31 }
 0x329   : > { %13260 = vpow2.f32 %v1372_v47  ;;  %13086 = vpush %v1398_v48  ;;  %v12464_v47 = vld [vmem:[%s13761_s14 + $0x90] sm:$0xf0]  ;;  %v1392_v48 = vld [vmem:[%s13756_s8] sm:$0xff] }
 0x32c   : > { %1781 = vmatpush.bf16.msrb.mxu0 %v9917_v42 }
 0x32f   : > { %v13261_v49 = vpop.eup %13260 }
 0x330   : > { %1375 = vrot.lane.b32.xlu1 %v13261_v49, %s13697_s2  ;;  %v1408_v50 = vpop.permute.xlu2 %1407 }
 0x331   : > { %13088 = vpush %v1408_v50  ;;  %v9868_v50 = vld [vmem:[%s13761_s14 + $0x50] sm:$0xf] }
 0x340   : > { %v1417_v51 = vpop.permute.xlu0 %1416 }
 0x341   : > { %13090 = vpush %v1417_v51  ;;  %v12458_v51 = vld [vmem:[%s13761_s14 + $0x60] sm:$0xf0] }
 0x35a   : > { %s14076_s1 = spop %13086 }
 0x35b   : > { %v1400_v21 = vstv %s14076_s1  ;;  %s15953_s1 = sld [smem:[#allocation22_spill]] }
 0x362   : > { %s14080_s19 = spop %13088 }
 0x363   : > { %v1410_v12 = vstv %s14080_s19  ;;  %s15954_s19 = sld [smem:[#allocation23_spill]] }
 0x372   : > { %s14085_s22 = spop %13090 }
 0x3a2   : > { %v1376_v53 = vpop.permute.xlu1 %1375 }
 0x3a3   : > { %v1379_v54 = vsel %vm1378_vm9, %v1376_v53, 0.0  ;;  %v1394_v53 = vld [vmem:[%s13756_s8 + $0x10] sm:$0xff] }
 0x3a4   : > { %1380 = vadd.xlane.f32.xlu1 %v1379_v54 }
 0x3bd   : > { %1479 = vperm.xlu1 %13237, %v1384_v55  }
 0x417   : > { %v1381_v56 = vpop.xlane.xlu1 %1380 }
 0x418   : > { %13262 = vrcp.f32 %v1381_v56 }
 0x41e   : > { %v13263_v57 = vpop.eup %13262 }
 0x41f   : > { %v1383_v58 = vmul.f32 %v13263_v57, %v13261_v49  ;;  %v9893_v57 = vor.u32 %v12461_v43, %v9890_v45  ;;  %v12467_v43 = vld [vmem:[%s13761_s14 + $0xac] sm:$0xf] }
 0x420   : > { %v9921_v45 = vor.u32 %v12467_v43, %v9918_v44 }
 0x421   : > { %1443 = vrot.lane.b32.xlu0 %v1383_v58, %s13698_s4  ;;  %1423 = vrot.lane.b32.xlu2 %v1383_v58, %s13697_s2  ;;  %s13704_s2 = smov 32   ;;  %s13705_s4 = smov 64  }
 0x429   : > { %1429 = vrot.lane.b32.xlu2 %v1383_v58, %s13699_s12  ;;  %s13706_s12 = smov 96  }
 0x42f   : > { %v1480_v27 = vpop.permute.xlu1 %1479 }
 0x431   : > { %1436 = vrot.lane.b32.xlu2 %v1383_v58, %s13700_s10  ;;  %v9897_v58 = vor.u32 %v12464_v47, %v9896_v46  ;;  %v12462_v46 = vld [vmem:[%s13761_s14 + $0x84] sm:$0xf]  ;;  %v9898_v47 = vld [vmem:[%s13761_s14 + $0x94] sm:$0xf0]  ;;  %s15950_s10 = sld [smem:[#allocation19_spill]] }
 0x433   : > { %1782 = vmatpush.bf16.msrb.mxu0 %v9897_v58  ;;  %v9858_v58 = vld [vmem:[%s13761_s14 + $0x44] sm:$0xf0] }
 0x437   : > { %1783 = vmatpush.bf16.msrb.mxu0 %v9877_v15  ;;  %v12465_v15 = vld [vmem:[%s13761_s14 + $0x98] sm:$0xf0] }
 0x439   : > { %1389 = vperm.xlu2 %13236, %v1384_v55   ;;  %v1395_v55 = vld [vmem:[%s13756_s8 + $0x18] sm:$0xff] }
 0x47b   : > { %v1424_v59 = vpop.permute.xlu2 %1423 }
 0x47c   : > { %13092 = vpush %v1424_v59  ;;  %v12456_v59 = vld [vmem:[%s13761_s14 + $0x54] sm:$0xf] }
 0x483   : > { %v1430_v60 = vpop.permute.xlu2 %1429 }
 0x484   : > { %13094 = vpush %v1430_v60  ;;  %v1419_v60 = vstv %s14085_s22  ;;  %s15959_s22 = sld [smem:[#allocation25_spill]] }
 0x48b   : > { %v1437_v61 = vpop.permute.xlu2 %1436 }
 0x48c   : > { %13096 = vpush %v1437_v61 }
 0x493   : > { %v1444_v62 = vpop.permute.xlu0 %1443  ;;  %v1390_v63 = vpop.permute.xlu2 %1389 }
 0x494   : > { %v14058_v0 = vmul.f32 %v1390_v63, %v14044_v14  ;;  %13098 = vpush %v1444_v62  ;;  %v9973_v14 = vor.u32 %v12481_v6, %v9970_v8  ;;  %v9869_v63 = vor.u32 %v12458_v51, %v9868_v50  ;;  %v12453_v8 = vld [vmem:[%s13761_s14 + $0x38] sm:$0xf0]  ;;  %v9878_v50 = vld [vmem:[%s13761_s14 + $0x6c] sm:$0xf0] }
 0x495   : > { %v9849_v20 = vor.u32 %v12453_v8, %v9848_v7  ;;  %v9838_v8 = vld [vmem:[%s13761_s14 + $0x1c] sm:$0xf0] }
 0x496   : > { %1404 = vrot.lane.b32.xlu2 %v14058_v0, %s13701_s11  ;;  %1413 = vrot.lane.b32.xlu0 %v14058_v0, %s13702_s28  ;;  %v1402_v26 = vmul.f32 %v1400_v21, %v14058_v0  ;;  %v9864_v21 = vld [vmem:[%s13761_s14 + $0x38] sm:$0xf]  ;;  %s15951_s11 = sld [smem:[#allocation20_spill]] }
 0x497   : > { %1765 = vmatpush.bf16.msrb.mxu2 %v9973_v14  ;;  %v9873_v14 = vor.u32 %v12456_v59, %v9870_v1  ;;  %1757 = vmatpush.bf16.msrb.mxu1 %v9869_v63  ;;  %v12446_v1 = vld [vmem:[%s13761_s14 + $0x4] sm:$0xf]  ;;  %s15952_s28 = sld [smem:[#allocation21_spill]] }
 0x498   : > { %v9833_v3 = vor.u32 %v12446_v1, %v9830_v2 }
 0x49b   : > { %1766 = vmatpush.bf16.msrb.mxu2 %v9953_v19  ;;  %v9978_v19 = vld [vmem:[%s13761_s14 + $0x134] sm:$0xf0]  ;;  %1758 = vmatpush.bf16.msrb.mxu1 %v9849_v20 }
 0x49f   : > { %1767 = vmatpush.bf16.msrb.mxu2 %v9933_v30  ;;  %v9981_v30 = vor.u32 %v12482_v18, %v9978_v19  ;;  %1759 = vmatpush.bf16.msrb.mxu1 %v9829_v34  ;;  %v9884_v18 = vld [vmem:[%s13761_s14 + $0x60] sm:$0xf]  ;;  %v12460_v19 = vld [vmem:[%s13761_s14 + $0x70] sm:$0xf0] }
 0x4a0   : > { %v9885_v20 = vor.u32 %v12460_v19, %v9884_v18 }
 0x4a3   : > { %1768 = vmatpush.bf16.msrb.mxu2 %v9913_v41  ;;  %1804 = vmatpush.bf16.msra.mxu1 %v9985_v35  ;;  %v9965_v41 = vor.u32 %v12480_v37, %v9964_v36  ;;  %v14174_v37 = vld [vmem:[%s15949_s18] sm:$0x1f]  ;;  %s15964_s18 = sld [smem:[#allocation30_spill]] }
 0x4a7   : > { %1769 = vmatpush.bf16.msrb.mxu2 %v9893_v57  ;;  %1805 = vmatpush.bf16.msra.mxu1 %v9965_v41  ;;  %v12452_v57 = vld [vmem:[%s13761_s14 + $0x34] sm:$0xf] }
 0x4ab   : > { %1770 = vmatpush.bf16.msrb.mxu2 %v9873_v14  ;;  %v9904_v14 = vld [vmem:[%s13761_s14 + $0x88] sm:$0xf] }
 0x4ad   : > { %s14088_s16 = spop %13092 }
 0x4ae   : > { %v1426_v49 = vstv %s14088_s16  ;;  %s15960_s16 = sld [smem:[#allocation28_spill]] }
 0x4af   : > { %v1428_v61 = vmul.f32 %v1426_v49, %v1392_v48  ;;  %v9901_v48 = vor.u32 %v12462_v46, %v9898_v47  ;;  %v12457_v49 = vld [vmem:[%s13761_s14 + $0x5c] sm:$0xf] }
 0x4b0   : > { %v9881_v51 = vor.u32 %v12457_v49, %v9878_v50 }
 0x4b5   : > { %s13095_s15 = spop %13094 }
 0x4b6   : > { %v1432_v40 = vstv %s13095_s15  ;;  %s15961_s15 = sld [smem:[#allocation26_spill]] }
 0x4b7   : > { %v1434_v52 = vmul.f32 %v1432_v40, %v1393_v39  ;;  %v12472_v39 = vld [vmem:[%s13761_s14 + $0xd4] sm:$0xf]  ;;  %v9938_v40 = vld [vmem:[%s13761_s14 + $0xe4] sm:$0xf0] }
 0x4b8   : > { %v9941_v42 = vor.u32 %v12472_v39, %v9938_v40 }
 0x4b9   : > { %v1435_v10 = vadd.f32 %v1434_v52, %v1428_v61  ;;  %v12451_v52 = vld [vmem:[%s13761_s14 + $0x2c] sm:$0xf]  ;;  %v9944_v61 = vld [vmem:[%s13761_s14 + $0xd8] sm:$0xf] }
 0x4bd   : > { %s14097_s7 = spop %13096 }
 0x4be   : > { %v1439_v54 = vstv %s14097_s7  ;;  %s15962_s7 = sld [smem:[#allocation27_spill]] }
 0x4bf   : > { %v1441_v4 = vmul.f32 %v1439_v54, %v1394_v53  ;;  %v9850_v53 = vld [vmem:[%s13761_s14 + $0x3c] sm:$0xf0]  ;;  %v9856_v54 = vld [vmem:[%s13761_s14 + $0x30] sm:$0xf] }
 0x4c1   : > { %v1442_v22 = vadd.f32 %v1441_v4, %v1435_v10  ;;  %v9836_v4 = vld [vmem:[%s13761_s14 + $0x8] sm:$0xf]  ;;  %v9924_v10 = vld [vmem:[%s13761_s14 + $0xb0] sm:$0xf] }
 0x4c5   : > { %s14100_s26 = spop %13098 }
 0x4c6   : > { %v1446_v56 = vstv %s14100_s26  ;;  %s15963_s26 = sld [smem:[#allocation29_spill]] }
 0x4c7   : > { %v1448_v11 = vmul.f32 %v1446_v56, %v1395_v55  ;;  %v9853_v55 = vor.u32 %v12451_v52, %v9850_v53  ;;  %v12454_v56 = vld [vmem:[%s13761_s14 + $0x40] sm:$0xf0] }
 0x4c8   : > { %v9857_v59 = vor.u32 %v12454_v56, %v9856_v54 }
 0x4c9   : > { %v1449_v29 = vadd.f32 %v1448_v11, %v1442_v22  ;;  %1771 = vmatpush.bf16.msrb.mxu2 %v9853_v55  ;;  %v12470_v11 = vld [vmem:[%s13761_s14 + $0xc0] sm:$0xf0]  ;;  %v12455_v22 = vld [vmem:[%s13761_s14 + $0x48] sm:$0xf0] }
 0x4ca   : > { %1784 = vmatpush.bf16.msrb.mxu0 %v9857_v59 }
 0x4cb   : > { %v1450_v0 = vpack.c.bf16 %v1449_v29, %v1449_v29  ;;  %v13703_v29 = vmov 0.0  }
 0x4cd   : > { %1772 = vmatpush.bf16.msrb.mxu2 %v9833_v3 }
 0x4f0   : > { %v1405_v5 = vpop.permute.xlu2 %1404 }
 0x4f1   : > { %v1412_v16 = vmul.f32 %v1410_v12, %v1405_v5  ;;  %v12449_v5 = vld [vmem:[%s13761_s14 + $0x18] sm:$0xf0] }
 0x4f2   : > { %v9837_v7 = vor.u32 %v12449_v5, %v9836_v4 }
 0x4f3   : > { %v1451_v31 = vpack.c.bf16 %v1412_v16, %v1402_v26  ;;  %v9905_v16 = vor.u32 %v12465_v15, %v9904_v14  ;;  %v9845_v26 = vor.u32 %v12450_v25, %v9844_v24 }
 0x4f4   : > { %1785 = vmatpush.bf16.msrb.mxu0 %v9837_v7 }
 0x508   : > { %v1414_v62 = vpop.permute.xlu0 %1413 }
 0x509   : > { %v1421_v6 = vmul.f32 %v1419_v60, %v1414_v62  ;;  %v9861_v60 = vor.u32 %v12452_v57, %v9858_v58  ;;  %v12475_v62 = vld [vmem:[%s13761_s14 + $0xe8] sm:$0xf0] }
 0x50a   : > { %v9945_v63 = vor.u32 %v12475_v62, %v9944_v61  ;;  %v12487_v62 = vld [vmem:[%s15950_s10 + $0x8] sm:$0xff] }
 0x50b   : > { %v1452_v13 = vpack.c.bf16 %v1421_v6, %v1421_v6  ;;  %v12447_v6 = vld [vmem:[%s13761_s14 + $0xc] sm:$0xf] }
 0x50c   : > { %1806 = vmatpush.bf16.msra.mxu1 %v9945_v63  ;;  %v9841_v12 = vor.u32 %v12447_v6, %v9838_v8  ;;  %v12486_v63 = vld [vmem:[%s15950_s10] sm:$0xff] }
 0x50d   : > { %v1457_v23 = vsel %vm1269_vm0, %v1452_v13, 0  ;;  %v9925_v13 = vor.u32 %v12470_v11, %v9924_v10 }
 0x50e   : > { %1465 = vmatpush.bf16.msra.mxu3 %v1457_v23  ;;  %v9865_v23 = vor.u32 %v12455_v22, %v9864_v21  ;;  %v12489_v22 = vld [vmem:[%s15950_s10 + $0x18] sm:$0xff] }
 0x510   : > { %1807 = vmatpush.bf16.msra.mxu1 %v9925_v13 }
 0x512   : > { %1466 = vmatpush.bf16.msra.mxu3 %v1451_v31 }
 0x514   : > { %1808 = vmatpush.bf16.msra.mxu1 %v9905_v16 }
 0x515   : > { %9824 = vmatmul.msk.bf16.vlgmr.msra.gmra.mxu3 %vm1265_vm1, %v1450_v0  ;;  %v1535_v0 = vperm.slane %v14174_v37, 1 }
 0x516   : > { %1791 = vmatpush.bf16.msrb.mxu3 %v9981_v30  ;;  %v9825_v30 = vsel %vm1472_vm10, 1.0, %v13703_v29 }
 0x518   : > { %1809 = vmatpush.bf16.msra.mxu1 %v9885_v20 }
 0x51a   : > { %1792 = vmatpush.bf16.msrb.mxu3 %v9961_v38  ;;  %v1537_v38 = vperm.slane %v14174_v37, 3 }
 0x51c   : > { %1810 = vmatpush.bf16.msra.mxu1 %v9865_v23  ;;  %v12488_v23 = vld [vmem:[%s15950_s10 + $0x10] sm:$0xff] }
 0x51e   : > { %1793 = vmatpush.bf16.msrb.mxu3 %v9941_v42 }
 0x520   : > { %1811 = vmatpush.bf16.msra.mxu1 %v9845_v26 }
 0x522   : > { %1794 = vmatpush.bf16.msrb.mxu3 %v9921_v45  ;;  %v1534_v45 = vperm.slane %v14174_v37, 0 }
 0x526   : > { %1795 = vmatpush.bf16.msrb.mxu3 %v9901_v48 }
 0x52a   : > { %1796 = vmatpush.bf16.msrb.mxu3 %v9881_v51 }
 0x52e   : > { %1797 = vmatpush.bf16.msrb.mxu3 %v9861_v60  ;;  %v1536_v60 = vperm.slane %v14174_v37, 2 }
 0x532   : > { %1798 = vmatpush.bf16.msrb.mxu3 %v9841_v12 }
 0x598   : > { %v1468_v28 = vpop.f32.mrf.mxu3 }
 0x599   : > { %v1481_v31 = vmul.f32 %v1480_v27, %v1468_v28 }
 0x59b   : > { %v14169_v32 = vmul.f32 %v9825_v30, %v1481_v31 }
 0x59d   : > { %v1483_v33 = vpack.c.bf16 %v14169_v32, %v14169_v32 }
 0x59f   : > { %1760 = vmatmul.bf16.vlgmr.msrb.gmra.mxu1 %v1483_v33  ;;  %1773 = vmatmul.bf16.vlgmr.msrb.gmra.mxu2 %v1483_v33 }
 0x5a0   : > { %1786 = vmatmul.bf16.vlgmr.msrb.gmra.mxu0 %v1483_v33  ;;  %1799 = vmatmul.bf16.vlgmr.msrb.gmra.mxu3 %v1483_v33  ;;  %v1470_v34 = vpop.f32.mrf.mxu3 }
 0x5af   : > { %1812 = vmatmul.bf16.vlgmr.msra.gmra.mxu1 %v1483_v33 }
 0x61c   : > { %v1761_v35 = vpop.f32.mrf.mxu1 }
 0x61d   : > { %v1787_v36 = vpop.f32.mrf.mxu0  ;;  %v1762_v47 = vadd.f32 %v1761_v35, %v1534_v45 }
 0x61e   : > { %v1788_v61 = vadd.f32 %v1787_v36, %v1536_v60 }
 0x622   : > { %v1774_v39 = vpop.f32.mrf.mxu2 }
 0x623   : > { %v14178_v40 = vadd.f32 %v1774_v39, %v1535_v0  ;;  %v1800_v41 = vpop.f32.mrf.mxu3 }
 0x624   : > { %v14180_v42 = vadd.f32 %v1800_v41, %v1537_v38  ;;  %v1763_v43 = vpop.f32.mrf.mxu1 }
 0x625   : > { %v1789_v44 = vpop.f32.mrf.mxu0  ;;  %1908 = vrot.lane.b32.xlu2 %v14178_v40, %s13704_s2  ;;  %1842 = vrot.lane.b32.xlu0 %v14178_v40, %s13705_s4 }
 0x626   : > { %1900 = vmatpush.msra.mxu0 %v14180_v42 }
 0x628   : > { %1995 = vmatpush.bf16.msrb.mxu0 %v12489_v22 }
 0x62a   : > { %v1776_v46 = vpop.f32.mrf.mxu2 }
 0x62b   : > { %v1802_v48 = vpop.f32.mrf.mxu3 }
 0x62c   : > { %v14188_v49 = vpop.f32.mrf.mxu1  ;;  %1996 = vmatpush.bf16.msrb.mxu0 %v12488_v23 }
 0x62d   : > { %1906 = vrot.lane.b32.xlu0 %v1762_v47, %s13706_s12 }
 0x634   : > { %v1815_v50 = vpop.f32.mrf.mxu1 }
 0x67f   : > { %v1909_v51 = vpop.permute.xlu2 %1908 }
 0x680   : > { %9989 = vmatpush.xpose.msk.msra.mxu3 %vm1844_vm11, %v1909_v51 }
 0x684   : > { %2023 = vmatpush.bf16.msrb.mxu3 %v12487_v62 }
 0x688   : > { %2024 = vmatpush.bf16.msrb.mxu3 %v12486_v63 }
 0x697   : > { %v1843_v52 = vpop.permute.xlu0 %1842 }
 0x698   : > { %9986 = vmatpush.xpose.msk.msra.mxu2 %vm1844_vm11, %v1843_v52 }
 0x69b   : > { %9987 = vmatmul.msk.f32.vlgmr.msra.gmra.mxu2 %vm1844_vm11, %v1762_v47 }
 0x69f   : > { %v1907_v53 = vpop.permute.xlu0 %1906 }
 0x6a0   : > { %9990 = vmatmul.msk.f32.vlgmr.msra.gmra.mxu3 %vm1844_vm11, %v1907_v53 }
 0x71e   : > { %v1867_v54 = vpop.f32.mrf.mxu2 }
 0x71f   : > { %v1870_v55 = vmul.f32 0.2182179, %v1867_v54 }
 0x721   : > { %v1871_v56 = vsel %vm1297_vm2, %v1870_v55, -inf }
 0x722   : > { %1872 = vmax.xlane.f32.xlu2 %v1871_v56 }
 0x723   : > { %v1931_v57 = vpop.f32.mrf.mxu3 }
 0x724   : > { %v1934_v58 = vmul.f32 0.2182179, %v1931_v57 }
 0x726   : > { %v1935_v59 = vsel %vm1297_vm2, %v1934_v58, -inf }
 0x727   : > { %1936 = vmax.xlane.f32.xlu1 %v1935_v59 }
 0x73a   : > { %2127 = vrot.lane.b32.xlu2 %v1788_v61, %s13706_s12 }
 0x740   : > { %2030 = vrot.lane.b32.xlu1 %v1762_v47, %s13705_s4 }
 0x748   : > { %2312 = vrot.lane.b32.xlu1 %v14178_v40, %s13706_s12 }
 0x795   : > { %v1873_v1 = vpop.xlane.xlu2 %1872 }
 0x796   : > { %v1874_v2 = vsub.f32 %v1870_v55, %v1873_v1 }
 0x798   : > { %v1875_v3 = vmul.f32 1.442695, %v1874_v2 }
 0x79a   : > { %13264 = vpow2.f32 %v1875_v3  ;;  %v1937_v4 = vpop.xlane.xlu1 %1936 }
 0x79b   : > { %v1938_v5 = vsub.f32 %v1934_v58, %v1937_v4 }
 0x79d   : > { %v1939_v6 = vmul.f32 1.442695, %v1938_v5  ;;  %v2128_v7 = vpop.permute.xlu2 %2127 }
 0x79e   : > { %10022 = vmatpush.xpose.msk.msra.mxu3 %vm1844_vm11, %v2128_v7 }
 0x79f   : > { %13266 = vpow2.f32 %v1939_v6 }
 0x7a0   : > { %v13265_v8 = vpop.eup %13264 }
 0x7a1   : > { %v1877_v10 = vsel %vm1297_vm2, %v13265_v8, 0.0 }
 0x7a2   : > { %1878 = vadd.xlane.f32.xlu0 %v1877_v10 }
 0x7a5   : > { %v13267_v11 = vpop.eup %13266 }
 0x7a6   : > { %v1941_v12 = vsel %vm1297_vm2, %v13267_v11, 0.0 }
 0x7a7   : > { %1942 = vadd.xlane.f32.xlu2 %v1941_v12 }
 0x7b2   : > { %v2031_v21 = vpop.permute.xlu1 %2030 }
 0x7b6   : > { %1947 = vrot.lane.b32.xlu0 %v14180_v42, %s13706_s12 }
 0x7ba   : > { %v2313_v36 = vpop.permute.xlu1 %2312 }
 0x7be   : > { %2125 = vrot.lane.b32.xlu0 %v1762_v47, %s13704_s2 }
 0x7bf   : > { %2221 = vrot.lane.b32.xlu2 %v1788_v61, %s13705_s4 }
 0x7c6   : > { %2314 = vrot.lane.b32.xlu0 %v1788_v61, %s13704_s2 }
 0x815   : > { %v1879_v13 = vpop.xlane.xlu0 %1878 }
 0x816   : > { %13268 = vrcp.f32 %v1879_v13 }
 0x81a   : > { %v1943_v15 = vpop.xlane.xlu2 %1942 }
 0x81b   : > { %13270 = vrcp.f32 %v1943_v15 }
 0x81c   : > { %v13269_v14 = vpop.eup %13268 }
 0x81d   : > { %v1881_v16 = vmul.f32 %v13269_v14, %v13265_v8  ;;  %v1538_v14 = vperm.slane %v14174_v37, 4 }
 0x81f   : > { %9988 = vmatmul.msk.f32.vlgmr.msra.gmra.mxu0 %vm1297_vm2, %v1881_v16  ;;  %v1814_v15 = vadd.f32 %v14188_v49, %v1538_v14  ;;  %v12491_v16 = vld [vmem:[%s15950_s10 + $0x28] sm:$0xff] }
 0x820   : > { %2117 = vmatpush.bf16.msra.mxu0 %v12491_v16  ;;  %v10382_v14 = vld [vmem:[#allocation3 + $0x2c0] sm:$0xf0] }
 0x821   : > { %v13271_v18 = vpop.eup %13270 }
 0x822   : > { %v1945_v19 = vmul.f32 %v13271_v18, %v13267_v11  ;;  %v2222_v26 = vpop.permute.xlu2 %2221  ;;  %v12490_v18 = vld [vmem:[%s15950_s10 + $0x20] sm:$0xff] }
 0x824   : > { %2118 = vmatpush.bf16.msra.mxu0 %v12490_v18 }
 0x828   : > { %v1948_v20 = vpop.permute.xlu0 %1947 }
 0x829   : > { %1968 = vmatpush.msrb.mxu2 %v1948_v20 }
 0x82a   : > { %9991 = vmatmul.msk.f32.vlgmr.msrb.gmra.mxu2 %vm1297_vm2, %v1945_v19  ;;  %v12493_v19 = vld [vmem:[%s15950_s10 + $0x38] sm:$0xff] }
 0x82b   : > { %10010 = vmatpush.xpose.msk.msra.mxu2 %vm1844_vm11, %v1788_v61 }
 0x830   : > { %v2126_v27 = vpop.permute.xlu0 %2125 }
 0x832   : > { %10011 = vmatmul.msk.f32.vlgmr.msra.gmra.mxu2 %vm1844_vm11, %v2031_v21 }
 0x838   : > { %v2315_v31 = vpop.permute.xlu0 %2314 }
 0x89c   : > { %v1902_v24 = vpop.f32.mrf.mxu0 }
 0x89d   : > { %v1905_v25 = vpack.c.bf16 %v1902_v24, %v1902_v24 }
 0x89f   : > { %10009 = vmatmul.msk.bf16.vlgmr.msrb.gmra.mxu3 %vm1844_vm11, %v1905_v25 }
 0x8a0   : > { %10034 = vmatpush.xpose.msk.msrb.mxu3 %vm1844_vm11, %v2222_v26 }
 0x8ad   : > { %v1970_v28 = vpop.f32.mrf.mxu2 }
 0x8ae   : > { %v1973_v30 = vpack.c.bf16 %v1970_v28, %v1970_v28 }
 0x8af   : > { %10023 = vmatmul.msk.f32.vlgmr.msra.gmra.mxu3 %vm1844_vm11, %v2126_v27 }
 0x8b0   : > { %10046 = vmatpush.xpose.msk.msra.mxu3 %vm1844_vm11, %v2315_v31  ;;  %10000 = vmatmul.msk.bf16.vlgmr.msrb.gmra.mxu0 %vm1844_vm11, %v1973_v30  ;;  %v12492_v31 = vld [vmem:[%s15950_s10 + $0x30] sm:$0xff] }
 0x8b5   : > { %v2054_v33 = vpop.f32.mrf.mxu2 }
 0x8b6   : > { %v2057_v34 = vmul.f32 0.2182179, %v2054_v33  ;;  %v12495_v33 = vld [vmem:[%s15950_s10 + $0x48] sm:$0xff] }
 0x8b7   : > { %10035 = vmatmul.msk.f32.vlgmr.msrb.gmra.mxu3 %vm1844_vm11, %v14178_v40  ;;  %2304 = vmatpush.bf16.msrb.mxu0 %v12495_v33 }
 0x8b8   : > { %v2058_v35 = vsel %vm1297_vm2, %v2057_v34, -inf }
 0x8b9   : > { %2059 = vmax.xlane.f32.xlu2 %v2058_v35  ;;  %v12497_v35 = vld [vmem:[%s15950_s10 + $0x58] sm:$0xff] }
 0x8bf   : > { %10047 = vmatmul.msk.f32.vlgmr.msra.gmra.mxu3 %vm1844_vm11, %v2313_v36  ;;  %v12496_v36 = vld [vmem:[%s15950_s10 + $0x50] sm:$0xff] }
 0x922   : > { %v14227_v0 = vpop.f32.mrf.mxu3 }
 0x92a   : > { %v2028_v38 = vpop.f32.mrf.mxu3 }
 0x92c   : > { %v2060_v39 = vpop.xlane.xlu2 %2059 }
 0x92d   : > { %v2061_v41 = vsub.f32 %v2057_v34, %v2060_v39  ;;  %v14229_v43 = vpop.f32.mrf.mxu0  ;;  %v12494_v34 = vld [vmem:[%s15950_s10 + $0x40] sm:$0xff] }
 0x92e   : > { %2305 = vmatpush.bf16.msrb.mxu0 %v12494_v34 }
 0x92f   : > { %v2062_v44 = vmul.f32 1.442695, %v2061_v41 }
 0x931   : > { %13272 = vpow2.f32 %v2062_v44 }
 0x932   : > { %v2150_v45 = vpop.f32.mrf.mxu3 }
 0x933   : > { %v2153_v46 = vmul.f32 0.2182179, %v2150_v45 }
 0x935   : > { %v2000_v47 = vpop.f32.mrf.mxu0  ;;  %v2154_v40 = vsel %vm1297_vm2, %v2153_v46, -inf }
 0x936   : > { %2155 = vmax.xlane.f32.xlu0 %v2154_v40 }
 0x937   : > { %v13273_v48 = vpop.eup %13272 }
 0x938   : > { %v2064_v53 = vsel %vm1297_vm2, %v13273_v48, 0.0 }
 0x93a   : > { %v2244_v50 = vpop.f32.mrf.mxu3 }
 0x93b   : > { %v2247_v51 = vmul.f32 0.2182179, %v2244_v50  ;;  %v12618_v50 = vld [vmem:[#allocation3 + $0x3bc] sm:$0xf0] }
 0x93d   : > { %v2248_v52 = vsel %vm1297_vm2, %v2247_v51, -inf }
 0x93e   : > { %2249 = vmax.xlane.f32.xlu1 %v2248_v52  ;;  %2065 = vadd.xlane.f32.xlu0 %v2064_v53  ;;  %v10510_v53 = vld [vmem:[#allocation3 + $0x3c0] sm:$0xf0] }
 0x942   : > { %v2337_v54 = vpop.f32.mrf.mxu3 }
 0x943   : > { %v2340_v55 = vmul.f32 0.2182179, %v2337_v54  ;;  %v10516_v54 = vld [vmem:[#allocation3 + $0x388] sm:$0xf] }
 0x945   : > { %v2341_v56 = vsel %vm1297_vm2, %v2340_v55, -inf }
 0x946   : > { %2342 = vmax.xlane.f32.xlu2 %v2341_v56 }
 0x95e   : > { %2069 = vrot.lane.b32.xlu2 %v14180_v42, %s13705_s4 }
 0x9a9   : > { %v2156_v57 = vpop.xlane.xlu0 %2155 }
 0x9aa   : > { %v2157_v58 = vsub.f32 %v2153_v46, %v2156_v57 }
 0x9ac   : > { %v2158_v59 = vmul.f32 1.442695, %v2157_v58  ;;  %v12611_v58 = vld [vmem:[#allocation3 + $0x38c] sm:$0xf] }
 0x9ae   : > { %13274 = vpow2.f32 %v2158_v59  ;;  %v10518_v59 = vld [vmem:[#allocation3 + $0x3c8] sm:$0xf0] }
 0x9b1   : > { %v2250_v60 = vpop.xlane.xlu1 %2249  ;;  %v2066_v1 = vpop.xlane.xlu0 %2065 }
 0x9b2   : > { %v2251_v61 = vsub.f32 %v2247_v51, %v2250_v60  ;;  %v12610_v51 = vld [vmem:[#allocation3 + $0x384] sm:$0xf]  ;;  %v10444_v60 = vld [vmem:[#allocation3 + $0x300] sm:$0xf] }
 0x9b3   : > { %v10513_v56 = vor.u32 %v12610_v51, %v10510_v53 }
 0x9b4   : > { %v13275_v62 = vpop.eup %13274  ;;  %v2252_v63 = vmul.f32 1.442695, %v2251_v61  ;;  %v10521_v61 = vor.u32 %v12611_v58, %v10518_v59  ;;  %v12530_v58 = vld [vmem:[#allocation3 + $0x104] sm:$0xf] }
 0x9b5   : > { %v2160_v2 = vsel %vm1297_vm2, %v13275_v62, 0.0  ;;  %3265 = vmatpush.bf16.msrb.mxu3 %v10513_v56  ;;  %v10188_v56 = vld [vmem:[#allocation3 + $0x100] sm:$0xf] }
 0x9b6   : > { %13276 = vpow2.f32 %v2252_v63  ;;  %2161 = vadd.xlane.f32.xlu1 %v2160_v2  ;;  %v12594_v63 = vld [vmem:[#allocation3 + $0x304] sm:$0xf] }
 0x9b7   : > { %13278 = vrcp.f32 %v2066_v1  ;;  %v10446_v1 = vld [vmem:[#allocation3 + $0x340] sm:$0xf0] }
 0x9b9   : > { %v2343_v3 = vpop.xlane.xlu2 %2342 }
 0x9ba   : > { %v2344_v4 = vsub.f32 %v2340_v55, %v2343_v3  ;;  %v12619_v55 = vld [vmem:[#allocation3 + $0x3c4] sm:$0xf0]  ;;  %v10449_v3 = vor.u32 %v12594_v63, %v10446_v1  ;;  %v12531_v63 = vld [vmem:[#allocation3 + $0x10c] sm:$0xf] }
 0x9bb   : > { %v10517_v57 = vor.u32 %v12619_v55, %v10516_v54  ;;  %v10198_v1 = vld [vmem:[#allocation3 + $0x148] sm:$0xf0] }
 0x9bc   : > { %v13277_v5 = vpop.eup %13276  ;;  %v2345_v6 = vmul.f32 1.442695, %v2344_v4  ;;  %v10452_v4 = vld [vmem:[#allocation3 + $0x308] sm:$0xf]  ;;  %3266 = vmatpush.bf16.msrb.mxu3 %v10449_v3 }
 0x9bd   : > { %v2254_v7 = vsel %vm1297_vm2, %v13277_v5, 0.0  ;;  %v13279_v8 = vpop.eup %13278 }
 0x9be   : > { %13280 = vpow2.f32 %v2345_v6  ;;  %2255 = vadd.xlane.f32.xlu0 %v2254_v7  ;;  %v2068_v10 = vmul.f32 %v13279_v8, %v13273_v48  ;;  %v10508_v48 = vld [vmem:[#allocation3 + $0x380] sm:$0xf]  ;;  %v12595_v6 = vld [vmem:[#allocation3 + $0x30c] sm:$0xf] }
 0x9bf   : > { %v10509_v52 = vor.u32 %v12618_v50, %v10508_v48  ;;  %v10454_v8 = vld [vmem:[#allocation3 + $0x348] sm:$0xf0] }
 0x9c0   : > { %v12547_v48 = vld [vmem:[#allocation3 + $0x18c] sm:$0xf] }
 0x9c1   : > { %v2070_v11 = vpop.permute.xlu2 %2069  ;;  %v10262_v50 = vld [vmem:[#allocation3 + $0x1c8] sm:$0xf0] }
 0x9c2   : > { %2090 = vmatpush.msrb.mxu2 %v2070_v11  ;;  %v12586_v11 = vld [vmem:[#allocation3 + $0x2bc] sm:$0xf0] }
 0x9c3   : > { %10012 = vmatmul.msk.f32.vlgmr.msrb.gmra.mxu2 %vm1297_vm2, %v2068_v10  ;;  %v10380_v10 = vld [vmem:[#allocation3 + $0x280] sm:$0xf] }
 0x9c4   : > { %v13281_v12 = vpop.eup %13280  ;;  %2213 = vmatpush.bf16.msra.mxu2 %v12493_v19  ;;  %v10381_v18 = vor.u32 %v12586_v11, %v10380_v10  ;;  %v12587_v19 = vld [vmem:[#allocation3 + $0x2c4] sm:$0xf0] }
 0x9c5   : > { %v2347_v13 = vsel %vm1297_vm2, %v13281_v12, 0.0 }
 0x9c6   : > { %2348 = vadd.xlane.f32.xlu0 %v2347_v13  ;;  %v12578_v13 = vld [vmem:[#allocation3 + $0x284] sm:$0xf] }
 0x9c8   : > { %2214 = vmatpush.bf16.msra.mxu2 %v12492_v31  ;;  %v10326_v31 = vld [vmem:[#allocation3 + $0x248] sm:$0xf0] }
 0x9cc   : > { %2401 = vmatpush.bf16.msrb.mxu2 %v12497_v35 }
 0x9cf   : > { %2165 = vrot.lane.b32.xlu1 %v14180_v42, %s13704_s2 }
 0x9d0   : > { %2402 = vmatpush.bf16.msrb.mxu2 %v12496_v36  ;;  %v10252_v36 = vld [vmem:[#allocation3 + $0x180] sm:$0xf] }
 0x9da   : > { %2353 = vrot.lane.b32.xlu0 %v1814_v15, %s13706_s12 }
 0xa29   : > { %v2162_v20 = vpop.xlane.xlu1 %2161 }
 0xa2a   : > { %13282 = vrcp.f32 %v2162_v20  ;;  %v12579_v20 = vld [vmem:[#allocation3 + $0x28c] sm:$0xf] }
 0xa30   : > { %v13283_v22 = vpop.eup %13282 }
 0xa31   : > { %v2256_v21 = vpop.xlane.xlu0 %2255  ;;  %v2164_v23 = vmul.f32 %v13283_v22, %v13275_v62  ;;  %v12602_v62 = vld [vmem:[#allocation3 + $0x33c] sm:$0xf0]  ;;  %v10385_v22 = vor.u32 %v12578_v13, %v10382_v14 }
 0xa32   : > { %13284 = vrcp.f32 %v2256_v21  ;;  %v10445_v2 = vor.u32 %v12602_v62, %v10444_v60  ;;  %v10390_v21 = vld [vmem:[#allocation3 + $0x2c8] sm:$0xf0]  ;;  %v10265_v60 = vor.u32 %v12547_v48, %v10262_v50  ;;  %v10196_v62 = vld [vmem:[#allocation3 + $0x108] sm:$0xf]  ;;  %v10124_v14 = vld [vmem:[#allocation3 + $0x80] sm:$0xf] }
 0xa33   : > { %3267 = vmatpush.bf16.msrb.mxu3 %v10385_v22  ;;  %v12621_v48 = vld [vmem:[#allocation3 + $0x3d4] sm:$0xf0]  ;;  %v12613_v50 = vld [vmem:[#allocation3 + $0x39c] sm:$0xf] }
 0xa38   : > { %v13285_v42 = vpop.eup %13284 }
 0xa39   : > { %v2349_v37 = vpop.xlane.xlu0 %2348  ;;  %v2258_v26 = vmul.f32 %v13285_v42, %v13277_v5  ;;  %v12603_v5 = vld [vmem:[#allocation3 + $0x344] sm:$0xf0]  ;;  %v12562_v42 = vld [vmem:[#allocation3 + $0x204] sm:$0xf] }
 0xa3a   : > { %13286 = vrcp.f32 %v2349_v37  ;;  %v10453_v7 = vor.u32 %v12603_v5, %v10452_v4  ;;  %v12570_v37 = vld [vmem:[#allocation3 + $0x23c] sm:$0xf0]  ;;  %v10201_v4 = vor.u32 %v12531_v63, %v10198_v1  ;;  %v10396_v1 = vld [vmem:[#allocation3 + $0x290] sm:$0xf] }
 0xa40   : > { %v13287_v28 = vpop.eup %13286 }
 0xa41   : > { %v2166_v24 = vpop.permute.xlu1 %2165  ;;  %v2351_v30 = vmul.f32 %v13287_v28, %v13281_v12  ;;  %v10457_v12 = vor.u32 %v12595_v6, %v10454_v8  ;;  %v12571_v28 = vld [vmem:[#allocation3 + $0x244] sm:$0xf0]  ;;  %v13241_v8 = vld [vmem:[%s15951_s11] ss:$0 sm:$0xff]  ;;  %s15965_s11 = sld [smem:[#allocation31_spill]] }
 0xa42   : > { %2186 = vmatpush.msrb.mxu1 %v2166_v24  ;;  %v10316_v24 = vld [vmem:[#allocation3 + $0x200] sm:$0xf] }
 0xa43   : > { %10024 = vmatmul.msk.f32.vlgmr.msrb.gmra.mxu1 %vm1297_vm2, %v2164_v23  ;;  %v10317_v33 = vor.u32 %v12570_v37, %v10316_v24  ;;  %v12515_v24 = vld [vmem:[#allocation3 + $0x8c] sm:$0xf] }
 0xa44   : > { %2277 = vmatpush.msra.mxu1 %v1814_v15  ;;  %v10388_v15 = vld [vmem:[#allocation3 + $0x288] sm:$0xf] }
 0xa45   : > { %v10389_v23 = vor.u32 %v12587_v19, %v10388_v15  ;;  %v12522_v15 = vld [vmem:[#allocation3 + $0xbc] sm:$0xf0]  ;;  %v10126_v19 = vld [vmem:[#allocation3 + $0xc0] sm:$0xf0] }
 0xa46   : > { %v2092_v49 = vpop.f32.mrf.mxu2 }
 0xa47   : > { %v2095_v25 = vpack.c.bf16 %v2092_v49, %v2092_v49 }
 0xa49   : > { %10021 = vmatmul.msk.bf16.vlgmr.msra.gmra.mxu0 %vm1844_vm11, %v2095_v25  ;;  %v10393_v25 = vor.u32 %v12579_v20, %v10390_v21  ;;  %v10132_v20 = vld [vmem:[#allocation3 + $0x88] sm:$0xf] }
 0xa4a   : > { %3252 = vmatpush.bf16.msra.mxu0 %v10509_v52  ;;  %v12523_v21 = vld [vmem:[#allocation3 + $0xc4] sm:$0xf0] }
 0xa4b   : > { %10036 = vmatmul.msk.f32.vlgmr.msra.gmra.mxu1 %vm1297_vm2, %v2258_v26  ;;  %v10318_v26 = vld [vmem:[#allocation3 + $0x240] sm:$0xf0] }
 0xa4c   : > { %v2354_v27 = vpop.permute.xlu0 %2353  ;;  %v10321_v34 = vor.u32 %v12562_v42, %v10318_v26  ;;  %v10060_v42 = vld [vmem:[#allocation3] sm:$0xf]  ;;  %v10062_v26 = vld [vmem:[#allocation3 + $0x40] sm:$0xf0] }
 0xa4d   : > { %2374 = vmatpush.msrb.mxu1 %v2354_v27  ;;  %v10324_v27 = vld [vmem:[#allocation3 + $0x208] sm:$0xf] }
 0xa4e   : > { %3253 = vmatpush.bf16.msra.mxu0 %v10445_v2  ;;  %v10325_v35 = vor.u32 %v12571_v28, %v10324_v27  ;;  %3268 = vmatpush.bf16.msrb.mxu3 %v10321_v34 }
 0xa4f   : > { %3278 = vmatpush.bf16.msra.mxu1 %v10517_v57  ;;  %v12538_v57 = vld [vmem:[#allocation3 + $0x13c] sm:$0xf0] }
 0xa50   : > { %v10189_v2 = vor.u32 %v12538_v57, %v10188_v56  ;;  %v12596_v56 = vld [vmem:[#allocation3 + $0x314] sm:$0xf] }
 0xa52   : > { %3254 = vmatpush.bf16.msra.mxu0 %v10381_v18  ;;  %v10125_v18 = vor.u32 %v12522_v15, %v10124_v14  ;;  %v10332_v14 = vld [vmem:[#allocation3 + $0x210] sm:$0xf] }
 0xa53   : > { %10048 = vmatmul.msk.f32.vlgmr.msrb.gmra.mxu1 %vm1297_vm2, %v2351_v30  ;;  %v12563_v30 = vld [vmem:[#allocation3 + $0x20c] sm:$0xf]  ;;  %v12572_v15 = vld [vmem:[#allocation3 + $0x24c] sm:$0xf0] }
 0xa54   : > { %3279 = vmatpush.bf16.msra.mxu1 %v10453_v7 }
 0xa56   : > { %3255 = vmatpush.bf16.msra.mxu0 %v10317_v33  ;;  %v12499_v33 = vld [vmem:[#allocation3 + $0xc] sm:$0xf] }
 0xa58   : > { %3280 = vmatpush.bf16.msra.mxu1 %v10389_v23  ;;  %v10133_v23 = vor.u32 %v12523_v21, %v10132_v20  ;;  %v10340_v20 = vld [vmem:[#allocation3 + $0x218] sm:$0xf] }
 0xa59   : > { %v12573_v21 = vld [vmem:[#allocation3 + $0x254] sm:$0xf0] }
 0xa5c   : > { %3281 = vmatpush.bf16.msra.mxu1 %v10325_v35  ;;  %v10070_v35 = vld [vmem:[#allocation3 + $0x48] sm:$0xf0] }
 0xac0   : > { %v2188_v38 = vpop.f32.mrf.mxu1 }
 0xac1   : > { %v2191_v39 = vpack.c.bf16 %v2188_v38, %v2188_v38  ;;  %v12554_v38 = vld [vmem:[#allocation3 + $0x1bc] sm:$0xf0] }
 0xac2   : > { %v10253_v52 = vor.u32 %v12554_v38, %v10252_v36  ;;  %v10524_v36 = vld [vmem:[#allocation3 + $0x390] sm:$0xf] }
 0xac3   : > { %10033 = vmatmul.msk.bf16.vlgmr.msra.gmra.mxu2 %vm1844_vm11, %v2191_v39  ;;  %v12546_v39 = vld [vmem:[#allocation3 + $0x184] sm:$0xf]  ;;  %v12620_v38 = vld [vmem:[#allocation3 + $0x3cc] sm:$0xf0] }
 0xac4   : > { %3291 = vmatpush.bf16.msra.mxu2 %v10521_v61  ;;  %v10190_v61 = vld [vmem:[#allocation3 + $0x140] sm:$0xf0]  ;;  %3256 = vmatpush.bf16.msra.mxu0 %v10253_v52 }
 0xac6   : > { %v14259_v41 = vpop.f32.mrf.mxu0 }
 0xac8   : > { %v2279_v44 = vpop.f32.mrf.mxu1  ;;  %3292 = vmatpush.bf16.msra.mxu2 %v10457_v12  ;;  %3257 = vmatpush.bf16.msra.mxu0 %v10189_v2  ;;  %v12588_v2 = vld [vmem:[#allocation3 + $0x2cc] sm:$0xf0] }
 0xac9   : > { %v2282_v45 = vpack.c.bf16 %v2279_v44, %v2279_v44  ;;  %v10329_v44 = vor.u32 %v12563_v30, %v10326_v31  ;;  %v10068_v30 = vld [vmem:[#allocation3 + $0x8] sm:$0xf] }
 0xaca   : > { %v12507_v31 = vld [vmem:[#allocation3 + $0x44] sm:$0xf0] }
 0xacb   : > { %10045 = vmatmul.msk.bf16.vlgmr.msrb.gmra.mxu0 %vm1844_vm11, %v2282_v45  ;;  %v10254_v45 = vld [vmem:[#allocation3 + $0x1c0] sm:$0xf0]  ;;  %v10069_v34 = vor.u32 %v12507_v31, %v10068_v30  ;;  %v12557_v30 = vld [vmem:[#allocation3 + $0x1d4] sm:$0xf0] }
 0xacc   : > { %3293 = vmatpush.bf16.msra.mxu2 %v10393_v25  ;;  %v10257_v54 = vor.u32 %v12546_v39, %v10254_v45  ;;  %3258 = vmatpush.bf16.msra.mxu0 %v10125_v18  ;;  %v12498_v25 = vld [vmem:[#allocation3 + $0x4] sm:$0xf]  ;;  %v10073_v39 = vor.u32 %v12499_v33, %v10070_v35  ;;  %v12612_v45 = vld [vmem:[#allocation3 + $0x394] sm:$0xf]  ;;  %v10333_v18 = vor.u32 %v12572_v15, %v10332_v14  ;;  %v12549_v33 = vld [vmem:[#allocation3 + $0x19c] sm:$0xf] }
 0xacd   : > { %v10065_v28 = vor.u32 %v12498_v25, %v10062_v26  ;;  %v12548_v25 = vld [vmem:[#allocation3 + $0x194] sm:$0xf]  ;;  %v10086_v14 = vld [vmem:[#allocation3 + $0x58] sm:$0xf0] }
 0xace   : > { %v2122_v46 = vpop.f32.mrf.mxu0  ;;  %3269 = vmatpush.bf16.msrb.mxu3 %v10257_v54  ;;  %v10460_v54 = vld [vmem:[#allocation3 + $0x310] sm:$0xf] }
 0xacf   : > { %v10260_v46 = vld [vmem:[#allocation3 + $0x188] sm:$0xf] }
 0xad0   : > { %v2376_v47 = vpop.f32.mrf.mxu1  ;;  %3294 = vmatpush.bf16.msra.mxu2 %v10329_v44  ;;  %v10525_v44 = vor.u32 %v12620_v38, %v10524_v36  ;;  %v10204_v38 = vld [vmem:[#allocation3 + $0x110] sm:$0xf] }
 0xad1   : > { %v2379_v40 = vpack.c.bf16 %v2376_v47, %v2376_v47  ;;  %v12555_v47 = vld [vmem:[#allocation3 + $0x1c4] sm:$0xf0] }
 0xad2   : > { %v10261_v55 = vor.u32 %v12555_v47, %v10260_v46  ;;  %v10526_v46 = vld [vmem:[#allocation3 + $0x3d0] sm:$0xf0]  ;;  %v10532_v47 = vld [vmem:[#allocation3 + $0x398] sm:$0xf] }
 0xad3   : > { %10057 = vmatmul.msk.bf16.vlgmr.msrb.gmra.mxu2 %vm1844_vm11, %v2379_v40  ;;  %v2027_v40 = vadd.f32 %v14227_v0, %v14229_v43  ;;  %v12539_v0 = vld [vmem:[#allocation3 + $0x144] sm:$0xf0]  ;;  %v10533_v52 = vor.u32 %v12621_v48, %v10532_v47  ;;  %v10212_v47 = vld [vmem:[#allocation3 + $0x118] sm:$0xf] }
 0xad4   : > { %3282 = vmatpush.bf16.msra.mxu1 %v10261_v55  ;;  %v10197_v3 = vor.u32 %v12539_v0, %v10196_v62  ;;  %3295 = vmatpush.bf16.msra.mxu2 %v10265_v60  ;;  %v12604_v55 = vld [vmem:[#allocation3 + $0x34c] sm:$0xf0]  ;;  %v12605_v60 = vld [vmem:[#allocation3 + $0x354] sm:$0xf0]  ;;  %v12597_v0 = vld [vmem:[#allocation3 + $0x31c] sm:$0xf] }
 0xad5   : > { %v2124_v53 = vadd.f32 %v14259_v41, %v2027_v40  ;;  %v10193_v41 = vor.u32 %v12530_v58, %v10190_v61  ;;  %v10529_v40 = vor.u32 %v12612_v45, %v10526_v46  ;;  %v10461_v57 = vor.u32 %v12604_v55, %v10460_v54  ;;  %v10462_v58 = vld [vmem:[#allocation3 + $0x350] sm:$0xf0]  ;;  %v10140_v54 = vld [vmem:[#allocation3 + $0x90] sm:$0xf] }
 0xad6   : > { %v10465_v61 = vor.u32 %v12596_v56, %v10462_v58  ;;  %v10206_v46 = vld [vmem:[#allocation3 + $0x150] sm:$0xf0]  ;;  %v12524_v55 = vld [vmem:[#allocation3 + $0xcc] sm:$0xf0] }
 0xad7   : > { %3270 = vmatpush.bf16.msrb.mxu3 %v10193_v41  ;;  %v12580_v41 = vld [vmem:[#allocation3 + $0x294] sm:$0xf] }
 0xad8   : > { %3283 = vmatpush.bf16.msra.mxu1 %v10197_v3  ;;  %3296 = vmatpush.bf16.msra.mxu2 %v10201_v4  ;;  %v10397_v3 = vor.u32 %v12588_v2, %v10396_v1  ;;  %v10398_v4 = vld [vmem:[#allocation3 + $0x2d0] sm:$0xf0]  ;;  %v10076_v2 = vld [vmem:[#allocation3 + $0x10] sm:$0xf] }
 0xad9   : > { %v12516_v56 = vld [vmem:[#allocation3 + $0x94] sm:$0xf] }
 0xada   : > { %v10142_v58 = vld [vmem:[#allocation3 + $0xd0] sm:$0xf0] }
 0xadc   : > { %3284 = vmatpush.bf16.msra.mxu1 %v10133_v23  ;;  %v12565_v23 = vld [vmem:[#allocation3 + $0x21c] sm:$0xf] }
 0xae0   : > { %3285 = vmatpush.bf16.msra.mxu1 %v10069_v34  ;;  %v10278_v34 = vld [vmem:[#allocation3 + $0x1d8] sm:$0xf0] }
 0xae1   : > { %v10281_v36 = vor.u32 %v12549_v33, %v10278_v34  ;;  %v12622_v33 = vld [vmem:[#allocation3 + $0x3dc] sm:$0xf0]  ;;  %v12614_v34 = vld [vmem:[#allocation3 + $0x3a4] sm:$0xf] }
 0xae4   : > { %3330 = vmatpush.bf16.msrb.mxu1 %v10533_v52 }
 0xb46   : > { %v2216_v16 = vpop.f32.mrf.mxu2 }
 0xb47   : > { %v2220_v43 = vadd.f32 %v2216_v16, %v2124_v53  ;;  %v12514_v16 = vld [vmem:[#allocation3 + $0x84] sm:$0xf] }
 0xb48   : > { %v2307_v49 = vpop.f32.mrf.mxu0  ;;  %v10129_v22 = vor.u32 %v12514_v16, %v10126_v19  ;;  %v12564_v16 = vld [vmem:[#allocation3 + $0x214] sm:$0xf] }
 0xb49   : > { %v2311_v5 = vadd.f32 %v2307_v49, %v2220_v43  ;;  %v12506_v49 = vld [vmem:[#allocation3 + $0x3c] sm:$0xf0]  ;;  %v10470_v43 = vld [vmem:[#allocation3 + $0x358] sm:$0xf0]  ;;  %v10334_v19 = vld [vmem:[#allocation3 + $0x250] sm:$0xf0] }
 0xb4a   : > { %3271 = vmatpush.bf16.msrb.mxu3 %v10129_v22  ;;  %v10061_v27 = vor.u32 %v12506_v49, %v10060_v42  ;;  %v10473_v63 = vor.u32 %v12597_v0, %v10470_v43  ;;  %v10337_v22 = vor.u32 %v12564_v16, %v10334_v19  ;;  %v10268_v42 = vld [vmem:[#allocation3 + $0x190] sm:$0xf]  ;;  %v10150_v0 = vld [vmem:[#allocation3 + $0xd8] sm:$0xf0] }
 0xb4b   : > { %v12556_v49 = vld [vmem:[#allocation3 + $0x1cc] sm:$0xf0] }
 0xb4c   : > { %3259 = vmatpush.bf16.msra.mxu0 %v10061_v27  ;;  %v10269_v26 = vor.u32 %v12556_v49, %v10268_v42  ;;  %v10270_v27 = vld [vmem:[#allocation3 + $0x1d0] sm:$0xf0] }
 0xb4d   : > { %v10273_v31 = vor.u32 %v12548_v25, %v10270_v27  ;;  %v13242_v25 = vld [vmem:[%s15952_s28] ss:$0 sm:$0xff]  ;;  %s15966_s28 = sld [smem:[#allocation32_spill]] }
 0xb4e   : > { %v2218_v51 = vpop.f32.mrf.mxu2  ;;  %3272 = vmatpush.bf16.msrb.mxu3 %v10065_v28  ;;  %v10276_v28 = vld [vmem:[#allocation3 + $0x198] sm:$0xf]  ;;  %v13243_v27 = vld [vmem:[%s15953_s1] ss:$0 sm:$0xff] }
 0xb4f   : > { %v10534_v51 = vld [vmem:[#allocation3 + $0x3d8] sm:$0xf0]  ;;  %v10277_v35 = vor.u32 %v12557_v30, %v10276_v28 }
 0xb50   : > { %v2309_v59 = vpop.f32.mrf.mxu0  ;;  %3304 = vmatpush.bf16.msrb.mxu0 %v10525_v44  ;;  %v10537_v53 = vor.u32 %v12613_v50, %v10534_v51  ;;  %v12532_v44 = vld [vmem:[#allocation3 + $0x114] sm:$0xf]  ;;  %v12533_v50 = vld [vmem:[#allocation3 + $0x11c] sm:$0xf] }
 0xb51   : > { %v10468_v59 = vld [vmem:[#allocation3 + $0x318] sm:$0xf]  ;;  %v10209_v48 = vor.u32 %v12532_v44, %v10206_v46  ;;  %v10214_v51 = vld [vmem:[#allocation3 + $0x158] sm:$0xf0]  ;;  %v12615_v44 = vld [vmem:[#allocation3 + $0x3ac] sm:$0xf] }
 0xb52   : > { %3317 = vmatpush.bf16.msra.mxu3 %v10529_v40  ;;  %v10469_v62 = vor.u32 %v12605_v60, %v10468_v59  ;;  %v12541_v40 = vld [vmem:[#allocation3 + $0x154] sm:$0xf0] }
 0xb53   : > { %v10213_v52 = vor.u32 %v12541_v40, %v10212_v47  ;;  %v10148_v59 = vld [vmem:[#allocation3 + $0x98] sm:$0xf]  ;;  %v10476_v40 = vld [vmem:[#allocation3 + $0x320] sm:$0xf]  ;;  %s15967_s1 = smov %s15966_s28 }
 0xb54   : > { %3305 = vmatpush.bf16.msrb.mxu0 %v10461_v57  ;;  %3331 = vmatpush.bf16.msrb.mxu1 %v10469_v62  ;;  %v10141_v57 = vor.u32 %v12524_v55, %v10140_v54  ;;  %v12525_v60 = vld [vmem:[#allocation3 + $0xd4] sm:$0xf0]  ;;  %v12517_v62 = vld [vmem:[#allocation3 + $0x9c] sm:$0xf]  ;;  %v10484_v54 = vld [vmem:[#allocation3 + $0x328] sm:$0xf] }
 0xb55   : > { %v10149_v43 = vor.u32 %v12525_v60, %v10148_v59  ;;  %v12607_v55 = vld [vmem:[#allocation3 + $0x364] sm:$0xf0]  ;;  %v10412_v60 = vld [vmem:[#allocation3 + $0x2a0] sm:$0xf] }
 0xb56   : > { %v2404_v6 = vpop.f32.mrf.mxu2  ;;  %3318 = vmatpush.bf16.msra.mxu3 %v10465_v61  ;;  %v10145_v61 = vor.u32 %v12516_v56, %v10142_v58  ;;  %v12599_v56 = vld [vmem:[#allocation3 + $0x32c] sm:$0xf] }
 0xb57   : > { %v2408_v7 = vadd.f32 %v2404_v6, %v2311_v5  ;;  %v10404_v5 = vld [vmem:[#allocation3 + $0x298] sm:$0xf] }
 0xb58   : > { %v12589_v6 = vld [vmem:[#allocation3 + $0x2d4] sm:$0xf0]  ;;  %3306 = vmatpush.bf16.msrb.mxu0 %v10397_v3  ;;  %v12500_v3 = vld [vmem:[#allocation3 + $0x14] sm:$0xf] }
 0xb59   : > { %v2409_v10 = vadd.f32 %v2408_v7, %v14169_v32  ;;  %v10134_v32 = vld [vmem:[#allocation3 + $0xc8] sm:$0xf0]  ;;  %v10401_v7 = vor.u32 %v12580_v41, %v10398_v4  ;;  %v12508_v41 = vld [vmem:[#allocation3 + $0x4c] sm:$0xf0] }
 0xb5a   : > { %v10137_v37 = vor.u32 %v12515_v24, %v10134_v32  ;;  %v10342_v24 = vld [vmem:[#allocation3 + $0x258] sm:$0xf0]  ;;  %v10341_v32 = vor.u32 %v12573_v21, %v10340_v20 }
 0xb5b   : > { %v14268_v11 = vadd.f32 %v13241_v8, %v2409_v10  ;;  %v12581_v8 = vld [vmem:[#allocation3 + $0x29c] sm:$0xf]  ;;  %3319 = vmatpush.bf16.msra.mxu3 %v10401_v7  ;;  %v10084_v7 = vld [vmem:[#allocation3 + $0x18] sm:$0xf] }
 0xb5c   : > { %3297 = vmatpush.bf16.msra.mxu2 %v10137_v37  ;;  %v10406_v10 = vld [vmem:[#allocation3 + $0x2d8] sm:$0xf0]  ;;  %v10345_v37 = vor.u32 %v12565_v23, %v10342_v24  ;;  %3307 = vmatpush.bf16.msrb.mxu0 %v10333_v18 }
 0xb5d   : > { %2417 = vadd.xlane.f32.xlu2 %v14268_v11  ;;  %v2420_v12 = vmul.f32 %v14268_v11, %v14268_v11 }
 0xb5e   : > { %v2406_v13 = vpop.f32.mrf.mxu2 }
 0xb5f   : > { %2421 = vadd.xlane.f32.xlu1 %v2420_v12  ;;  %v10405_v12 = vor.u32 %v12589_v6, %v10404_v5  ;;  %v10409_v13 = vor.u32 %v12581_v8, %v10406_v10  ;;  %3320 = vmatpush.bf16.msra.mxu3 %v10337_v22  ;;  %v10077_v5 = vor.u32 %v12508_v41, %v10076_v2  ;;  %v10078_v6 = vld [vmem:[#allocation3 + $0x50] sm:$0xf0]  ;;  %v12591_v2 = vld [vmem:[#allocation3 + $0x2e4] sm:$0xf0]  ;;  %v12583_v41 = vld [vmem:[#allocation3 + $0x2ac] sm:$0xf] }
 0xb60   : > { %3298 = vmatpush.bf16.msra.mxu2 %v10073_v39  ;;  %v12540_v39 = vld [vmem:[#allocation3 + $0x14c] sm:$0xf0]  ;;  %3308 = vmatpush.bf16.msrb.mxu0 %v10269_v26  ;;  %v10081_v10 = vor.u32 %v12500_v3, %v10078_v6  ;;  %v10422_v3 = vld [vmem:[#allocation3 + $0x2e8] sm:$0xf0]  ;;  %v10348_v6 = vld [vmem:[#allocation3 + $0x220] sm:$0xf] }
 0xb61   : > { %3332 = vmatpush.bf16.msrb.mxu1 %v10405_v12  ;;  %v10205_v45 = vor.u32 %v12540_v39, %v10204_v38  ;;  %v12509_v12 = vld [vmem:[#allocation3 + $0x54] sm:$0xf0]  ;;  %v12623_v39 = vld [vmem:[#allocation3 + $0x3e4] sm:$0xf0] }
 0xb62   : > { %v10085_v18 = vor.u32 %v12509_v12, %v10084_v7  ;;  %v12574_v7 = vld [vmem:[#allocation3 + $0x25c] sm:$0xf0]  ;;  %v12566_v12 = vld [vmem:[#allocation3 + $0x224] sm:$0xf] }
 0xb63   : > { %3321 = vmatpush.bf16.msra.mxu3 %v10273_v31  ;;  %v10540_v31 = vld [vmem:[#allocation3 + $0x3a0] sm:$0xf] }
 0xb64   : > { %3343 = vmatpush.bf16.msrb.mxu2 %v10537_v53  ;;  %v10217_v53 = vor.u32 %v12533_v50, %v10214_v51  ;;  %3309 = vmatpush.bf16.msrb.mxu0 %v10205_v45  ;;  %v10550_v45 = vld [vmem:[#allocation3 + $0x3e8] sm:$0xf0] }
 0xb65   : > { %3333 = vmatpush.bf16.msrb.mxu1 %v10341_v32  ;;  %v10553_v51 = vor.u32 %v12615_v44, %v10550_v45  ;;  %v12543_v44 = vld [vmem:[#allocation3 + $0x164] sm:$0xf0]  ;;  %v12535_v45 = vld [vmem:[#allocation3 + $0x12c] sm:$0xf] }
 0xb67   : > { %3322 = vmatpush.bf16.msra.mxu3 %v10209_v48  ;;  %v12606_v48 = vld [vmem:[#allocation3 + $0x35c] sm:$0xf0] }
 0xb68   : > { %3344 = vmatpush.bf16.msrb.mxu2 %v10473_v63  ;;  %v10153_v63 = vor.u32 %v12517_v62, %v10150_v0  ;;  %3310 = vmatpush.bf16.msrb.mxu0 %v10141_v57  ;;  %v10486_v57 = vld [vmem:[#allocation3 + $0x368] sm:$0xf0]  ;;  %v10477_v58 = vor.u32 %v12606_v48, %v10476_v40  ;;  %v10485_v62 = vor.u32 %v12607_v55, %v10484_v54  ;;  %v10156_v48 = vld [vmem:[#allocation3 + $0xa0] sm:$0xf]  ;;  %v10158_v54 = vld [vmem:[#allocation3 + $0xe0] sm:$0xf0] }
 0xb69   : > { %3334 = vmatpush.bf16.msrb.mxu1 %v10277_v35  ;;  %v10542_v35 = vld [vmem:[#allocation3 + $0x3e0] sm:$0xf0]  ;;  %v10489_v0 = vor.u32 %v12599_v56, %v10486_v57  ;;  %v10164_v55 = vld [vmem:[#allocation3 + $0xa8] sm:$0xf]  ;;  %v12519_v57 = vld [vmem:[#allocation3 + $0xac] sm:$0xf] }
 0xb6a   : > { %v10545_v47 = vor.u32 %v12614_v34, %v10542_v35  ;;  %v12534_v35 = vld [vmem:[#allocation3 + $0x124] sm:$0xf]  ;;  %v12527_v56 = vld [vmem:[#allocation3 + $0xe4] sm:$0xf0] }
 0xb6b   : > { %3323 = vmatpush.bf16.msra.mxu3 %v10145_v61  ;;  %v12590_v61 = vld [vmem:[#allocation3 + $0x2dc] sm:$0xf0] }
 0xb6c   : > { %3345 = vmatpush.bf16.msrb.mxu2 %v10409_v13  ;;  %v12501_v13 = vld [vmem:[#allocation3 + $0x1c] sm:$0xf]  ;;  %3311 = vmatpush.bf16.msrb.mxu0 %v10077_v5 }
 0xb6d   : > { %3335 = vmatpush.bf16.msrb.mxu1 %v10213_v52  ;;  %v10089_v19 = vor.u32 %v12501_v13, %v10086_v14  ;;  %v12598_v52 = vld [vmem:[#allocation3 + $0x324] sm:$0xf]  ;;  %v10356_v14 = vld [vmem:[#allocation3 + $0x228] sm:$0xf] }
 0xb6e   : > { %v10350_v13 = vld [vmem:[#allocation3 + $0x260] sm:$0xf0] }
 0xb6f   : > { %3324 = vmatpush.bf16.msra.mxu3 %v10081_v10  ;;  %v10425_v10 = vor.u32 %v12583_v41, %v10422_v3  ;;  %v12511_v41 = vld [vmem:[#allocation3 + $0x64] sm:$0xf0]  ;;  %v12503_v3 = vld [vmem:[#allocation3 + $0x2c] sm:$0xf] }
 0xb70   : > { %3346 = vmatpush.bf16.msrb.mxu2 %v10345_v37 }
 0xb71   : > { %3336 = vmatpush.bf16.msrb.mxu1 %v10149_v43  ;;  %v12582_v43 = vld [vmem:[#allocation3 + $0x2a4] sm:$0xf] }
 0xb74   : > { %3347 = vmatpush.bf16.msrb.mxu2 %v10281_v36  ;;  %v10548_v36 = vld [vmem:[#allocation3 + $0x3a8] sm:$0xf] }
 0xb75   : > { %3337 = vmatpush.bf16.msrb.mxu1 %v10085_v18  ;;  %v10549_v50 = vor.u32 %v12623_v39, %v10548_v36  ;;  %v10358_v18 = vld [vmem:[#allocation3 + $0x268] sm:$0xf0]  ;;  %v10222_v36 = vld [vmem:[#allocation3 + $0x160] sm:$0xf0]  ;;  %v10228_v39 = vld [vmem:[#allocation3 + $0x128] sm:$0xf] }
 0xb76   : > { %v10225_v40 = vor.u32 %v12534_v35, %v10222_v36  ;;  %v12584_v36 = vld [vmem:[#allocation3 + $0x2b4] sm:$0xf] }
 0xb78   : > { %3348 = vmatpush.bf16.msrb.mxu2 %v10217_v53  ;;  %v10478_v53 = vld [vmem:[#allocation3 + $0x360] sm:$0xf0] }
 0xb79   : > { %v10481_v59 = vor.u32 %v12598_v52, %v10478_v53  ;;  %v12518_v53 = vld [vmem:[#allocation3 + $0xa4] sm:$0xf] }
 0xb7c   : > { %3349 = vmatpush.bf16.msrb.mxu2 %v10153_v63  ;;  %v10414_v63 = vld [vmem:[#allocation3 + $0x2e0] sm:$0xf0] }
 0xb7d   : > { %v10417_v5 = vor.u32 %v12582_v43, %v10414_v63  ;;  %v10094_v43 = vld [vmem:[#allocation3 + $0x60] sm:$0xf0]  ;;  %v10165_v63 = vor.u32 %v12527_v56, %v10164_v55  ;;  %v10366_v55 = vld [vmem:[#allocation3 + $0x270] sm:$0xf0]  ;;  %v10372_v56 = vld [vmem:[#allocation3 + $0x238] sm:$0xf] }
 0xb80   : > { %3350 = vmatpush.bf16.msrb.mxu2 %v10089_v19  ;;  %v10349_v19 = vor.u32 %v12574_v7, %v10348_v6  ;;  %v12624_v6 = vld [vmem:[#allocation3 + $0x3ec] sm:$0xf0]  ;;  %v12616_v7 = vld [vmem:[#allocation3 + $0x3b4] sm:$0xf] }
 0xbd0   : > { %v2418_v1 = vpop.xlane.xlu2 %2417 }
 0xbd1   : > { %v2419_v4 = vmul.f32 0.007936508, %v2418_v1  ;;  %v10420_v1 = vld [vmem:[#allocation3 + $0x2a8] sm:$0xf] }
 0xbd2   : > { %v2422_v8 = vpop.xlane.xlu1 %2421 }
 0xbd3   : > { %v2424_v15 = vmul.f32 %v2419_v4, %v2419_v4  ;;  %v2423_v16 = vmul.f32 0.007936508, %v2422_v8  ;;  %v2426_v49 = vsub.f32 %v14268_v11, %v2419_v4  ;;  %v10541_v11 = vor.u32 %v12622_v33, %v10540_v31  ;;  %v12542_v31 = vld [vmem:[#allocation3 + $0x15c] sm:$0xf0] }
 0xbd4   : > { %v10413_v4 = vor.u32 %v12590_v61, %v10412_v60  ;;  %v10421_v8 = vor.u32 %v12591_v2, %v10420_v1  ;;  %v10161_v61 = vor.u32 %v12518_v53, %v10158_v54  ;;  %v10100_v2 = vld [vmem:[#allocation3 + $0x28] sm:$0xf]  ;;  %v12568_v54 = vld [vmem:[#allocation3 + $0x234] sm:$0xf] }
 0xbd5   : > { %v2425_v20 = vsub.f32 %v2423_v16, %v2424_v15  ;;  %v12575_v15 = vld [vmem:[#allocation3 + $0x264] sm:$0xf0]  ;;  %v12567_v16 = vld [vmem:[#allocation3 + $0x22c] sm:$0xf] }
 0xbd7   : > { %v2427_v21 = vadd.f32 1e-05, %v2425_v20  ;;  %v10353_v20 = vor.u32 %v12566_v12, %v10350_v13 }
 0xbd9   : > { %13288 = vrsqrt.f32 %v2427_v21  ;;  %vm2434_vm13 = vweird.f32 %v2427_v21 }
 0xbdf   : > { %v13289_v22 = vpop.eup %13288 }
 0xbe0   : > { %v2429_v23 = vmul.f32 %v13289_v22, %v2427_v21  ;;  %vm2435_vm12 = vweird.f32 %v13289_v22  ;;  %v10284_v21 = vld [vmem:[#allocation3 + $0x1a0] sm:$0xf] }
 0xbe1   : > { %vm2436_vm14 = vmor %vm2434_vm13, %vm2435_vm12 }
 0xbe2   : > { %v2430_v24 = vmul.f32 %v13289_v22, %v2429_v23  ;;  %v10357_v23 = vor.u32 %v12575_v15, %v10356_v14  ;;  %v12625_v14 = vld [vmem:[#allocation3 + $0x3f4] sm:$0xf0]  ;;  %v12617_v15 = vld [vmem:[#allocation3 + $0x3bc] sm:$0xf] }
 0xbe4   : > { %v2431_v32 = vmul.f32 0.5, %v2430_v24  ;;  %v10361_v24 = vor.u32 %v12567_v16, %v10358_v18  ;;  %v10566_v16 = vld [vmem:[#allocation3 + $0x3f8] sm:$0xf0]  ;;  %v10101_v18 = vor.u32 %v12511_v41, %v10100_v2  ;;  %v10302_v2 = vld [vmem:[#allocation3 + $0x1f0] sm:$0xf0] }
 0xbe5   : > { %v10308_v41 = vld [vmem:[#allocation3 + $0x1b8] sm:$0xf] }
 0xbe6   : > { %v2432_v37 = vsub.f32 1.5, %v2431_v32  ;;  %v12550_v32 = vld [vmem:[#allocation3 + $0x1a4] sm:$0xf] }
 0xbe8   : > { %v2433_v42 = vmul.f32 %v13289_v22, %v2432_v37  ;;  %v10286_v37 = vld [vmem:[#allocation3 + $0x1e0] sm:$0xf0] }
 0xbea   : > { %v2437_v26 = vsel %vm2436_vm14, %v13289_v22, %v2433_v42  ;;  %v12558_v22 = vld [vmem:[#allocation3 + $0x1dc] sm:$0xf0]  ;;  %v10292_v42 = vld [vmem:[#allocation3 + $0x1a8] sm:$0xf] }
 0xbeb   : > { %v2438_v28 = vmul.f32 %v2437_v26, %v2426_v49  ;;  %v12559_v49 = vld [vmem:[#allocation3 + $0x1e4] sm:$0xf0]  ;;  %v10294_v26 = vld [vmem:[#allocation3 + $0x1e8] sm:$0xf0] }
 0xbec   : > { %v10293_v33 = vor.u32 %v12559_v49, %v10292_v42  ;;  %v10494_v42 = vld [vmem:[#allocation3 + $0x370] sm:$0xf0]  ;;  %v10500_v49 = vld [vmem:[#allocation3 + $0x338] sm:$0xf] }
 0xbed   : > { %v2442_v30 = vmul.f32 %v13242_v25, %v2438_v28  ;;  %v12551_v25 = vld [vmem:[#allocation3 + $0x1ac] sm:$0xf]  ;;  %v10289_v28 = vor.u32 %v12550_v32, %v10286_v37  ;;  %v10569_v32 = vor.u32 %v12617_v15, %v10566_v16  ;;  %v12600_v37 = vld [vmem:[#allocation3 + $0x334] sm:$0xf]  ;;  %v10244_v16 = vld [vmem:[#allocation3 + $0x138] sm:$0xf] }
 0xbee   : > { %v10297_v34 = vor.u32 %v12551_v25, %v10294_v26  ;;  %v12609_v25 = vld [vmem:[#allocation3 + $0x374] sm:$0xf0]  ;;  %v12601_v26 = vld [vmem:[#allocation3 + $0x33c] sm:$0xf]  ;;  %v10238_v15 = vld [vmem:[#allocation3 + $0x170] sm:$0xf0] }
 0xbef   : > { %v14276_v38 = vadd.f32 %v13243_v27, %v2442_v30  ;;  %v10285_v27 = vor.u32 %v12558_v22, %v10284_v21  ;;  %v10220_v30 = vld [vmem:[#allocation3 + $0x120] sm:$0xf]  ;;  %v10492_v22 = vld [vmem:[#allocation3 + $0x330] sm:$0xf] }
 0xbf1   : > { %v14280_v46 = vpack.c.bf16 %v14276_v38, %v14276_v38 }
 0xbf3   : > { %3260 = vmatmul.bf16.vlgmr.msra.gmra.mxu0 %v14280_v46  ;;  %3273 = vmatmul.bf16.vlgmr.msrb.gmra.mxu3 %v14280_v46 }
 0xbf4   : > { %3286 = vmatmul.bf16.vlgmr.msra.gmra.mxu1 %v14280_v46  ;;  %3299 = vmatmul.bf16.vlgmr.msra.gmra.mxu2 %v14280_v46 }
 0xbf5   : > { %3356 = vmatpush.bf16.msra.mxu0 %v10541_v11  ;;  %3369 = vmatpush.bf16.msrb.mxu3 %v10545_v47  ;;  %v10230_v11 = vld [vmem:[#allocation3 + $0x168] sm:$0xf0]  ;;  %v10221_v47 = vor.u32 %v12542_v31, %v10220_v30  ;;  %v10497_v30 = vor.u32 %v12600_v37, %v10494_v42  ;;  %v10428_v31 = vld [vmem:[#allocation3 + $0x2b0] sm:$0xf]  ;;  %v12520_v42 = vld [vmem:[#allocation3 + $0xb4] sm:$0xf] }
 0xbf6   : > { %3382 = vmatpush.bf16.msra.mxu1 %v10549_v50  ;;  %3395 = vmatpush.bf16.msra.mxu2 %v10553_v51  ;;  %v12526_v50 = vld [vmem:[#allocation3 + $0xdc] sm:$0xf0]  ;;  %v10229_v51 = vor.u32 %v12543_v44, %v10228_v39  ;;  %v10233_v52 = vor.u32 %v12535_v45, %v10230_v11  ;;  %v10430_v39 = vld [vmem:[#allocation3 + $0x2f0] sm:$0xf0]  ;;  %v10436_v44 = vld [vmem:[#allocation3 + $0x2b8] sm:$0xf] }
 0xbf7   : > { %v10157_v60 = vor.u32 %v12526_v50, %v10156_v48  ;;  %v12593_v45 = vld [vmem:[#allocation3 + $0x2f4] sm:$0xf0]  ;;  %v12585_v11 = vld [vmem:[#allocation3 + $0x2bc] sm:$0xf]  ;;  %v10433_v48 = vor.u32 %v12584_v36, %v10430_v39  ;;  %v10364_v50 = vld [vmem:[#allocation3 + $0x230] sm:$0xf] }
 0xbf8   : > { %v12504_v39 = vld [vmem:[#allocation3 + $0x34] sm:$0xf] }
 0xbf9   : > { %3357 = vmatpush.bf16.msra.mxu0 %v10477_v58  ;;  %3370 = vmatpush.bf16.msrb.mxu3 %v10481_v59  ;;  %v10166_v58 = vld [vmem:[#allocation3 + $0xe8] sm:$0xf0]  ;;  %v10092_v59 = vld [vmem:[#allocation3 + $0x20] sm:$0xf] }
 0xbfa   : > { %3383 = vmatpush.bf16.msra.mxu1 %v10485_v62  ;;  %3396 = vmatpush.bf16.msra.mxu2 %v10489_v0  ;;  %v12510_v62 = vld [vmem:[#allocation3 + $0x5c] sm:$0xf0]  ;;  %v12502_v0 = vld [vmem:[#allocation3 + $0x24] sm:$0xf]  ;;  %v10169_v1 = vor.u32 %v12519_v57, %v10166_v58  ;;  %v12577_v57 = vld [vmem:[#allocation3 + $0x274] sm:$0xf0] }
 0xbfb   : > { %v10093_v12 = vor.u32 %v12510_v62, %v10092_v59  ;;  %v10097_v13 = vor.u32 %v12502_v0, %v10094_v43  ;;  %v12569_v58 = vld [vmem:[#allocation3 + $0x23c] sm:$0xf]  ;;  %v10300_v62 = vld [vmem:[#allocation3 + $0x1b0] sm:$0xf]  ;;  %v10373_v43 = vor.u32 %v12577_v57, %v10372_v56 }
 0xbfc   : > { %v10374_v59 = vld [vmem:[#allocation3 + $0x278] sm:$0xf0]  ;;  %v12560_v0 = vld [vmem:[#allocation3 + $0x1ec] sm:$0xf0] }
 0xbfd   : > { %3358 = vmatpush.bf16.msra.mxu0 %v10413_v4  ;;  %3371 = vmatpush.bf16.msrb.mxu3 %v10417_v5  ;;  %v10102_v4 = vld [vmem:[#allocation3 + $0x68] sm:$0xf0]  ;;  %v10556_v5 = vld [vmem:[#allocation3 + $0x3b0] sm:$0xf]  ;;  %v12641_v57 = vld [vmem:[#allocation6 + $0x78] sm:$0xff] }
 0xbfe   : > { %3384 = vmatpush.bf16.msra.mxu1 %v10421_v8  ;;  %3397 = vmatpush.bf16.msra.mxu2 %v10425_v10  ;;  %v10558_v8 = vld [vmem:[#allocation3 + $0x3f0] sm:$0xf0]  ;;  %v10564_v10 = vld [vmem:[#allocation3 + $0x3b8] sm:$0xf] }
 0xbff   : > { %v10561_v21 = vor.u32 %v12616_v7, %v10558_v8  ;;  %v10236_v8 = vld [vmem:[#allocation3 + $0x130] sm:$0xf] }
 0xc00   : > { %v12648_v56 = vld [vmem:[#allocation6 + $0xb0] sm:$0xff] }
 0xc01   : > { %3359 = vmatpush.bf16.msra.mxu0 %v10349_v19  ;;  %3372 = vmatpush.bf16.msrb.mxu3 %v10353_v20  ;;  %v10105_v19 = vor.u32 %v12503_v3, %v10102_v4  ;;  %v10557_v20 = vor.u32 %v12624_v6, %v10556_v5  ;;  %v12561_v3 = vld [vmem:[#allocation3 + $0x1f4] sm:$0xf0]  ;;  %v12553_v4 = vld [vmem:[#allocation3 + $0x1bc] sm:$0xf]  ;;  %v10301_v6 = vor.u32 %v12560_v0, %v10300_v62  ;;  %v12656_v62 = vld [vmem:[#allocation6 + $0xf0] sm:$0xff] }
 0xc02   : > { %3385 = vmatpush.bf16.msra.mxu1 %v10357_v23  ;;  %3398 = vmatpush.bf16.msra.mxu2 %v10361_v24  ;;  %v12608_v23 = vld [vmem:[#allocation3 + $0x36c] sm:$0xf0]  ;;  %v10565_v24 = vor.u32 %v12625_v14, %v10564_v10  ;;  %v10310_v5 = vld [vmem:[#allocation3 + $0x1f8] sm:$0xf0]  ;;  %v12536_v14 = vld [vmem:[#allocation3 + $0x134] sm:$0xf] }
 0xc03   : > { %3312 = vmatmul.bf16.vlgmr.msrb.gmra.mxu0 %v14280_v46  ;;  %3325 = vmatmul.bf16.vlgmr.msra.gmra.mxu3 %v14280_v46  ;;  %v12544_v10 = vld [vmem:[#allocation3 + $0x16c] sm:$0xf0]  ;;  %v12646_v0 = vld [vmem:[#allocation6 + $0xa0] sm:$0xff] }
 0xc04   : > { %3338 = vmatmul.bf16.vlgmr.msrb.gmra.mxu1 %v14280_v46  ;;  %3351 = vmatmul.bf16.vlgmr.msrb.gmra.mxu2 %v14280_v46 }
 0xc05   : > { %3360 = vmatpush.bf16.msra.mxu0 %v10285_v27  ;;  %3373 = vmatpush.bf16.msrb.mxu3 %v10289_v28  ;;  %v10502_v27 = vld [vmem:[#allocation3 + $0x378] sm:$0xf0]  ;;  %v10493_v28 = vor.u32 %v12608_v23, %v10492_v22  ;;  %v10241_v22 = vor.u32 %v12536_v14, %v10238_v15  ;;  %v10172_v23 = vld [vmem:[#allocation3 + $0xb0] sm:$0xf]  ;;  %v12654_v14 = vld [vmem:[#allocation6 + $0xe0] sm:$0xff] }
 0xc06   : > { %3386 = vmatpush.bf16.msra.mxu1 %v10293_v33  ;;  %3399 = vmatpush.bf16.msra.mxu2 %v10297_v34  ;;  %v12592_v33 = vld [vmem:[#allocation3 + $0x2ec] sm:$0xf0]  ;;  %v10501_v34 = vor.u32 %v12609_v25, %v10500_v49  ;;  %v10505_v35 = vor.u32 %v12601_v26, %v10502_v27  ;;  %v10174_v49 = vld [vmem:[#allocation3 + $0xf0] sm:$0xf0]  ;;  %v10180_v25 = vld [vmem:[#allocation3 + $0xb8] sm:$0xf] }
 0xc07   : > { %v12529_v26 = vld [vmem:[#allocation3 + $0xf4] sm:$0xf0]  ;;  %v12521_v27 = vld [vmem:[#allocation3 + $0xbc] sm:$0xf] }
 0xc09   : > { %3361 = vmatpush.bf16.msra.mxu0 %v10221_v47  ;;  %3374 = vmatpush.bf16.msrb.mxu3 %v10225_v40  ;;  %v10438_v47 = vld [vmem:[#allocation3 + $0x2f8] sm:$0xf0]  ;;  %v10429_v40 = vor.u32 %v12592_v33, %v10428_v31  ;;  %v10177_v31 = vor.u32 %v12520_v42, %v10174_v49  ;;  %v10108_v33 = vld [vmem:[#allocation3 + $0x30] sm:$0xf] }
 0xc0a   : > { %3387 = vmatpush.bf16.msra.mxu1 %v10229_v51  ;;  %3400 = vmatpush.bf16.msra.mxu2 %v10233_v52  ;;  %v12576_v51 = vld [vmem:[#allocation3 + $0x26c] sm:$0xf0]  ;;  %v10437_v52 = vor.u32 %v12593_v45, %v10436_v44  ;;  %v10441_v53 = vor.u32 %v12585_v11, %v10438_v47  ;;  %v10110_v44 = vld [vmem:[#allocation3 + $0x70] sm:$0xf0]  ;;  %v10116_v45 = vld [vmem:[#allocation3 + $0x38] sm:$0xf] }
 0xc0b   : > { %v12513_v11 = vld [vmem:[#allocation3 + $0x74] sm:$0xf0]  ;;  %v12505_v47 = vld [vmem:[#allocation3 + $0x3c] sm:$0xf] }
 0xc0d   : > { %3362 = vmatpush.bf16.msra.mxu0 %v10157_v60  ;;  %3375 = vmatpush.bf16.msrb.mxu3 %v10161_v61  ;;  %v10365_v60 = vor.u32 %v12576_v51, %v10364_v50  ;;  %v10369_v61 = vor.u32 %v12568_v54, %v10366_v55  ;;  %v10113_v50 = vor.u32 %v12504_v39, %v10110_v44  ;;  %v12649_v54 = vld [vmem:[#allocation6 + $0xb8] sm:$0xff]  ;;  %v12632_v55 = vld [vmem:[#allocation6 + $0x30] sm:$0xff] }
 0xc0e   : > { %3388 = vmatpush.bf16.msra.mxu1 %v10165_v63  ;;  %3401 = vmatpush.bf16.msra.mxu2 %v10169_v1  ;;  %v10377_v63 = vor.u32 %v12569_v58, %v10374_v59  ;;  %v12552_v1 = vld [vmem:[#allocation3 + $0x1b4] sm:$0xf]  ;;  %v10117_v51 = vor.u32 %v12513_v11, %v10116_v45  ;;  %v12657_v58 = vld [vmem:[#allocation6 + $0xf8] sm:$0xff]  ;;  %v12631_v59 = vld [vmem:[#allocation6 + $0x28] sm:$0xff] }
 0xc0f   : > { %v10305_v7 = vor.u32 %v12552_v1, %v10302_v2  ;;  %v14299_v1 = vld [vmem:[%s15954_s19] sm:$0xff] }
 0xc10   : > { %v2580_v2 = vperm.slane %v14299_v1, 0  ;;  %v2584_v44 = vperm.slane %v14299_v1, 4 }
 0xc11   : > { %3363 = vmatpush.bf16.msra.mxu0 %v10093_v12  ;;  %3376 = vmatpush.bf16.msrb.mxu3 %v10097_v13  ;;  %v10309_v12 = vor.u32 %v12561_v3, %v10308_v41  ;;  %v10313_v13 = vor.u32 %v12553_v4, %v10310_v5  ;;  %v2582_v41 = vperm.slane %v14299_v1, 2 }
 0xc12   : > { %3389 = vmatpush.bf16.msra.mxu1 %v10101_v18  ;;  %3402 = vmatpush.bf16.msra.mxu2 %v10105_v19  ;;  %v12545_v18 = vld [vmem:[#allocation3 + $0x174] sm:$0xf0]  ;;  %v12537_v19 = vld [vmem:[#allocation3 + $0x13c] sm:$0xf] }
 0xc14   : > { %3364 = vmatmul.bf16.vlgmr.msra.gmra.mxu0 %v14280_v46  ;;  %3377 = vmatmul.bf16.vlgmr.msrb.gmra.mxu3 %v14280_v46 }
 0xc15   : > { %3408 = vmatpush.bf16.msrb.mxu0 %v10557_v20  ;;  %3421 = vmatpush.bf16.msra.mxu3 %v10561_v21  ;;  %v10246_v20 = vld [vmem:[#allocation3 + $0x178] sm:$0xf0]  ;;  %v10237_v21 = vor.u32 %v12544_v10, %v10236_v8 }
 0xc16   : > { %3434 = vmatpush.bf16.msrb.mxu1 %v10565_v24  ;;  %3447 = vmatpush.bf16.msrb.mxu2 %v10569_v32  ;;  %v12528_v24 = vld [vmem:[#allocation3 + $0xec] sm:$0xf0]  ;;  %v10245_v32 = vor.u32 %v12545_v18, %v10244_v16  ;;  %v10249_v37 = vor.u32 %v12537_v19, %v10246_v20  ;;  %v2583_v16 = vperm.slane %v14299_v1, 3 }
 0xc17   : > { %3390 = vmatmul.bf16.vlgmr.msra.gmra.mxu1 %v14280_v46  ;;  %3403 = vmatmul.bf16.vlgmr.msra.gmra.mxu2 %v14280_v46  ;;  %v12628_v19 = vld [vmem:[#allocation6 + $0x10] sm:$0xff] }
 0xc18   : > { %v12644_v20 = vld [vmem:[#allocation6 + $0x90] sm:$0xff] }
 0xc19   : > { %3409 = vmatpush.bf16.msrb.mxu0 %v10493_v28  ;;  %3422 = vmatpush.bf16.msra.mxu3 %v10497_v30  ;;  %v10182_v28 = vld [vmem:[#allocation3 + $0xf8] sm:$0xf0]  ;;  %v10173_v30 = vor.u32 %v12528_v24, %v10172_v23 }
 0xc1a   : > { %3435 = vmatpush.bf16.msrb.mxu1 %v10501_v34  ;;  %3448 = vmatpush.bf16.msrb.mxu2 %v10505_v35  ;;  %v12512_v34 = vld [vmem:[#allocation3 + $0x6c] sm:$0xf0]  ;;  %v10181_v35 = vor.u32 %v12529_v26, %v10180_v25  ;;  %v10185_v36 = vor.u32 %v12521_v27, %v10182_v28 }
 0xc1d   : > { %3410 = vmatpush.bf16.msrb.mxu0 %v10429_v40  ;;  %3423 = vmatpush.bf16.msra.mxu3 %v10433_v48  ;;  %v10118_v40 = vld [vmem:[#allocation3 + $0x78] sm:$0xf0]  ;;  %v10109_v48 = vor.u32 %v12512_v34, %v10108_v33 }
 0xc1e   : > { %3436 = vmatpush.bf16.msrb.mxu1 %v10437_v52  ;;  %3449 = vmatpush.bf16.msrb.mxu2 %v10441_v53  ;;  %v10121_v52 = vor.u32 %v12505_v47, %v10118_v40  ;;  %v12633_v53 = vld [vmem:[#allocation6 + $0x38] sm:$0xff] }
 0xc21   : > { %3411 = vmatpush.bf16.msrb.mxu0 %v10365_v60  ;;  %3424 = vmatpush.bf16.msra.mxu3 %v10369_v61  ;;  %v12647_v60 = vld [vmem:[#allocation6 + $0xa8] sm:$0xff]  ;;  %v12640_v61 = vld [vmem:[#allocation6 + $0x70] sm:$0xff] }
 0xc22   : > { %3437 = vmatpush.bf16.msrb.mxu1 %v10373_v43  ;;  %3450 = vmatpush.bf16.msrb.mxu2 %v10377_v63  ;;  %v12639_v43 = vld [vmem:[#allocation6 + $0x68] sm:$0xff] }
 0xc23   : > { %v12655_v63 = vld [vmem:[#allocation6 + $0xe8] sm:$0xff] }
 0xc25   : > { %3412 = vmatpush.bf16.msrb.mxu0 %v10301_v6  ;;  %3425 = vmatpush.bf16.msra.mxu3 %v10305_v7  ;;  %v12629_v6 = vld [vmem:[#allocation6 + $0x18] sm:$0xff] }
 0xc26   : > { %3438 = vmatpush.bf16.msrb.mxu1 %v10309_v12  ;;  %3451 = vmatpush.bf16.msrb.mxu2 %v10313_v13  ;;  %v12645_v7 = vld [vmem:[#allocation6 + $0x98] sm:$0xff]  ;;  %v2581_v12 = vperm.slane %v14299_v1, 1  ;;  %v12638_v13 = vld [vmem:[#allocation6 + $0x60] sm:$0xff] }
 0xc29   : > { %3413 = vmatpush.bf16.msrb.mxu0 %v10237_v21  ;;  %3426 = vmatpush.bf16.msra.mxu3 %v10241_v22 }
 0xc2a   : > { %3439 = vmatpush.bf16.msrb.mxu1 %v10245_v32  ;;  %3452 = vmatpush.bf16.msrb.mxu2 %v10249_v37 }
 0xc2d   : > { %3414 = vmatpush.bf16.msrb.mxu0 %v10173_v30  ;;  %3427 = vmatpush.bf16.msra.mxu3 %v10177_v31 }
 0xc2e   : > { %3440 = vmatpush.bf16.msrb.mxu1 %v10181_v35  ;;  %3453 = vmatpush.bf16.msrb.mxu2 %v10185_v36 }
 0xc31   : > { %3415 = vmatpush.bf16.msrb.mxu0 %v10109_v48  ;;  %3428 = vmatpush.bf16.msra.mxu3 %v10113_v50 }
 0xc32   : > { %3441 = vmatpush.bf16.msrb.mxu1 %v10117_v51  ;;  %3454 = vmatpush.bf16.msrb.mxu2 %v10121_v52 }
 0xc34   : > { %3416 = vmatmul.bf16.vlgmr.msrb.gmra.mxu0 %v14280_v46  ;;  %3429 = vmatmul.bf16.vlgmr.msra.gmra.mxu3 %v14280_v46 }
 0xc35   : > { %3442 = vmatmul.bf16.vlgmr.msrb.gmra.mxu1 %v14280_v46  ;;  %3455 = vmatmul.bf16.vlgmr.msrb.gmra.mxu2 %v14280_v46  ;;  %v12630_v46 = vld [vmem:[#allocation6 + $0x20] sm:$0xff] }
 0xc36   : > { %5144 = vmatpush.bf16.msra.mxu0 %v12633_v53  ;;  %5170 = vmatpush.bf16.msra.mxu1 %v12649_v54 }
 0xc37   : > { %5157 = vmatpush.bf16.msrb.mxu3 %v12641_v57  ;;  %5183 = vmatpush.bf16.msra.mxu2 %v12657_v58 }
 0xc3a   : > { %5145 = vmatpush.bf16.msra.mxu0 %v12632_v55  ;;  %5171 = vmatpush.bf16.msra.mxu1 %v12648_v56 }
 0xc3b   : > { %5158 = vmatpush.bf16.msrb.mxu3 %v12640_v61  ;;  %5184 = vmatpush.bf16.msra.mxu2 %v12656_v62  ;;  %v2586_v61 = vperm.slane %v14299_v1, 6 }
 0xc3e   : > { %5146 = vmatpush.bf16.msra.mxu0 %v12631_v59  ;;  %5172 = vmatpush.bf16.msra.mxu1 %v12647_v60 }
 0xc3f   : > { %5159 = vmatpush.bf16.msrb.mxu3 %v12639_v43  ;;  %5185 = vmatpush.bf16.msra.mxu2 %v12655_v63 }
 0xc42   : > { %5147 = vmatpush.bf16.msra.mxu0 %v12630_v46  ;;  %5173 = vmatpush.bf16.msra.mxu1 %v12646_v0 }
 0xc43   : > { %5160 = vmatpush.bf16.msrb.mxu3 %v12638_v13  ;;  %5186 = vmatpush.bf16.msra.mxu2 %v12654_v14 }
 0xc46   : > { %5148 = vmatpush.bf16.msra.mxu0 %v12629_v6  ;;  %5174 = vmatpush.bf16.msra.mxu1 %v12645_v7 }
 0xc4a   : > { %5149 = vmatpush.bf16.msra.mxu0 %v12628_v19  ;;  %5175 = vmatpush.bf16.msra.mxu1 %v12644_v20 }
 0xc70   : > { %v3261_v3 = vpop.f32.mrf.mxu0 }
 0xc71   : > { %v14303_v4 = vadd.f32 %v3261_v3, %v2580_v2  ;;  %v3287_v5 = vpop.f32.mrf.mxu1 }
 0xc72   : > { %v14305_v8 = vadd.f32 %v3287_v5, %v2582_v41 }
 0xc73   : > { %v3460_v10 = vand.u32 2147483647, %v14303_v4 }
 0xc74   : > { %v3462_v15 = vand.u32 2147483647, %v14305_v8 }
 0xc75   : > { %v14311_v18 = vmul.f32 0.70710677, %v3460_v10 }
 0xc76   : > { %v14313_v21 = vmul.f32 0.70710677, %v3462_v15  ;;  %v3274_v22 = vpop.f32.mrf.mxu3 }
 0xc77   : > { %v3492_v23 = vmul.f32 0.3275911, %v14311_v18  ;;  %v14316_v24 = vadd.f32 %v3274_v22, %v2581_v12  ;;  %v3300_v32 = vpop.f32.mrf.mxu2  ;;  %v3908_v46 = vsub.f32 0.0, %v14311_v18 }
 0xc78   : > { %v3494_v37 = vmul.f32 0.3275911, %v14313_v21  ;;  %v14319_v42 = vadd.f32 %v3300_v32, %v2583_v16  ;;  %v3263_v49 = vpop.f32.mrf.mxu0  ;;  %v3910_v43 = vsub.f32 0.0, %v14313_v21 }
 0xc79   : > { %v3508_v25 = vadd.f32 1.0, %v3492_v23  ;;  %v3289_v26 = vpop.f32.mrf.mxu1  ;;  %v3461_v28 = vand.u32 2147483647, %v14316_v24 }
 0xc7a   : > { %v3510_v27 = vadd.f32 1.0, %v3494_v37  ;;  %v3463_v30 = vand.u32 2147483647, %v14319_v42 }
 0xc7b   : > { %13290 = vrcp.f32 %v3508_v25  ;;  %v14323_v31 = vmul.f32 0.70710677, %v3461_v28  ;;  %v3533_v54 = vand.u32 2147483647, %v3508_v25  ;;  %v3535_v56 = vand.u32 2147483648, %v3508_v25 }
 0xc7c   : > { %13292 = vrcp.f32 %v3510_v27  ;;  %v14325_v33 = vmul.f32 0.70710677, %v3463_v30  ;;  %v3563_v58 = vand.u32 2147483647, %v3510_v27  ;;  %v3565_v60 = vand.u32 2147483648, %v3510_v27 }
 0xc7d   : > { %v3493_v36 = vmul.f32 0.3275911, %v14323_v31  ;;  %vm3529_vm3 = vweird.f32 %v3508_v25  ;;  %vm3559_vm4 = vweird.f32 %v3510_v27  ;;  %vm3534_vm6 = vcmp.eq.f32.partialorder %v3533_v54, 8.507059e+37 }
 0xc7e   : > { %v3276_v34 = vpop.f32.mrf.mxu3  ;;  %v3495_v39 = vmul.f32 0.3275911, %v14325_v33  ;;  %v3536_v5 = vor.u32 1.1754944e-38, %v3535_v56  ;;  %vm3564_vm7 = vcmp.eq.f32.partialorder %v3563_v58, 8.507059e+37  ;;  %v3566_v13 = vor.u32 1.1754944e-38, %v3565_v60  ;;  %v12643_v58 = vld [vmem:[#allocation6 + $0x88] sm:$0xff] }
 0xc7f   : > { %v3302_v35 = vpop.f32.mrf.mxu2  ;;  %v14330_v50 = vadd.f32 1.0, %v3493_v36  ;;  %5176 = vmatpush.bf16.msra.mxu1 %v12643_v58 }
 0xc80   : > { %v3313_v45 = vpop.f32.mrf.mxu0  ;;  %v14332_v52 = vadd.f32 1.0, %v3495_v39 }
 0xc81   : > { %v13291_v11 = vpop.eup %13290  ;;  %v3339_v47 = vpop.f32.mrf.mxu1  ;;  %13294 = vrcp.f32 %v14330_v50  ;;  %v14335_v55 = vadd.f32 %v3313_v45, %v2584_v44  ;;  %v3548_v23 = vand.u32 2147483647, %v14330_v50  ;;  %v3550_v28 = vand.u32 2147483648, %v14330_v50 }
 0xc82   : > { %v13293_v40 = vpop.eup %13292  ;;  %v3525_v48 = vmul.f32 %v13291_v11, %v3508_v25  ;;  %13296 = vrcp.f32 %v14332_v52  ;;  %vm3530_vm15 = vweird.f32 %v13291_v11  ;;  %v14349_v15 = vadd.f32 %v3339_v47, %v2586_v61 }
 0xc83   : > { %v3555_v51 = vmul.f32 %v13293_v40, %v3510_v27  ;;  %vm3560_vm1 = vweird.f32 %v13293_v40  ;;  %v3464_v41 = vand.u32 2147483647, %v14335_v55  ;;  %vm3531_vm5 = vmor %vm3529_vm3, %vm3530_vm15  ;;  %v3578_v25 = vand.u32 2147483647, %v14332_v52 }
 0xc84   : > { %v3526_v53 = vsub.f32 1.0, %v3525_v48  ;;  %vm3561_vm8 = vmor %vm3559_vm4, %vm3560_vm1  ;;  %v3580_v36 = vand.u32 2147483648, %v14332_v52  ;;  %v3466_v39 = vand.u32 2147483647, %v14349_v15  ;;  %v12653_v48 = vld [vmem:[#allocation6 + $0xd8] sm:$0xff]  ;;  %vm3544_vm12 = vweird.f32 %v14330_v50 }
 0xc85   : > { %v3556_v57 = vsub.f32 1.0, %v3555_v51  ;;  %v14347_v14 = vmul.f32 0.70710677, %v3464_v41  ;;  %5187 = vmatpush.bf16.msra.mxu2 %v12653_v48  ;;  %vm3549_vm14 = vcmp.eq.f32.partialorder %v3548_v23, 8.507059e+37  ;;  %v3551_v61 = vor.u32 1.1754944e-38, %v3550_v28 }
 0xc86   : > { %v3527_v59 = vmul.f32 %v13291_v11, %v3526_v53  ;;  %v14339_v62 = vpop.f32.mrf.mxu3  ;;  %v14368_v56 = vmul.f32 0.70710677, %v3466_v39  ;;  %vm3574_vm15 = vweird.f32 %v14332_v52  ;;  %vm3579_vm3 = vcmp.eq.f32.partialorder %v3578_v25, 8.507059e+37 }
 0xc87   : > { %v3557_v0 = vmul.f32 %v13293_v40, %v3556_v57  ;;  %v14343_v63 = vpop.f32.mrf.mxu2  ;;  %v13295_v10 = vpop.eup %13294  ;;  %v3496_v30 = vmul.f32 0.3275911, %v14347_v14  ;;  %v12627_v57 = vld [vmem:[#allocation6 + $0x8] sm:$0xff] }
 0xc88   : > { %v3528_v2 = vadd.f32 %v13291_v11, %v3527_v59  ;;  %v3315_v3 = vpop.f32.mrf.mxu0  ;;  %v13297_v16 = vpop.eup %13296  ;;  %v3540_v22 = vmul.f32 %v13295_v10, %v14330_v50  ;;  %vm3545_vm9 = vweird.f32 %v13295_v10  ;;  %5150 = vmatpush.bf16.msra.mxu0 %v12627_v57  ;;  %v3498_v50 = vmul.f32 0.3275911, %v14368_v56 }
 0xc89   : > { %v3558_v6 = vadd.f32 %v13293_v40, %v3557_v0  ;;  %v3341_v7 = vpop.f32.mrf.mxu1  ;;  %v3570_v49 = vmul.f32 %v13297_v16, %v14332_v52  ;;  %v14365_v47 = vadd.f32 1.0, %v3496_v30  ;;  %vm3575_vm10 = vweird.f32 %v13297_v16  ;;  %vm3546_vm13 = vmor %vm3544_vm12, %vm3545_vm9  ;;  %v12626_v52 = vld [vmem:[#allocation6] sm:$0xff] }
 0xc8a   : > { %v3532_v12 = vsel %vm3531_vm5, %v13291_v11, %v3528_v2  ;;  %v3541_v27 = vsub.f32 1.0, %v3540_v22  ;;  %v12636_v2 = vld [vmem:[#allocation6 + $0x50] sm:$0xff]  ;;  %vm3576_vm1 = vmor %vm3574_vm15, %vm3575_vm10  ;;  %v2585_v30 = vperm.slane %v14299_v1, 5 }
 0xc8b   : > { %v14351_v19 = vsel %vm3534_vm6, %v3536_v5, %v3532_v12  ;;  %v3562_v20 = vsel %vm3561_vm8, %v13293_v40, %v3558_v6  ;;  %v3571_v35 = vsub.f32 1.0, %v3570_v49  ;;  %v12637_v40 = vld [vmem:[#allocation6 + $0x58] sm:$0xff]  ;;  %13298 = vrcp.f32 %v14365_v47 }
 0xc8c   : > { %v3764_v32 = vmul.f32 1.0614054, %v14351_v19  ;;  %v14356_v37 = vsel %vm3564_vm7, %v3566_v13, %v3562_v20  ;;  %v3542_v11 = vmul.f32 %v13295_v10, %v3541_v27  ;;  %5161 = vmatpush.bf16.msrb.mxu3 %v12637_v40  ;;  %v3581_v5 = vor.u32 1.1754944e-38, %v3580_v36  ;;  %v12652_v13 = vld [vmem:[#allocation6 + $0xd0] sm:$0xff]  ;;  %v12642_v20 = vld [vmem:[#allocation6 + $0x80] sm:$0xff]  ;;  %v12681_v49 = vld [vmem:[#allocation6 + $0x1b8] sm:$0xff]  ;;  %5151 = vmatpush.bf16.msra.mxu0 %v12626_v52 }
 0xc8d   : > { %v3766_v26 = vmul.f32 1.0614054, %v14356_v37  ;;  %v3572_v54 = vmul.f32 %v13297_v16, %v3571_v35  ;;  %v3924_v6 = vmul.f32 %v3908_v46, %v14311_v18  ;;  %v14389_v46 = vadd.f32 1.0, %v3498_v50  ;;  %5188 = vmatpush.bf16.msra.mxu2 %v12652_v13  ;;  %5177 = vmatpush.bf16.msra.mxu1 %v12642_v20  ;;  %v12673_v52 = vld [vmem:[#allocation6 + $0x178] sm:$0xff] }
 0xc8e   : > { %v3780_v34 = vadd.f32 -1.4531521, %v3764_v32  ;;  %v3328_v44 = vpop.f32.mrf.mxu3  ;;  %v3543_v60 = vadd.f32 %v13295_v10, %v3542_v11  ;;  %v12665_v32 = vld [vmem:[#allocation6 + $0x138] sm:$0xff]  ;;  %v3595_v58 = vand.u32 2147483648, %v14365_v47  ;;  %vm3589_vm5 = vweird.f32 %v14365_v47 }
 0xc8f   : > { %v3782_v45 = vadd.f32 -1.4531521, %v3766_v26  ;;  %v3354_v51 = vpop.f32.mrf.mxu2  ;;  %v3573_v0 = vadd.f32 %v13297_v16, %v3572_v54  ;;  %v3926_v26 = vmul.f32 %v3910_v43, %v14313_v21  ;;  %v3940_v35 = vmul.f32 1.442695, %v3924_v6  ;;  %v12634_v6 = vld [vmem:[#allocation6 + $0x40] sm:$0xff]  ;;  %v12689_v20 = vld [vmem:[#allocation6 + $0x1f8] sm:$0xff] }
 0xc90   : > { %v3796_v53 = vmul.f32 %v3780_v34, %v14351_v19  ;;  %v3547_v3 = vsel %vm3546_vm13, %v13295_v10, %v3543_v60  ;;  %5162 = vmatpush.bf16.msrb.mxu3 %v12636_v2  ;;  %5196 = vmatpush.bf16.msrb.mxu0 %v12665_v32  ;;  %v12651_v34 = vld [vmem:[#allocation6 + $0xc8] sm:$0xff]  ;;  %v3909_v44 = vsub.f32 0.0, %v14323_v31  ;;  %13300 = vrcp.f32 %v14389_v46  ;;  %v12664_v2 = vld [vmem:[#allocation6 + $0x130] sm:$0xff] }
 0xc91   : > { %v3798_v59 = vmul.f32 %v3782_v45, %v14356_v37  ;;  %v14380_v7 = vsel %vm3549_vm14, %v3551_v61, %v3547_v3  ;;  %v3577_v12 = vsel %vm3576_vm1, %v13297_v16, %v3573_v0  ;;  %v12635_v16 = vld [vmem:[#allocation6 + $0x48] sm:$0xff]  ;;  %v14391_v25 = vpop.eup %13298  ;;  %5222 = vmatpush.bf16.msrb.mxu1 %v12681_v49  ;;  %v14401_v45 = vpop.f32.mrf.mxu0  ;;  %v3944_v40 = vmul.f32 1.442695, %v3926_v26  ;;  %5189 = vmatpush.bf16.msra.mxu2 %v12651_v34 }
 0xc92   : > { %v3812_v41 = vadd.f32 1.4214138, %v3796_v53  ;;  %v3765_v23 = vmul.f32 1.0614054, %v14380_v7  ;;  %v14383_v10 = vsel %vm3579_vm3, %v3581_v5, %v3577_v12  ;;  %v3585_v21 = vmul.f32 %v14391_v25, %v14365_v47  ;;  %v12650_v12 = vld [vmem:[#allocation6 + $0xc0] sm:$0xff] }
 0xc93   : > { %v3814_v22 = vadd.f32 1.4214138, %v3798_v59  ;;  %v3767_v18 = vmul.f32 1.0614054, %v14383_v10  ;;  %v3911_v51 = vsub.f32 0.0, %v14325_v33  ;;  %v14409_v59 = vadd.f32 %v14339_v62, %v2585_v30 }
 0xc94   : > { %v3828_v27 = vmul.f32 %v3812_v41, %v14351_v19  ;;  %v3781_v28 = vadd.f32 -1.4531521, %v3765_v23  ;;  %5163 = vmatpush.bf16.msrb.mxu3 %v12635_v16  ;;  %v14403_v11 = vpop.f32.mrf.mxu1  ;;  %v3586_v53 = vsub.f32 1.0, %v3585_v21  ;;  %vm3590_vm4 = vweird.f32 %v14391_v25  ;;  %v12680_v41 = vld [vmem:[#allocation6 + $0x1b0] sm:$0xff]  ;;  %5197 = vmatpush.bf16.msrb.mxu0 %v12664_v2 }
 0xc95   : > { %v3783_v36 = vadd.f32 -1.4531521, %v3767_v18  ;;  %v3830_v43 = vmul.f32 %v3814_v22, %v14356_v37  ;;  %v3593_v0 = vand.u32 2147483647, %v14365_v47  ;;  %v3925_v50 = vmul.f32 %v3909_v44, %v14323_v31  ;;  %5223 = vmatpush.bf16.msrb.mxu1 %v12680_v41  ;;  %vm3591_vm6 = vmor %vm3589_vm5, %vm3590_vm4  ;;  %5190 = vmatpush.bf16.msra.mxu2 %v12650_v12 }
 0xc96   : > { %v3797_v39 = vmul.f32 %v3781_v28, %v14380_v7  ;;  %v3844_v54 = vadd.f32 -0.28449672, %v3828_v27  ;;  %v3587_v61 = vmul.f32 %v14391_v25, %v3586_v53  ;;  %13302 = vpow2.f32 %v3940_v35  ;;  %v13301_v22 = vpop.eup %13300 }
 0xc97   : > { %v3799_v48 = vmul.f32 %v3783_v36, %v14383_v10  ;;  %v3846_v3 = vadd.f32 -0.28449672, %v3830_v43  ;;  %13304 = vpow2.f32 %v3944_v40  ;;  %v3596_v31 = vor.u32 1.1754944e-38, %v3595_v58 }
 0xc98   : > { %v3813_v57 = vadd.f32 1.4214138, %v3797_v39  ;;  %v3588_v13 = vadd.f32 %v14391_v25, %v3587_v61  ;;  %v3860_v23 = vmul.f32 %v3844_v54, %v14351_v19  ;;  %v3465_v32 = vand.u32 2147483647, %v14409_v59  ;;  %5164 = vmatpush.bf16.msrb.mxu3 %v12634_v6 }
 0xc99   : > { %v3815_v60 = vadd.f32 1.4214138, %v3799_v48  ;;  %v3927_v49 = vmul.f32 %v3911_v51, %v14325_v33  ;;  %vm3594_vm7 = vcmp.eq.f32.partialorder %v3593_v0, 8.507059e+37  ;;  %v3615_v26 = vmul.f32 %v13301_v22, %v14389_v46  ;;  %5235 = vmatpush.bf16.msrb.mxu2 %v12689_v20  ;;  %v3367_v30 = vpop.f32.mrf.mxu0 }
 0xc9a   : > { %v3829_v5 = vmul.f32 %v3813_v57, %v14380_v7  ;;  %v3592_v47 = vsel %vm3591_vm6, %v14391_v25, %v3588_v13  ;;  %v3862_v18 = vmul.f32 %v3846_v3, %v14356_v37  ;;  %v3942_v27 = vmul.f32 1.442695, %v3925_v50  ;;  %v14431_v25 = vpop.f32.mrf.mxu3 }
 0xc9b   : > { %v3831_v62 = vmul.f32 %v3815_v60, %v14383_v10  ;;  %v14427_v28 = vsel %vm3594_vm7, %v3596_v31, %v3592_v47  ;;  %v3616_v21 = vsub.f32 1.0, %v3615_v26  ;;  %v2587_v33 = vperm.slane %v14299_v1, 7 }
 0xc9c   : > { %5209 = vmatpush.bf16.msra.mxu3 %v12673_v52  ;;  %v3845_v16 = vadd.f32 -0.28449672, %v3829_v5  ;;  %v3393_v34 = vpop.f32.mrf.mxu1  ;;  %v3768_v36 = vmul.f32 1.0614054, %v14427_v28  ;;  %v3876_v43 = vadd.f32 0.2548296, %v3860_v23  ;;  %v13303_v48 = vpop.eup %13302  ;;  %vm3620_vm8 = vweird.f32 %v13301_v22 }
 0xc9d   : > { %v3847_v35 = vadd.f32 -0.28449672, %v3831_v62  ;;  %v3912_v39 = vsub.f32 0.0, %v14347_v14  ;;  %v3625_v44 = vand.u32 2147483648, %v14389_v46  ;;  %v14435_v40 = vmul.f32 0.70710677, %v3465_v32  ;;  %v13305_v57 = vpop.eup %13304  ;;  %v14457_v32 = vpop.f32.mrf.mxu2 }
 0xc9e   : > { %v3784_v51 = vadd.f32 -1.4531521, %v3768_v36  ;;  %v3617_v53 = vmul.f32 %v13301_v22, %v3616_v21  ;;  %v3623_v54 = vand.u32 2147483647, %v14389_v46  ;;  %v3878_v58 = vadd.f32 0.2548296, %v3862_v18 }
 0xc9f   : > { %v3861_v60 = vmul.f32 %v3845_v16, %v14380_v7  ;;  %v3946_v1 = vmul.f32 1.442695, %v3927_v49  ;;  %v3497_v61 = vmul.f32 0.3275911, %v14435_v40  ;;  %v3863_v0 = vmul.f32 %v3847_v35, %v14383_v10  ;;  %v14478_v36 = vld [vmem:[%s15954_s19 + $0x8] sm:$0xff] }
 0xca0   : > { %v3618_v2 = vadd.f32 %v13301_v22, %v3617_v53  ;;  %vm3619_vm9 = vweird.f32 %v14389_v46  ;;  %v3914_v41 = vsub.f32 0.0, %v14368_v56  ;;  %v3800_v3 = vmul.f32 %v3784_v51, %v14427_v28  ;;  %v12663_v21 = vld [vmem:[#allocation6 + $0x128] sm:$0xff] }
 0xca1   : > { %vm3621_vm10 = vmor %vm3619_vm9, %vm3620_vm8  ;;  %v3626_v5 = vor.u32 1.1754944e-38, %v3625_v44  ;;  %v14444_v50 = vadd.f32 1.0, %v3497_v61  ;;  %v14447_v6 = vadd.f32 %v14343_v63, %v2587_v33  ;;  %v3892_v12 = vmul.f32 %v3876_v43, %v14351_v19  ;;  %v12679_v33 = vld [vmem:[#allocation6 + $0x1a8] sm:$0xff]  ;;  %5198 = vmatpush.bf16.msrb.mxu0 %v12663_v21 }
 0xca2   : > { %v3928_v62 = vmul.f32 %v3912_v39, %v14347_v14  ;;  %v3622_v13 = vsel %vm3621_vm10, %v13301_v22, %v3618_v2  ;;  %vm3624_vm12 = vcmp.eq.f32.partialorder %v3623_v54, 8.507059e+37  ;;  %v3894_v52 = vmul.f32 %v3878_v58, %v14356_v37  ;;  %v3380_v19 = vpop.f32.mrf.mxu3  ;;  %5224 = vmatpush.bf16.msrb.mxu1 %v12679_v33  ;;  %v12688_v58 = vld [vmem:[#allocation6 + $0x1f0] sm:$0xff] }
 0xca3   : > { %v3877_v46 = vadd.f32 0.2548296, %v3861_v60  ;;  %v14452_v20 = vsel %vm3624_vm12, %v3626_v5, %v3622_v13  ;;  %13306 = vrcp.f32 %v14444_v50  ;;  %v3879_v23 = vadd.f32 0.2548296, %v3863_v0  ;;  %5236 = vmatpush.bf16.msrb.mxu2 %v12688_v58 }
 0xca4   : > { %13308 = vpow2.f32 %v3942_v27  ;;  %v3770_v31 = vmul.f32 1.0614054, %v14452_v20  ;;  %v3930_v63 = vmul.f32 %v3914_v41, %v14368_v56  ;;  %v3816_v14 = vadd.f32 1.4214138, %v3800_v3 }
 0xca5   : > { %13310 = vpow2.f32 %v3946_v1  ;;  %v3467_v22 = vand.u32 2147483647, %v14447_v6  ;;  %v14460_v37 = vmul.f32 %v13303_v48, %v3892_v12  ;;  %v14463_v49 = vmul.f32 0.5, %v14303_v4  ;;  %v12662_v12 = vld [vmem:[#allocation6 + $0x120] sm:$0xff]  ;;  %v3406_v13 = vpop.f32.mrf.mxu2 }
 0xca6   : > { %v3948_v47 = vmul.f32 1.442695, %v3928_v62  ;;  %v3786_v26 = vadd.f32 -1.4531521, %v3770_v31  ;;  %v14465_v18 = vmul.f32 %v13305_v57, %v3894_v52  ;;  %v14468_v16 = vmul.f32 0.5, %v14305_v8  ;;  %v12672_v57 = vld [vmem:[#allocation6 + $0x170] sm:$0xff]  ;;  %5199 = vmatpush.bf16.msrb.mxu0 %v12662_v12 }
 0xca7   : > { %v3893_v56 = vmul.f32 %v3877_v46, %v14380_v7  ;;  %v14471_v27 = vmul.f32 0.70710677, %v3467_v22  ;;  %v14474_v30 = vmul.f32 0.5, %v14316_v24  ;;  %v3895_v34 = vmul.f32 %v3879_v23, %v14383_v10  ;;  %5210 = vmatpush.bf16.msra.mxu3 %v12672_v57  ;;  %v12678_v62 = vld [vmem:[#allocation6 + $0x1a0] sm:$0xff]  ;;  %v12687_v22 = vld [vmem:[#allocation6 + $0x1e8] sm:$0xff] }
 0xca8   : > { %v3952_v35 = vmul.f32 1.442695, %v3930_v63  ;;  %v14483_v39 = vmul.f32 0.5, %v14319_v42  ;;  %v3832_v44 = vmul.f32 %v3816_v14, %v14427_v28  ;;  %v3802_v7 = vmul.f32 %v3786_v26, %v14452_v20  ;;  %5225 = vmatpush.bf16.msrb.mxu1 %v12678_v62  ;;  %v12671_v14 = vld [vmem:[#allocation6 + $0x168] sm:$0xff]  ;;  %5237 = vmatpush.bf16.msrb.mxu2 %v12687_v22 }
 0xca9   : > { %v14480_v43 = vpop.eup %13306  ;;  %v3499_v48 = vmul.f32 0.3275911, %v14471_v27  ;;  %v3988_v53 = vsub.f32 1.0, %v14460_v37  ;;  %vm4004_vm13 = vcmp.ge.f32.partialorder %v14303_v4, 0.0  ;;  %13312 = vpow2.f32 %v3948_v47  ;;  %v12660_v4 = vld [vmem:[#allocation6 + $0x110] sm:$0xff] }
 0xcaa   : > { %v13309_v51 = vpop.eup %13308  ;;  %v14491_v10 = vmul.f32 0.5, %v14335_v55  ;;  %v3600_v54 = vmul.f32 %v14480_v43, %v14444_v50  ;;  %v3990_v1 = vsub.f32 1.0, %v14465_v18  ;;  %v2588_v2 = vperm.slane %v14478_v36, 0 }
 0xcab   : > { %v13311_v60 = vpop.eup %13310  ;;  %v14496_v61 = vmul.f32 %v13309_v51, %v3893_v56  ;;  %v14498_v0 = vadd.f32 1.0, %v3499_v48  ;;  %vm4006_vm14 = vcmp.ge.f32.partialorder %v14305_v8, 0.0  ;;  %13314 = vpow2.f32 %v3952_v35  ;;  %5211 = vmatpush.bf16.msra.mxu3 %v12671_v14  ;;  %v12677_v48 = vld [vmem:[#allocation6 + $0x198] sm:$0xff] }
 0xcac   : > { %v14502_v41 = vmul.f32 %v13311_v60, %v3895_v34  ;;  %v3601_v3 = vsub.f32 1.0, %v3600_v54  ;;  %v3610_v5 = vand.u32 2147483648, %v14444_v50  ;;  %v3848_v52 = vadd.f32 -0.28449672, %v3832_v44  ;;  %5226 = vmatpush.bf16.msrb.mxu1 %v12677_v48  ;;  %v12669_v48 = vld [vmem:[#allocation6 + $0x158] sm:$0xff] }
 0xcad   : > { %v3818_v46 = vadd.f32 1.4214138, %v3802_v7  ;;  %v14506_v23 = vmul.f32 0.5, %v14349_v15  ;;  %13316 = vrcp.f32 %v14498_v0  ;;  %v4020_v31 = vsub.f32 0.0, %v3988_v53  ;;  %v12661_v7 = vld [vmem:[#allocation6 + $0x118] sm:$0xff] }
 0xcae   : > { %v3602_v63 = vmul.f32 %v14480_v43, %v3601_v3  ;;  %vm3605_vm15 = vweird.f32 %v14480_v43  ;;  %v3608_v19 = vand.u32 2147483647, %v14444_v50  ;;  %v4022_v47 = vsub.f32 0.0, %v3990_v1  ;;  %5200 = vmatpush.bf16.msrb.mxu0 %v12661_v7  ;;  %v12670_v3 = vld [vmem:[#allocation6 + $0x160] sm:$0xff] }
 0xcaf   : > { %v3989_v26 = vsub.f32 1.0, %v14496_v61  ;;  %v14518_v56 = vadd.f32 %v14401_v45, %v2588_v2  ;;  %v2590_v34 = vperm.slane %v14478_v36, 2  ;;  %v14521_v35 = vpop.eup %13312  ;;  %v3991_v21 = vsub.f32 1.0, %v14502_v41  ;;  %5212 = vmatpush.bf16.msra.mxu3 %v12670_v3 }
 0xcb0   : > { %vm4007_vm1 = vcmp.ge.f32.partialorder %v14319_v42, 0.0  ;;  %v3603_v33 = vadd.f32 %v14480_v43, %v3602_v63  ;;  %vm3604_vm3 = vweird.f32 %v14444_v50  ;;  %v3611_v44 = vor.u32 1.1754944e-38, %v3610_v5  ;;  %v12686_v5 = vld [vmem:[#allocation6 + $0x1e0] sm:$0xff] }
 0xcb1   : > { %v3864_v45 = vmul.f32 %v3848_v52, %v14427_v28  ;;  %v3834_v51 = vmul.f32 %v3818_v46, %v14452_v20  ;;  %vm14531_vm4 = vmor %vm3604_vm3, %vm3605_vm15  ;;  %v3468_v57 = vand.u32 2147483647, %v14518_v56  ;;  %v14537_v58 = vadd.f32 %v14403_v11, %v2590_v34  ;;  %v14539_v50 = vpop.eup %13314  ;;  %5238 = vmatpush.bf16.msrb.mxu2 %v12686_v5 }
 0xcb2   : > { %v3607_v60 = vsel %vm14531_vm4, %v14480_v43, %v3603_v33  ;;  %vm3609_vm5 = vcmp.eq.f32.partialorder %v3608_v19, 8.507059e+37  ;;  %v3913_v2 = vsub.f32 0.0, %v14435_v40  ;;  %v14546_v41 = vmul.f32 0.5, %v14409_v59  ;;  %5201 = vmatpush.bf16.msrb.mxu0 %v12660_v4  ;;  %v12668_v4 = vld [vmem:[#allocation6 + $0x150] sm:$0xff] }
 0xcb3   : > { %v14548_v12 = vpop.eup %13316  ;;  %v14554_v11 = vsel %vm4004_vm13, %v3988_v53, %v4020_v31  ;;  %vm4005_vm6 = vcmp.ge.f32.partialorder %v14316_v24, 0.0  ;;  %v14557_v43 = vsel %vm3609_vm5, %v3611_v44, %v3607_v60  ;;  %v14559_v62 = vmul.f32 0.70710677, %v3468_v57  ;;  %v12676_v53 = vld [vmem:[#allocation6 + $0x190] sm:$0xff]  ;;  %5213 = vmatpush.bf16.msra.mxu3 %v12669_v48  ;;  %v12675_v60 = vld [vmem:[#allocation6 + $0x188] sm:$0xff] }
 0xcb4   : > { %v3470_v13 = vand.u32 2147483647, %v14537_v58  ;;  %v4021_v52 = vsub.f32 0.0, %v3989_v26  ;;  %v4023_v46 = vsub.f32 0.0, %v3991_v21  ;;  %v3769_v63 = vmul.f32 1.0614054, %v14557_v43  ;;  %5227 = vmatpush.bf16.msrb.mxu1 %v12676_v53 }
 0xcb5   : > { %v3630_v37 = vmul.f32 %v14548_v12, %v14498_v0  ;;  %v4038_v31 = vsel %vm4006_vm14, %v3990_v1, %v4022_v47  ;;  %v3880_v19 = vadd.f32 0.2548296, %v3864_v45  ;;  %v3850_v14 = vadd.f32 -0.28449672, %v3834_v51  ;;  %v12685_v1 = vld [vmem:[#allocation6 + $0x1d8] sm:$0xff]  ;;  %v12659_v51 = vld [vmem:[#allocation6 + $0x108] sm:$0xff] }
 0xcb6   : > { %v3500_v22 = vmul.f32 0.3275911, %v14559_v62  ;;  %v3785_v34 = vadd.f32 -1.4531521, %v3769_v63  ;;  %v3929_v33 = vmul.f32 %v3913_v2, %v14435_v40  ;;  %v14573_v7 = vmul.f32 0.70710677, %v3470_v13  ;;  %5239 = vmatpush.bf16.msrb.mxu2 %v12685_v1  ;;  %5202 = vmatpush.bf16.msrb.mxu0 %v12659_v51  ;;  %v14630_v1 = vpop.f32.mrf.mxu1 }
 0xcb7   : > { %v3631_v44 = vsub.f32 1.0, %v3630_v37  ;;  %v3638_v54 = vand.u32 2147483647, %v14498_v0  ;;  %v3640_v18 = vand.u32 2147483648, %v14498_v0  ;;  %v2589_v8 = vperm.slane %v14478_v36, 1  ;;  %5214 = vmatpush.bf16.msra.mxu3 %v12668_v4 }
 0xcb8   : > { %v14577_v57 = vadd.f32 1.0, %v3500_v22  ;;  %v3801_v47 = vmul.f32 %v3785_v34, %v14557_v43  ;;  %vm3635_vm7 = vweird.f32 %v14548_v12  ;;  %v3502_v40 = vmul.f32 0.3275911, %v14573_v7  ;;  %5228 = vmatpush.bf16.msrb.mxu1 %v12675_v60  ;;  %v12658_v22 = vld [vmem:[#allocation6 + $0x100] sm:$0xff] }
 0xcb9   : > { %v3632_v45 = vmul.f32 %v14548_v12, %v3631_v44  ;;  %v4039_v2 = vsel %vm4007_vm1, %v3991_v21, %v4023_v46  ;;  %v3866_v3 = vmul.f32 %v3850_v14, %v14452_v20  ;;  %v3915_v5 = vsub.f32 0.0, %v14471_v27  ;;  %v12684_v14 = vld [vmem:[#allocation6 + $0x1d0] sm:$0xff]  ;;  %v12674_v34 = vld [vmem:[#allocation6 + $0x180] sm:$0xff] }
 0xcba   : > { %13318 = vrcp.f32 %v14577_v57  ;;  %v3896_v13 = vmul.f32 %v3880_v19, %v14427_v28  ;;  %v3950_v63 = vmul.f32 1.442695, %v3929_v33  ;;  %vm3634_vm8 = vweird.f32 %v14498_v0  ;;  %5240 = vmatpush.bf16.msrb.mxu2 %v12684_v14  ;;  %5203 = vmatpush.bf16.msrb.mxu0 %v12658_v22 }
 0xcbb   : > { %v3633_v37 = vadd.f32 %v14548_v12, %v3632_v45  ;;  %v3817_v53 = vadd.f32 1.4214138, %v3801_v47  ;;  %vm3636_vm9 = vmor %vm3634_vm8, %vm3635_vm7  ;;  %v3641_v42 = vor.u32 1.1754944e-38, %v3640_v18  ;;  %v14594_v21 = vadd.f32 1.0, %v3502_v40 }
 0xcbc   : > { %v14597_v46 = vadd.f32 %v14431_v25, %v2589_v8  ;;  %v4037_v28 = vsel %vm4005_vm6, %v3989_v26, %v4021_v52  ;;  %v4071_v0 = vadd.f32 1.0, %v4039_v2  ;;  %vm3639_vm10 = vcmp.eq.f32.partialorder %v3638_v54, 8.507059e+37  ;;  %5229 = vmatpush.bf16.msrb.mxu1 %v12674_v34  ;;  %v14628_v8 = vpop.f32.mrf.mxu0 }
 0xcbd   : > { %v3637_v19 = vsel %vm3636_vm9, %v14548_v12, %v3633_v37  ;;  %v3882_v33 = vadd.f32 0.2548296, %v3866_v3  ;;  %v3931_v48 = vmul.f32 %v3915_v5, %v14471_v27  ;;  %13320 = vrcp.f32 %v14594_v21  ;;  %v12667_v5 = vld [vmem:[#allocation6 + $0x148] sm:$0xff] }
 0xcbe   : > { %v14604_v44 = vsel %vm3639_vm10, %v3641_v42, %v3637_v19  ;;  %v14609_v25 = vadd.f32 1.0, %v14554_v11  ;;  %v14611_v24 = vadd.f32 1.0, %v4038_v31  ;;  %v14614_v61 = vmul.f32 %v14521_v35, %v3896_v13  ;;  %v12683_v13 = vld [vmem:[#allocation6 + $0x1c8] sm:$0xff]  ;;  %5215 = vmatpush.bf16.msra.mxu3 %v12667_v5 }
 0xcbf   : > { %v3771_v26 = vmul.f32 1.0614054, %v14604_v44  ;;  %v14617_v52 = vadd.f32 1.0, %v4037_v28  ;;  %v3833_v27 = vmul.f32 %v3817_v53, %v14557_v43  ;;  %13322 = vpow2.f32 %v3950_v63  ;;  %5241 = vmatpush.bf16.msrb.mxu2 %v12683_v13 }
 0xcc0   : > { %v13319_v12 = vpop.eup %13318  ;;  %v3469_v54 = vand.u32 2147483647, %v14597_v46  ;;  %v14622_v11 = vmul.f32 %v4071_v0, %v14483_v39  ;;  %v14625_v18 = vmul.f32 0.5, %v14447_v6  ;;  %v3898_v47 = vmul.f32 %v3882_v33, %v14452_v20  ;;  %v12666_v33 = vld [vmem:[#allocation6 + $0x140] sm:$0xff] }
 0xcc1   : > { %v3787_v31 = vadd.f32 -1.4531521, %v3771_v26  ;;  %v3645_v35 = vmul.f32 %v13319_v12, %v14577_v57  ;;  %v3954_v45 = vmul.f32 1.442695, %v3931_v48  ;;  %v3653_v40 = vand.u32 2147483647, %v14577_v57 }
 0xcc2   : > { %v14634_v51 = vmul.f32 0.70710677, %v3469_v54  ;;  %v3992_v39 = vsub.f32 1.0, %v14614_v61  ;;  %v3655_v3 = vand.u32 2147483648, %v14577_v57  ;;  %v3849_v37 = vadd.f32 -0.28449672, %v3833_v27  ;;  %5216 = vmatpush.bf16.msra.mxu3 %v12666_v33 }
 0xcc3   : > { %v3803_v60 = vmul.f32 %v3787_v31, %v14604_v44  ;;  %v3646_v2 = vsub.f32 1.0, %v3645_v35  ;;  %v13321_v63 = vpop.eup %13320  ;;  %v3916_v4 = vsub.f32 0.0, %v14559_v62  ;;  %v2591_v53 = vperm.slane %v14478_v36, 3  ;;  %v12682_v48 = vld [vmem:[#allocation6 + $0x1c0] sm:$0xff] }
 0xcc4   : > { %v3501_v20 = vmul.f32 0.3275911, %v14634_v51  ;;  %vm3650_vm12 = vweird.f32 %v13319_v12  ;;  %v3675_v28 = vmul.f32 %v13321_v63, %v14594_v21  ;;  %v14646_v19 = vmul.f32 %v14539_v50, %v3898_v47  ;;  %5242 = vmatpush.bf16.msrb.mxu2 %v12682_v48 }
 0xcc5   : > { %v3819_v42 = vadd.f32 1.4214138, %v3803_v60  ;;  %v3647_v14 = vmul.f32 %v13319_v12, %v3646_v2  ;;  %v14643_v0 = vpop.eup %13322  ;;  %vm3649_vm13 = vweird.f32 %v14577_v57  ;;  %vm14649_vm14 = vcmp.eq.f32.partialorder %v3653_v40, 8.507059e+37  ;;  %v3419_v2 = vpop.f32.mrf.mxu0 }
 0xcc6   : > { %v14653_v34 = vadd.f32 1.0, %v3501_v20  ;;  %v3656_v27 = vor.u32 1.1754944e-38, %v3655_v3  ;;  %v3676_v54 = vsub.f32 1.0, %v3675_v28  ;;  %v3685_v31 = vand.u32 2147483648, %v14594_v21  ;;  %vm3651_vm1 = vmor %vm3649_vm13, %vm3650_vm12  ;;  %v3445_v3 = vpop.f32.mrf.mxu1 }
 0xcc7   : > { %v3648_v26 = vadd.f32 %v13319_v12, %v3647_v14  ;;  %vm4008_vm15 = vcmp.ge.f32.partialorder %v14335_v55, 0.0  ;;  %v3865_v50 = vmul.f32 %v3849_v37, %v14557_v43  ;;  %v3835_v35 = vmul.f32 %v3819_v42, %v14604_v44 }
 0xcc8   : > { %13324 = vrcp.f32 %v14653_v34  ;;  %v14662_v57 = vadd.f32 %v14457_v32, %v2591_v53  ;;  %v3677_v40 = vmul.f32 %v13321_v63, %v3676_v54  ;;  %vm3680_vm3 = vweird.f32 %v13321_v63 }
 0xcc9   : > { %v3652_v47 = vsel %vm3651_vm1, %v13319_v12, %v3648_v26  ;;  %v3683_v60 = vand.u32 2147483647, %v14594_v21  ;;  %v4024_v5 = vsub.f32 0.0, %v3992_v39  ;;  %v3994_v13 = vsub.f32 1.0, %v14646_v19  ;;  %v14675_v12 = vpop.f32.mrf.mxu3  ;;  %v14683_v26 = vpop.f32.mrf.mxu2 }
 0xcca   : > { %v14670_v37 = vsel %vm14649_vm14, %v3656_v27, %v3652_v47  ;;  %v14673_v32 = vmul.f32 0.5, %v14518_v56  ;;  %v3678_v53 = vadd.f32 %v13321_v63, %v3677_v40  ;;  %vm3679_vm4 = vweird.f32 %v14594_v21 }
 0xccb   : > { %v3772_v20 = vmul.f32 1.0614054, %v14670_v37  ;;  %v3686_v42 = vor.u32 1.1754944e-38, %v3685_v31  ;;  %v3881_v14 = vadd.f32 0.2548296, %v3865_v50  ;;  %13326 = vpow2.f32 %v3954_v45  ;;  %vm3681_vm5 = vmor %vm3679_vm4, %vm3680_vm3 }
 0xccc   : > { %v3851_v28 = vadd.f32 -0.28449672, %v3835_v35  ;;  %v3471_v19 = vand.u32 2147483647, %v14662_v57  ;;  %vm4010_vm6 = vcmp.ge.f32.partialorder %v14349_v15, 0.0  ;;  %v3932_v33 = vmul.f32 %v3916_v4, %v14559_v62 }
 0xccd   : > { %v3788_v22 = vadd.f32 -1.4531521, %v3772_v20  ;;  %v3682_v48 = vsel %vm3681_vm5, %v13321_v63, %v3678_v53  ;;  %vm3684_vm7 = vcmp.eq.f32.partialorder %v3683_v60, 8.507059e+37  ;;  %v4026_v54 = vsub.f32 0.0, %v3994_v13  ;;  %v12697_v20 = vld [vmem:[#allocation6 + $0x238] sm:$0xff] }
 0xcce   : > { %v13325_v27 = vpop.eup %13324  ;;  %v14685_v21 = vsel %vm3684_vm7, %v3686_v42, %v3682_v48  ;;  %v14687_v31 = vmul.f32 0.70710677, %v3471_v19  ;;  %v4084_v45 = vmul.f32 %v14609_v25, %v14463_v49  ;;  %v3918_v47 = vsub.f32 0.0, %v14573_v7 }
 0xccf   : > { %v3804_v50 = vmul.f32 %v3788_v22, %v14670_v37  ;;  %v3774_v35 = vmul.f32 1.0614054, %v14685_v21  ;;  %v3660_v62 = vmul.f32 %v13325_v27, %v14653_v34  ;;  %v3897_v63 = vmul.f32 %v3881_v14, %v14557_v43 }
 0xcd0   : > { %v3867_v4 = vmul.f32 %v3851_v28, %v14604_v44  ;;  %v3668_v40 = vand.u32 2147483647, %v14653_v34  ;;  %v3503_v60 = vmul.f32 0.3275911, %v14687_v31  ;;  %v14703_v49 = vsel %vm4008_vm15, %v3992_v39, %v4024_v5 }
 0xcd1   : > { %v3820_v25 = vadd.f32 1.4214138, %v3804_v50  ;;  %v3790_v2 = vadd.f32 -1.4531521, %v3774_v35  ;;  %v3661_v3 = vsub.f32 1.0, %v3660_v62  ;;  %v13327_v53 = vpop.eup %13326  ;;  %v3670_v42 = vand.u32 2147483648, %v14653_v34  ;;  %v3432_v19 = vpop.f32.mrf.mxu3 }
 0xcd2   : > { %v14706_v43 = vadd.f32 1.0, %v3503_v60  ;;  %v4100_v14 = vpack.c.bf16 %v4084_v45, %v4084_v45  ;;  %v4086_v28 = vmul.f32 %v14611_v24, %v14468_v16  ;;  %vm3665_vm8 = vweird.f32 %v13325_v27  ;;  %v12713_v16 = vld [vmem:[#allocation6 + $0x2b8] sm:$0xff]  ;;  %v12696_v24 = vld [vmem:[#allocation6 + $0x230] sm:$0xff]  ;;  %v3458_v62 = vpop.f32.mrf.mxu2  ;;  %v12695_v19 = vld [vmem:[#allocation6 + $0x228] sm:$0xff] }
 0xcd3   : > { %v3836_v61 = vmul.f32 %v3820_v25, %v14670_v37  ;;  %v3806_v55 = vmul.f32 %v3790_v2, %v14685_v21  ;;  %v3662_v39 = vmul.f32 %v13325_v27, %v3661_v3  ;;  %v14713_v5 = vmul.f32 %v14643_v0, %v3897_v63 }
 0xcd4   : > { %v3883_v22 = vadd.f32 0.2548296, %v3867_v4  ;;  %v3956_v48 = vmul.f32 1.442695, %v3932_v33  ;;  %13328 = vrcp.f32 %v14706_v43  ;;  %5152 = vmatmul.bf16.vlgmr.msra.gmra.mxu0 %v4100_v14  ;;  %vm3664_vm9 = vweird.f32 %v14653_v34 }
 0xcd5   : > { %v3852_v50 = vadd.f32 -0.28449672, %v3836_v61  ;;  %v3822_v45 = vadd.f32 1.4214138, %v3806_v55  ;;  %v3663_v35 = vadd.f32 %v13325_v27, %v3662_v39  ;;  %5248 = vmatpush.bf16.msra.mxu0 %v12697_v20  ;;  %v4042_v60 = vsel %vm4010_vm6, %v3994_v13, %v4026_v54  ;;  %vm3666_vm10 = vmor %vm3664_vm9, %vm3665_vm8 }
 0xcd6   : > { %v3934_v0 = vmul.f32 %v3918_v47, %v14573_v7  ;;  %v3671_v33 = vor.u32 1.1754944e-38, %v3670_v42  ;;  %v4102_v63 = vpack.c.bf16 %v4086_v28, %v4086_v28  ;;  %vm3669_vm12 = vcmp.eq.f32.partialorder %v3668_v40, 8.507059e+37  ;;  %v12712_v7 = vld [vmem:[#allocation6 + $0x2b0] sm:$0xff] }
 0xcd7   : > { %v3868_v4 = vmul.f32 %v3852_v50, %v14670_v37  ;;  %v3667_v25 = vsel %vm3666_vm10, %v13325_v27, %v3663_v35  ;;  %v3917_v2 = vsub.f32 0.0, %v14634_v51  ;;  %v3899_v34 = vmul.f32 %v3883_v22, %v14604_v44  ;;  %v12721_v27 = vld [vmem:[#allocation6 + $0x2f8] sm:$0xff] }
 0xcd8   : > { %v3838_v3 = vmul.f32 %v3822_v45, %v14685_v21  ;;  %v14725_v20 = vsel %vm3669_vm12, %v3671_v33, %v3667_v25  ;;  %5178 = vmatmul.bf16.vlgmr.msra.gmra.mxu1 %v4102_v63  ;;  %v2592_v15 = vperm.slane %v14478_v36, 4  ;;  %v3993_v13 = vsub.f32 1.0, %v14713_v5  ;;  %v12694_v33 = vld [vmem:[#allocation6 + $0x220] sm:$0xff] }
 0xcd9   : > { %v3884_v54 = vadd.f32 0.2548296, %v3868_v4  ;;  %13330 = vpow2.f32 %v3956_v48  ;;  %v3773_v47 = vmul.f32 1.0614054, %v14725_v20  ;;  %5274 = vmatpush.bf16.msra.mxu1 %v12713_v16  ;;  %5249 = vmatpush.bf16.msra.mxu0 %v12696_v24  ;;  %vm4009_vm13 = vcmp.ge.f32.partialorder %v14409_v59, 0.0  ;;  %v12705_v16 = vld [vmem:[#allocation6 + $0x278] sm:$0xff] }
 0xcda   : > { %v14730_v40 = vpop.eup %13328  ;;  %v14734_v44 = vadd.f32 %v14628_v8, %v2592_v15  ;;  %v2594_v42 = vperm.slane %v14478_v36, 6  ;;  %v4085_v14 = vmul.f32 %v14617_v52, %v14474_v30  ;;  %v4103_v28 = vpack.c.bf16 %v14622_v11, %v14622_v11  ;;  %v12711_v24 = vld [vmem:[#allocation6 + $0x2a8] sm:$0xff] }
 0xcdb   : > { %v14741_v61 = vadd.f32 1.0, %v4042_v60  ;;  %v3960_v55 = vmul.f32 1.442695, %v3934_v0  ;;  %v3789_v39 = vadd.f32 -1.4531521, %v3773_v47  ;;  %v3690_v22 = vmul.f32 %v14730_v40, %v14706_v43  ;;  %v12720_v0 = vld [vmem:[#allocation6 + $0x2f0] sm:$0xff] }
 0xcdc   : > { %v14745_v48 = vmul.f32 %v13327_v53, %v3899_v34  ;;  %v3854_v8 = vadd.f32 -0.28449672, %v3838_v3  ;;  %v3933_v50 = vmul.f32 %v3917_v2, %v14634_v51  ;;  %v3472_v45 = vand.u32 2147483647, %v14734_v44  ;;  %5191 = vmatmul.bf16.vlgmr.msra.gmra.mxu2 %v4103_v28  ;;  %v12704_v47 = vld [vmem:[#allocation6 + $0x270] sm:$0xff]  ;;  %v12703_v59 = vld [vmem:[#allocation6 + $0x268] sm:$0xff] }
 0xcdd   : > { %v4025_v30 = vsub.f32 0.0, %v3993_v13  ;;  %v3805_v52 = vmul.f32 %v3789_v39, %v14725_v20  ;;  %v3691_v11 = vsub.f32 1.0, %v3690_v22  ;;  %v3700_v35 = vand.u32 2147483648, %v14706_v43  ;;  %5275 = vmatpush.bf16.msra.mxu1 %v12712_v7  ;;  %5287 = vmatpush.bf16.msra.mxu2 %v12721_v27  ;;  %v12710_v27 = vld [vmem:[#allocation6 + $0x2a0] sm:$0xff]  ;;  %v12719_v39 = vld [vmem:[#allocation6 + $0x2e8] sm:$0xff] }
 0xcde   : > { %v3900_v53 = vmul.f32 %v3884_v54, %v14670_v37  ;;  %v14754_v62 = vmul.f32 0.70710677, %v3472_v45  ;;  %v14757_v51 = vadd.f32 %v14630_v1, %v2594_v42  ;;  %v4101_v60 = vpack.c.bf16 %v4085_v14, %v4085_v14  ;;  %5250 = vmatpush.bf16.msra.mxu0 %v12695_v19 }
 0xcdf   : > { %v13331_v63 = vpop.eup %13330  ;;  %vm4011_vm14 = vcmp.ge.f32.partialorder %v14447_v6, 0.0  ;;  %v3821_v4 = vadd.f32 1.4214138, %v3805_v52  ;;  %v3692_v25 = vmul.f32 %v14730_v40, %v3691_v11  ;;  %vm3695_vm15 = vweird.f32 %v14730_v40 }
 0xce0   : > { %v3698_v2 = vand.u32 2147483647, %v14706_v43  ;;  %v3995_v37 = vsub.f32 1.0, %v14745_v48  ;;  %v3870_v34 = vmul.f32 %v3854_v8, %v14685_v21  ;;  %v3504_v1 = vmul.f32 0.3275911, %v14754_v62  ;;  %5165 = vmatmul.bf16.vlgmr.msrb.gmra.mxu3 %v4101_v60 }
 0xce1   : > { %v3474_v3 = vand.u32 2147483647, %v14757_v51  ;;  %v3837_v15 = vmul.f32 %v3821_v4, %v14725_v20  ;;  %v3693_v7 = vadd.f32 %v14730_v40, %v3692_v25  ;;  %vm3694_vm1 = vweird.f32 %v14706_v43  ;;  %5261 = vmatpush.bf16.msrb.mxu3 %v12705_v16  ;;  %5276 = vmatpush.bf16.msra.mxu1 %v12711_v24  ;;  %v12693_v43 = vld [vmem:[#allocation6 + $0x218] sm:$0xff] }
 0xce2   : > { %v3919_v54 = vsub.f32 0.0, %v14687_v31  ;;  %v14771_v42 = vmul.f32 %v13331_v63, %v3900_v53  ;;  %vm3696_vm3 = vmor %vm3694_vm1, %vm3695_vm15  ;;  %v3701_v14 = vor.u32 1.1754944e-38, %v3700_v35  ;;  %v14775_v28 = vadd.f32 1.0, %v3504_v1  ;;  %5288 = vmatpush.bf16.msra.mxu2 %v12720_v0  ;;  %5251 = vmatpush.bf16.msra.mxu0 %v12694_v33 }
 0xce3   : > { %v14777_v19 = vmul.f32 0.70710677, %v3474_v3  ;;  %v4041_v22 = vsel %vm4009_vm13, %v3993_v13, %v4025_v30  ;;  %v3853_v48 = vadd.f32 -0.28449672, %v3837_v15  ;;  %v3697_v8 = vsel %vm3696_vm3, %v14730_v40, %v3693_v7  ;;  %v12709_v13 = vld [vmem:[#allocation6 + $0x298] sm:$0xff]  ;;  %v12702_v3 = vld [vmem:[#allocation6 + $0x260] sm:$0xff] }
 0xce4   : > { %vm3699_vm4 = vcmp.eq.f32.partialorder %v3698_v2, 8.507059e+37  ;;  %v4027_v45 = vsub.f32 0.0, %v3995_v37  ;;  %v3886_v52 = vadd.f32 0.2548296, %v3870_v34  ;;  %13332 = vrcp.f32 %v14775_v28  ;;  %v12708_v15 = vld [vmem:[#allocation6 + $0x290] sm:$0xff]  ;;  %v12717_v7 = vld [vmem:[#allocation6 + $0x2d8] sm:$0xff] }
 0xce5   : > { %v14784_v11 = vsel %vm3699_vm4, %v3701_v14, %v3697_v8  ;;  %vm4012_vm5 = vcmp.ge.f32.partialorder %v14518_v56, 0.0  ;;  %13334 = vpow2.f32 %v3960_v55  ;;  %v3958_v35 = vmul.f32 1.442695, %v3933_v50  ;;  %5262 = vmatpush.bf16.msrb.mxu3 %v12704_v47  ;;  %5277 = vmatpush.bf16.msra.mxu1 %v12710_v27  ;;  %v12718_v55 = vld [vmem:[#allocation6 + $0x2e0] sm:$0xff]  ;;  %v12692_v50 = vld [vmem:[#allocation6 + $0x210] sm:$0xff] }
 0xce6   : > { %v3775_v16 = vmul.f32 1.0614054, %v14784_v11  ;;  %v3935_v5 = vmul.f32 %v3919_v54, %v14687_v31  ;;  %v3996_v40 = vsub.f32 1.0, %v14771_v42  ;;  %v3869_v30 = vmul.f32 %v3853_v48, %v14725_v20  ;;  %5289 = vmatpush.bf16.msra.mxu2 %v12719_v39  ;;  %5252 = vmatpush.bf16.msra.mxu0 %v12693_v43  ;;  %v12691_v54 = vld [vmem:[#allocation6 + $0x208] sm:$0xff] }
 0xce7   : > { %v3506_v24 = vmul.f32 0.3275911, %v14777_v19  ;;  %v2593_v53 = vperm.slane %v14478_v36, 5  ;;  %v4072_v60 = vadd.f32 1.0, %v14703_v49  ;;  %v4073_v0 = vadd.f32 1.0, %v4041_v22 }
 0xce8   : > { %v14796_v31 = vmul.f32 0.5, %v14537_v58  ;;  %v3791_v33 = vadd.f32 -1.4531521, %v3775_v16  ;;  %v14800_v63 = vmul.f32 %v14741_v61, %v14506_v23  ;;  %v4043_v4 = vsel %vm4011_vm14, %v3995_v37, %v4027_v45  ;;  %v12701_v45 = vld [vmem:[#allocation6 + $0x258] sm:$0xff] }
 0xce9   : > { %v3902_v25 = vmul.f32 %v3886_v52, %v14685_v21  ;;  %v14806_v2 = vmul.f32 0.5, %v14597_v46  ;;  %13336 = vpow2.f32 %v3958_v35  ;;  %v3962_v34 = vmul.f32 1.442695, %v3935_v5  ;;  %5263 = vmatpush.bf16.msrb.mxu3 %v12703_v59  ;;  %5278 = vmatpush.bf16.msra.mxu1 %v12709_v13  ;;  %v12707_v52 = vld [vmem:[#allocation6 + $0x288] sm:$0xff] }
 0xcea   : > { %v3807_v49 = vmul.f32 %v3791_v33, %v14784_v11  ;;  %v14809_v1 = vadd.f32 1.0, %v3506_v24  ;;  %v14811_v23 = vpop.eup %13332  ;;  %v4028_v61 = vsub.f32 0.0, %v3996_v40  ;;  %v3885_v6 = vadd.f32 0.2548296, %v3869_v30  ;;  %5290 = vmatpush.bf16.msra.mxu2 %v12718_v55  ;;  %5253 = vmatpush.bf16.msra.mxu0 %v12692_v50  ;;  %v12729_v50 = vld [vmem:[#allocation6 + $0x338] sm:$0xff] }
 0xceb   : > { %v14814_v37 = vmul.f32 0.5, %v14662_v57  ;;  %v14817_v21 = vadd.f32 %v14675_v12, %v2593_v53  ;;  %v13335_v47 = vpop.eup %13334  ;;  %v14820_v27 = vmul.f32 %v4073_v0, %v14546_v41  ;;  %v14822_v42 = vadd.f32 1.0, %v4043_v4  ;;  %v12700_v4 = vld [vmem:[#allocation6 + $0x250] sm:$0xff] }
 0xcec   : > { %v3823_v14 = vadd.f32 1.4214138, %v3807_v49  ;;  %v3705_v39 = vmul.f32 %v14811_v23, %v14775_v28  ;;  %v14826_v43 = vmul.f32 %v13335_v47, %v3902_v25  ;;  %13338 = vrcp.f32 %v14809_v1  ;;  %v12706_v25 = vld [vmem:[#allocation6 + $0x280] sm:$0xff] }
 0xced   : > { %v2595_v12 = vperm.slane %v14478_v36, 7  ;;  %v4088_v22 = vmul.f32 %v4072_v60, %v14491_v10  ;;  %13340 = vpow2.f32 %v3962_v34  ;;  %v3920_v41 = vsub.f32 0.0, %v14754_v62  ;;  %5264 = vmatpush.bf16.msrb.mxu3 %v12702_v3  ;;  %5279 = vmatpush.bf16.msra.mxu1 %v12708_v15  ;;  %v12716_v10 = vld [vmem:[#allocation6 + $0x2d0] sm:$0xff] }
 0xcee   : > { %v3839_v48 = vmul.f32 %v3823_v14, %v14784_v11  ;;  %v3706_v8 = vsub.f32 1.0, %v3705_v39  ;;  %v4044_v35 = vsel %vm4012_vm5, %v3996_v40, %v4028_v61  ;;  %v3901_v16 = vmul.f32 %v3885_v6, %v14725_v20  ;;  %5291 = vmatpush.bf16.msra.mxu2 %v12717_v7  ;;  %5254 = vmatpush.bf16.msra.mxu0 %v12691_v54  ;;  %v12690_v40 = vld [vmem:[#allocation6 + $0x200] sm:$0xff]  ;;  %v12715_v61 = vld [vmem:[#allocation6 + $0x2c8] sm:$0xff] }
 0xcef   : > { %v3715_v5 = vand.u32 2147483648, %v14775_v28  ;;  %v3473_v36 = vand.u32 2147483647, %v14817_v21  ;;  %v13337_v59 = vpop.eup %13336  ;;  %vm4014_vm6 = vcmp.ge.f32.partialorder %v14537_v58, 0.0  ;;  %vm3710_vm7 = vweird.f32 %v14811_v23  ;;  %v12698_v58 = vld [vmem:[#allocation6 + $0x240] sm:$0xff] }
 0xcf0   : > { %v3855_v13 = vadd.f32 -0.28449672, %v3839_v48  ;;  %v3707_v30 = vmul.f32 %v14811_v23, %v3706_v8  ;;  %v3713_v56 = vand.u32 2147483647, %v14775_v28  ;;  %v3998_v20 = vsub.f32 1.0, %v14826_v43 }
 0xcf1   : > { %v14843_v24 = vmul.f32 0.70710677, %v3473_v36  ;;  %v14846_v53 = vadd.f32 %v14683_v26, %v2595_v12  ;;  %v4104_v55 = vpack.c.bf16 %v4088_v22, %v4088_v22  ;;  %v4076_v60 = vadd.f32 1.0, %v4044_v35  ;;  %5265 = vmatpush.bf16.msrb.mxu3 %v12701_v45  ;;  %5280 = vmatpush.bf16.msra.mxu1 %v12707_v52  ;;  %v12728_v12 = vld [vmem:[#allocation6 + $0x330] sm:$0xff]  ;;  %v12699_v45 = vld [vmem:[#allocation6 + $0x248] sm:$0xff] }
 0xcf2   : > { %v3871_v0 = vmul.f32 %v3855_v13, %v14784_v11  ;;  %v3708_v33 = vadd.f32 %v14811_v23, %v3707_v30  ;;  %vm3709_vm8 = vweird.f32 %v14775_v28  ;;  %v14851_v49 = vpop.eup %13338  ;;  %v14853_v34 = vmul.f32 %v13337_v59, %v3901_v16  ;;  %5292 = vmatpush.bf16.msra.mxu2 %v12716_v10  ;;  %5255 = vmatpush.bf16.msra.mxu0 %v12690_v40  ;;  %v12727_v40 = vld [vmem:[#allocation6 + $0x328] sm:$0xff] }
 0xcf3   : > { %vm3711_vm9 = vmor %vm3709_vm8, %vm3710_vm7  ;;  %v3716_v26 = vor.u32 1.1754944e-38, %v3715_v5  ;;  %v3505_v3 = vmul.f32 0.3275911, %v14843_v24  ;;  %v3475_v15 = vand.u32 2147483647, %v14846_v53  ;;  %5204 = vmatmul.bf16.vlgmr.msrb.gmra.mxu0 %v4104_v55  ;;  %v13341_v28 = vpop.eup %13340  ;;  %vm3714_vm10 = vcmp.eq.f32.partialorder %v3713_v56, 8.507059e+37 }
 0xcf4   : > { %v3887_v6 = vadd.f32 0.2548296, %v3871_v0  ;;  %v3712_v7 = vsel %vm3711_vm9, %v14811_v23, %v3708_v33  ;;  %v3735_v54 = vmul.f32 %v14851_v49, %v14809_v1  ;;  %v4030_v47 = vsub.f32 0.0, %v3998_v20  ;;  %v12714_v5 = vld [vmem:[#allocation6 + $0x2c0] sm:$0xff]  ;;  %v12745_v0 = vld [vmem:[#allocation6 + $0x3b8] sm:$0xff] }
 0xcf5   : > { %v14862_v14 = vsel %vm3714_vm10, %v3716_v26, %v3712_v7  ;;  %v3922_v39 = vsub.f32 0.0, %v14777_v19  ;;  %v14865_v43 = vadd.f32 1.0, %v3505_v3  ;;  %vm4013_vm12 = vcmp.ge.f32.partialorder %v14597_v46, 0.0  ;;  %5266 = vmatpush.bf16.msrb.mxu3 %v12700_v4  ;;  %5281 = vmatpush.bf16.msra.mxu1 %v12706_v25  ;;  %v12726_v3 = vld [vmem:[#allocation6 + $0x320] sm:$0xff]  ;;  %v12744_v7 = vld [vmem:[#allocation6 + $0x3b0] sm:$0xff]  ;;  %v12725_v46 = vld [vmem:[#allocation6 + $0x318] sm:$0xff] }
 0xcf6   : > { %5300 = vmatpush.bf16.msrb.mxu0 %v12729_v50  ;;  %v3903_v22 = vmul.f32 %v3887_v6, %v14784_v11  ;;  %v3776_v23 = vmul.f32 1.0614054, %v14862_v14  ;;  %v3736_v48 = vsub.f32 1.0, %v3735_v54  ;;  %v14870_v8 = vmul.f32 0.70710677, %v3475_v15  ;;  %5293 = vmatpush.bf16.msra.mxu2 %v12715_v61 }
 0xcf7   : > { %v3997_v52 = vsub.f32 1.0, %v14853_v34  ;;  %v3743_v35 = vand.u32 2147483647, %v14809_v1  ;;  %v3745_v16 = vand.u32 2147483648, %v14809_v1  ;;  %13342 = vrcp.f32 %v14865_v43 }
 0xcf8   : > { %v14876_v36 = vmul.f32 %v13341_v28, %v3903_v22  ;;  %v3792_v11 = vadd.f32 -1.4531521, %v3776_v23  ;;  %v3737_v10 = vmul.f32 %v14851_v49, %v3736_v48  ;;  %vm3740_vm13 = vweird.f32 %v14851_v49  ;;  %v12737_v22 = vld [vmem:[#allocation6 + $0x378] sm:$0xff] }
 0xcf9   : > { %v14881_v59 = vmul.f32 %v4076_v60, %v14673_v32  ;;  %v4046_v13 = vsel %vm4014_vm6, %v3998_v20, %v4030_v47  ;;  %v3936_v30 = vmul.f32 %v3920_v41, %v14754_v62  ;;  %v3507_v56 = vmul.f32 0.3275911, %v14870_v8  ;;  %5267 = vmatpush.bf16.msrb.mxu3 %v12699_v45 }
 0xcfa   : > { %5301 = vmatpush.bf16.msrb.mxu0 %v12728_v12  ;;  %vm4015_vm14 = vcmp.ge.f32.partialorder %v14662_v57, 0.0  ;;  %v3808_v55 = vmul.f32 %v3792_v11, %v14862_v14  ;;  %v3738_v50 = vadd.f32 %v14851_v49, %v3737_v10  ;;  %vm3739_vm15 = vweird.f32 %v14809_v1  ;;  %5294 = vmatpush.bf16.msra.mxu2 %v12714_v5 }
 0xcfb   : > { %v3938_v32 = vmul.f32 %v3922_v39, %v14777_v19  ;;  %v4029_v20 = vsub.f32 0.0, %v3997_v52  ;;  %v3999_v60 = vsub.f32 1.0, %v14876_v36  ;;  %vm3741_vm1 = vmor %vm3739_vm15, %vm3740_vm13  ;;  %v3746_v62 = vor.u32 1.1754944e-38, %v3745_v16 }
 0xcfc   : > { %v14897_v41 = vadd.f32 1.0, %v3507_v56  ;;  %v3824_v33 = vadd.f32 1.4214138, %v3808_v55  ;;  %v3742_v4 = vsel %vm3741_vm1, %v14851_v49, %v3738_v50  ;;  %vm3744_vm3 = vcmp.eq.f32.partialorder %v3743_v35, 8.507059e+37  ;;  %v12753_v35 = vld [vmem:[#allocation6 + $0x3f8] sm:$0xff]  ;;  %v12736_v55 = vld [vmem:[#allocation6 + $0x370] sm:$0xff] }
 0xcfd   : > { %v4106_v19 = vpack.c.bf16 %v14800_v63, %v14800_v63  ;;  %v14902_v1 = vpop.eup %13342  ;;  %v4091_v25 = vmul.f32 %v14822_v42, %v14625_v18  ;;  %v3964_v34 = vmul.f32 1.442695, %v3936_v30  ;;  %v14906_v26 = vsel %vm3744_vm3, %v3746_v62, %v3742_v4  ;;  %5268 = vmatpush.bf16.msrb.mxu3 %v12698_v58  ;;  %v12724_v58 = vld [vmem:[#allocation6 + $0x310] sm:$0xff] }
 0xcfe   : > { %13344 = vrcp.f32 %v14897_v41  ;;  %5302 = vmatpush.bf16.msrb.mxu0 %v12727_v40  ;;  %v4108_v15 = vpack.c.bf16 %v14881_v59, %v14881_v59  ;;  %v3840_v49 = vmul.f32 %v3824_v33, %v14862_v14  ;;  %v3778_v61 = vmul.f32 1.0614054, %v14906_v26  ;;  %v12743_v40 = vld [vmem:[#allocation6 + $0x3a8] sm:$0xff] }
 0xcff   : > { %v3720_v63 = vmul.f32 %v14902_v1, %v14865_v43  ;;  %5230 = vmatmul.bf16.vlgmr.msrb.gmra.mxu1 %v4106_v19  ;;  %v4078_v18 = vadd.f32 1.0, %v4046_v13  ;;  %v4045_v42 = vsel %vm4013_vm12, %v3997_v52, %v4029_v20  ;;  %v4031_v28 = vsub.f32 0.0, %v3999_v60 }
 0xd00   : > { %v3968_v6 = vmul.f32 1.442695, %v3938_v32  ;;  %5326 = vmatpush.bf16.msrb.mxu1 %v12745_v0  ;;  %v3856_v54 = vadd.f32 -0.28449672, %v3840_v49  ;;  %v3794_v47 = vadd.f32 -1.4531521, %v3778_v61  ;;  %v4105_v12 = vpack.c.bf16 %v14820_v27, %v14820_v27 }
 0xd01   : > { %v3721_v39 = vsub.f32 1.0, %v3720_v63  ;;  %13346 = vpow2.f32 %v3964_v34  ;;  %v3728_v23 = vand.u32 2147483647, %v14865_v43  ;;  %v3730_v48 = vand.u32 2147483648, %v14865_v43  ;;  %v12752_v32 = vld [vmem:[#allocation6 + $0x3f0] sm:$0xff]  ;;  %v12735_v49 = vld [vmem:[#allocation6 + $0x368] sm:$0xff] }
 0xd02   : > { %v4107_v45 = vpack.c.bf16 %v4091_v25, %v4091_v25  ;;  %5303 = vmatpush.bf16.msrb.mxu0 %v12726_v3  ;;  %v3872_v52 = vmul.f32 %v3856_v54, %v14862_v14  ;;  %v3810_v16 = vmul.f32 %v3794_v47, %v14906_v26  ;;  %vm3725_vm4 = vweird.f32 %v14902_v1  ;;  %5217 = vmatmul.bf16.vlgmr.msra.gmra.mxu3 %v4105_v12  ;;  %v12751_v63 = vld [vmem:[#allocation6 + $0x3e8] sm:$0xff] }
 0xd03   : > { %v3722_v5 = vmul.f32 %v14902_v1, %v3721_v39  ;;  %v4077_v36 = vadd.f32 1.0, %v4045_v42  ;;  %v4047_v11 = vsel %vm4015_vm14, %v3999_v60, %v4031_v28  ;;  %vm3724_vm5 = vweird.f32 %v14865_v43  ;;  %5256 = vmatmul.bf16.vlgmr.msra.gmra.mxu0 %v4108_v15  ;;  %5313 = vmatpush.bf16.msra.mxu3 %v12737_v22 }
 0xd04   : > { %v14925_v27 = vpop.eup %13344  ;;  %v3921_v10 = vsub.f32 0.0, %v14843_v24  ;;  %5243 = vmatmul.bf16.vlgmr.msrb.gmra.mxu2 %v4107_v45  ;;  %v3888_v59 = vadd.f32 0.2548296, %v3872_v52  ;;  %v3826_v13 = vadd.f32 1.4214138, %v3810_v16  ;;  %5327 = vmatpush.bf16.msrb.mxu1 %v12744_v7  ;;  %v14935_v57 = vmul.f32 %v4078_v18, %v14796_v31  ;;  %vm3726_vm6 = vmor %vm3724_vm5, %vm3725_vm4  ;;  %v12723_v18 = vld [vmem:[#allocation6 + $0x308] sm:$0xff] }
 0xd05   : > { %v3723_v30 = vadd.f32 %v14902_v1, %v3722_v5  ;;  %v3750_v56 = vmul.f32 %v14925_v27, %v14897_v41  ;;  %vm3729_vm7 = vcmp.eq.f32.partialorder %v3728_v23, 8.507059e+37  ;;  %v3731_v43 = vor.u32 1.1754944e-38, %v3730_v48  ;;  %5339 = vmatpush.bf16.msrb.mxu2 %v12753_v35  ;;  %v12741_v23 = vld [vmem:[#allocation6 + $0x398] sm:$0xff]  ;;  %v12734_v48 = vld [vmem:[#allocation6 + $0x360] sm:$0xff] }
 0xd06   : > { %v3758_v50 = vand.u32 2147483647, %v14897_v41  ;;  %5304 = vmatpush.bf16.msrb.mxu0 %v12725_v46  ;;  %v3904_v20 = vmul.f32 %v3888_v59, %v14862_v14  ;;  %v3842_v60 = vmul.f32 %v3826_v13, %v14906_v26  ;;  %v4079_v33 = vadd.f32 1.0, %v4047_v11  ;;  %v12742_v14 = vld [vmem:[#allocation6 + $0x3a0] sm:$0xff] }
 0xd07   : > { %v3727_v62 = vsel %vm3726_vm6, %v14902_v1, %v3723_v30  ;;  %v3751_v0 = vsub.f32 1.0, %v3750_v56  ;;  %v13347_v31 = vpop.eup %13346  ;;  %vm3755_vm8 = vweird.f32 %v14925_v27  ;;  %v3760_v19 = vand.u32 2147483648, %v14897_v41  ;;  %5314 = vmatpush.bf16.msra.mxu3 %v12736_v55  ;;  %v12750_v35 = vld [vmem:[#allocation6 + $0x3e0] sm:$0xff]  ;;  %v12740_v55 = vld [vmem:[#allocation6 + $0x390] sm:$0xff] }
 0xd08   : > { %v14943_v4 = vsel %vm3729_vm7, %v3731_v43, %v3727_v62  ;;  %v3984_v25 = vmul.f32 %v13347_v31, %v3904_v20  ;;  %v3858_v34 = vadd.f32 -0.28449672, %v3842_v60  ;;  %5328 = vmatpush.bf16.msrb.mxu1 %v12743_v40  ;;  %v4093_v1 = vmul.f32 %v4077_v36, %v14806_v2  ;;  %v12722_v46 = vld [vmem:[#allocation6 + $0x300] sm:$0xff]  ;;  %v12739_v31 = vld [vmem:[#allocation6 + $0x388] sm:$0xff] }
 0xd09   : > { %v3777_v3 = vmul.f32 1.0614054, %v14943_v4  ;;  %v3752_v15 = vmul.f32 %v14925_v27, %v3751_v0  ;;  %13348 = vpow2.f32 %v3968_v6  ;;  %vm3754_vm9 = vweird.f32 %v14897_v41  ;;  %5340 = vmatpush.bf16.msrb.mxu2 %v12752_v32 }
 0xd0a   : > { %v4110_v61 = vpack.c.bf16 %v14935_v57, %v14935_v57  ;;  %5305 = vmatpush.bf16.msrb.mxu0 %v12724_v58  ;;  %v4000_v42 = vsub.f32 1.0, %v3984_v25  ;;  %v3874_v28 = vmul.f32 %v3858_v34, %v14906_v26  ;;  %v4095_v47 = vmul.f32 %v4079_v33, %v14814_v37  ;;  %vm3756_vm10 = vmor %vm3754_vm9, %vm3755_vm8  ;;  %v12733_v57 = vld [vmem:[#allocation6 + $0x358] sm:$0xff]  ;;  %v12732_v33 = vld [vmem:[#allocation6 + $0x350] sm:$0xff] }
 0xd0b   : > { %v3793_v7 = vadd.f32 -1.4531521, %v3777_v3  ;;  %v3753_v54 = vadd.f32 %v14925_v27, %v3752_v15  ;;  %v3937_v2 = vmul.f32 %v3921_v10, %v14843_v24  ;;  %vm3759_vm12 = vcmp.eq.f32.partialorder %v3758_v50, 8.507059e+37  ;;  %5315 = vmatpush.bf16.msra.mxu3 %v12735_v49  ;;  %v12749_v50 = vld [vmem:[#allocation6 + $0x3d8] sm:$0xff] }
 0xd0c   : > { %v3761_v41 = vor.u32 1.1754944e-38, %v3760_v19  ;;  %v4032_v6 = vsub.f32 0.0, %v4000_v42  ;;  %v3890_v39 = vadd.f32 0.2548296, %v3874_v28  ;;  %5329 = vmatpush.bf16.msrb.mxu1 %v12742_v14  ;;  %vm4016_vm13 = vcmp.ge.f32.partialorder %v14734_v44, 0.0  ;;  %v12748_v19 = vld [vmem:[#allocation6 + $0x3d0] sm:$0xff] }
 0xd0d   : > { %v3809_v12 = vmul.f32 %v3793_v7, %v14943_v4  ;;  %v3757_v22 = vsel %vm3756_vm10, %v14925_v27, %v3753_v54  ;;  %v3923_v24 = vsub.f32 0.0, %v14870_v8  ;;  %v4109_v45 = vpack.c.bf16 %v4093_v1, %v4093_v1  ;;  %5341 = vmatpush.bf16.msrb.mxu2 %v12751_v63  ;;  %v12731_v63 = vld [vmem:[#allocation6 + $0x348] sm:$0xff] }
 0xd0e   : > { %v14962_v37 = vsel %vm3759_vm12, %v3761_v41, %v3757_v22  ;;  %5306 = vmatpush.bf16.msrb.mxu0 %v12723_v18  ;;  %v4048_v52 = vsel %vm4016_vm13, %v4000_v42, %v4032_v6  ;;  %v3906_v16 = vmul.f32 %v3890_v39, %v14906_v26  ;;  %v4111_v11 = vpack.c.bf16 %v4095_v47, %v4095_v47  ;;  %v12747_v28 = vld [vmem:[#allocation6 + $0x3c8] sm:$0xff] }
 0xd0f   : > { %v3825_v5 = vadd.f32 1.4214138, %v3809_v12  ;;  %v3779_v27 = vmul.f32 1.0614054, %v14962_v37  ;;  %5282 = vmatmul.bf16.vlgmr.msra.gmra.mxu1 %v4110_v61  ;;  %v13349_v36 = vpop.eup %13348  ;;  %v4064_v10 = vmul.f32 0.5, %v14734_v44  ;;  %v4080_v59 = vadd.f32 1.0, %v4048_v52  ;;  %5316 = vmatpush.bf16.msra.mxu3 %v12734_v48 }
 0xd10   : > { %v3966_v13 = vmul.f32 1.442695, %v3937_v2  ;;  %v3986_v30 = vmul.f32 %v13349_v36, %v3906_v16  ;;  %5330 = vmatpush.bf16.msrb.mxu1 %v12741_v23  ;;  %v3939_v26 = vmul.f32 %v3923_v24, %v14870_v8  ;;  %vm4018_vm14 = vcmp.ge.f32.partialorder %v14757_v51, 0.0  ;;  %v12738_v61 = vld [vmem:[#allocation6 + $0x380] sm:$0xff] }
 0xd11   : > { %v3841_v56 = vmul.f32 %v3825_v5, %v14943_v4  ;;  %v3795_v40 = vadd.f32 -1.4531521, %v3779_v27  ;;  %v4096_v43 = vmul.f32 %v4080_v59, %v4064_v10  ;;  %5342 = vmatpush.bf16.msrb.mxu2 %v12750_v35  ;;  %v4066_v15 = vmul.f32 0.5, %v14757_v51  ;;  %v12730_v51 = vld [vmem:[#allocation6 + $0x340] sm:$0xff] }
 0xd12   : > { %5307 = vmatpush.bf16.msrb.mxu0 %v12722_v46  ;;  %v4002_v32 = vsub.f32 1.0, %v3986_v30  ;;  %5269 = vmatmul.bf16.vlgmr.msrb.gmra.mxu3 %v4109_v45  ;;  %13350 = vpow2.f32 %v3966_v13  ;;  %v3970_v8 = vmul.f32 1.442695, %v3939_v26  ;;  %vm4017_vm15 = vcmp.ge.f32.partialorder %v14817_v21, 0.0  ;;  %v13244_v26 = vld [vmem:[%s15959_s22] ss:$0 sm:$0xff] }
 0xd13   : > { %v3857_v58 = vadd.f32 -0.28449672, %v3841_v56  ;;  %v3811_v44 = vmul.f32 %v3795_v40, %v14962_v37  ;;  %v4112_v20 = vpack.c.bf16 %v4096_v43, %v4096_v43  ;;  %5317 = vmatpush.bf16.msra.mxu3 %v12733_v57  ;;  %v4065_v48 = vmul.f32 0.5, %v14817_v21  ;;  %s15971_s22 = sld [smem:[#allocation36_spill]] }
 0xd14   : > { %5295 = vmatmul.bf16.vlgmr.msra.gmra.mxu2 %v4111_v11  ;;  %v4034_v60 = vsub.f32 0.0, %v4002_v32  ;;  %5331 = vmatpush.bf16.msrb.mxu1 %v12740_v55  ;;  %13352 = vpow2.f32 %v3970_v8  ;;  %vm4019_vm1 = vcmp.ge.f32.partialorder %v14846_v53, 0.0  ;;  %vm5651_vm7 = vcmp.eq.s32.totalorder %v14039_v9, 0 }
 0xd15   : > { %v3873_v62 = vmul.f32 %v3857_v58, %v14943_v4  ;;  %v3827_v0 = vadd.f32 1.4214138, %v3811_v44  ;;  %5343 = vmatpush.bf16.msrb.mxu2 %v12749_v50  ;;  %5308 = vmatmul.bf16.vlgmr.msrb.gmra.mxu0 %v4112_v20  ;;  %vm5655_vm8 = vcmp.eq.s32.totalorder %v14039_v9, 7  ;;  %vm6083_vm10 = vcmask 31744  }
 0xd16   : > { %v4050_v25 = vsel %vm4018_vm14, %v4002_v32, %v4034_v60 }
 0xd17   : > { %v3889_v34 = vadd.f32 0.2548296, %v3873_v62  ;;  %v3843_v3 = vmul.f32 %v3827_v0, %v14962_v37  ;;  %v4082_v14 = vadd.f32 1.0, %v4050_v25  ;;  %5318 = vmatpush.bf16.msra.mxu3 %v12732_v33 }
 0xd18   : > { %5332 = vmatpush.bf16.msrb.mxu1 %v12739_v31  ;;  %v13351_v18 = vpop.eup %13350 }
 0xd19   : > { %v3905_v49 = vmul.f32 %v3889_v34, %v14943_v4  ;;  %v3859_v1 = vadd.f32 -0.28449672, %v3843_v3  ;;  %v4098_v42 = vmul.f32 %v4082_v14, %v4066_v15  ;;  %5344 = vmatpush.bf16.msrb.mxu2 %v12748_v19  ;;  %v12746_v4 = vld [vmem:[#allocation6 + $0x3c0] sm:$0xff] }
 0xd1a   : > { %v13353_v12 = vpop.eup %13352 }
 0xd1b   : > { %v3985_v7 = vmul.f32 %v13351_v18, %v3905_v49  ;;  %v3875_v54 = vmul.f32 %v3859_v1, %v14962_v37  ;;  %v4114_v47 = vpack.c.bf16 %v4098_v42, %v4098_v42  ;;  %5319 = vmatpush.bf16.msra.mxu3 %v12731_v63 }
 0xd1c   : > { %5333 = vmatpush.bf16.msrb.mxu1 %v12738_v61 }
 0xd1d   : > { %v4001_v2 = vsub.f32 1.0, %v3985_v7  ;;  %v3891_v41 = vadd.f32 0.2548296, %v3875_v54  ;;  %5345 = vmatpush.bf16.msrb.mxu2 %v12747_v28 }
 0xd1f   : > { %v4033_v6 = vsub.f32 0.0, %v4001_v2  ;;  %v3907_v39 = vmul.f32 %v3891_v41, %v14962_v37  ;;  %5334 = vmatmul.bf16.vlgmr.msrb.gmra.mxu1 %v4114_v47  ;;  %5320 = vmatpush.bf16.msra.mxu3 %v12730_v51  ;;  %v4067_v37 = vmul.f32 0.5, %v14846_v53 }
 0xd21   : > { %v4049_v22 = vsel %vm4017_vm15, %v4001_v2, %v4033_v6  ;;  %v3987_v23 = vmul.f32 %v13353_v12, %v3907_v39  ;;  %5346 = vmatpush.bf16.msrb.mxu2 %v12746_v4 }
 0xd22   : > { %v4081_v24 = vadd.f32 1.0, %v4049_v22 }
 0xd23   : > { %v4003_v45 = vsub.f32 1.0, %v3987_v23 }
 0xd24   : > { %v4097_v35 = vmul.f32 %v4081_v24, %v4065_v48 }
 0xd25   : > { %v4035_v46 = vsub.f32 0.0, %v4003_v45 }
 0xd26   : > { %v4113_v52 = vpack.c.bf16 %v4097_v35, %v4097_v35  ;;  %v12761_v35 = vld [vmem:[%s15960_s16 + $0x38] sm:$0xff] }
 0xd27   : > { %v4051_v16 = vsel %vm4019_vm1, %v4003_v45, %v4035_v46  ;;  %v12769_v45 = vld [vmem:[%s15960_s16 + $0x78] sm:$0xff]  ;;  %5599 = vmatpush.bf16.msra.mxu0 %v12761_v35  ;;  %v11325_v35 = vld [vmem:[%s15964_s18 + $0x12c] sm:$0xf0] }
 0xd28   : > { %v4083_v5 = vadd.f32 1.0, %v4051_v16  ;;  %5321 = vmatmul.bf16.vlgmr.msra.gmra.mxu3 %v4113_v52  ;;  %v12777_v46 = vld [vmem:[%s15960_s16 + $0xb8] sm:$0xff]  ;;  %v12760_v52 = vld [vmem:[%s15960_s16 + $0x30] sm:$0xff] }
 0xd29   : > { %5612 = vmatpush.bf16.msrb.mxu3 %v12769_v45  ;;  %5625 = vmatpush.bf16.msra.mxu1 %v12777_v46  ;;  %v12776_v16 = vld [vmem:[%s15960_s16 + $0xb0] sm:$0xff]  ;;  %v12813_v45 = vld [vmem:[%s15964_s18 + $0x11c] sm:$0xf]  ;;  %v11331_v46 = vld [vmem:[%s15964_s18 + $0x120] sm:$0xf] }
 0xd2a   : > { %v4099_v27 = vmul.f32 %v4083_v5, %v4067_v37  ;;  %v12767_v37 = vld [vmem:[%s15960_s16 + $0x68] sm:$0xff] }
 0xd2b   : > { %5600 = vmatpush.bf16.msra.mxu0 %v12760_v52  ;;  %v12759_v5 = vld [vmem:[%s15960_s16 + $0x28] sm:$0xff]  ;;  %v12816_v52 = vld [vmem:[%s15964_s18 + $0x130] sm:$0xf0] }
 0xd2c   : > { %v4115_v36 = vpack.c.bf16 %v4099_v27, %v4099_v27  ;;  %v12775_v27 = vld [vmem:[%s15960_s16 + $0xa8] sm:$0xff] }
 0xd2d   : > { %5626 = vmatpush.bf16.msra.mxu1 %v12776_v16  ;;  %v12814_v16 = vld [vmem:[%s15964_s18 + $0x124] sm:$0xf] }
 0xd2e   : > { %5347 = vmatmul.bf16.vlgmr.msrb.gmra.mxu2 %v4115_v36  ;;  %v12766_v36 = vld [vmem:[%s15960_s16 + $0x60] sm:$0xff] }
 0xd2f   : > { %5601 = vmatpush.bf16.msra.mxu0 %v12759_v5  ;;  %v11332_v5 = vor.u32 %v12816_v52, %v11331_v46  ;;  %v11283_v46 = vld [vmem:[%s15964_s18 + $0xc8] sm:$0xf] }
 0xd31   : > { %5627 = vmatpush.bf16.msra.mxu1 %v12775_v27 }
 0xd51   : > { %v5153_v11 = vpop.f32.mrf.mxu0 }
 0xd52   : > { %v5154_v53 = vadd.f32 %v13244_v26, %v5153_v11  ;;  %v12758_v11 = vld [vmem:[%s15960_s16 + $0x20] sm:$0xff]  ;;  %v12763_v26 = vld [vmem:[%s15960_s16 + $0x48] sm:$0xff] }
 0xd53   : > { %5602 = vmatpush.bf16.msra.mxu0 %v12758_v11  ;;  %v11305_v11 = vld [vmem:[%s15964_s18 + $0x104] sm:$0xf0] }
 0xd55   : > { %v5179_v10 = vpop.f32.mrf.mxu1 }
 0xd59   : > { %v5155_v21 = vpop.f32.mrf.mxu0 }
 0xd5a   : > { %v12765_v21 = vld [vmem:[%s15960_s16 + $0x58] sm:$0xff] }
 0xd5d   : > { %v5181_v59 = vpop.f32.mrf.mxu1 }
 0xd5e   : > { %v12757_v59 = vld [vmem:[%s15960_s16 + $0x18] sm:$0xff] }
 0xd5f   : > { %v5192_v13 = vpop.f32.mrf.mxu2  ;;  %5603 = vmatpush.bf16.msra.mxu0 %v12757_v59  ;;  %v12811_v59 = vld [vmem:[%s15964_s18 + $0x108] sm:$0xf0] }
 0xd63   : > { %v5166_v30 = vpop.f32.mrf.mxu3 }
 0xd64   : > { %v5167_v32 = vadd.f32 %v5166_v30, %v5154_v53  ;;  %v12764_v30 = vld [vmem:[%s15960_s16 + $0x50] sm:$0xff] }
 0xd66   : > { %v5180_v60 = vadd.f32 %v5179_v10, %v5167_v32  ;;  %v12774_v10 = vld [vmem:[%s15960_s16 + $0xa0] sm:$0xff]  ;;  %v12755_v32 = vld [vmem:[%s15960_s16 + $0x8] sm:$0xff] }
 0xd67   : > { %v5194_v56 = vpop.f32.mrf.mxu2  ;;  %5628 = vmatpush.bf16.msra.mxu1 %v12774_v10  ;;  %v11311_v10 = vld [vmem:[%s15964_s18 + $0xf8] sm:$0xf] }
 0xd68   : > { %v5193_v0 = vadd.f32 %v5192_v13, %v5180_v60  ;;  %v12773_v13 = vld [vmem:[%s15960_s16 + $0x98] sm:$0xff] }
 0xd6b   : > { %v5168_v40 = vpop.f32.mrf.mxu3  ;;  %5629 = vmatpush.bf16.msra.mxu1 %v12773_v13  ;;  %v12809_v13 = vld [vmem:[%s15964_s18 + $0xfc] sm:$0xf] }
 0xd6c   : > { %v12756_v40 = vld [vmem:[%s15960_s16 + $0x10] sm:$0xff] }
 0xd6d   : > { %5604 = vmatpush.bf16.msra.mxu0 %v12756_v40 }
 0xd70   : > { %v5205_v55 = vpop.f32.mrf.mxu0 }
 0xd71   : > { %v5206_v19 = vadd.f32 %v5205_v55, %v5193_v0  ;;  %v12772_v55 = vld [vmem:[%s15960_s16 + $0x90] sm:$0xff]  ;;  %5605 = vmatpush.bf16.msra.mxu0 %v12755_v32  ;;  %v12770_v0 = vld [vmem:[%s15960_s16 + $0x80] sm:$0xff] }
 0xd72   : > { %5630 = vmatpush.bf16.msra.mxu1 %v12772_v55  ;;  %v11291_v32 = vld [vmem:[%s15964_s18 + $0xd0] sm:$0xf] }
 0xd78   : > { %v5207_v57 = vpop.f32.mrf.mxu0 }
 0xd7c   : > { %v5231_v43 = vpop.f32.mrf.mxu1 }
 0xd80   : > { %v5257_v50 = vpop.f32.mrf.mxu0 }
 0xd84   : > { %v5233_v58 = vpop.f32.mrf.mxu1 }
 0xd85   : > { %v5218_v44 = vpop.f32.mrf.mxu3  ;;  %v12771_v58 = vld [vmem:[%s15960_s16 + $0x88] sm:$0xff] }
 0xd86   : > { %v5219_v25 = vadd.f32 %v5218_v44, %v5206_v19  ;;  %5631 = vmatpush.bf16.msra.mxu1 %v12771_v58  ;;  %v12806_v58 = vld [vmem:[%s15964_s18 + $0xe0] sm:$0xf0] }
 0xd87   : > { %v5244_v20 = vpop.f32.mrf.mxu2 }
 0xd88   : > { %v5259_v62 = vpop.f32.mrf.mxu0  ;;  %v5232_v15 = vadd.f32 %v5231_v43, %v5219_v25 }
 0xd89   : > { %v12754_v62 = vld [vmem:[%s15960_s16] sm:$0xff] }
 0xd8a   : > { %v5245_v1 = vadd.f32 %v5244_v20, %v5232_v15  ;;  %v12762_v20 = vld [vmem:[%s15960_s16 + $0x40] sm:$0xff]  ;;  %5606 = vmatpush.bf16.msra.mxu0 %v12754_v62  ;;  %5632 = vmatpush.bf16.msra.mxu1 %v12770_v0  ;;  %v11293_v62 = vld [vmem:[%s15964_s18 + $0xe4] sm:$0xf0] }
 0xd8b   : > { %v13245_v15 = vld [vmem:[%s15961_s15] ss:$0 sm:$0xff]  ;;  %s15972_s15 = smov %s15971_s22 }
 0xd8c   : > { %v5283_v31 = vpop.f32.mrf.mxu1  ;;  %v5258_v18 = vadd.f32 %v5257_v50, %v5245_v1 }
 0xd8d   : > { %v5220_v33 = vpop.f32.mrf.mxu3 }
 0xd8f   : > { %v5246_v8 = vpop.f32.mrf.mxu2 }
 0xd92   : > { %v5309_v34 = vpop.f32.mrf.mxu0 }
 0xd94   : > { %v5285_v3 = vpop.f32.mrf.mxu1 }
 0xd95   : > { %v5270_v14 = vpop.f32.mrf.mxu3 }
 0xd96   : > { %v5271_v7 = vadd.f32 %v5270_v14, %v5258_v18 }
 0xd97   : > { %v5296_v49 = vpop.f32.mrf.mxu2 }
 0xd98   : > { %v5284_v54 = vadd.f32 %v5283_v31, %v5271_v7 }
 0xd9a   : > { %v5311_v61 = vpop.f32.mrf.mxu0  ;;  %v5297_v2 = vadd.f32 %v5296_v49, %v5284_v54  ;;  %v13246_v49 = vld [vmem:[%s15962_s7] ss:$0 sm:$0xff]  ;;  %s15993_s7 = sld [smem:[#allocation38_spill]] }
 0xd9c   : > { %v5335_v63 = vpop.f32.mrf.mxu1  ;;  %v5310_v41 = vadd.f32 %v5309_v34, %v5297_v2 }
 0xd9d   : > { %v5272_v42 = vpop.f32.mrf.mxu3 }
 0xd9f   : > { %v5298_v28 = vpop.f32.mrf.mxu2 }
 0xda4   : > { %v5337_v47 = vpop.f32.mrf.mxu1 }
 0xda5   : > { %v13247_v47 = vld [vmem:[%s15963_s26] ss:$0 sm:$0xff]  ;;  %s15994_s26 = sld [smem:[#allocation39_spill]] }
 0xdab   : > { %v5322_v51 = vpop.f32.mrf.mxu3 }
 0xdac   : > { %v5323_v4 = vadd.f32 %v5322_v51, %v5310_v41 }
 0xdae   : > { %v5336_v6 = vadd.f32 %v5335_v63, %v5323_v4 }
 0xdb1   : > { %v5348_v39 = vpop.f32.mrf.mxu2 }
 0xdb2   : > { %v5349_v12 = vadd.f32 %v5348_v39, %v5336_v6 }
 0xdb3   : > { %v5324_v22 = vpop.f32.mrf.mxu3 }
 0xdb4   : > { %v14984_v23 = vadd.f32 %v5349_v12, %v14276_v38  ;;  %v12768_v38 = vld [vmem:[%s15960_s16 + $0x70] sm:$0xff] }
 0xdb5   : > { %5613 = vmatpush.bf16.msrb.mxu3 %v12768_v38  ;;  %v11328_v38 = vor.u32 %v12813_v45, %v11325_v35  ;;  %v12791_v45 = vld [vmem:[%s15964_s18 + $0x68] sm:$0xf0] }
 0xdb6   : > { %5355 = vadd.xlane.f32.xlu0 %v14984_v23  ;;  %v5358_v48 = vmul.f32 %v14984_v23, %v14984_v23 }
 0xdb7   : > { %5966 = vmatpush.bf16.msrb.mxu0 %v11328_v38 }
 0xdb8   : > { %5359 = vadd.xlane.f32.xlu2 %v5358_v48 }
 0xdb9   : > { %v5350_v24 = vpop.f32.mrf.mxu2  ;;  %5614 = vmatpush.bf16.msrb.mxu3 %v12767_v37  ;;  %v11333_v37 = vld [vmem:[%s15964_s18 + $0x134] sm:$0xf0] }
 0xdba   : > { %v11336_v27 = vor.u32 %v12814_v16, %v11333_v37  ;;  %v12789_v16 = vld [vmem:[%s15964_s18 + $0x5c] sm:$0xf]  ;;  %v11233_v37 = vld [vmem:[%s15964_s18 + $0x6c] sm:$0xf0] }
 0xdbc   : > { %5992 = vmatpush.bf16.msrb.mxu1 %v11336_v27  ;;  %v11236_v27 = vor.u32 %v12789_v16, %v11233_v37  ;;  %v15110_v16 = vld [vmem:[%s15965_s11] sm:$0x1f]  ;;  %s15995_s11 = sld [smem:[#allocation40_spill]] }
 0xdbd   : > { %5615 = vmatpush.bf16.msrb.mxu3 %v12766_v36  ;;  %v12808_v36 = vld [vmem:[%s15964_s18 + $0xf4] sm:$0xf]  ;;  %v5736_v37 = vperm.slane %v15110_v16, 1 }
 0xdc1   : > { %5616 = vmatpush.bf16.msrb.mxu3 %v12765_v21  ;;  %v11308_v21 = vor.u32 %v12808_v36, %v11305_v11  ;;  %v12783_v36 = vld [vmem:[%s15964_s18 + $0x2c] sm:$0xf]  ;;  %v11205_v11 = vld [vmem:[%s15964_s18 + $0x3c] sm:$0xf0] }
 0xdc3   : > { %5967 = vmatpush.bf16.msrb.mxu0 %v11308_v21  ;;  %v12786_v21 = vld [vmem:[%s15964_s18 + $0x40] sm:$0xf0] }
 0xdc5   : > { %5617 = vmatpush.bf16.msrb.mxu3 %v12764_v30  ;;  %v11313_v30 = vld [vmem:[%s15964_s18 + $0x10c] sm:$0xf0] }
 0xdc6   : > { %v11316_v40 = vor.u32 %v12809_v13, %v11313_v30  ;;  %v11208_v13 = vor.u32 %v12783_v36, %v11205_v11  ;;  %v11213_v30 = vld [vmem:[%s15964_s18 + $0x44] sm:$0xf0] }
 0xdc8   : > { %5993 = vmatpush.bf16.msrb.mxu1 %v11316_v40 }
 0xdc9   : > { %5618 = vmatpush.bf16.msrb.mxu3 %v12763_v26  ;;  %v12803_v26 = vld [vmem:[%s15964_s18 + $0xcc] sm:$0xf] }
 0xdcd   : > { %5619 = vmatpush.bf16.msrb.mxu3 %v12762_v20 }
 0xdd1   : > { %5979 = vmatpush.bf16.msra.mxu3 %v11332_v5  ;;  %v12805_v5 = vld [vmem:[%s15964_s18 + $0xd8] sm:$0xf0] }
 0xe29   : > { %v5356_v56 = vpop.xlane.xlu0 %5355 }
 0xe2a   : > { %v5357_v57 = vmul.f32 0.007936508, %v5356_v56  ;;  %v11312_v56 = vor.u32 %v12811_v59, %v11311_v10  ;;  %v11211_v10 = vld [vmem:[%s15964_s18 + $0x30] sm:$0xf]  ;;  %v12784_v59 = vld [vmem:[%s15964_s18 + $0x34] sm:$0xf] }
 0xe2b   : > { %v5360_v43 = vpop.xlane.xlu2 %5359  ;;  %v11212_v40 = vor.u32 %v12786_v21, %v11211_v10  ;;  %v5735_v21 = vperm.slane %v15110_v16, 0 }
 0xe2c   : > { %v5362_v50 = vmul.f32 %v5357_v57, %v5357_v57  ;;  %v5361_v53 = vmul.f32 0.007936508, %v5360_v43  ;;  %v5364_v3 = vsub.f32 %v14984_v23, %v5357_v57  ;;  %v5387_v57 = vmul.u32 2, %v14039_v9  ;;  %5980 = vmatpush.bf16.msra.mxu3 %v11312_v56  ;;  %v11253_v9 = vld [vmem:[%s15964_s18 + $0x94] sm:$0xf0] }
 0xe2d   : > { %v11284_v56 = vor.u32 %v12805_v5, %v11283_v46  ;;  %v5738_v5 = vperm.slane %v15110_v16, 3 }
 0xe2e   : > { %v5363_v44 = vsub.f32 %v5361_v53, %v5362_v50  ;;  %v11285_v50 = vld [vmem:[%s15964_s18 + $0xdc] sm:$0xf0]  ;;  %vm5388_vm9 = vcmp.eq.s32.totalorder %v14048_v17, %v5387_v57  ;;  %v12800_v57 = vld [vmem:[%s15964_s18 + $0xb0] sm:$0xf0] }
 0xe2f   : > { %v11288_v53 = vor.u32 %v12803_v26, %v11285_v50  ;;  %v11243_v50 = vld [vmem:[%s15964_s18 + $0x78] sm:$0xf] }
 0xe30   : > { %v5365_v60 = vadd.f32 1e-05, %v5363_v44  ;;  %v12804_v44 = vld [vmem:[%s15964_s18 + $0xd4] sm:$0xf] }
 0xe31   : > { %5968 = vmatpush.bf16.msrb.mxu0 %v11288_v53  ;;  %v12795_v53 = vld [vmem:[%s15964_s18 + $0x88] sm:$0xf0] }
 0xe32   : > { %13354 = vrsqrt.f32 %v5365_v60  ;;  %vm5372_vm4 = vweird.f32 %v5365_v60 }
 0xe38   : > { %v13355_v31 = vpop.eup %13354 }
 0xe39   : > { %v5367_v33 = vmul.f32 %v13355_v31, %v5365_v60  ;;  %vm5373_vm3 = vweird.f32 %v13355_v31  ;;  %v11292_v60 = vor.u32 %v12806_v58, %v11291_v32  ;;  %v11244_v32 = vor.u32 %v12795_v53, %v11243_v50  ;;  %v11223_v58 = vld [vmem:[%s15964_s18 + $0x50] sm:$0xf] }
 0xe3a   : > { %vm5374_vm5 = vmor %vm5372_vm4, %vm5373_vm3 }
 0xe3b   : > { %v5368_v8 = vmul.f32 %v13355_v31, %v5367_v33  ;;  %v11323_v33 = vld [vmem:[%s15964_s18 + $0x118] sm:$0xf]  ;;  %5981 = vmatpush.bf16.msra.mxu3 %v11292_v60  ;;  %v11203_v60 = vld [vmem:[%s15964_s18 + $0x28] sm:$0xf] }
 0xe3d   : > { %v5369_v19 = vmul.f32 0.5, %v5368_v8  ;;  %v12815_v8 = vld [vmem:[%s15964_s18 + $0x128] sm:$0xf0] }
 0xe3f   : > { %v5370_v25 = vsub.f32 1.5, %v5369_v19  ;;  %v11296_v19 = vor.u32 %v12804_v44, %v11293_v62  ;;  %v12790_v44 = vld [vmem:[%s15964_s18 + $0x60] sm:$0xf0]  ;;  %v12785_v62 = vld [vmem:[%s15964_s18 + $0x38] sm:$0xf0] }
 0xe41   : > { %v5371_v34 = vmul.f32 %v13355_v31, %v5370_v25  ;;  %v12798_v25 = vld [vmem:[%s15964_s18 + $0xa4] sm:$0xf]  ;;  %5994 = vmatpush.bf16.msrb.mxu1 %v11296_v19  ;;  %v12817_v19 = vld [vmem:[%s15964_s18 + $0x138] sm:$0xf0] }
 0xe43   : > { %v5375_v14 = vsel %vm5374_vm5, %v13355_v31, %v5371_v34  ;;  %v11265_v34 = vld [vmem:[%s15964_s18 + $0xb4] sm:$0xf0] }
 0xe44   : > { %v5376_v1 = vmul.f32 %v5375_v14, %v5364_v3  ;;  %v11271_v3 = vld [vmem:[%s15964_s18 + $0xa8] sm:$0xf]  ;;  %v11268_v14 = vor.u32 %v12798_v25, %v11265_v34 }
 0xe46   : > { %v5380_v61 = vmul.f32 %v13245_v15, %v5376_v1  ;;  %v12799_v1 = vld [vmem:[%s15964_s18 + $0xac] sm:$0xf]  ;;  %5969 = vmatpush.bf16.msrb.mxu0 %v11268_v14 }
 0xe48   : > { %v5384_v63 = vadd.f32 %v13246_v49, %v5380_v61  ;;  %v12801_v49 = vld [vmem:[%s15964_s18 + $0xb8] sm:$0xf0]  ;;  %v11273_v61 = vld [vmem:[%s15964_s18 + $0xbc] sm:$0xf0] }
 0xe49   : > { %v11276_v17 = vor.u32 %v12799_v1, %v11273_v61  ;;  %v12807_v1 = vld [vmem:[%s15964_s18 + $0xe8] sm:$0xf0] }
 0xe4a   : > { %v5450_v18 = vpack.c.bf16 %v5384_v63, %v5384_v63  ;;  %v5441_v42 = vrot.slane %v5384_v63, 7  ;;  %v5445_v28 = vrot.slane %v5384_v63, 1 }
 0xe4b   : > { %5995 = vmatpush.bf16.msrb.mxu1 %v11276_v17  ;;  %v11191_v17 = vld [vmem:[%s15964_s18 + $0x8] sm:$0xf] }
 0xe4c   : > { %5620 = vmatmul.bf16.vlgmr.msrb.gmra.mxu3 %v5450_v18  ;;  %v5449_v7 = vpack.c.bf16 %v5441_v42, %v5441_v42  ;;  %v5451_v54 = vpack.c.bf16 %v5445_v28, %v5445_v28  ;;  %v11272_v18 = vor.u32 %v12801_v49, %v11271_v3  ;;  %v11082_v42 = vsel %vm5388_vm9, 1.0, %v13703_v29  ;;  %v12796_v29 = vld [vmem:[%s15964_s18 + $0x90] sm:$0xf0]  ;;  %v11319_v3 = vld [vmem:[%s15964_s18 + $0x100] sm:$0xf] }
 0xe4d   : > { %v11299_v49 = vld [vmem:[%s15964_s18 + $0xd8] sm:$0xf] }
 0xe4e   : > { %5607 = vmatmul.bf16.vlgmr.msra.gmra.mxu0 %v5449_v7  ;;  %5633 = vmatmul.bf16.vlgmr.msra.gmra.mxu1 %v5451_v54  ;;  %v11303_v7 = vld [vmem:[%s15964_s18 + $0xf0] sm:$0xf]  ;;  %v12810_v54 = vld [vmem:[%s15964_s18 + $0x100] sm:$0xf0]  ;;  %v11300_v61 = vor.u32 %v12807_v1, %v11299_v49 }
 0xe4f   : > { %5982 = vmatpush.bf16.msra.mxu3 %v11272_v18  ;;  %v11304_v35 = vor.u32 %v12810_v54, %v11303_v7  ;;  %v11185_v18 = vld [vmem:[%s15964_s18 + $0x14] sm:$0xf0]  ;;  %v12779_v7 = vld [vmem:[%s15964_s18 + $0xc] sm:$0xf]  ;;  %v11193_v54 = vld [vmem:[%s15964_s18 + $0x1c] sm:$0xf0] }
 0xecb   : > { %v5608_v2 = vpop.f32.mrf.mxu0  ;;  %v5634_v41 = vpop.f32.mrf.mxu1 }
 0xecc   : > { %v5609_v51 = vadd.f32 %v13247_v47, %v5608_v2  ;;  %v11324_v2 = vor.u32 %v12815_v8, %v11323_v33  ;;  %v12780_v33 = vld [vmem:[%s15964_s18 + $0x10] sm:$0xf0]  ;;  %v11339_v8 = vld [vmem:[%s15964_s18 + $0x128] sm:$0xf] }
 0xecd   : > { %v11340_v34 = vor.u32 %v12817_v19, %v11339_v8 }
 0xecf   : > { %v5621_v4 = vpop.f32.mrf.mxu3 }
 0xed0   : > { %v5622_v6 = vadd.f32 %v5621_v4, %v5609_v51  ;;  %v11245_v51 = vld [vmem:[%s15964_s18 + $0x8c] sm:$0xf0]  ;;  %v11251_v4 = vld [vmem:[%s15964_s18 + $0x80] sm:$0xf] }
 0xed2   : > { %v5635_v39 = vadd.f32 %v5634_v41, %v5622_v6  ;;  %v12793_v41 = vld [vmem:[%s15964_s18 + $0x7c] sm:$0xf] }
 0xed3   : > { %v5610_v12 = vpop.f32.mrf.mxu0  ;;  %v5636_v22 = vpop.f32.mrf.mxu1  ;;  %v11248_v6 = vor.u32 %v12793_v41, %v11245_v51  ;;  %v11279_v41 = vld [vmem:[%s15964_s18 + $0xb0] sm:$0xf]  ;;  %v12802_v51 = vld [vmem:[%s15964_s18 + $0xc0] sm:$0xf0] }
 0xed4   : > { %v5639_v23 = vmin.f32 %v5635_v39, 0.0  ;;  %vm5638_vm6 = vcmp.gt.f32.partialorder %v5635_v39, 0.0  ;;  %v11252_v12 = vor.u32 %v12796_v29, %v11251_v4  ;;  %v11280_v4 = vor.u32 %v12802_v51, %v11279_v41  ;;  %v12797_v29 = vld [vmem:[%s15964_s18 + $0x98] sm:$0xf0] }
 0xed5   : > { %5970 = vmatpush.bf16.msrb.mxu0 %v11248_v6  ;;  %v11259_v6 = vld [vmem:[%s15964_s18 + $0x88] sm:$0xf] }
 0xed6   : > { %v5640_v48 = vmul.f32 1.442695, %v5639_v23  ;;  %v12788_v23 = vld [vmem:[%s15964_s18 + $0x54] sm:$0xf]  ;;  %5983 = vmatpush.bf16.msra.mxu3 %v11252_v12 }
 0xed7   : > { %v5623_v24 = vpop.f32.mrf.mxu3  ;;  %v12792_v12 = vld [vmem:[%s15964_s18 + $0x70] sm:$0xf0] }
 0xed8   : > { %13356 = vpow2.f32 %v5640_v48  ;;  %v11225_v48 = vld [vmem:[%s15964_s18 + $0x64] sm:$0xf0]  ;;  %v11231_v24 = vld [vmem:[%s15964_s18 + $0x58] sm:$0xf] }
 0xed9   : > { %v11228_v38 = vor.u32 %v12788_v23, %v11225_v48  ;;  %v11232_v52 = vor.u32 %v12791_v45, %v11231_v24  ;;  %v11219_v23 = vld [vmem:[%s15964_s18 + $0x38] sm:$0xf]  ;;  %v12787_v48 = vld [vmem:[%s15964_s18 + $0x48] sm:$0xf0]  ;;  %v11199_v45 = vld [vmem:[%s15964_s18 + $0x10] sm:$0xf] }
 0xeda   : > { %v11220_v24 = vor.u32 %v12787_v48, %v11219_v23 }
 0xedb   : > { %5971 = vmatpush.bf16.msrb.mxu0 %v11228_v38  ;;  %5984 = vmatpush.bf16.msra.mxu3 %v11232_v52 }
 0xede   : > { %v13357_v55 = vpop.eup %13356 }
 0xedf   : > { %v11179_v43 = vadd.f32 -1.0, %v13357_v55  ;;  %v11263_v55 = vld [vmem:[%s15964_s18 + $0xa0] sm:$0xf]  ;;  %5972 = vmatpush.bf16.msrb.mxu0 %v11208_v13  ;;  %5985 = vmatpush.bf16.msra.mxu3 %v11212_v40 }
 0xee0   : > { %v11264_v26 = vor.u32 %v12800_v57, %v11263_v55 }
 0xee1   : > { %v5643_v20 = vsel %vm5638_vm6, %v5635_v39, %v11179_v43  ;;  %v12794_v39 = vld [vmem:[%s15964_s18 + $0x84] sm:$0xf]  ;;  %v11216_v43 = vor.u32 %v12784_v59, %v11213_v30 }
 0xee2   : > { %v5645_v0 = vrot.slane %v5643_v20, 7  ;;  %v5648_v31 = vrot.slane %v5643_v20, 1  ;;  %v11256_v22 = vor.u32 %v12794_v39, %v11253_v9  ;;  %v11260_v39 = vor.u32 %v12797_v29, %v11259_v6  ;;  %v11239_v9 = vld [vmem:[%s15964_s18 + $0x60] sm:$0xf] }
 0xee3   : > { %v12818_v6 = vld [vmem:[%s15967_s1] sm:$0xff] }
 0xee4   : > { %v5654_v15 = vsel %vm5651_vm7, %v5643_v20, %v5645_v0  ;;  %v5658_v28 = vsel %vm5655_vm8, %v5643_v20, %v5648_v31  ;;  %5996 = vmatpush.bf16.msrb.mxu1 %v11256_v22  ;;  %v11204_v0 = vor.u32 %v12785_v62, %v11203_v60  ;;  %v11183_v31 = vld [vmem:[%s15964_s18] sm:$0xf]  ;;  %v11240_v22 = vor.u32 %v12792_v12, %v11239_v9 }
 0xee5   : > { %v5659_v63 = vmax.f32 %v5654_v15, %v5643_v20  ;;  %v11224_v20 = vor.u32 %v12790_v44, %v11223_v58  ;;  %v11184_v25 = vor.u32 %v12780_v33, %v11183_v31  ;;  %v12812_v15 = vld [vmem:[%s15964_s18 + $0x110] sm:$0xf0]  ;;  %v5737_v58 = vperm.slane %v15110_v16, 2 }
 0xee6   : > { %v11320_v14 = vor.u32 %v12812_v15, %v11319_v3 }
 0xee7   : > { %v5660_v47 = vmax.f32 %v5659_v63, %v5658_v28  ;;  %v12778_v63 = vld [vmem:[%s15964_s18 + $0x4] sm:$0xf]  ;;  %v12781_v28 = vld [vmem:[%s15964_s18 + $0x18] sm:$0xf0] }
 0xee8   : > { %5997 = vmatpush.bf16.msrb.mxu1 %v11236_v27 }
 0xee9   : > { %5679 = vmatpush.msra.mxu2 %v5660_v47  ;;  %v11192_v47 = vor.u32 %v12781_v28, %v11191_v17  ;;  %v12820_v17 = vld [vmem:[%s15967_s1 + $0x10] sm:$0xff] }
 0xeea   : > { %11180 = vmatmul.msk.f32.vlgmr.msra.gmra.mxu2 %vm1297_vm2, %v11082_v42  ;;  %v11188_v42 = vor.u32 %v12778_v63, %v11185_v18  ;;  %vm6071_vm2 = vcmask 27648   ;;  %v12821_v18 = vld [vmem:[%s15966_s28 + $0x18] sm:$0xff]  ;;  %s15996_s28 = sld [smem:[#allocation41_spill]] }
 0xeeb   : > { %5953 = vmatpush.bf16.msrb.mxu2 %v11324_v2  ;;  %v11196_v2 = vor.u32 %v12779_v7, %v11193_v54  ;;  %5986 = vmatpush.bf16.msra.mxu3 %v11192_v47 }
 0xeec   : > { %5998 = vmatpush.bf16.msrb.mxu1 %v11216_v43  ;;  %5973 = vmatpush.bf16.msrb.mxu0 %v11188_v42 }
 0xeef   : > { %5954 = vmatpush.bf16.msrb.mxu2 %v11304_v35  ;;  %v12782_v35 = vld [vmem:[%s15964_s18 + $0x20] sm:$0xf0] }
 0xef0   : > { %5999 = vmatpush.bf16.msrb.mxu1 %v11196_v2  ;;  %v11200_v46 = vor.u32 %v12782_v35, %v11199_v45 }
 0xef3   : > { %5955 = vmatpush.bf16.msrb.mxu2 %v11284_v56 }
 0xef7   : > { %5956 = vmatpush.bf16.msrb.mxu2 %v11264_v26 }
 0xefb   : > { %5957 = vmatpush.bf16.msrb.mxu2 %v11244_v32 }
 0xeff   : > { %5958 = vmatpush.bf16.msrb.mxu2 %v11224_v20 }
 0xf03   : > { %5959 = vmatpush.bf16.msrb.mxu2 %v11204_v0 }
 0xf07   : > { %5960 = vmatpush.bf16.msrb.mxu2 %v11184_v25 }
 0xf0b   : > { %6005 = vmatpush.bf16.msra.mxu2 %v11340_v34 }
 0xf0f   : > { %6006 = vmatpush.bf16.msra.mxu2 %v11320_v14 }
 0xf13   : > { %6007 = vmatpush.bf16.msra.mxu2 %v11300_v61 }
 0xf17   : > { %6008 = vmatpush.bf16.msra.mxu2 %v11280_v4  ;;  %v12819_v4 = vld [vmem:[%s15967_s1 + $0x8] sm:$0xff] }
 0xf1b   : > { %6009 = vmatpush.bf16.msra.mxu2 %v11260_v39 }
 0xf1f   : > { %6010 = vmatpush.bf16.msra.mxu2 %v11240_v22 }
 0xf23   : > { %6011 = vmatpush.bf16.msra.mxu2 %v11220_v24 }
 0xf27   : > { %6012 = vmatpush.bf16.msra.mxu2 %v11200_v46 }
 0xf6d   : > { %v15105_v38 = vpop.f32.mrf.mxu2 }
 0xf6e   : > { %v5684_v52 = vpack.c.bf16 %v15105_v38, %v15105_v38 }
 0xf70   : > { %5961 = vmatmul.bf16.vlgmr.msrb.gmra.mxu2 %v5684_v52  ;;  %5974 = vmatmul.bf16.vlgmr.msrb.gmra.mxu0 %v5684_v52 }
 0xf71   : > { %5987 = vmatmul.bf16.vlgmr.msra.gmra.mxu3 %v5684_v52  ;;  %6000 = vmatmul.bf16.vlgmr.msrb.gmra.mxu1 %v5684_v52 }
 0xf80   : > { %6013 = vmatmul.bf16.vlgmr.msra.gmra.mxu2 %v5684_v52 }
 0xfed   : > { %v5975_v27 = vpop.f32.mrf.mxu0 }
 0xfee   : > { %v15114_v36 = vadd.f32 %v5975_v27, %v5736_v37  ;;  %v6001_v11 = vpop.f32.mrf.mxu1 }
 0xfef   : > { %v15116_v10 = vadd.f32 %v6001_v11, %v5738_v5 }
 0xff0   : > { %6043 = vrot.lane.b32.xlu0 %v15114_v36, %s13705_s4  ;;  %6113 = vrot.lane.b32.xlu1 %v15114_v36, %s13704_s2 }
 0xff1   : > { %11343 = vmatpush.msk.msrb.mxu3 %vm1269_vm0, %v15116_v10 }
 0xff3   : > { %v5962_v59 = vpop.f32.mrf.mxu2  ;;  %6200 = vmatpush.bf16.msra.mxu3 %v12821_v18 }
 0xff4   : > { %v5963_v13 = vadd.f32 %v5962_v59, %v5735_v21  ;;  %v5988_v30 = vpop.f32.mrf.mxu3 }
 0xff5   : > { %v5977_v56 = vpop.f32.mrf.mxu0  ;;  %v5989_v44 = vadd.f32 %v5988_v30, %v5737_v58 }
 0xff6   : > { %v6003_v40 = vpop.f32.mrf.mxu1  ;;  %6111 = vrot.lane.b32.xlu2 %v5963_v13, %s13706_s12 }
 0xff7   : > { %6201 = vmatpush.bf16.msra.mxu3 %v12820_v17  ;;  %v5739_v17 = vperm.slane %v15110_v16, 4 }
 0xff8   : > { %6151 = vrot.lane.b32.xlu0 %v15116_v10, %s13706_s12 }
 0xffb   : > { %v5964_v55 = vpop.f32.mrf.mxu2 }
 0xffc   : > { %v5990_v57 = vpop.f32.mrf.mxu3 }
0x1003   : > { %v15128_v43 = vpop.f32.mrf.mxu2 }
0x100b   : > { %v6016_v26 = vpop.f32.mrf.mxu2 }
0x1050   : > { %v6112_v32 = vpop.permute.xlu2 %6111 }
0x1062   : > { %v6044_v50 = vpop.permute.xlu0 %6043  ;;  %v6114_v53 = vpop.permute.xlu1 %6113 }
0x1063   : > { %11341 = vmatpush.xpose.msk.msra.mxu0 %vm1844_vm11, %v6044_v50  ;;  %11345 = vmatpush.xpose.msk.msra.mxu1 %vm1844_vm11, %v6114_v53 }
0x1066   : > { %11342 = vmatmul.msk.f32.vlgmr.msra.gmra.mxu0 %vm1844_vm11, %v5963_v13  ;;  %11346 = vmatmul.msk.f32.vlgmr.msra.gmra.mxu1 %vm1844_vm11, %v6112_v32 }
0x1067   : > { %6228 = vmatpush.bf16.msrb.mxu1 %v12819_v4 }
0x106a   : > { %v6152_v20 = vpop.permute.xlu0 %6151 }
0x106b   : > { %11347 = vmatpush.msk.msrb.mxu0 %vm1269_vm0, %v6152_v20  ;;  %6229 = vmatpush.bf16.msrb.mxu1 %v12818_v6 }
0x106d   : > { %11367 = vmatpush.xpose.msk.msra.mxu0 %vm1844_vm11, %v5989_v44 }
0x10e3   : > { %v6067_v60 = vpop.f32.mrf.mxu0  ;;  %v6136_v62 = vpop.f32.mrf.mxu1 }
0x10e4   : > { %v6070_v0 = vmul.f32 0.2182179, %v6067_v60  ;;  %v6139_v31 = vmul.f32 0.2182179, %v6136_v62 }
0x10e6   : > { %v6140_v33 = vsel %vm6071_vm2, %v6139_v31, -inf  ;;  %v6072_v8 = vsel %vm6071_vm2, %v6070_v0, -inf }
0x10e7   : > { %6141 = vmax.xlane.f32.xlu2 %v6140_v33  ;;  %6073 = vmax.xlane.f32.xlu0 %v6072_v8 }
0x10fb   : > { %6235 = vrot.lane.b32.xlu0 %v5963_v13, %s13705_s4 }
0x1103   : > { %6524 = vrot.lane.b32.xlu0 %v5989_v44, %s13704_s2 }
0x115a   : > { %v6142_v19 = vpop.xlane.xlu2 %6141  ;;  %v6074_v25 = vpop.xlane.xlu0 %6073 }
0x115b   : > { %v6143_v34 = vsub.f32 %v6139_v31, %v6142_v19  ;;  %v6075_v3 = vsub.f32 %v6070_v0, %v6074_v25 }
0x115d   : > { %v6144_v15 = vmul.f32 1.442695, %v6143_v34  ;;  %v6076_v14 = vmul.f32 1.442695, %v6075_v3 }
0x115f   : > { %13358 = vpow2.f32 %v6144_v15 }
0x1160   : > { %13360 = vpow2.f32 %v6076_v14 }
0x1165   : > { %v13359_v49 = vpop.eup %13358 }
0x1166   : > { %v13361_v1 = vpop.eup %13360  ;;  %v6146_v61 = vsel %vm6071_vm2, %v13359_v49, 0.0 }
0x1167   : > { %6147 = vadd.xlane.f32.xlu1 %v6146_v61  ;;  %v6078_v63 = vsel %vm6071_vm2, %v13361_v1, 0.0 }
0x1168   : > { %6079 = vadd.xlane.f32.xlu2 %v6078_v63 }
0x116d   : > { %v6236_v41 = vpop.permute.xlu0 %6235 }
0x1175   : > { %v6525_v35 = vpop.permute.xlu0 %6524 }
0x1180   : > { %6331 = vrot.lane.b32.xlu2 %v5963_v13, %s13704_s2  ;;  %6333 = vrot.lane.b32.xlu1 %v5989_v44, %s13706_s12 }
0x1188   : > { %6522 = vrot.lane.b32.xlu2 %v15114_v36, %s13706_s12  ;;  %6428 = vrot.lane.b32.xlu1 %v5989_v44, %s13705_s4 }
0x11da   : > { %v6148_v42 = vpop.xlane.xlu1 %6147 }
0x11db   : > { %13362 = vrcp.f32 %v6148_v42  ;;  %v6080_v28 = vpop.xlane.xlu2 %6079  ;;  %v6015_v42 = vadd.f32 %v15128_v43, %v5739_v17  ;;  %v12919_v17 = vld [vmem:[#allocation8 + $0x2c4] sm:$0xf0] }
0x11dc   : > { %13364 = vrcp.f32 %v6080_v28  ;;  %v12823_v28 = vld [vmem:[%s15967_s1 + $0x28] sm:$0xff] }
0x11e1   : > { %v13363_v7 = vpop.eup %13362 }
0x11e2   : > { %v13365_v54 = vpop.eup %13364  ;;  %v6150_v47 = vmul.f32 %v13363_v7, %v13359_v49 }
0x11e3   : > { %v6082_v2 = vmul.f32 %v13365_v54, %v13361_v1  ;;  %v6332_v45 = vpop.permute.xlu2 %6331 }
0x11e4   : > { %11348 = vmatmul.msk.f32.vlgmr.msrb.gmra.mxu0 %vm6083_vm10, %v6150_v47 }
0x11e5   : > { %11344 = vmatmul.msk.f32.vlgmr.msrb.gmra.mxu3 %vm6083_vm10, %v6082_v2  ;;  %6323 = vmatpush.bf16.msrb.mxu0 %v12823_v28  ;;  %v11751_v28 = vld [vmem:[#allocation8 + $0x2c8] sm:$0xf0] }
0x11eb   : > { %v6523_v46 = vpop.permute.xlu2 %6522 }
0x11ec   : > { %11368 = vmatmul.msk.f32.vlgmr.msra.gmra.mxu0 %vm1844_vm11, %v6236_v41  ;;  %v12825_v41 = vld [vmem:[%s15967_s1 + $0x38] sm:$0xff] }
0x11f2   : > { %v6334_v51 = vpop.permute.xlu1 %6333 }
0x11f3   : > { %11380 = vmatpush.xpose.msk.msrb.mxu3 %vm1844_vm11, %v6334_v51 }
0x11fa   : > { %v6429_v9 = vpop.permute.xlu1 %6428 }
0x1261   : > { %v6175_v29 = vpop.f32.mrf.mxu0 }
0x1262   : > { %v6178_v39 = vpack.c.bf16 %v6175_v29, %v6175_v29 }
0x1264   : > { %11357 = vmatmul.msk.bf16.vlgmr.msra.gmra.mxu3 %vm1844_vm11, %v6178_v39 }
0x1265   : > { %11393 = vmatpush.xpose.msk.msra.mxu3 %vm1844_vm11, %v6429_v9 }
0x1268   : > { %v6107_v12 = vpop.f32.mrf.mxu3 }
0x1269   : > { %v6110_v22 = vpack.c.bf16 %v6107_v12, %v6107_v12  ;;  %v6259_v23 = vpop.f32.mrf.mxu0 }
0x126a   : > { %v6262_v48 = vmul.f32 0.2182179, %v6259_v23  ;;  %v12827_v23 = vld [vmem:[%s15967_s1 + $0x48] sm:$0xff] }
0x126b   : > { %11366 = vmatmul.msk.bf16.vlgmr.msrb.gmra.mxu1 %vm1844_vm11, %v6110_v22  ;;  %v12824_v22 = vld [vmem:[%s15967_s1 + $0x30] sm:$0xff] }
0x126c   : > { %v6263_v24 = vsel %vm6071_vm2, %v6262_v48, -inf }
0x126d   : > { %6264 = vmax.xlane.f32.xlu1 %v6263_v24  ;;  %v12829_v24 = vld [vmem:[%s15967_s1 + $0x58] sm:$0xff] }
0x1274   : > { %11381 = vmatmul.msk.f32.vlgmr.msrb.gmra.mxu3 %vm1844_vm11, %v6332_v45  ;;  %v12828_v45 = vld [vmem:[%s15967_s1 + $0x50] sm:$0xff] }
0x1275   : > { %11406 = vmatpush.xpose.msk.msrb.mxu3 %vm1844_vm11, %v6525_v35 }
0x127c   : > { %11394 = vmatmul.msk.f32.vlgmr.msra.gmra.mxu3 %vm1844_vm11, %v15114_v36 }
0x1284   : > { %11407 = vmatmul.msk.f32.vlgmr.msrb.gmra.mxu3 %vm1844_vm11, %v6523_v46 }
0x12e0   : > { %v6265_v21 = vpop.xlane.xlu1 %6264 }
0x12e1   : > { %v6266_v30 = vsub.f32 %v6262_v48, %v6265_v21  ;;  %v12826_v48 = vld [vmem:[%s15967_s1 + $0x40] sm:$0xff] }
0x12e3   : > { %v6267_v40 = vmul.f32 1.442695, %v6266_v30  ;;  %v11869_v30 = vld [vmem:[#allocation8 + $0x380] sm:$0xf] }
0x12e5   : > { %13366 = vpow2.f32 %v6267_v40  ;;  %v12942_v40 = vld [vmem:[#allocation8 + $0x384] sm:$0xf] }
0x12e7   : > { %v6203_v52 = vpop.f32.mrf.mxu3 }
0x12e8   : > { %v6231_v37 = vpop.f32.mrf.mxu1 }
0x12e9   : > { %v15165_v5 = vadd.f32 %v6231_v37, %v6203_v52 }
0x12eb   : > { %v13367_v26 = vpop.eup %13366 }
0x12ec   : > { %v6269_v32 = vsel %vm6071_vm2, %v13367_v26, 0.0 }
0x12ef   : > { %v6205_v27 = vpop.f32.mrf.mxu3 }
0x12f0   : > { %v6233_v11 = vpop.f32.mrf.mxu1 }
0x12f7   : > { %v6356_v59 = vpop.f32.mrf.mxu3 }
0x12f8   : > { %v6359_v13 = vmul.f32 0.2182179, %v6356_v59 }
0x12fa   : > { %v6360_v56 = vsel %vm6071_vm2, %v6359_v13, -inf }
0x12fb   : > { %6361 = vmax.xlane.f32.xlu0 %v6360_v56  ;;  %v12950_v56 = vld [vmem:[#allocation8 + $0x3bc] sm:$0xf0] }
0x12ff   : > { %v6451_v55 = vpop.f32.mrf.mxu3 }
0x1300   : > { %v6454_v57 = vmul.f32 0.2182179, %v6451_v55  ;;  %v11870_v55 = vor.u32 %v12950_v56, %v11869_v30  ;;  %v11549_v56 = vld [vmem:[#allocation8 + $0x100] sm:$0xf] }
0x1302   : > { %v6455_v36 = vsel %vm6071_vm2, %v6454_v57, -inf }
0x1303   : > { %6456 = vmax.xlane.f32.xlu2 %v6455_v36  ;;  %v11877_v36 = vld [vmem:[#allocation8 + $0x388] sm:$0xf] }
0x1307   : > { %v6547_v50 = vpop.f32.mrf.mxu3 }
0x1308   : > { %v6550_v53 = vmul.f32 0.2182179, %v6547_v50 }
0x130a   : > { %v6551_v58 = vsel %vm6071_vm2, %v6550_v53, -inf }
0x130b   : > { %6270 = vadd.xlane.f32.xlu2 %v6269_v32  ;;  %6552 = vmax.xlane.f32.xlu1 %v6551_v58  ;;  %v12943_v32 = vld [vmem:[#allocation8 + $0x38c] sm:$0xf] }
0x130c   : > { %v11879_v58 = vld [vmem:[#allocation8 + $0x3c8] sm:$0xf0] }
0x1324   : > { %6274 = vrot.lane.b32.xlu1 %v15116_v10, %s13705_s4  ;;  %s15969_s4 = sld [smem:[#allocation34_spill]] }
0x136e   : > { %v6362_v44 = vpop.xlane.xlu0 %6361 }
0x136f   : > { %v6363_v20 = vsub.f32 %v6359_v13, %v6362_v44  ;;  %v11805_v44 = vld [vmem:[#allocation8 + $0x300] sm:$0xf] }
0x1371   : > { %v6364_v60 = vmul.f32 1.442695, %v6363_v20  ;;  %v11882_v20 = vor.u32 %v12943_v32, %v11879_v58  ;;  %v12863_v32 = vld [vmem:[#allocation8 + $0x10c] sm:$0xf] }
0x1372   : > { %v11559_v58 = vld [vmem:[#allocation8 + $0x148] sm:$0xf0] }
0x1373   : > { %13368 = vpow2.f32 %v6364_v60  ;;  %v12934_v60 = vld [vmem:[#allocation8 + $0x33c] sm:$0xf0] }
0x1376   : > { %v6457_v62 = vpop.xlane.xlu2 %6456 }
0x1377   : > { %v6458_v0 = vsub.f32 %v6454_v57, %v6457_v62  ;;  %v11871_v57 = vld [vmem:[#allocation8 + $0x3c0] sm:$0xf0] }
0x1378   : > { %v11874_v50 = vor.u32 %v12942_v40, %v11871_v57  ;;  %v12926_v62 = vld [vmem:[#allocation8 + $0x304] sm:$0xf]  ;;  %v12870_v40 = vld [vmem:[#allocation8 + $0x13c] sm:$0xf0] }
0x1379   : > { %v13369_v31 = vpop.eup %13368  ;;  %v6459_v33 = vmul.f32 1.442695, %v6458_v0  ;;  %v11807_v0 = vld [vmem:[#allocation8 + $0x340] sm:$0xf0] }
0x137a   : > { %v6366_v8 = vsel %vm6071_vm2, %v13369_v31, 0.0  ;;  %7477 = vmatpush.bf16.msra.mxu3 %v11874_v50  ;;  %v11557_v50 = vld [vmem:[#allocation8 + $0x108] sm:$0xf] }
0x137b   : > { %13370 = vpow2.f32 %v6459_v33  ;;  %6367 = vadd.xlane.f32.xlu0 %v6366_v8  ;;  %v11813_v33 = vld [vmem:[#allocation8 + $0x308] sm:$0xf] }
0x137c   : > { %v12935_v8 = vld [vmem:[#allocation8 + $0x344] sm:$0xf0] }
0x137e   : > { %v6553_v19 = vpop.xlane.xlu1 %6552  ;;  %v6271_v49 = vpop.xlane.xlu2 %6270 }
0x137f   : > { %v6554_v25 = vsub.f32 %v6550_v53, %v6553_v19  ;;  %v12927_v19 = vld [vmem:[#allocation8 + $0x30c] sm:$0xf] }
0x1381   : > { %v13371_v34 = vpop.eup %13370  ;;  %v6555_v3 = vmul.f32 1.442695, %v6554_v25  ;;  %v11814_v25 = vor.u32 %v12935_v8, %v11813_v33 }
0x1382   : > { %v6461_v15 = vsel %vm6071_vm2, %v13371_v34, 0.0 }
0x1383   : > { %13372 = vpow2.f32 %v6555_v3  ;;  %6462 = vadd.xlane.f32.xlu2 %v6461_v15  ;;  %v11741_v3 = vld [vmem:[#allocation8 + $0x280] sm:$0xf] }
0x1384   : > { %13374 = vrcp.f32 %v6271_v49  ;;  %v12918_v15 = vld [vmem:[#allocation8 + $0x2bc] sm:$0xf0] }
0x1389   : > { %v13373_v14 = vpop.eup %13372 }
0x138a   : > { %v6557_v1 = vsel %vm6071_vm2, %v13373_v14, 0.0  ;;  %v13375_v61 = vpop.eup %13374 }
0x138b   : > { %6558 = vadd.xlane.f32.xlu2 %v6557_v1  ;;  %v6273_v63 = vmul.f32 %v13375_v61, %v13367_v26  ;;  %v12951_v26 = vld [vmem:[#allocation8 + $0x3c4] sm:$0xf0]  ;;  %v12910_v1 = vld [vmem:[#allocation8 + $0x284] sm:$0xf] }
0x138c   : > { %v11878_v53 = vor.u32 %v12951_v26, %v11877_v36  ;;  %v11743_v61 = vld [vmem:[#allocation8 + $0x2c0] sm:$0xf0] }
0x138d   : > { %v11551_v26 = vld [vmem:[#allocation8 + $0x140] sm:$0xf0] }
0x138f   : > { %6371 = vrot.lane.b32.xlu0 %v15116_v10, %s13704_s2  ;;  %v12822_v10 = vld [vmem:[%s15967_s1 + $0x20] sm:$0xff]  ;;  %s15968_s2 = sld [smem:[#allocation33_spill]] }
0x1390   : > { %6324 = vmatpush.bf16.msrb.mxu0 %v12822_v10 }
0x1394   : > { %6514 = vmatpush.bf16.msra.mxu0 %v12827_v23  ;;  %v12886_v23 = vld [vmem:[#allocation8 + $0x1bc] sm:$0xf0] }
0x1396   : > { %v6275_v18 = vpop.permute.xlu1 %6274 }
0x1397   : > { %11369 = vmatpush.msk.msrb.mxu2 %vm1269_vm0, %v6275_v18  ;;  %v11742_v18 = vor.u32 %v12918_v15, %v11741_v3  ;;  %v11485_v15 = vld [vmem:[#allocation8 + $0x80] sm:$0xf] }
0x1398   : > { %11370 = vmatmul.msk.f32.vlgmr.msrb.gmra.mxu2 %vm6083_vm10, %v6273_v63  ;;  %6515 = vmatpush.bf16.msra.mxu0 %v12826_v48  ;;  %v11749_v63 = vld [vmem:[#allocation8 + $0x288] sm:$0xf]  ;;  %v12878_v48 = vld [vmem:[#allocation8 + $0x184] sm:$0xf] }
0x1399   : > { %6420 = vmatpush.bf16.msra.mxu2 %v12825_v41  ;;  %v11750_v10 = vor.u32 %v12919_v17, %v11749_v63  ;;  %v12894_v41 = vld [vmem:[#allocation8 + $0x204] sm:$0xf]  ;;  %v12855_v63 = vld [vmem:[#allocation8 + $0xc4] sm:$0xf0] }
0x139d   : > { %6421 = vmatpush.bf16.msra.mxu2 %v12824_v22  ;;  %v11613_v22 = vld [vmem:[#allocation8 + $0x180] sm:$0xf] }
0x13a1   : > { %6611 = vmatpush.bf16.msrb.mxu2 %v12829_v24 }
0x13a3   : > { %6562 = vrot.lane.b32.xlu2 %v6015_v42, %s13706_s12  ;;  %s15970_s12 = sld [smem:[#allocation35_spill]] }
0x13a5   : > { %6612 = vmatpush.bf16.msrb.mxu2 %v12828_v45  ;;  %v11615_v45 = vld [vmem:[#allocation8 + $0x1c0] sm:$0xf0] }
0x13ee   : > { %v6368_v7 = vpop.xlane.xlu0 %6367 }
0x13ef   : > { %13376 = vrcp.f32 %v6368_v7 }
0x13f5   : > { %v13377_v47 = vpop.eup %13376 }
0x13f6   : > { %v6463_v54 = vpop.xlane.xlu2 %6462  ;;  %v6370_v51 = vmul.f32 %v13377_v47, %v13369_v31  ;;  %v11810_v31 = vor.u32 %v12926_v62, %v11807_v0  ;;  %v11677_v47 = vld [vmem:[#allocation8 + $0x200] sm:$0xf]  ;;  %v11562_v0 = vor.u32 %v12863_v32, %v11559_v58  ;;  %v11757_v32 = vld [vmem:[#allocation8 + $0x290] sm:$0xf] }
0x13f7   : > { %13378 = vrcp.f32 %v6463_v54  ;;  %v11746_v54 = vor.u32 %v12910_v1, %v11743_v61  ;;  %v11487_v61 = vld [vmem:[#allocation8 + $0xc0] sm:$0xf0]  ;;  %v12920_v58 = vld [vmem:[#allocation8 + $0x2cc] sm:$0xf0] }
0x13f8   : > { %7478 = vmatpush.bf16.msra.mxu3 %v11810_v31 }
0x13fc   : > { %7479 = vmatpush.bf16.msra.mxu3 %v11746_v54  ;;  %v11421_v54 = vld [vmem:[#allocation8] sm:$0xf] }
0x13fd   : > { %v13379_v16 = vpop.eup %13378 }
0x13fe   : > { %v6559_v2 = vpop.xlane.xlu2 %6558  ;;  %v6465_v6 = vmul.f32 %v13379_v16, %v13371_v34  ;;  %v11815_v34 = vld [vmem:[#allocation8 + $0x348] sm:$0xf0]  ;;  %v11685_v16 = vld [vmem:[#allocation8 + $0x208] sm:$0xf] }
0x13ff   : > { %13380 = vrcp.f32 %v6559_v2  ;;  %v11818_v49 = vor.u32 %v12927_v19, %v11815_v34  ;;  %v12902_v2 = vld [vmem:[#allocation8 + $0x23c] sm:$0xf0] }
0x1401   : > { %v6372_v4 = vpop.permute.xlu0 %6371 }
0x1402   : > { %11382 = vmatpush.msk.msra.mxu1 %vm1269_vm0, %v6372_v4  ;;  %v11679_v4 = vld [vmem:[#allocation8 + $0x240] sm:$0xf0] }
0x1403   : > { %11383 = vmatmul.msk.f32.vlgmr.msra.gmra.mxu1 %vm6083_vm10, %v6370_v51 }
0x1404   : > { %11395 = vmatpush.msk.msrb.mxu1 %vm1269_vm0, %v6015_v42  ;;  %v12911_v42 = vld [vmem:[#allocation8 + $0x28c] sm:$0xf] }
0x1405   : > { %v13381_v29 = vpop.eup %13380  ;;  %v11754_v51 = vor.u32 %v12911_v42, %v11751_v28  ;;  %v12847_v42 = vld [vmem:[#allocation8 + $0x8c] sm:$0xf] }
0x1406   : > { %v6563_v43 = vpop.permute.xlu2 %6562  ;;  %v6561_v39 = vmul.f32 %v13381_v29, %v13373_v14  ;;  %v11687_v29 = vld [vmem:[#allocation8 + $0x248] sm:$0xf0] }
0x1407   : > { %11408 = vmatpush.msk.msra.mxu1 %vm1269_vm0, %v6563_v43  ;;  %v12903_v43 = vld [vmem:[#allocation8 + $0x244] sm:$0xf0]  ;;  %v11495_v28 = vld [vmem:[#allocation8 + $0xc8] sm:$0xf0] }
0x140b   : > { %11396 = vmatmul.msk.f32.vlgmr.msrb.gmra.mxu1 %vm6083_vm10, %v6465_v6  ;;  %v12895_v6 = vld [vmem:[#allocation8 + $0x20c] sm:$0xf] }
0x140c   : > { %7490 = vmatpush.bf16.msrb.mxu1 %v11878_v53  ;;  %v11690_v24 = vor.u32 %v12895_v6, %v11687_v29  ;;  %v12871_v53 = vld [vmem:[#allocation8 + $0x144] sm:$0xf0]  ;;  %v12831_v6 = vld [vmem:[#allocation8 + $0xc] sm:$0xf] }
0x140d   : > { %v11431_v29 = vld [vmem:[#allocation8 + $0x48] sm:$0xf0] }
0x1410   : > { %7491 = vmatpush.bf16.msrb.mxu1 %v11814_v25 }
0x1413   : > { %11409 = vmatmul.msk.f32.vlgmr.msra.gmra.mxu1 %vm6083_vm10, %v6561_v39  ;;  %v11678_v39 = vor.u32 %v12902_v2, %v11677_v47  ;;  %v12830_v47 = vld [vmem:[#allocation8 + $0x4] sm:$0xf] }
0x1414   : > { %7492 = vmatpush.bf16.msrb.mxu1 %v11750_v10  ;;  %v12838_v10 = vld [vmem:[#allocation8 + $0x3c] sm:$0xf0] }
0x1415   : > { %v11422_v2 = vor.u32 %v12838_v10, %v11421_v54  ;;  %v11631_v10 = vld [vmem:[#allocation8 + $0x1d0] sm:$0xf0] }
0x141b   : > { %v6298_v9 = vpop.f32.mrf.mxu2 }
0x141c   : > { %v6301_v12 = vpack.c.bf16 %v6298_v9, %v6298_v9  ;;  %v11682_v9 = vor.u32 %v12894_v41, %v11679_v4  ;;  %v11423_v41 = vld [vmem:[#allocation8 + $0x40] sm:$0xf0]  ;;  %v12839_v4 = vld [vmem:[#allocation8 + $0x44] sm:$0xf0] }
0x141e   : > { %11379 = vmatmul.msk.bf16.vlgmr.msrb.gmra.mxu0 %vm1844_vm11, %v6301_v12  ;;  %v11686_v12 = vor.u32 %v12903_v43, %v11685_v16  ;;  %7480 = vmatpush.bf16.msra.mxu3 %v11682_v9  ;;  %v11426_v16 = vor.u32 %v12830_v47, %v11423_v41  ;;  %v11434_v9 = vor.u32 %v12831_v6, %v11431_v29  ;;  %v11637_v47 = vld [vmem:[#allocation8 + $0x198] sm:$0xf] }
0x141f   : > { %7464 = vmatpush.bf16.msrb.mxu0 %v11870_v55  ;;  %v12862_v55 = vld [vmem:[#allocation8 + $0x104] sm:$0xf] }
0x1420   : > { %7493 = vmatpush.bf16.msrb.mxu1 %v11686_v12  ;;  %v12952_v12 = vld [vmem:[#allocation8 + $0x3cc] sm:$0xf0] }
0x1480   : > { %v6395_v35 = vpop.f32.mrf.mxu1 }
0x1481   : > { %v6398_v46 = vpack.c.bf16 %v6395_v35, %v6395_v35  ;;  %v11621_v35 = vld [vmem:[#allocation8 + $0x188] sm:$0xf] }
0x1483   : > { %11392 = vmatmul.msk.bf16.vlgmr.msra.gmra.mxu2 %vm1844_vm11, %v6398_v46  ;;  %v12887_v46 = vld [vmem:[#allocation8 + $0x1c4] sm:$0xf0] }
0x1484   : > { %7503 = vmatpush.bf16.msra.mxu2 %v11882_v20  ;;  %v11622_v30 = vor.u32 %v12887_v46, %v11621_v35  ;;  %v11554_v20 = vor.u32 %v12862_v55, %v11551_v26  ;;  %v12953_v35 = vld [vmem:[#allocation8 + $0x3d4] sm:$0xf0]  ;;  %v12945_v46 = vld [vmem:[#allocation8 + $0x39c] sm:$0xf] }
0x1485   : > { %v11831_v26 = vld [vmem:[#allocation8 + $0x358] sm:$0xf0] }
0x1486   : > { %7494 = vmatpush.bf16.msrb.mxu1 %v11622_v30  ;;  %v12928_v30 = vld [vmem:[#allocation8 + $0x314] sm:$0xf] }
0x1488   : > { %v6489_v52 = vpop.f32.mrf.mxu1  ;;  %7504 = vmatpush.bf16.msra.mxu2 %v11818_v49  ;;  %v12846_v49 = vld [vmem:[#allocation8 + $0x84] sm:$0xf] }
0x1489   : > { %v6492_v37 = vpack.c.bf16 %v6489_v52, %v6489_v52 }
0x148b   : > { %11405 = vmatmul.msk.bf16.vlgmr.msra.gmra.mxu0 %vm1844_vm11, %v6492_v37  ;;  %v12879_v37 = vld [vmem:[#allocation8 + $0x18c] sm:$0xf] }
0x148c   : > { %7505 = vmatpush.bf16.msra.mxu2 %v11754_v51  ;;  %v11429_v51 = vld [vmem:[#allocation8 + $0x8] sm:$0xf] }
0x148d   : > { %v11430_v43 = vor.u32 %v12839_v4, %v11429_v51  ;;  %v12881_v4 = vld [vmem:[#allocation8 + $0x19c] sm:$0xf] }
0x1490   : > { %v6586_v27 = vpop.f32.mrf.mxu1  ;;  %7506 = vmatpush.bf16.msra.mxu2 %v11690_v24 }
0x1491   : > { %v6589_v11 = vpack.c.bf16 %v6586_v27, %v6586_v27  ;;  %v11623_v27 = vld [vmem:[#allocation8 + $0x1c8] sm:$0xf0] }
0x1492   : > { %v11626_v36 = vor.u32 %v12879_v37, %v11623_v27  ;;  %v11895_v37 = vld [vmem:[#allocation8 + $0x3d8] sm:$0xf0]  ;;  %v11821_v27 = vld [vmem:[#allocation8 + $0x310] sm:$0xf] }
0x1493   : > { %11418 = vmatmul.msk.bf16.vlgmr.msrb.gmra.mxu2 %vm1844_vm11, %v6589_v11  ;;  %v11614_v11 = vor.u32 %v12886_v23, %v11613_v22  ;;  %v12944_v22 = vld [vmem:[#allocation8 + $0x394] sm:$0xf] }
0x1494   : > { %7507 = vmatpush.bf16.msra.mxu2 %v11626_v36  ;;  %v11887_v23 = vld [vmem:[#allocation8 + $0x3d0] sm:$0xf0]  ;;  %v12929_v36 = vld [vmem:[#allocation8 + $0x31c] sm:$0xf] }
0x1495   : > { %v11890_v24 = vor.u32 %v12944_v22, %v11887_v23  ;;  %v12864_v23 = vld [vmem:[#allocation8 + $0x114] sm:$0xf] }
0x1498   : > { %7508 = vmatpush.bf16.msra.mxu2 %v11562_v0  ;;  %v12921_v0 = vld [vmem:[#allocation8 + $0x2d4] sm:$0xf0] }
0x149b   : > { %v6326_v21 = vpop.f32.mrf.mxu0 }
0x149c   : > { %v15202_v59 = vadd.f32 %v6326_v21, %v15165_v5  ;;  %v11806_v5 = vor.u32 %v12934_v60, %v11805_v44  ;;  %v11550_v44 = vor.u32 %v12870_v40, %v11549_v56  ;;  %v11558_v60 = vor.u32 %v12871_v53, %v11557_v50  ;;  %v11823_v56 = vld [vmem:[#allocation8 + $0x350] sm:$0xf0]  ;;  %v11829_v40 = vld [vmem:[#allocation8 + $0x318] sm:$0xf] }
0x149d   : > { %v11826_v55 = vor.u32 %v12928_v30, %v11823_v56  ;;  %v11834_v53 = vor.u32 %v12929_v36, %v11831_v26 }
0x149e   : > { %7465 = vmatpush.bf16.msrb.mxu0 %v11806_v5  ;;  %7495 = vmatpush.bf16.msrb.mxu1 %v11558_v60  ;;  %v11759_v60 = vld [vmem:[#allocation8 + $0x2d0] sm:$0xf0] }
0x14a2   : > { %7466 = vmatpush.bf16.msrb.mxu0 %v11742_v18  ;;  %v11490_v18 = vor.u32 %v12846_v49, %v11487_v61  ;;  %v11701_v49 = vld [vmem:[#allocation8 + $0x218] sm:$0xf] }
0x14a3   : > { %v6328_v13 = vpop.f32.mrf.mxu0 }
0x14a4   : > { %v11618_v13 = vor.u32 %v12878_v48, %v11615_v45  ;;  %v11893_v45 = vld [vmem:[#allocation8 + $0x398] sm:$0xf] }
0x14a6   : > { %7467 = vmatpush.bf16.msrb.mxu0 %v11678_v39  ;;  %7481 = vmatpush.bf16.msra.mxu3 %v11618_v13  ;;  %v11885_v39 = vld [vmem:[#allocation8 + $0x390] sm:$0xf] }
0x14a7   : > { %v11886_v48 = vor.u32 %v12952_v12, %v11885_v39  ;;  %v11565_v39 = vld [vmem:[#allocation8 + $0x110] sm:$0xf] }
0x14aa   : > { %7468 = vmatpush.bf16.msrb.mxu0 %v11614_v11  ;;  %7482 = vmatpush.bf16.msra.mxu3 %v11554_v20  ;;  %v12936_v11 = vld [vmem:[#allocation8 + $0x34c] sm:$0xf0]  ;;  %v11758_v20 = vor.u32 %v12920_v58, %v11757_v32  ;;  %v11511_v32 = vld [vmem:[#allocation8 + $0xd8] sm:$0xf0] }
0x14ab   : > { %v11822_v13 = vor.u32 %v12936_v11, %v11821_v27  ;;  %v11575_v11 = vld [vmem:[#allocation8 + $0x158] sm:$0xf0] }
0x14ae   : > { %7469 = vmatpush.bf16.msrb.mxu0 %v11550_v44  ;;  %7483 = vmatpush.bf16.msra.mxu3 %v11490_v18  ;;  %v12912_v44 = vld [vmem:[#allocation8 + $0x294] sm:$0xf]  ;;  %v11703_v18 = vld [vmem:[#allocation8 + $0x258] sm:$0xf0] }
0x14b2   : > { %7484 = vmatpush.bf16.msra.mxu3 %v11426_v16  ;;  %v11639_v16 = vld [vmem:[#allocation8 + $0x1d8] sm:$0xf0] }
0x14b3   : > { %v11642_v6 = vor.u32 %v12881_v4, %v11639_v16  ;;  %v12955_v16 = vld [vmem:[#allocation8 + $0x3e4] sm:$0xf0] }
0x14b6   : > { %7529 = vmatpush.bf16.msrb.mxu3 %v11890_v24  ;;  %v11573_v24 = vld [vmem:[#allocation8 + $0x118] sm:$0xf] }
0x14ba   : > { %7530 = vmatpush.bf16.msrb.mxu3 %v11826_v55  ;;  %v11503_v55 = vld [vmem:[#allocation8 + $0xd0] sm:$0xf0] }
0x1506   : > { %v6423_v14 = vpop.f32.mrf.mxu2 }
0x1507   : > { %v6427_v57 = vadd.f32 %v6423_v14, %v15202_v59  ;;  %v13248_v59 = vld [vmem:[%s15968_s2] ss:$0 sm:$0xff]  ;;  %v12854_v14 = vld [vmem:[#allocation8 + $0xbc] sm:$0xf0]  ;;  %s15997_s2 = sld [smem:[#allocation42_spill]] }
0x1508   : > { %v6517_v7 = vpop.f32.mrf.mxu0  ;;  %v11486_v1 = vor.u32 %v12854_v14, %v11485_v15  ;;  %v11695_v14 = vld [vmem:[#allocation8 + $0x250] sm:$0xf0] }
0x1509   : > { %v6521_v62 = vadd.f32 %v6517_v7, %v6427_v57  ;;  %v11498_v7 = vor.u32 %v12847_v42, %v11495_v28  ;;  %v12937_v57 = vld [vmem:[#allocation8 + $0x354] sm:$0xf0]  ;;  %v11629_v42 = vld [vmem:[#allocation8 + $0x190] sm:$0xf] }
0x150a   : > { %7470 = vmatpush.bf16.msrb.mxu0 %v11486_v1  ;;  %v11830_v50 = vor.u32 %v12937_v57, %v11829_v40  ;;  %v12905_v1 = vld [vmem:[#allocation8 + $0x254] sm:$0xf0]  ;;  %v12888_v28 = vld [vmem:[#allocation8 + $0x1cc] sm:$0xf0]  ;;  %v12848_v40 = vld [vmem:[#allocation8 + $0x94] sm:$0xf] }
0x150b   : > { %7509 = vmatpush.bf16.msra.mxu2 %v11498_v7  ;;  %v12880_v7 = vld [vmem:[#allocation8 + $0x194] sm:$0xf]  ;;  %v11630_v54 = vor.u32 %v12888_v28, %v11629_v42  ;;  %v11509_v57 = vld [vmem:[#allocation8 + $0x98] sm:$0xf]  ;;  %v11506_v26 = vor.u32 %v12848_v40, %v11503_v55  ;;  %v13250_v28 = vld [vmem:[%s15970_s12] ss:$0 sm:$0xff] }
0x150c   : > { %v11634_v41 = vor.u32 %v12880_v7, %v11631_v10  ;;  %v11901_v10 = vld [vmem:[#allocation8 + $0x3a0] sm:$0xf]  ;;  %v11775_v40 = vld [vmem:[#allocation8 + $0x2e0] sm:$0xf0]  ;;  %v11781_v55 = vld [vmem:[#allocation8 + $0x2a8] sm:$0xf] }
0x150d   : > { %s9665_s12 = scalar_lea.hbm %s15997_s2, %s13932_s0  ;;  %s13592_s0 = scalar_lea.hbm %s15997_s2, 2 }
0x150e   : > { %v6425_v52 = vpop.f32.mrf.mxu2  ;;  %7471 = vmatpush.bf16.msrb.mxu0 %v11422_v2  ;;  %v12889_v2 = vld [vmem:[#allocation8 + $0x1d4] sm:$0xf0] }
0x150f   : > { %7510 = vmatpush.bf16.msra.mxu2 %v11434_v9  ;;  %v11894_v52 = vor.u32 %v12953_v35, %v11893_v45  ;;  %v11638_v51 = vor.u32 %v12889_v2, %v11637_v47  ;;  %v12872_v9 = vld [vmem:[#allocation8 + $0x14c] sm:$0xf0]  ;;  %v12954_v47 = vld [vmem:[#allocation8 + $0x3dc] sm:$0xf0]  ;;  %v12946_v2 = vld [vmem:[#allocation8 + $0x3a4] sm:$0xf] }
0x1510   : > { %v6519_v21 = vpop.f32.mrf.mxu0  ;;  %v11566_v22 = vor.u32 %v12872_v9, %v11565_v39  ;;  %v11837_v9 = vld [vmem:[#allocation8 + $0x320] sm:$0xf] }
0x1511   : > { %v11898_v21 = vor.u32 %v12945_v46, %v11895_v37  ;;  %v12865_v37 = vld [vmem:[#allocation8 + $0x11c] sm:$0xf] }
0x1512   : > { %7516 = vmatpush.bf16.msra.mxu0 %v11886_v48  ;;  %v11567_v48 = vld [vmem:[#allocation8 + $0x150] sm:$0xf0]  ;;  %v11578_v56 = vor.u32 %v12865_v37, %v11575_v11  ;;  %v11773_v11 = vld [vmem:[#allocation8 + $0x2a0] sm:$0xf] }
0x1513   : > { %7555 = vmatpush.bf16.msrb.mxu2 %v11898_v21  ;;  %v11570_v46 = vor.u32 %v12864_v23, %v11567_v48  ;;  %v11501_v21 = vld [vmem:[#allocation8 + $0x90] sm:$0xf]  ;;  %v12930_v48 = vld [vmem:[#allocation8 + $0x324] sm:$0xf] }
0x1516   : > { %v6614_v5 = vpop.f32.mrf.mxu2  ;;  %7517 = vmatpush.bf16.msra.mxu0 %v11822_v13  ;;  %v12856_v13 = vld [vmem:[#allocation8 + $0xcc] sm:$0xf0] }
0x1517   : > { %v6618_v31 = vadd.f32 %v6614_v5, %v6521_v62  ;;  %v11765_v62 = vld [vmem:[#allocation8 + $0x298] sm:$0xf]  ;;  %v11762_v5 = vor.u32 %v12912_v44, %v11759_v60  ;;  %7556 = vmatpush.bf16.msrb.mxu2 %v11834_v53  ;;  %v11502_v36 = vor.u32 %v12856_v13, %v11501_v21  ;;  %v12849_v53 = vld [vmem:[#allocation8 + $0x9c] sm:$0xf]  ;;  %v12840_v60 = vld [vmem:[#allocation8 + $0x4c] sm:$0xf0] }
0x1518   : > { %v12922_v21 = vld [vmem:[#allocation8 + $0x2dc] sm:$0xf0] }
0x1519   : > { %v6619_v33 = vadd.f32 %v6618_v31, %v15105_v38  ;;  %v11493_v38 = vld [vmem:[#allocation8 + $0x88] sm:$0xf]  ;;  %v11766_v31 = vor.u32 %v12921_v0, %v11765_v62  ;;  %7531 = vmatpush.bf16.msrb.mxu3 %v11762_v5  ;;  %v11514_v62 = vor.u32 %v12849_v53, %v11511_v32  ;;  %v12832_v0 = vld [vmem:[#allocation8 + $0x14] sm:$0xf]  ;;  %v11709_v32 = vld [vmem:[#allocation8 + $0x220] sm:$0xf] }
0x151a   : > { %v11494_v17 = vor.u32 %v12855_v63, %v11493_v38  ;;  %7518 = vmatpush.bf16.msra.mxu0 %v11758_v20  ;;  %v11702_v38 = vor.u32 %v12905_v1, %v11701_v49  ;;  %v12897_v63 = vld [vmem:[#allocation8 + $0x21c] sm:$0xf]  ;;  %v11437_v20 = vld [vmem:[#allocation8 + $0x10] sm:$0xf]  ;;  %v11439_v5 = vld [vmem:[#allocation8 + $0x50] sm:$0xf0] }
0x151b   : > { %v15207_v8 = vadd.f32 %v13248_v59, %v6619_v33  ;;  %v12913_v59 = vld [vmem:[#allocation8 + $0x29c] sm:$0xf] }
0x151c   : > { %7496 = vmatpush.bf16.msrb.mxu1 %v11494_v17  ;;  %v11767_v33 = vld [vmem:[#allocation8 + $0x2d8] sm:$0xf0]  ;;  %v11706_v17 = vor.u32 %v12897_v63, %v11703_v18 }
0x151d   : > { %v6627_v19 = vsel %vm1269_vm0, %v15207_v8, 0.0  ;;  %v6631_v25 = vmul.f32 %v15207_v8, %v15207_v8 }
0x151e   : > { %6628 = vadd.xlane.f32.xlu0 %v6627_v19  ;;  %v6616_v34 = vpop.f32.mrf.mxu2  ;;  %v11770_v19 = vor.u32 %v12913_v59, %v11767_v33  ;;  %v12841_v59 = vld [vmem:[#allocation8 + $0x54] sm:$0xf0]  ;;  %v12833_v33 = vld [vmem:[#allocation8 + $0x1c] sm:$0xf] }
0x151f   : > { %v6632_v3 = vsel %vm1269_vm0, %v6631_v25, 0.0  ;;  %v11693_v25 = vld [vmem:[#allocation8 + $0x210] sm:$0xf] }
0x1520   : > { %6633 = vadd.xlane.f32.xlu1 %v6632_v3  ;;  %7497 = vmatpush.bf16.msrb.mxu1 %v11430_v43  ;;  %v12904_v34 = vld [vmem:[#allocation8 + $0x24c] sm:$0xf0]  ;;  %v12896_v3 = vld [vmem:[#allocation8 + $0x214] sm:$0xf] }
0x1521   : > { %v11694_v15 = vor.u32 %v12904_v34, %v11693_v25  ;;  %v11698_v61 = vor.u32 %v12896_v3, %v11695_v14  ;;  %7557 = vmatpush.bf16.msrb.mxu2 %v11770_v19  ;;  %v11447_v19 = vld [vmem:[#allocation8 + $0x58] sm:$0xf0]  ;;  %v11438_v25 = vor.u32 %v12840_v60, %v11437_v20  ;;  %v11442_v34 = vor.u32 %v12832_v0, %v11439_v5  ;;  %v12898_v60 = vld [vmem:[#allocation8 + $0x224] sm:$0xf]  ;;  %v11717_v0 = vld [vmem:[#allocation8 + $0x228] sm:$0xf] }
0x1522   : > { %v12907_v5 = vld [vmem:[#allocation8 + $0x264] sm:$0xf0] }
0x1523   : > { %7519 = vmatpush.bf16.msra.mxu0 %v11694_v15  ;;  %7532 = vmatpush.bf16.msrb.mxu3 %v11698_v61  ;;  %v11450_v15 = vor.u32 %v12833_v33, %v11447_v19 }
0x1524   : > { %7542 = vmatpush.bf16.msra.mxu1 %v11894_v52  ;;  %v12873_v52 = vld [vmem:[#allocation8 + $0x154] sm:$0xf0] }
0x1525   : > { %7558 = vmatpush.bf16.msrb.mxu2 %v11706_v17  ;;  %v11574_v27 = vor.u32 %v12873_v52, %v11573_v24  ;;  %v13249_v17 = vld [vmem:[%s15969_s4] ss:$0 sm:$0xff]  ;;  %v11839_v24 = vld [vmem:[#allocation8 + $0x360] sm:$0xf0]  ;;  %v11847_v52 = vld [vmem:[#allocation8 + $0x368] sm:$0xf0] }
0x1526   : > { %s1240_s4 = sand.u32 1, %s13638_s23  }
0x1527   : > { %7520 = vmatpush.bf16.msra.mxu0 %v11630_v54  ;;  %7533 = vmatpush.bf16.msrb.mxu3 %v11634_v41  ;;  %v11903_v41 = vld [vmem:[#allocation8 + $0x3e0] sm:$0xf0] }
0x1528   : > { %7543 = vmatpush.bf16.msra.mxu1 %v11830_v50  ;;  %v12857_v50 = vld [vmem:[#allocation8 + $0xd4] sm:$0xf0] }
0x1529   : > { %7559 = vmatpush.bf16.msrb.mxu2 %v11642_v6  ;;  %v11510_v44 = vor.u32 %v12857_v50, %v11509_v57  ;;  %v11911_v6 = vld [vmem:[#allocation8 + $0x3e8] sm:$0xf0]  ;;  %v12923_v57 = vld [vmem:[#allocation8 + $0x2e4] sm:$0xf0]  ;;  %v11774_v50 = vor.u32 %v12922_v21, %v11773_v11  ;;  %v12834_v11 = vld [vmem:[#allocation8 + $0x24] sm:$0xf] }
0x152a   : > { %v11455_v21 = vld [vmem:[#allocation8 + $0x60] sm:$0xf0] }
0x152b   : > { %7521 = vmatpush.bf16.msra.mxu0 %v11566_v22  ;;  %7534 = vmatpush.bf16.msrb.mxu3 %v11570_v46  ;;  %v12931_v46 = vld [vmem:[#allocation8 + $0x32c] sm:$0xf] }
0x152c   : > { %7544 = vmatpush.bf16.msra.mxu1 %v11766_v31  ;;  %v11445_v31 = vld [vmem:[#allocation8 + $0x18] sm:$0xf] }
0x152d   : > { %7560 = vmatpush.bf16.msrb.mxu2 %v11578_v56  ;;  %v11446_v3 = vor.u32 %v12841_v59, %v11445_v31  ;;  %v12914_v56 = vld [vmem:[#allocation8 + $0x2a4] sm:$0xf]  ;;  %v12899_v31 = vld [vmem:[#allocation8 + $0x22c] sm:$0xf] }
0x152e   : > { %v11778_v53 = vor.u32 %v12914_v56, %v11775_v40  ;;  %v11719_v59 = vld [vmem:[#allocation8 + $0x268] sm:$0xf0]  ;;  %v11461_v56 = vld [vmem:[#allocation8 + $0x28] sm:$0xf] }
0x152f   : > { %7522 = vmatpush.bf16.msra.mxu0 %v11502_v36  ;;  %7535 = vmatpush.bf16.msrb.mxu3 %v11506_v26  ;;  %v12915_v36 = vld [vmem:[#allocation8 + $0x2ac] sm:$0xf]  ;;  %v12843_v40 = vld [vmem:[#allocation8 + $0x64] sm:$0xf0] }
0x1530   : > { %7545 = vmatpush.bf16.msra.mxu1 %v11702_v38  ;;  %v11783_v26 = vld [vmem:[#allocation8 + $0x2e8] sm:$0xf0] }
0x1531   : > { %7561 = vmatpush.bf16.msrb.mxu2 %v11514_v62  ;;  %v11786_v20 = vor.u32 %v12915_v36, %v11783_v26  ;;  %v11711_v62 = vld [vmem:[#allocation8 + $0x260] sm:$0xf0]  ;;  %v11917_v36 = vld [vmem:[#allocation8 + $0x3b0] sm:$0xf] }
0x1532   : > { %v11714_v19 = vor.u32 %v12898_v60, %v11711_v62  ;;  %v12956_v26 = vld [vmem:[#allocation8 + $0x3ec] sm:$0xf0]  ;;  %v12949_v60 = vld [vmem:[#allocation8 + $0x3bc] sm:$0xf] }
0x1533   : > { %7523 = vmatpush.bf16.msra.mxu0 %v11438_v25  ;;  %7536 = vmatpush.bf16.msrb.mxu3 %v11442_v34  ;;  %v11645_v25 = vld [vmem:[#allocation8 + $0x1a0] sm:$0xf]  ;;  %v11927_v62 = vld [vmem:[#allocation8 + $0x3f8] sm:$0xf0] }
0x1534   : > { %7546 = vmatpush.bf16.msra.mxu1 %v11638_v51  ;;  %v11909_v51 = vld [vmem:[#allocation8 + $0x3a8] sm:$0xf]  ;;  %v12890_v34 = vld [vmem:[#allocation8 + $0x1dc] sm:$0xf0] }
0x1535   : > { %7562 = vmatpush.bf16.msrb.mxu2 %v11450_v15  ;;  %v11910_v22 = vor.u32 %v12955_v16, %v11909_v51  ;;  %v11722_v15 = vor.u32 %v12899_v31, %v11719_v59  ;;  %v12867_v51 = vld [vmem:[#allocation8 + $0x12c] sm:$0xf]  ;;  %v11918_v31 = vor.u32 %v12956_v26, %v11917_v36  ;;  %v11597_v36 = vld [vmem:[#allocation8 + $0x130] sm:$0xf] }
0x1536   : > { %v11591_v16 = vld [vmem:[#allocation8 + $0x168] sm:$0xf0]  ;;  %v12876_v26 = vld [vmem:[#allocation8 + $0x16c] sm:$0xf0] }
0x1538   : > { %7547 = vmatpush.bf16.msra.mxu1 %v11574_v27  ;;  %v11842_v27 = vor.u32 %v12930_v48, %v11839_v24  ;;  %v11525_v48 = vld [vmem:[#allocation8 + $0xa8] sm:$0xf] }
0x1539   : > { %v12859_v24 = vld [vmem:[#allocation8 + $0xe4] sm:$0xf0] }
0x153c   : > { %7548 = vmatpush.bf16.msra.mxu1 %v11510_v44  ;;  %v11782_v44 = vor.u32 %v12923_v57, %v11781_v55  ;;  %v12835_v55 = vld [vmem:[#allocation8 + $0x2c] sm:$0xf] }
0x153d   : > { %v11463_v57 = vld [vmem:[#allocation8 + $0x68] sm:$0xf0] }
0x1540   : > { %7549 = vmatpush.bf16.msra.mxu1 %v11446_v3  ;;  %v11718_v3 = vor.u32 %v12907_v5, %v11717_v0  ;;  %v11462_v0 = vor.u32 %v12843_v40, %v11461_v56  ;;  %v11466_v5 = vor.u32 %v12835_v55, %v11463_v57  ;;  %v12885_v56 = vld [vmem:[#allocation8 + $0x1bc] sm:$0xf] }
0x1541   : > { %v11671_v40 = vld [vmem:[#allocation8 + $0x1f8] sm:$0xf0] }
0x1591   : > { %v6629_v43 = vpop.xlane.xlu0 %6628 }
0x1592   : > { %v15214_v29 = vmul.f32 0.007936508, %v6629_v43  ;;  %v12947_v43 = vld [vmem:[#allocation8 + $0x3ac] sm:$0xf] }
0x1593   : > { %v6634_v12 = vpop.xlane.xlu1 %6633  ;;  %v11914_v23 = vor.u32 %v12947_v43, %v11911_v6 }
0x1594   : > { %v6636_v45 = vmul.f32 %v15214_v29, %v15214_v29  ;;  %v6635_v35 = vmul.f32 0.007936508, %v6634_v12  ;;  %v6638_v18 = vsub.f32 %v15207_v8, %v15214_v29  ;;  %v11902_v8 = vor.u32 %v12954_v47, %v11901_v10  ;;  %v12938_v12 = vld [vmem:[#allocation8 + $0x35c] sm:$0xf0]  ;;  %v12866_v10 = vld [vmem:[#allocation8 + $0x124] sm:$0xf] }
0x1595   : > { %v11906_v29 = vor.u32 %v12946_v2, %v11903_v41  ;;  %v11838_v37 = vor.u32 %v12938_v12, %v11837_v9  ;;  %v11583_v47 = vld [vmem:[#allocation8 + $0x160] sm:$0xf0]  ;;  %v11589_v2 = vld [vmem:[#allocation8 + $0x128] sm:$0xf]  ;;  %v11594_v12 = vor.u32 %v12867_v51, %v11591_v16 }
0x1596   : > { %v6637_v30 = vsub.f32 %v6635_v35, %v6636_v45  ;;  %v11845_v45 = vld [vmem:[#allocation8 + $0x328] sm:$0xf]  ;;  %v11586_v6 = vor.u32 %v12866_v10, %v11583_v47  ;;  %v11797_v10 = vld [vmem:[#allocation8 + $0x2b8] sm:$0xf] }
0x1597   : > { %v12939_v35 = vld [vmem:[#allocation8 + $0x364] sm:$0xf0]  ;;  %v12925_v47 = vld [vmem:[#allocation8 + $0x2f4] sm:$0xf0] }
0x1598   : > { %v6639_v58 = vadd.f32 1e-05, %v6637_v30  ;;  %v11846_v13 = vor.u32 %v12939_v35, %v11845_v45  ;;  %v11850_v30 = vor.u32 %v12931_v46, %v11847_v52  ;;  %v12875_v41 = vld [vmem:[#allocation8 + $0x164] sm:$0xf0]  ;;  %v12851_v45 = vld [vmem:[#allocation8 + $0xac] sm:$0xf] }
0x1599   : > { %v11590_v9 = vor.u32 %v12875_v41, %v11589_v2  ;;  %v11527_v35 = vld [vmem:[#allocation8 + $0xe8] sm:$0xf0]  ;;  %v11453_v46 = vld [vmem:[#allocation8 + $0x20] sm:$0xf]  ;;  %v12917_v2 = vld [vmem:[#allocation8 + $0x2bc] sm:$0xf] }
0x159a   : > { %13382 = vrsqrt.f32 %v6639_v58  ;;  %vm6646_vm12 = vweird.f32 %v6639_v58  ;;  %v11799_v41 = vld [vmem:[#allocation8 + $0x2f8] sm:$0xf0] }
0x15a0   : > { %v13383_v14 = vpop.eup %13382 }
0x15a1   : > { %v6641_v49 = vmul.f32 %v13383_v14, %v6639_v58  ;;  %vm6647_vm11 = vweird.f32 %v13383_v14  ;;  %v12906_v58 = vld [vmem:[#allocation8 + $0x25c] sm:$0xf0] }
0x15a2   : > { %vm6648_vm13 = vmor %vm6646_vm12, %vm6647_vm11  ;;  %v11710_v33 = vor.u32 %v12906_v58, %v11709_v32  ;;  %v11925_v32 = vld [vmem:[#allocation8 + $0x3b8] sm:$0xf] }
0x15a3   : > { %v6642_v1 = vmul.f32 %v13383_v14, %v6641_v49  ;;  %v11647_v49 = vld [vmem:[#allocation8 + $0x1e0] sm:$0xf0] }
0x15a5   : > { %v6643_v61 = vmul.f32 0.5, %v6642_v1  ;;  %v11653_v1 = vld [vmem:[#allocation8 + $0x1a8] sm:$0xf] }
0x15a7   : > { %v6644_v38 = vsub.f32 1.5, %v6643_v61  ;;  %v12891_v61 = vld [vmem:[#allocation8 + $0x1e4] sm:$0xf0] }
0x15a9   : > { %v6645_v63 = vmul.f32 %v13383_v14, %v6644_v38  ;;  %v12883_v38 = vld [vmem:[#allocation8 + $0x1ac] sm:$0xf] }
0x15ab   : > { %v6649_v42 = vsel %vm6648_vm13, %v13383_v14, %v6645_v63  ;;  %v12882_v14 = vld [vmem:[#allocation8 + $0x1a4] sm:$0xf]  ;;  %v11655_v63 = vld [vmem:[#allocation8 + $0x1e8] sm:$0xf0] }
0x15ac   : > { %v6650_v7 = vmul.f32 %v6649_v42, %v6638_v18  ;;  %v11646_v18 = vor.u32 %v12890_v34, %v11645_v25  ;;  %v11581_v42 = vld [vmem:[#allocation8 + $0x120] sm:$0xf]  ;;  %v11930_v34 = vor.u32 %v12949_v60, %v11927_v62  ;;  %v12869_v60 = vld [vmem:[#allocation8 + $0x13c] sm:$0xf] }
0x15ad   : > { %v11607_v62 = vld [vmem:[#allocation8 + $0x178] sm:$0xf0] }
0x15ae   : > { %v6654_v54 = vmul.f32 %v13249_v17, %v6650_v7  ;;  %v11650_v17 = vor.u32 %v12882_v14, %v11647_v49  ;;  %v11654_v7 = vor.u32 %v12891_v61, %v11653_v1  ;;  %v11861_v14 = vld [vmem:[#allocation8 + $0x338] sm:$0xf]  ;;  %v12933_v1 = vld [vmem:[#allocation8 + $0x33c] sm:$0xf] }
0x15af   : > { %v12941_v49 = vld [vmem:[#allocation8 + $0x374] sm:$0xf0]  ;;  %v11863_v61 = vld [vmem:[#allocation8 + $0x378] sm:$0xf0] }
0x15b0   : > { %v15222_v4 = vadd.f32 %v13250_v28, %v6654_v54  ;;  %v12874_v28 = vld [vmem:[#allocation8 + $0x15c] sm:$0xf0]  ;;  %v11658_v54 = vor.u32 %v12883_v38, %v11655_v63 }
0x15b1   : > { %v11582_v43 = vor.u32 %v12874_v28, %v11581_v42  ;;  %v11862_v42 = vor.u32 %v12941_v49, %v11861_v14  ;;  %v11866_v28 = vor.u32 %v12933_v1, %v11863_v61  ;;  %v12853_v14 = vld [vmem:[#allocation8 + $0xbc] sm:$0xf] }
0x15b2   : > { %v15226_v39 = vpack.c.bf16 %v15222_v4, %v15222_v4  ;;  %v11543_v49 = vld [vmem:[#allocation8 + $0xf8] sm:$0xf0] }
0x15b4   : > { %7472 = vmatmul.bf16.vlgmr.msrb.gmra.mxu0 %v15226_v39  ;;  %7485 = vmatmul.bf16.vlgmr.msra.gmra.mxu3 %v15226_v39 }
0x15b5   : > { %7498 = vmatmul.bf16.vlgmr.msrb.gmra.mxu1 %v15226_v39  ;;  %7511 = vmatmul.bf16.vlgmr.msra.gmra.mxu2 %v15226_v39 }
0x15b6   : > { %7568 = vmatpush.bf16.msrb.mxu0 %v11902_v8  ;;  %7581 = vmatpush.bf16.msra.mxu3 %v11906_v29  ;;  %v11517_v8 = vld [vmem:[#allocation8 + $0xa0] sm:$0xf] }
0x15b7   : > { %7594 = vmatpush.bf16.msrb.mxu1 %v11910_v22  ;;  %7607 = vmatpush.bf16.msra.mxu2 %v11914_v23  ;;  %v12858_v29 = vld [vmem:[#allocation8 + $0xdc] sm:$0xf0]  ;;  %v12850_v22 = vld [vmem:[#allocation8 + $0xa4] sm:$0xf] }
0x15b8   : > { %v11519_v23 = vld [vmem:[#allocation8 + $0xe0] sm:$0xf0]  ;;  %v11518_v52 = vor.u32 %v12858_v29, %v11517_v8  ;;  %v11798_v8 = vor.u32 %v12925_v47, %v11797_v10  ;;  %v11802_v29 = vor.u32 %v12917_v2, %v11799_v41  ;;  %v12837_v10 = vld [vmem:[#allocation8 + $0x3c] sm:$0xf] }
0x15b9   : > { %v11479_v47 = vld [vmem:[#allocation8 + $0x78] sm:$0xf0] }
0x15ba   : > { %7569 = vmatpush.bf16.msrb.mxu0 %v11838_v37  ;;  %7582 = vmatpush.bf16.msra.mxu3 %v11842_v27  ;;  %v11522_v37 = vor.u32 %v12850_v22, %v11519_v23  ;;  %v12842_v27 = vld [vmem:[#allocation8 + $0x5c] sm:$0xf0]  ;;  %v11733_v22 = vld [vmem:[#allocation8 + $0x238] sm:$0xf] }
0x15bb   : > { %7595 = vmatpush.bf16.msrb.mxu1 %v11846_v13  ;;  %7608 = vmatpush.bf16.msra.mxu2 %v11850_v30  ;;  %v11526_v13 = vor.u32 %v12859_v24, %v11525_v48  ;;  %v11530_v30 = vor.u32 %v12851_v45, %v11527_v35  ;;  %v11454_v58 = vor.u32 %v12842_v27, %v11453_v46  ;;  %v12909_v23 = vld [vmem:[#allocation8 + $0x274] sm:$0xf0]  ;;  %v12901_v48 = vld [vmem:[#allocation8 + $0x23c] sm:$0xf]  ;;  %v11661_v46 = vld [vmem:[#allocation8 + $0x1b0] sm:$0xf] }
0x15bc   : > { %v11735_v24 = vld [vmem:[#allocation8 + $0x278] sm:$0xf0] }
0x15bd   : > { %v11738_v27 = vor.u32 %v12901_v48, %v11735_v24  ;;  %v12972_v48 = vld [vmem:[#allocation9 + $0x70] sm:$0xff] }
0x15be   : > { %7570 = vmatpush.bf16.msrb.mxu0 %v11774_v50  ;;  %7583 = vmatpush.bf16.msra.mxu3 %v11778_v53  ;;  %v12948_v50 = vld [vmem:[#allocation8 + $0x3b4] sm:$0xf] }
0x15bf   : > { %7596 = vmatpush.bf16.msrb.mxu1 %v11782_v44  ;;  %7609 = vmatpush.bf16.msra.mxu2 %v11786_v20  ;;  %v11919_v53 = vld [vmem:[#allocation8 + $0x3f0] sm:$0xf0]  ;;  %v11458_v44 = vor.u32 %v12834_v11, %v11455_v21  ;;  %v12957_v20 = vld [vmem:[#allocation8 + $0x3f4] sm:$0xf0] }
0x15c0   : > { %v11922_v59 = vor.u32 %v12948_v50, %v11919_v53  ;;  %v11926_v25 = vor.u32 %v12957_v20, %v11925_v32  ;;  %v12884_v11 = vld [vmem:[#allocation8 + $0x1b4] sm:$0xf]  ;;  %v11674_v53 = vor.u32 %v12885_v56, %v11671_v40  ;;  %v12877_v20 = vld [vmem:[#allocation8 + $0x174] sm:$0xf0] }
0x15c1   : > { %v11663_v21 = vld [vmem:[#allocation8 + $0x1f0] sm:$0xf0]  ;;  %v12977_v56 = vld [vmem:[#allocation9 + $0x98] sm:$0xff] }
0x15c2   : > { %7571 = vmatpush.bf16.msrb.mxu0 %v11710_v33  ;;  %7584 = vmatpush.bf16.msra.mxu3 %v11714_v19  ;;  %v11853_v33 = vld [vmem:[#allocation8 + $0x330] sm:$0xf]  ;;  %v11666_v57 = vor.u32 %v12884_v11, %v11663_v21  ;;  %v12868_v32 = vld [vmem:[#allocation8 + $0x134] sm:$0xf] }
0x15c3   : > { %7597 = vmatpush.bf16.msrb.mxu1 %v11718_v3  ;;  %7610 = vmatpush.bf16.msra.mxu2 %v11722_v15  ;;  %v12940_v19 = vld [vmem:[#allocation8 + $0x36c] sm:$0xf0]  ;;  %v12932_v3 = vld [vmem:[#allocation8 + $0x334] sm:$0xf] }
0x15c4   : > { %7524 = vmatmul.bf16.vlgmr.msra.gmra.mxu0 %v15226_v39  ;;  %7537 = vmatmul.bf16.vlgmr.msrb.gmra.mxu3 %v15226_v39  ;;  %v11855_v15 = vld [vmem:[#allocation8 + $0x370] sm:$0xf0]  ;;  %v11854_v38 = vor.u32 %v12940_v19, %v11853_v33  ;;  %v11610_v19 = vor.u32 %v12869_v60, %v11607_v62 }
0x15c5   : > { %7550 = vmatmul.bf16.vlgmr.msra.gmra.mxu1 %v15226_v39  ;;  %7563 = vmatmul.bf16.vlgmr.msrb.gmra.mxu2 %v15226_v39  ;;  %v11858_v63 = vor.u32 %v12932_v3, %v11855_v15  ;;  %v11541_v3 = vld [vmem:[#allocation8 + $0xb8] sm:$0xf]  ;;  %v12988_v24 = vld [vmem:[#allocation9 + $0xf0] sm:$0xff] }
0x15c6   : > { %7572 = vmatpush.bf16.msrb.mxu0 %v11646_v18  ;;  %7585 = vmatpush.bf16.msra.mxu3 %v11650_v17  ;;  %v11789_v18 = vld [vmem:[#allocation8 + $0x2b0] sm:$0xf]  ;;  %v12861_v15 = vld [vmem:[#allocation8 + $0xf4] sm:$0xf0] }
0x15c7   : > { %7598 = vmatpush.bf16.msrb.mxu1 %v11654_v7  ;;  %7611 = vmatpush.bf16.msra.mxu2 %v11658_v54  ;;  %v12924_v17 = vld [vmem:[#allocation8 + $0x2ec] sm:$0xf0]  ;;  %v12916_v7 = vld [vmem:[#allocation8 + $0x2b4] sm:$0xf] }
0x15c8   : > { %v11791_v54 = vld [vmem:[#allocation8 + $0x2f0] sm:$0xf0]  ;;  %v11790_v51 = vor.u32 %v12924_v17, %v11789_v18  ;;  %v11542_v18 = vor.u32 %v12861_v15, %v11541_v3  ;;  %v11546_v17 = vor.u32 %v12853_v14, %v11543_v49 }
0x15c9   : > { %v11794_v16 = vor.u32 %v12916_v7, %v11791_v54  ;;  %v11477_v7 = vld [vmem:[#allocation8 + $0x38] sm:$0xf] }
0x15ca   : > { %7573 = vmatpush.bf16.msrb.mxu0 %v11582_v43  ;;  %7586 = vmatpush.bf16.msra.mxu3 %v11586_v6  ;;  %v11725_v43 = vld [vmem:[#allocation8 + $0x230] sm:$0xf]  ;;  %v12845_v54 = vld [vmem:[#allocation8 + $0x74] sm:$0xf0] }
0x15cb   : > { %7599 = vmatpush.bf16.msrb.mxu1 %v11590_v9  ;;  %7612 = vmatpush.bf16.msra.mxu2 %v11594_v12  ;;  %v12908_v6 = vld [vmem:[#allocation8 + $0x26c] sm:$0xf0]  ;;  %v12900_v9 = vld [vmem:[#allocation8 + $0x234] sm:$0xf] }
0x15cc   : > { %v11727_v12 = vld [vmem:[#allocation8 + $0x270] sm:$0xf0]  ;;  %v11726_v45 = vor.u32 %v12908_v6, %v11725_v43  ;;  %v12965_v43 = vld [vmem:[#allocation9 + $0x38] sm:$0xff] }
0x15cd   : > { %v11730_v35 = vor.u32 %v12900_v9, %v11727_v12  ;;  %v12981_v6 = vld [vmem:[#allocation9 + $0xb8] sm:$0xff] }
0x15ce   : > { %7574 = vmatpush.bf16.msrb.mxu0 %v11518_v52  ;;  %7587 = vmatpush.bf16.msra.mxu3 %v11522_v37  ;;  %v12892_v52 = vld [vmem:[#allocation8 + $0x1ec] sm:$0xf0]  ;;  %v11734_v37 = vor.u32 %v12909_v23, %v11733_v22  ;;  %v12973_v9 = vld [vmem:[#allocation9 + $0x78] sm:$0xff]  ;;  %v12963_v22 = vld [vmem:[#allocation9 + $0x28] sm:$0xff] }
0x15cf   : > { %7600 = vmatpush.bf16.msrb.mxu1 %v11526_v13  ;;  %7613 = vmatpush.bf16.msra.mxu2 %v11530_v30  ;;  %v11669_v13 = vld [vmem:[#allocation8 + $0x1b8] sm:$0xf]  ;;  %v11662_v55 = vor.u32 %v12892_v52, %v11661_v46  ;;  %v12979_v23 = vld [vmem:[#allocation9 + $0xa8] sm:$0xff]  ;;  %v15245_v52 = vld [vmem:[%s15971_s22] sm:$0xff] }
0x15d0   : > { %v12893_v30 = vld [vmem:[#allocation8 + $0x1f4] sm:$0xf0]  ;;  %v12987_v46 = vld [vmem:[#allocation9 + $0xe8] sm:$0xff] }
0x15d1   : > { %v11670_v50 = vor.u32 %v12893_v30, %v11669_v13  ;;  %v12989_v12 = vld [vmem:[#allocation9 + $0xf8] sm:$0xff] }
0x15d2   : > { %7575 = vmatpush.bf16.msrb.mxu0 %v11454_v58  ;;  %7588 = vmatpush.bf16.msra.mxu3 %v11458_v44  ;;  %v11599_v58 = vld [vmem:[#allocation8 + $0x170] sm:$0xf0]  ;;  %v11605_v44 = vld [vmem:[#allocation8 + $0x138] sm:$0xf] }
0x15d3   : > { %7601 = vmatpush.bf16.msrb.mxu1 %v11462_v0  ;;  %7614 = vmatpush.bf16.msra.mxu2 %v11466_v5  ;;  %v11598_v0 = vor.u32 %v12876_v26, %v11597_v36  ;;  %v11602_v5 = vor.u32 %v12868_v32, %v11599_v58  ;;  %v11606_v33 = vor.u32 %v12877_v20, %v11605_v44  ;;  %v12961_v30 = vld [vmem:[#allocation9 + $0x18] sm:$0xff]  ;;  %v12970_v36 = vld [vmem:[#allocation9 + $0x60] sm:$0xff]  ;;  %v12960_v58 = vld [vmem:[#allocation9 + $0x10] sm:$0xff] }
0x15d4   : > { %v12986_v26 = vld [vmem:[#allocation9 + $0xe0] sm:$0xff]  ;;  %v12976_v44 = vld [vmem:[#allocation9 + $0x90] sm:$0xff] }
0x15d5   : > { %7576 = vmatmul.bf16.vlgmr.msrb.gmra.mxu0 %v15226_v39  ;;  %7589 = vmatmul.bf16.vlgmr.msra.gmra.mxu3 %v15226_v39 }
0x15d6   : > { %7620 = vmatpush.bf16.msra.mxu0 %v11918_v31  ;;  %7633 = vmatpush.bf16.msrb.mxu3 %v11922_v59  ;;  %v11533_v31 = vld [vmem:[#allocation8 + $0xb0] sm:$0xf] }
0x15d7   : > { %7646 = vmatpush.bf16.msra.mxu1 %v11926_v25  ;;  %7659 = vmatpush.bf16.msrb.mxu2 %v11930_v34  ;;  %v12860_v59 = vld [vmem:[#allocation8 + $0xec] sm:$0xf0]  ;;  %v12852_v25 = vld [vmem:[#allocation8 + $0xb4] sm:$0xf] }
0x15d8   : > { %7602 = vmatmul.bf16.vlgmr.msrb.gmra.mxu1 %v15226_v39  ;;  %7615 = vmatmul.bf16.vlgmr.msra.gmra.mxu2 %v15226_v39  ;;  %v11535_v34 = vld [vmem:[#allocation8 + $0xf0] sm:$0xf0]  ;;  %v11534_v1 = vor.u32 %v12860_v59, %v11533_v31 }
0x15d9   : > { %v11538_v61 = vor.u32 %v12852_v25, %v11535_v34 }
0x15da   : > { %7621 = vmatpush.bf16.msra.mxu0 %v11854_v38  ;;  %7634 = vmatpush.bf16.msrb.mxu3 %v11858_v63  ;;  %v11469_v38 = vld [vmem:[#allocation8 + $0x30] sm:$0xf] }
0x15db   : > { %7647 = vmatpush.bf16.msra.mxu1 %v11862_v42  ;;  %7660 = vmatpush.bf16.msrb.mxu2 %v11866_v28  ;;  %v12844_v63 = vld [vmem:[#allocation8 + $0x6c] sm:$0xf0]  ;;  %v12836_v42 = vld [vmem:[#allocation8 + $0x34] sm:$0xf] }
0x15dc   : > { %v11471_v28 = vld [vmem:[#allocation8 + $0x70] sm:$0xf0]  ;;  %v11470_v2 = vor.u32 %v12844_v63, %v11469_v38 }
0x15dd   : > { %v11474_v41 = vor.u32 %v12836_v42, %v11471_v28 }
0x15de   : > { %7622 = vmatpush.bf16.msra.mxu0 %v11790_v51  ;;  %7635 = vmatpush.bf16.msrb.mxu3 %v11794_v16  ;;  %v11478_v51 = vor.u32 %v12845_v54, %v11477_v7  ;;  %v11482_v16 = vor.u32 %v12837_v10, %v11479_v47  ;;  %v6798_v54 = vperm.slane %v15245_v52, 6 }
0x15df   : > { %7648 = vmatpush.bf16.msra.mxu1 %v11798_v8  ;;  %7661 = vmatpush.bf16.msrb.mxu2 %v11802_v29  ;;  %v12964_v8 = vld [vmem:[#allocation9 + $0x30] sm:$0xff] }
0x15e0   : > { %v12980_v29 = vld [vmem:[#allocation9 + $0xb0] sm:$0xff] }
0x15e2   : > { %7623 = vmatpush.bf16.msra.mxu0 %v11726_v45  ;;  %7636 = vmatpush.bf16.msrb.mxu3 %v11730_v35  ;;  %v12978_v45 = vld [vmem:[#allocation9 + $0xa0] sm:$0xff]  ;;  %v12971_v35 = vld [vmem:[#allocation9 + $0x68] sm:$0xff] }
0x15e3   : > { %7649 = vmatpush.bf16.msra.mxu1 %v11734_v37  ;;  %7662 = vmatpush.bf16.msrb.mxu2 %v11738_v27  ;;  %v6792_v37 = vperm.slane %v15245_v52, 0  ;;  %v6794_v27 = vperm.slane %v15245_v52, 2 }
0x15e6   : > { %7624 = vmatpush.bf16.msra.mxu0 %v11662_v55  ;;  %7637 = vmatpush.bf16.msrb.mxu3 %v11666_v57  ;;  %v6793_v57 = vperm.slane %v15245_v52, 1 }
0x15e7   : > { %7650 = vmatpush.bf16.msra.mxu1 %v11670_v50  ;;  %7663 = vmatpush.bf16.msrb.mxu2 %v11674_v53  ;;  %v6795_v53 = vperm.slane %v15245_v52, 3 }
0x15ea   : > { %7625 = vmatpush.bf16.msra.mxu0 %v11598_v0  ;;  %7638 = vmatpush.bf16.msrb.mxu3 %v11602_v5 }
0x15eb   : > { %7651 = vmatpush.bf16.msra.mxu1 %v11606_v33  ;;  %7664 = vmatpush.bf16.msrb.mxu2 %v11610_v19 }
0x15ee   : > { %7626 = vmatpush.bf16.msra.mxu0 %v11534_v1  ;;  %7639 = vmatpush.bf16.msrb.mxu3 %v11538_v61 }
0x15ef   : > { %7652 = vmatpush.bf16.msra.mxu1 %v11542_v18  ;;  %7665 = vmatpush.bf16.msrb.mxu2 %v11546_v17  ;;  %v6796_v18 = vperm.slane %v15245_v52, 4 }
0x15f2   : > { %7627 = vmatpush.bf16.msra.mxu0 %v11470_v2  ;;  %7640 = vmatpush.bf16.msrb.mxu3 %v11474_v41 }
0x15f3   : > { %7653 = vmatpush.bf16.msra.mxu1 %v11478_v51  ;;  %7666 = vmatpush.bf16.msrb.mxu2 %v11482_v16  ;;  %v6797_v51 = vperm.slane %v15245_v52, 5 }
0x15f5   : > { %7628 = vmatmul.bf16.vlgmr.msra.gmra.mxu0 %v15226_v39  ;;  %7641 = vmatmul.bf16.vlgmr.msrb.gmra.mxu3 %v15226_v39 }
0x15f6   : > { %7654 = vmatmul.bf16.vlgmr.msra.gmra.mxu1 %v15226_v39  ;;  %7667 = vmatmul.bf16.vlgmr.msrb.gmra.mxu2 %v15226_v39  ;;  %v12962_v39 = vld [vmem:[#allocation9 + $0x20] sm:$0xff] }
0x15f7   : > { %9356 = vmatpush.bf16.msrb.mxu0 %v12965_v43  ;;  %9382 = vmatpush.bf16.msrb.mxu1 %v12981_v6 }
0x15f8   : > { %9369 = vmatpush.bf16.msra.mxu3 %v12973_v9  ;;  %9395 = vmatpush.bf16.msra.mxu2 %v12989_v12 }
0x15fb   : > { %9357 = vmatpush.bf16.msrb.mxu0 %v12964_v8  ;;  %9383 = vmatpush.bf16.msrb.mxu1 %v12980_v29 }
0x15fc   : > { %9370 = vmatpush.bf16.msra.mxu3 %v12972_v48  ;;  %9396 = vmatpush.bf16.msra.mxu2 %v12988_v24 }
0x15ff   : > { %9358 = vmatpush.bf16.msrb.mxu0 %v12963_v22  ;;  %9384 = vmatpush.bf16.msrb.mxu1 %v12979_v23 }
0x1600   : > { %9371 = vmatpush.bf16.msra.mxu3 %v12971_v35  ;;  %9397 = vmatpush.bf16.msra.mxu2 %v12987_v46 }
0x1603   : > { %9359 = vmatpush.bf16.msrb.mxu0 %v12962_v39  ;;  %9385 = vmatpush.bf16.msrb.mxu1 %v12978_v45 }
0x1604   : > { %9372 = vmatpush.bf16.msra.mxu3 %v12970_v36  ;;  %9398 = vmatpush.bf16.msra.mxu2 %v12986_v26 }
0x1607   : > { %9360 = vmatpush.bf16.msrb.mxu0 %v12961_v30  ;;  %9386 = vmatpush.bf16.msrb.mxu1 %v12977_v56 }
0x160b   : > { %9361 = vmatpush.bf16.msrb.mxu0 %v12960_v58  ;;  %9387 = vmatpush.bf16.msrb.mxu1 %v12976_v44 }
0x1631   : > { %v7473_v11 = vpop.f32.mrf.mxu0 }
0x1632   : > { %v15249_v21 = vadd.f32 %v7473_v11, %v6792_v37  ;;  %v7499_v13 = vpop.f32.mrf.mxu1 }
0x1633   : > { %v15251_v40 = vadd.f32 %v7499_v13, %v6794_v27 }
0x1634   : > { %v7672_v55 = vand.u32 2147483647, %v15249_v21  ;;  %v15268_v42 = vmul.f32 0.5, %v15249_v21 }
0x1635   : > { %v7674_v50 = vand.u32 2147483647, %v15251_v40  ;;  %v15271_v28 = vmul.f32 0.5, %v15251_v40 }
0x1636   : > { %v7688_v32 = vmul.f32 0.70710677, %v7672_v55 }
0x1637   : > { %v7690_v20 = vmul.f32 0.70710677, %v7674_v50  ;;  %v7486_v60 = vpop.f32.mrf.mxu3 }
0x1638   : > { %v7704_v62 = vmul.f32 0.3275911, %v7688_v32  ;;  %v15257_v0 = vadd.f32 %v7486_v60, %v6793_v57  ;;  %v7512_v5 = vpop.f32.mrf.mxu2  ;;  %v8120_v25 = vsub.f32 0.0, %v7688_v32 }
0x1639   : > { %v7706_v31 = vmul.f32 0.3275911, %v7690_v20  ;;  %v15259_v59 = vadd.f32 %v7512_v5, %v6795_v53  ;;  %v7475_v33 = vpop.f32.mrf.mxu0  ;;  %v8122_v49 = vsub.f32 0.0, %v7690_v20 }
0x163a   : > { %v7720_v19 = vadd.f32 1.0, %v7704_v62  ;;  %v7501_v34 = vpop.f32.mrf.mxu1  ;;  %v7673_v15 = vand.u32 2147483647, %v15257_v0  ;;  %v8136_v1 = vmul.f32 %v8120_v25, %v7688_v32 }
0x163b   : > { %v15261_v3 = vadd.f32 1.0, %v7706_v31  ;;  %v7675_v14 = vand.u32 2147483647, %v15259_v59  ;;  %v8138_v10 = vmul.f32 %v8122_v49, %v7690_v20 }
0x163c   : > { %13384 = vrcp.f32 %v7720_v19  ;;  %v7689_v61 = vmul.f32 0.70710677, %v7673_v15  ;;  %v7745_v17 = vand.u32 2147483647, %v7720_v19  ;;  %vm7741_vm14 = vweird.f32 %v7720_v19 }
0x163d   : > { %13386 = vrcp.f32 %v15261_v3  ;;  %v7691_v38 = vmul.f32 0.70710677, %v7675_v14  ;;  %v7747_v43 = vand.u32 2147483648, %v7720_v19  ;;  %v8152_v6 = vmul.f32 1.442695, %v8136_v1 }
0x163e   : > { %v7705_v47 = vmul.f32 0.3275911, %v7689_v61  ;;  %vm7771_vm15 = vweird.f32 %v15261_v3  ;;  %v7775_v12 = vand.u32 2147483647, %v15261_v3  ;;  %v8121_v23 = vsub.f32 0.0, %v7689_v61 }
0x163f   : > { %v7488_v63 = vpop.f32.mrf.mxu3  ;;  %v7707_v2 = vmul.f32 0.3275911, %v7691_v38  ;;  %vm15279_vm1 = vcmp.eq.f32.partialorder %v7745_v17, 8.507059e+37  ;;  %v7777_v39 = vand.u32 2147483648, %v15261_v3  ;;  %v8156_v46 = vmul.f32 1.442695, %v8138_v10 }
0x1640   : > { %v7514_v7 = vpop.f32.mrf.mxu2  ;;  %v15277_v22 = vadd.f32 1.0, %v7705_v47  ;;  %v7748_v27 = vor.u32 1.1754944e-38, %v7747_v43  ;;  %v8123_v13 = vsub.f32 0.0, %v7691_v38  ;;  %v8137_v56 = vmul.f32 %v8121_v23, %v7689_v61  ;;  %v12985_v23 = vld [vmem:[#allocation9 + $0xd8] sm:$0xff] }
0x1641   : > { %v7525_v41 = vpop.f32.mrf.mxu0  ;;  %v15285_v45 = vadd.f32 1.0, %v7707_v2  ;;  %vm15293_vm5 = vcmp.eq.f32.partialorder %v7775_v12, 8.507059e+37  ;;  %v7778_v53 = vor.u32 1.1754944e-38, %v7777_v39  ;;  %v12969_v12 = vld [vmem:[#allocation9 + $0x58] sm:$0xff]  ;;  %9399 = vmatpush.bf16.msra.mxu2 %v12985_v23 }
0x1642   : > { %v13385_v16 = vpop.eup %13384  ;;  %v7551_v8 = vpop.f32.mrf.mxu1  ;;  %13388 = vrcp.f32 %v15277_v22  ;;  %v15288_v37 = vadd.f32 %v7525_v41, %v6796_v18  ;;  %v7760_v26 = vand.u32 2147483647, %v15277_v22  ;;  %vm7756_vm7 = vweird.f32 %v15277_v22  ;;  %9373 = vmatpush.bf16.msra.mxu3 %v12969_v12 }
0x1643   : > { %v13387_v29 = vpop.eup %13386  ;;  %v7737_v9 = vmul.f32 %v13385_v16, %v7720_v19  ;;  %13390 = vrcp.f32 %v15285_v45  ;;  %vm7742_vm3 = vweird.f32 %v13385_v16  ;;  %v7762_v20 = vand.u32 2147483648, %v15277_v22 }
0x1644   : > { %v7767_v24 = vmul.f32 %v13387_v29, %v15261_v3  ;;  %13392 = vpow2.f32 %v8152_v6  ;;  %vm7772_vm4 = vweird.f32 %v13387_v29  ;;  %v7676_v32 = vand.u32 2147483647, %v15288_v37  ;;  %vm7743_vm6 = vmor %vm7741_vm14, %vm7742_vm3 }
0x1645   : > { %v7738_v35 = vsub.f32 1.0, %v7737_v9  ;;  %13394 = vpow2.f32 %v8156_v46  ;;  %v8139_v60 = vmul.f32 %v8123_v13, %v7691_v38  ;;  %vm7773_vm8 = vmor %vm7771_vm15, %vm7772_vm4  ;;  %v15305_v33 = vmul.f32 1.442695, %v8137_v56  ;;  %v12959_v13 = vld [vmem:[#allocation9 + $0x8] sm:$0xff] }
0x1646   : > { %v7768_v11 = vsub.f32 1.0, %v7767_v24  ;;  %v7692_v25 = vmul.f32 0.70710677, %v7676_v32  ;;  %v15307_v34 = vadd.f32 %v7551_v8, %v6798_v54  ;;  %vm15314_vm9 = vcmp.eq.f32.partialorder %v7760_v26, 8.507059e+37  ;;  %9362 = vmatpush.bf16.msrb.mxu0 %v12959_v13 }
0x1647   : > { %v7739_v30 = vmul.f32 %v13385_v16, %v7738_v35  ;;  %v15291_v55 = vpop.f32.mrf.mxu3  ;;  %vm7786_vm2 = vweird.f32 %v15285_v45  ;;  %v7790_v18 = vand.u32 2147483647, %v15285_v45  ;;  %v7792_v54 = vand.u32 2147483648, %v15285_v45 }
0x1648   : > { %v7769_v57 = vmul.f32 %v13387_v29, %v7768_v11  ;;  %v13389_v5 = vpop.eup %13388  ;;  %v7708_v10 = vmul.f32 0.3275911, %v7692_v25  ;;  %v15333_v43 = vpop.f32.mrf.mxu2  ;;  %v8124_v39 = vsub.f32 0.0, %v7692_v25  ;;  %v7763_v11 = vor.u32 1.1754944e-38, %v7762_v20 }
0x1649   : > { %v7740_v50 = vadd.f32 %v13385_v16, %v7739_v30  ;;  %v7527_v58 = vpop.f32.mrf.mxu0  ;;  %v13391_v19 = vpop.eup %13390  ;;  %v7752_v49 = vmul.f32 %v13389_v5, %v15277_v22  ;;  %vm7757_vm10 = vweird.f32 %v13389_v5  ;;  %v12975_v30 = vld [vmem:[#allocation9 + $0x88] sm:$0xff]  ;;  %vm15345_vm13 = vcmp.eq.f32.partialorder %v7790_v18, 8.507059e+37 }
0x164a   : > { %v7770_v44 = vadd.f32 %v13387_v29, %v7769_v57  ;;  %v7553_v62 = vpop.f32.mrf.mxu1  ;;  %v15319_v3 = vpop.eup %13392  ;;  %v7782_v63 = vmul.f32 %v13391_v19, %v15285_v45  ;;  %vm7787_vm11 = vweird.f32 %v13391_v19  ;;  %v15335_v9 = vadd.f32 1.0, %v7708_v10  ;;  %vm7758_vm12 = vmor %vm7756_vm7, %vm7757_vm10  ;;  %9388 = vmatpush.bf16.msrb.mxu1 %v12975_v30 }
0x164b   : > { %v7744_v31 = vsel %vm7743_vm6, %v13385_v16, %v7740_v50  ;;  %v7753_v7 = vsub.f32 1.0, %v7752_v49  ;;  %v15330_v47 = vpop.eup %13394  ;;  %v7678_v16 = vand.u32 2147483647, %v15307_v34  ;;  %v8158_v26 = vmul.f32 1.442695, %v8139_v60  ;;  %vm7788_vm14 = vmor %vm7786_vm2, %vm7787_vm11  ;;  %v12968_v60 = vld [vmem:[#allocation9 + $0x50] sm:$0xff] }
0x164c   : > { %v15311_v15 = vsel %vm15279_vm1, %v7748_v27, %v7744_v31  ;;  %v7774_v14 = vsel %vm7773_vm8, %v13387_v29, %v7770_v44  ;;  %v7783_v41 = vsub.f32 1.0, %v7782_v63  ;;  %13396 = vrcp.f32 %v15335_v9  ;;  %v12984_v31 = vld [vmem:[#allocation9 + $0xd0] sm:$0xff]  ;;  %v12974_v63 = vld [vmem:[#allocation9 + $0x80] sm:$0xff]  ;;  %9374 = vmatpush.bf16.msra.mxu3 %v12968_v60 }
0x164d   : > { %v7976_v61 = vmul.f32 1.0614054, %v15311_v15  ;;  %v15324_v38 = vsel %vm15293_vm5, %v7778_v53, %v7774_v14  ;;  %v7754_v29 = vmul.f32 %v13389_v5, %v7753_v7  ;;  %v15338_v35 = vmul.f32 0.70710677, %v7678_v16  ;;  %9400 = vmatpush.bf16.msra.mxu2 %v12984_v31 }
0x164e   : > { %v7978_v17 = vmul.f32 1.0614054, %v15324_v38  ;;  %v7784_v24 = vmul.f32 %v13391_v19, %v7783_v41  ;;  %v7793_v32 = vor.u32 1.1754944e-38, %v7792_v54  ;;  %v8140_v62 = vmul.f32 %v8124_v39, %v7692_v25  ;;  %9389 = vmatpush.bf16.msrb.mxu1 %v12974_v63  ;;  %v13013_v41 = vld [vmem:[#allocation9 + $0x1b8] sm:$0xff] }
0x164f   : > { %v7992_v2 = vadd.f32 -1.4531521, %v7976_v61  ;;  %v7540_v6 = vpop.f32.mrf.mxu3  ;;  %v7755_v27 = vadd.f32 %v13389_v5, %v7754_v29  ;;  %v7710_v58 = vmul.f32 0.3275911, %v15338_v35  ;;  %v7805_v49 = vand.u32 2147483647, %v15335_v9 }
0x1650   : > { %v7994_v8 = vadd.f32 -1.4531521, %v7978_v17  ;;  %v7785_v57 = vadd.f32 %v13391_v19, %v7784_v24  ;;  %v12958_v61 = vld [vmem:[#allocation9] sm:$0xff]  ;;  %13398 = vpow2.f32 %v15305_v33  ;;  %v7566_v1 = vpop.f32.mrf.mxu2  ;;  %v12997_v17 = vld [vmem:[#allocation9 + $0x138] sm:$0xff]  ;;  %vm7801_vm15 = vweird.f32 %v15335_v9  ;;  %v12983_v29 = vld [vmem:[#allocation9 + $0xc8] sm:$0xff] }
0x1651   : > { %v8008_v48 = vmul.f32 %v7992_v2, %v15311_v15  ;;  %v7759_v53 = vsel %vm7758_vm12, %v13389_v5, %v7755_v27  ;;  %v15367_v25 = vadd.f32 1.0, %v7710_v58  ;;  %13400 = vpow2.f32 %v8158_v26  ;;  %9363 = vmatpush.bf16.msrb.mxu0 %v12958_v61  ;;  %9401 = vmatpush.bf16.msra.mxu2 %v12983_v29 }
0x1652   : > { %v8010_v46 = vmul.f32 %v7994_v8, %v15324_v38  ;;  %v15356_v44 = vsel %vm15314_vm9, %v7763_v11, %v7759_v53  ;;  %v7789_v20 = vsel %vm7788_vm14, %v13391_v19, %v7785_v57  ;;  %v13397_v7 = vpop.eup %13396  ;;  %v7807_v2 = vand.u32 2147483648, %v15335_v9  ;;  %v12967_v8 = vld [vmem:[#allocation9 + $0x48] sm:$0xff]  ;;  %9434 = vmatpush.bf16.msra.mxu1 %v13013_v41  ;;  %v15383_v11 = vpop.f32.mrf.mxu0 }
0x1653   : > { %v8024_v56 = vadd.f32 1.4214138, %v8008_v48  ;;  %v7977_v45 = vmul.f32 1.0614054, %v15356_v44  ;;  %v15362_v14 = vsel %vm15345_vm13, %v7793_v32, %v7789_v20  ;;  %v7797_v6 = vmul.f32 %v13397_v7, %v15335_v9  ;;  %9375 = vmatpush.bf16.msra.mxu3 %v12967_v8  ;;  %v15466_v9 = vld [vmem:[%s15972_s15 + $0x8] sm:$0xff] }
0x1654   : > { %v8026_v50 = vadd.f32 1.4214138, %v8010_v46  ;;  %v7979_v19 = vmul.f32 1.0614054, %v15362_v14  ;;  %v15375_v48 = vmul.f32 1.442695, %v8140_v62  ;;  %13402 = vrcp.f32 %v15367_v25 }
0x1655   : > { %v8040_v22 = vmul.f32 %v8024_v56, %v15311_v15  ;;  %v7993_v10 = vadd.f32 -1.4531521, %v7977_v45  ;;  %9408 = vmatpush.bf16.msra.mxu0 %v12997_v17  ;;  %v7798_v46 = vsub.f32 1.0, %v7797_v6  ;;  %vm15379_vm1 = vcmp.eq.f32.partialorder %v7805_v49, 8.507059e+37  ;;  %v15385_v13 = vpop.f32.mrf.mxu1  ;;  %v12996_v17 = vld [vmem:[#allocation9 + $0x130] sm:$0xff] }
0x1656   : > { %v8042_v5 = vmul.f32 %v8026_v50, %v15324_v38  ;;  %v7995_v33 = vadd.f32 -1.4531521, %v7979_v19  ;;  %vm8216_vm3 = vcmp.ge.f32.partialorder %v15249_v21, 0.0  ;;  %v7808_v57 = vor.u32 1.1754944e-38, %v7807_v2  ;;  %v15393_v26 = vpop.eup %13398 }
0x1657   : > { %v8056_v18 = vadd.f32 -0.28449672, %v8040_v22  ;;  %v8009_v23 = vmul.f32 %v7993_v10, %v15356_v44  ;;  %v15391_v36 = vadd.f32 %v15291_v55, %v6797_v51  ;;  %vm8218_vm4 = vcmp.ge.f32.partialorder %v15251_v40, 0.0  ;;  %v15397_v58 = vpop.eup %13400 }
0x1658   : > { %v8058_v54 = vadd.f32 -0.28449672, %v8042_v5  ;;  %v8011_v39 = vmul.f32 %v7995_v33, %v15362_v14  ;;  %v7799_v32 = vmul.f32 %v13397_v7, %v7798_v46  ;;  %vm7802_vm5 = vweird.f32 %v13397_v7  ;;  %v12982_v33 = vld [vmem:[#allocation9 + $0xc0] sm:$0xff] }
0x1659   : > { %v8072_v16 = vmul.f32 %v8056_v18, %v15311_v15  ;;  %v8025_v56 = vadd.f32 1.4214138, %v8009_v23  ;;  %v7835_v62 = vand.u32 2147483647, %v15367_v25  ;;  %v8126_v51 = vsub.f32 0.0, %v15338_v35  ;;  %vm7803_vm7 = vmor %vm7801_vm15, %vm7802_vm5  ;;  %9409 = vmatpush.bf16.msra.mxu0 %v12996_v17  ;;  %9402 = vmatpush.bf16.msra.mxu2 %v12982_v33 }
0x165a   : > { %v8074_v12 = vmul.f32 %v8058_v54, %v15324_v38  ;;  %v8027_v53 = vadd.f32 1.4214138, %v8011_v39  ;;  %vm7831_vm6 = vweird.f32 %v15367_v25  ;;  %v15406_v31 = vpop.eup %13402  ;;  %v7677_v49 = vand.u32 2147483647, %v15391_v36  ;;  %v13012_v54 = vld [vmem:[#allocation9 + $0x1b0] sm:$0xff]  ;;  %v7579_v6 = vpop.f32.mrf.mxu0 }
0x165b   : > { %v8088_v24 = vadd.f32 0.2548296, %v8072_v16  ;;  %v8041_v20 = vmul.f32 %v8025_v56, %v15356_v44  ;;  %v7827_v18 = vmul.f32 %v15406_v31, %v15367_v25  ;;  %vm15420_vm8 = vcmp.eq.f32.partialorder %v7835_v62, 8.507059e+37  ;;  %v12966_v16 = vld [vmem:[#allocation9 + $0x40] sm:$0xff]  ;;  %9435 = vmatpush.bf16.msra.mxu1 %v13012_v54  ;;  %v13021_v56 = vld [vmem:[#allocation9 + $0x1f8] sm:$0xff] }
0x165c   : > { %v8090_v30 = vadd.f32 0.2548296, %v8074_v12  ;;  %v8043_v60 = vmul.f32 %v8027_v53, %v15362_v14  ;;  %vm7832_vm9 = vweird.f32 %v15406_v31  ;;  %v15427_v23 = vmul.f32 0.70710677, %v7677_v49  ;;  %9376 = vmatpush.bf16.msra.mxu3 %v12966_v16 }
0x165d   : > { %v8104_v50 = vmul.f32 %v8088_v24, %v15311_v15  ;;  %v7800_v15 = vadd.f32 %v13397_v7, %v7799_v32  ;;  %v8057_v45 = vadd.f32 -0.28449672, %v8041_v20  ;;  %v7828_v41 = vsub.f32 1.0, %v7827_v18  ;;  %v7605_v8 = vpop.f32.mrf.mxu1  ;;  %9447 = vmatpush.bf16.msrb.mxu2 %v13021_v56  ;;  %vm7833_vm10 = vmor %vm7831_vm6, %vm7832_vm9 }
0x165e   : > { %v8106_v22 = vmul.f32 %v8090_v30, %v15324_v38  ;;  %v7837_v38 = vand.u32 2147483648, %v15367_v25  ;;  %v8059_v63 = vadd.f32 -0.28449672, %v8043_v60  ;;  %vm8217_vm2 = vcmp.ge.f32.partialorder %v15257_v0, 0.0  ;;  %v13005_v30 = vld [vmem:[#allocation9 + $0x178] sm:$0xff] }
0x165f   : > { %v8184_v55 = vmul.f32 %v15319_v3, %v8104_v50  ;;  %v7804_v3 = vsel %vm7803_vm7, %v13397_v7, %v7800_v15  ;;  %v8073_v1 = vmul.f32 %v8057_v45, %v15356_v44  ;;  %v7829_v27 = vmul.f32 %v15406_v31, %v7828_v41  ;;  %v15448_v15 = vpop.f32.mrf.mxu3  ;;  %v15475_v41 = vpop.f32.mrf.mxu2 }
0x1660   : > { %v8186_v5 = vmul.f32 %v15330_v47, %v8106_v22  ;;  %v15418_v47 = vsel %vm15379_vm1, %v7808_v57, %v7804_v3  ;;  %v8075_v2 = vmul.f32 %v8059_v63, %v15362_v14  ;;  %v7709_v32 = vmul.f32 0.3275911, %v15427_v23  ;;  %9421 = vmatpush.bf16.msrb.mxu3 %v13005_v30 }
0x1661   : > { %v8200_v61 = vsub.f32 1.0, %v8184_v55  ;;  %v7980_v7 = vmul.f32 1.0614054, %v15418_v47  ;;  %v8089_v12 = vadd.f32 0.2548296, %v8073_v1  ;;  %v7830_v62 = vadd.f32 %v15406_v31, %v7829_v27 }
0x1662   : > { %v8202_v19 = vsub.f32 1.0, %v8186_v5  ;;  %v8091_v39 = vadd.f32 0.2548296, %v8075_v2  ;;  %v7838_v40 = vor.u32 1.1754944e-38, %v7837_v38  ;;  %vm8219_vm11 = vcmp.ge.f32.partialorder %v15259_v59, 0.0 }
0x1663   : > { %v8232_v10 = vsub.f32 0.0, %v8200_v61  ;;  %v7996_v46 = vadd.f32 -1.4531521, %v7980_v7  ;;  %v8105_v53 = vmul.f32 %v8089_v12, %v15356_v44  ;;  %v15446_v44 = vadd.f32 1.0, %v7709_v32 }
0x1664   : > { %v8234_v29 = vsub.f32 0.0, %v8202_v19  ;;  %v8107_v22 = vmul.f32 %v8091_v39, %v15362_v14  ;;  %v7834_v49 = vsel %vm7833_vm10, %v15406_v31, %v7830_v62  ;;  %v8142_v31 = vmul.f32 %v8126_v51, %v15338_v35 }
0x1665   : > { %v8248_v24 = vsel %vm8216_vm3, %v8200_v61, %v8232_v10  ;;  %v8012_v20 = vmul.f32 %v7996_v46, %v15418_v47  ;;  %v8185_v60 = vmul.f32 %v15393_v26, %v8105_v53  ;;  %v15455_v61 = vsel %vm15420_vm8, %v7838_v40, %v7834_v49  ;;  %v13011_v53 = vld [vmem:[#allocation9 + $0x1a8] sm:$0xff] }
0x1666   : > { %v8280_v57 = vadd.f32 1.0, %v8248_v24  ;;  %v8250_v50 = vsel %vm8218_vm4, %v8202_v19, %v8234_v29  ;;  %v8187_v5 = vmul.f32 %v15397_v58, %v8107_v22  ;;  %13404 = vrcp.f32 %v15446_v44  ;;  %9436 = vmatpush.bf16.msra.mxu1 %v13011_v53 }
0x1667   : > { %v8282_v21 = vadd.f32 1.0, %v8250_v50  ;;  %v8028_v45 = vadd.f32 1.4214138, %v8012_v20  ;;  %v8201_v26 = vsub.f32 1.0, %v8185_v60  ;;  %v8265_v58 = vmul.f32 0.5, %v15257_v0  ;;  %v7592_v8 = vpop.f32.mrf.mxu3  ;;  %v12995_v50 = vld [vmem:[#allocation9 + $0x128] sm:$0xff] }
0x1668   : > { %v8296_v55 = vmul.f32 %v8280_v57, %v15268_v42  ;;  %v8203_v38 = vsub.f32 1.0, %v8187_v5  ;;  %v8267_v54 = vmul.f32 0.5, %v15259_v59  ;;  %13406 = vpow2.f32 %v15375_v48  ;;  %9410 = vmatpush.bf16.msra.mxu0 %v12995_v50 }
0x1669   : > { %v8298_v14 = vmul.f32 %v8282_v21, %v15271_v28  ;;  %v8044_v63 = vmul.f32 %v8028_v45, %v15418_v47  ;;  %v7982_v28 = vmul.f32 1.0614054, %v15455_v61  ;;  %v8233_v3 = vsub.f32 0.0, %v8201_v26 }
0x166a   : > { %v8312_v42 = vpack.c.bf16 %v8296_v55, %v8296_v55  ;;  %v8235_v18 = vsub.f32 0.0, %v8203_v38  ;;  %v6799_v10 = vperm.slane %v15245_v52, 7  ;;  %v8164_v6 = vmul.f32 1.442695, %v8142_v31 }
0x166b   : > { %v8314_v25 = vpack.c.bf16 %v8298_v14, %v8298_v14  ;;  %v8060_v19 = vadd.f32 -0.28449672, %v8044_v63  ;;  %v7998_v1 = vadd.f32 -1.4531521, %v7982_v28  ;;  %v8249_v17 = vsel %vm8217_vm2, %v8201_v26, %v8233_v3  ;;  %v13020_v14 = vld [vmem:[#allocation9 + $0x1f0] sm:$0xff]  ;;  %v7618_v63 = vpop.f32.mrf.mxu2 }
0x166c   : > { %9364 = vmatmul.bf16.vlgmr.msrb.gmra.mxu0 %v8312_v42  ;;  %v8281_v2 = vadd.f32 1.0, %v8249_v17  ;;  %v8251_v7 = vsel %vm8219_vm11, %v8203_v38, %v8235_v18  ;;  %v13405_v16 = vpop.eup %13404  ;;  %v15478_v0 = vadd.f32 %v15333_v43, %v6799_v10  ;;  %v6800_v59 = vperm.slane %v15466_v9, 0  ;;  %9448 = vmatpush.bf16.msrb.mxu2 %v13020_v14  ;;  %v13010_v38 = vld [vmem:[#allocation9 + $0x1a0] sm:$0xff]  ;;  %v13003_v18 = vld [vmem:[#allocation9 + $0x168] sm:$0xff] }
0x166d   : > { %9390 = vmatmul.bf16.vlgmr.msrb.gmra.mxu1 %v8314_v25  ;;  %v8076_v35 = vmul.f32 %v8060_v19, %v15418_v47  ;;  %v8014_v51 = vmul.f32 %v7998_v1, %v15455_v61  ;;  %v8283_v33 = vadd.f32 1.0, %v8251_v7  ;;  %v7812_v12 = vmul.f32 %v13405_v16, %v15446_v44  ;;  %v12994_v25 = vld [vmem:[#allocation9 + $0x120] sm:$0xff]  ;;  %v13019_v17 = vld [vmem:[#allocation9 + $0x1e8] sm:$0xff]  ;;  %v12993_v7 = vld [vmem:[#allocation9 + $0x118] sm:$0xff] }
0x166e   : > { %v8297_v48 = vmul.f32 %v8281_v2, %v8265_v58  ;;  %v7820_v39 = vand.u32 2147483647, %v15446_v44  ;;  %v8125_v46 = vsub.f32 0.0, %v15427_v23  ;;  %v7679_v27 = vand.u32 2147483647, %v15478_v0  ;;  %v13407_v32 = vpop.eup %13406  ;;  %9411 = vmatpush.bf16.msra.mxu0 %v12994_v25  ;;  %9437 = vmatpush.bf16.msra.mxu1 %v13010_v38 }
0x166f   : > { %v8092_v29 = vadd.f32 0.2548296, %v8076_v35  ;;  %v8030_v52 = vadd.f32 1.4214138, %v8014_v51  ;;  %v8299_v24 = vmul.f32 %v8283_v33, %v8267_v54  ;;  %v7813_v57 = vsub.f32 1.0, %v7812_v12  ;;  %v13009_v35 = vld [vmem:[#allocation9 + $0x198] sm:$0xff] }
0x1670   : > { %v8313_v30 = vpack.c.bf16 %v8297_v48, %v8297_v48  ;;  %vm7817_vm12 = vweird.f32 %v13405_v16  ;;  %v7822_v22 = vand.u32 2147483648, %v15446_v44  ;;  %v15488_v20 = vmul.f32 0.70710677, %v7679_v27  ;;  %9449 = vmatpush.bf16.msrb.mxu2 %v13019_v17  ;;  %v13018_v48 = vld [vmem:[#allocation9 + $0x1e0] sm:$0xff]  ;;  %v12992_v27 = vld [vmem:[#allocation9 + $0x110] sm:$0xff] }
0x1671   : > { %v8108_v56 = vmul.f32 %v8092_v29, %v15418_v47  ;;  %v8046_v43 = vmul.f32 %v8030_v52, %v15455_v61  ;;  %v8315_v21 = vpack.c.bf16 %v8299_v24, %v8299_v24  ;;  %v7814_v60 = vmul.f32 %v13405_v16, %v7813_v57  ;;  %v13004_v47 = vld [vmem:[#allocation9 + $0x170] sm:$0xff] }
0x1672   : > { %v15491_v40 = vadd.f32 %v15383_v11, %v6800_v59  ;;  %13408 = vpow2.f32 %v8164_v6  ;;  %vm7816_vm13 = vweird.f32 %v15446_v44  ;;  %v8141_v5 = vmul.f32 %v8125_v46, %v15427_v23  ;;  %9377 = vmatmul.bf16.vlgmr.msra.gmra.mxu3 %v8313_v30  ;;  %9412 = vmatpush.bf16.msra.mxu0 %v12993_v7  ;;  %v13008_v30 = vld [vmem:[#allocation9 + $0x190] sm:$0xff] }
0x1673   : > { %v8188_v62 = vmul.f32 %v13407_v32, %v8108_v56  ;;  %v8062_v55 = vadd.f32 -0.28449672, %v8046_v43  ;;  %v7711_v45 = vmul.f32 0.3275911, %v15488_v20  ;;  %9403 = vmatmul.bf16.vlgmr.msra.gmra.mxu2 %v8315_v21  ;;  %v7815_v26 = vadd.f32 %v13405_v16, %v7814_v60  ;;  %9422 = vmatpush.bf16.msrb.mxu3 %v13004_v47  ;;  %vm7818_vm14 = vmor %vm7816_vm13, %vm7817_vm12  ;;  %v13001_v21 = vld [vmem:[#allocation9 + $0x158] sm:$0xff]  ;;  %v13016_v17 = vld [vmem:[#allocation9 + $0x1d0] sm:$0xff] }
0x1674   : > { %v7680_v11 = vand.u32 2147483647, %v15491_v40  ;;  %vm7821_vm15 = vcmp.eq.f32.partialorder %v7820_v39, 8.507059e+37  ;;  %v7823_v44 = vor.u32 1.1754944e-38, %v7822_v22  ;;  %v6802_v1 = vperm.slane %v15466_v9, 2  ;;  %9438 = vmatpush.bf16.msra.mxu1 %v13009_v35  ;;  %9450 = vmatpush.bf16.msrb.mxu2 %v13018_v48  ;;  %v13017_v22 = vld [vmem:[#allocation9 + $0x1d8] sm:$0xff] }
0x1675   : > { %v8204_v49 = vsub.f32 1.0, %v8188_v62  ;;  %v8078_v42 = vmul.f32 %v8062_v55, %v15455_v61  ;;  %v15499_v23 = vadd.f32 1.0, %v7711_v45  ;;  %v7819_v58 = vsel %vm7818_vm14, %v13405_v16, %v7815_v26  ;;  %v12990_v35 = vld [vmem:[#allocation9 + $0x100] sm:$0xff] }
0x1676   : > { %v15501_v31 = vmul.f32 0.70710677, %v7680_v11  ;;  %v15503_v19 = vsel %vm7821_vm15, %v7823_v44, %v7819_v58  ;;  %v8162_v2 = vmul.f32 1.442695, %v8141_v5  ;;  %vm8220_vm1 = vcmp.ge.f32.partialorder %v15288_v37, 0.0  ;;  %9413 = vmatpush.bf16.msra.mxu0 %v12992_v27  ;;  %v13000_v44 = vld [vmem:[#allocation9 + $0x150] sm:$0xff] }
0x1677   : > { %v8236_v28 = vsub.f32 0.0, %v8204_v49  ;;  %v8094_v3 = vadd.f32 0.2548296, %v8078_v42  ;;  %13410 = vrcp.f32 %v15499_v23  ;;  %v7981_v10 = vmul.f32 1.0614054, %v15503_v19  ;;  %9423 = vmatpush.bf16.msrb.mxu3 %v13003_v18 }
0x1678   : > { %v13409_v51 = vpop.eup %13408  ;;  %v7712_v16 = vmul.f32 0.3275911, %v15501_v31  ;;  %v6801_v8 = vperm.slane %v15466_v9, 1  ;;  %v8268_v29 = vmul.f32 0.5, %v15288_v37  ;;  %v8127_v52 = vsub.f32 0.0, %v15488_v20  ;;  %9439 = vmatpush.bf16.msra.mxu1 %v13008_v30  ;;  %9451 = vmatpush.bf16.msrb.mxu2 %v13017_v22 }
0x1679   : > { %v8110_v54 = vmul.f32 %v8094_v3, %v15455_v61  ;;  %v8252_v33 = vsel %vm8220_vm1, %v8204_v49, %v8236_v28  ;;  %v7997_v59 = vadd.f32 -1.4531521, %v7981_v10  ;;  %v13002_v61 = vld [vmem:[#allocation9 + $0x160] sm:$0xff]  ;;  %v15517_v24 = vadd.f32 %v15385_v13, %v6802_v1  ;;  %v13007_v49 = vld [vmem:[#allocation9 + $0x188] sm:$0xff] }
0x167a   : > { %v15514_v12 = vadd.f32 1.0, %v7712_v16  ;;  %vm8222_vm3 = vcmp.ge.f32.partialorder %v15307_v34, 0.0  ;;  %13412 = vpow2.f32 %v8162_v2  ;;  %v8284_v43 = vadd.f32 1.0, %v8252_v33 }
0x167b   : > { %v8190_v6 = vmul.f32 %v13409_v51, %v8110_v54  ;;  %v8013_v46 = vmul.f32 %v7997_v59, %v15503_v19  ;;  %9424 = vmatpush.bf16.msrb.mxu3 %v13002_v61  ;;  %v8270_v37 = vmul.f32 0.5, %v15307_v34  ;;  %v7850_v57 = vand.u32 2147483647, %v15499_v23  ;;  %v13006_v51 = vld [vmem:[#allocation9 + $0x180] sm:$0xff]  ;;  %v13029_v59 = vld [vmem:[#allocation9 + $0x238] sm:$0xff] }
0x167c   : > { %13414 = vrcp.f32 %v15514_v12  ;;  %v15529_v32 = vadd.f32 %v15448_v15, %v6801_v8  ;;  %v7852_v62 = vand.u32 2147483648, %v15499_v23  ;;  %v8143_v55 = vmul.f32 %v8127_v52, %v15488_v20  ;;  %v12991_v15 = vld [vmem:[#allocation9 + $0x108] sm:$0xff]  ;;  %9440 = vmatpush.bf16.msra.mxu1 %v13007_v49  ;;  %9452 = vmatpush.bf16.msrb.mxu2 %v13016_v17  ;;  %v13045_v8 = vld [vmem:[#allocation9 + $0x2b8] sm:$0xff] }
0x167d   : > { %v8206_v39 = vsub.f32 1.0, %v8190_v6  ;;  %v15521_v56 = vpop.eup %13410  ;;  %v8029_v50 = vadd.f32 1.4214138, %v8013_v46  ;;  %v8128_v60 = vsub.f32 0.0, %v15501_v31  ;;  %v7682_v47 = vand.u32 2147483647, %v15517_v24  ;;  %9414 = vmatpush.bf16.msra.mxu0 %v12991_v15 }
0x167e   : > { %v7842_v53 = vmul.f32 %v15521_v56, %v15499_v23  ;;  %vm7846_vm4 = vweird.f32 %v15499_v23  ;;  %v8300_v42 = vmul.f32 %v8284_v43, %v8268_v29  ;;  %vm15539_vm5 = vcmp.eq.f32.partialorder %v7850_v57, 8.507059e+37  ;;  %v15577_v43 = vpop.f32.mrf.mxu0  ;;  %v12999_v57 = vld [vmem:[#allocation9 + $0x148] sm:$0xff] }
0x167f   : > { %v8238_v13 = vsub.f32 0.0, %v8206_v39  ;;  %v8045_v5 = vmul.f32 %v8029_v50, %v15503_v19  ;;  %9425 = vmatpush.bf16.msrb.mxu3 %v13001_v21  ;;  %v15543_v20 = vmul.f32 0.70710677, %v7682_v47  ;;  %vm7847_vm6 = vweird.f32 %v15521_v56 }
0x1680   : > { %v7843_v45 = vsub.f32 1.0, %v7842_v53  ;;  %v13413_v25 = vpop.eup %13412  ;;  %v7681_v63 = vand.u32 2147483647, %v15529_v32  ;;  %v7853_v58 = vor.u32 1.1754944e-38, %v7852_v62  ;;  %v8144_v18 = vmul.f32 %v8128_v60, %v15501_v31  ;;  %vm7848_vm7 = vmor %vm7846_vm4, %vm7847_vm6  ;;  %9441 = vmatpush.bf16.msra.mxu1 %v13006_v51  ;;  %v15618_v51 = vpop.f32.mrf.mxu3 }
0x1681   : > { %v8254_v14 = vsel %vm8222_vm3, %v8206_v39, %v8238_v13  ;;  %v8061_v34 = vadd.f32 -0.28449672, %v8045_v5  ;;  %v7714_v1 = vmul.f32 0.3275911, %v15543_v20  ;;  %v7865_v7 = vand.u32 2147483647, %v15514_v12  ;;  %9415 = vmatpush.bf16.msra.mxu0 %v12990_v35 }
0x1682   : > { %v8286_v26 = vadd.f32 1.0, %v8254_v14  ;;  %v7844_v38 = vmul.f32 %v15521_v56, %v7843_v45  ;;  %v15548_v28 = vpop.eup %13414  ;;  %v8316_v16 = vpack.c.bf16 %v8300_v42, %v8300_v42  ;;  %v15563_v6 = vmul.f32 0.70710677, %v7681_v63  ;;  %v13015_v13 = vld [vmem:[#allocation9 + $0x1c8] sm:$0xff]  ;;  %v13028_v14 = vld [vmem:[#allocation9 + $0x230] sm:$0xff]  ;;  %v12998_v42 = vld [vmem:[#allocation9 + $0x140] sm:$0xff] }
0x1683   : > { %v8077_v54 = vmul.f32 %v8061_v34, %v15503_v19  ;;  %v7857_v2 = vmul.f32 %v15548_v28, %v15514_v12  ;;  %9426 = vmatpush.bf16.msrb.mxu3 %v13000_v44  ;;  %v15561_v31 = vadd.f32 1.0, %v7714_v1  ;;  %v7867_v52 = vand.u32 2147483648, %v15514_v12  ;;  %9453 = vmatpush.bf16.msrb.mxu2 %v13015_v13  ;;  %v13044_v5 = vld [vmem:[#allocation9 + $0x2b0] sm:$0xff]  ;;  %v13037_v63 = vld [vmem:[#allocation9 + $0x278] sm:$0xff] }
0x1684   : > { %v8302_v3 = vmul.f32 %v8286_v26, %v8270_v37  ;;  %v7845_v10 = vadd.f32 %v15521_v56, %v7844_v38  ;;  %vm8221_vm8 = vcmp.ge.f32.partialorder %v15391_v36, 0.0  ;;  %v8166_v39 = vmul.f32 1.442695, %v8143_v55  ;;  %9486 = vmatpush.bf16.msrb.mxu1 %v13045_v8  ;;  %v15579_v37 = vpop.f32.mrf.mxu1  ;;  %9416 = vmatmul.bf16.vlgmr.msra.gmra.mxu0 %v8316_v16  ;;  %v13014_v26 = vld [vmem:[#allocation9 + $0x1c0] sm:$0xff]  ;;  %v13053_v44 = vld [vmem:[#allocation9 + $0x2f8] sm:$0xff] }
0x1685   : > { %v8093_v61 = vadd.f32 0.2548296, %v8077_v54  ;;  %v7858_v29 = vsub.f32 1.0, %v7857_v2  ;;  %v8168_v46 = vmul.f32 1.442695, %v8144_v18  ;;  %13416 = vrcp.f32 %v15561_v31  ;;  %9460 = vmatpush.bf16.msrb.mxu0 %v13029_v59 }
0x1686   : > { %v8318_v33 = vpack.c.bf16 %v8302_v3, %v8302_v3  ;;  %v7849_v48 = vsel %vm7848_vm7, %v15521_v56, %v7845_v10  ;;  %vm7862_vm9 = vweird.f32 %v15548_v28  ;;  %v15582_v50 = vmul.f32 0.5, %v15391_v36  ;;  %v7631_v16 = vpop.f32.mrf.mxu0 }
0x1687   : > { %v15570_v23 = vsel %vm15539_vm5, %v7853_v58, %v7849_v48  ;;  %v8109_v27 = vmul.f32 %v8093_v61, %v15503_v19  ;;  %v7859_v56 = vmul.f32 %v15548_v28, %v7858_v29  ;;  %vm7861_vm2 = vweird.f32 %v15514_v12  ;;  %9427 = vmatpush.bf16.msrb.mxu3 %v12999_v57  ;;  %9454 = vmatpush.bf16.msrb.mxu2 %v13014_v26 }
0x1688   : > { %v7983_v30 = vmul.f32 1.0614054, %v15570_v23  ;;  %vm15585_vm10 = vcmp.eq.f32.partialorder %v7865_v7, 8.507059e+37  ;;  %v7713_v19 = vmul.f32 0.3275911, %v15563_v6  ;;  %9442 = vmatmul.bf16.vlgmr.msra.gmra.mxu1 %v8318_v33  ;;  %v7868_v55 = vor.u32 1.1754944e-38, %v7867_v52  ;;  %vm7863_vm11 = vmor %vm7861_vm2, %vm7862_vm9  ;;  %v7644_v26 = vpop.f32.mrf.mxu3 }
0x1689   : > { %v8189_v21 = vmul.f32 %v13413_v25, %v8109_v27  ;;  %v7860_v62 = vadd.f32 %v15548_v28, %v7859_v56  ;;  %13418 = vpow2.f32 %v8166_v39  ;;  %v7895_v12 = vand.u32 2147483647, %v15561_v31  ;;  %9461 = vmatpush.bf16.msrb.mxu0 %v13028_v14  ;;  %9487 = vmatpush.bf16.msrb.mxu1 %v13044_v5 }
0x168a   : > { %v7999_v22 = vadd.f32 -1.4531521, %v7983_v30  ;;  %v8130_v60 = vsub.f32 0.0, %v15543_v20  ;;  %v15595_v47 = vadd.f32 1.0, %v7713_v19  ;;  %13420 = vpow2.f32 %v8168_v46 }
0x168b   : > { %v8205_v45 = vsub.f32 1.0, %v8189_v21  ;;  %v7864_v49 = vsel %vm7863_vm11, %v15548_v28, %v7860_v62  ;;  %v13417_v11 = vpop.eup %13416  ;;  %v6803_v34 = vperm.slane %v15466_v9, 3  ;;  %v6804_v38 = vperm.slane %v15466_v9, 4  ;;  %9428 = vmatpush.bf16.msrb.mxu3 %v12998_v42  ;;  %9499 = vmatpush.bf16.msra.mxu2 %v13053_v44 }
0x168c   : > { %v8015_v15 = vmul.f32 %v7999_v22, %v15570_v23  ;;  %v15601_v25 = vsel %vm15585_vm10, %v7868_v55, %v7864_v49  ;;  %13422 = vrcp.f32 %v15595_v47  ;;  %v7887_v18 = vmul.f32 %v13417_v11, %v15561_v31 }
0x168d   : > { %v8237_v3 = vsub.f32 0.0, %v8205_v45  ;;  %v7984_v58 = vmul.f32 1.0614054, %v15601_v25  ;;  %vm7891_vm12 = vweird.f32 %v15561_v31  ;;  %vm15609_vm13 = vcmp.eq.f32.partialorder %v7895_v12, 8.507059e+37 }
0x168e   : > { %v8031_v28 = vadd.f32 1.4214138, %v8015_v15  ;;  %v7897_v17 = vand.u32 2147483648, %v15561_v31  ;;  %v8146_v54 = vmul.f32 %v8130_v60, %v15543_v20  ;;  %v7888_v35 = vsub.f32 1.0, %v7887_v18  ;;  %v7657_v20 = vpop.f32.mrf.mxu1 }
0x168f   : > { %9473 = vmatpush.bf16.msra.mxu3 %v13037_v63  ;;  %v8253_v10 = vsel %vm8221_vm8, %v8205_v45, %v8237_v3  ;;  %v8000_v7 = vadd.f32 -1.4531521, %v7984_v58  ;;  %v13419_v33 = vpop.eup %13418  ;;  %vm7892_vm14 = vweird.f32 %v13417_v11  ;;  %v8129_v8 = vsub.f32 0.0, %v15563_v6  ;;  %v15656_v63 = vpop.f32.mrf.mxu2 }
0x1690   : > { %v8047_v2 = vmul.f32 %v8031_v28, %v15570_v23  ;;  %v8285_v59 = vadd.f32 1.0, %v8253_v10  ;;  %v15622_v61 = vadd.f32 %v15475_v41, %v6803_v34  ;;  %v15624_v48 = vpop.eup %13420  ;;  %v7889_v52 = vmul.f32 %v13417_v11, %v7888_v35  ;;  %vm7893_vm15 = vmor %vm7891_vm12, %vm7892_vm14 }
0x1691   : > { %v8016_v29 = vmul.f32 %v8000_v7, %v15601_v25  ;;  %v15628_v39 = vadd.f32 %v15577_v43, %v6804_v38  ;;  %v7898_v30 = vor.u32 1.1754944e-38, %v7897_v17  ;;  %v7880_v56 = vand.u32 2147483647, %v15595_v47  ;;  %v13043_v7 = vld [vmem:[#allocation9 + $0x2a8] sm:$0xff] }
0x1692   : > { %v8063_v36 = vadd.f32 -0.28449672, %v8047_v2  ;;  %v13423_v46 = vpop.eup %13422  ;;  %v8301_v27 = vmul.f32 %v8285_v59, %v15582_v50  ;;  %v7683_v57 = vand.u32 2147483647, %v15622_v61  ;;  %v7890_v53 = vadd.f32 %v13417_v11, %v7889_v52  ;;  %v13027_v2 = vld [vmem:[#allocation9 + $0x228] sm:$0xff]  ;;  %9488 = vmatpush.bf16.msrb.mxu1 %v13043_v7  ;;  %v13052_v52 = vld [vmem:[#allocation9 + $0x2f0] sm:$0xff] }
0x1693   : > { %v8032_v13 = vadd.f32 1.4214138, %v8016_v29  ;;  %v7872_v19 = vmul.f32 %v13423_v46, %v15595_v47  ;;  %v7882_v43 = vand.u32 2147483648, %v15595_v47  ;;  %v7684_v50 = vand.u32 2147483647, %v15628_v39  ;;  %9462 = vmatpush.bf16.msrb.mxu0 %v13027_v2  ;;  %v13036_v29 = vld [vmem:[#allocation9 + $0x270] sm:$0xff]  ;;  %9500 = vmatpush.bf16.msra.mxu2 %v13052_v52 }
0x1694   : > { %v8079_v41 = vmul.f32 %v8063_v36, %v15570_v23  ;;  %v8317_v21 = vpack.c.bf16 %v8301_v27, %v8301_v27  ;;  %v15639_v22 = vmul.f32 0.70710677, %v7683_v57  ;;  %v7894_v12 = vsel %vm7893_vm15, %v13417_v11, %v7890_v53  ;;  %9474 = vmatpush.bf16.msra.mxu3 %v13036_v29  ;;  %v13026_v53 = vld [vmem:[#allocation9 + $0x220] sm:$0xff]  ;;  %v13024_v52 = vld [vmem:[#allocation9 + $0x210] sm:$0xff] }
0x1695   : > { %v8048_v55 = vmul.f32 %v8032_v13, %v15601_v25  ;;  %v7873_v60 = vsub.f32 1.0, %v7872_v19  ;;  %v15645_v14 = vsel %vm15609_vm13, %v7898_v30, %v7894_v12  ;;  %vm7877_vm1 = vweird.f32 %v13423_v46  ;;  %v13042_v19 = vld [vmem:[#allocation9 + $0x2a0] sm:$0xff] }
0x1696   : > { %v8095_v62 = vadd.f32 0.2548296, %v8079_v41  ;;  %v7715_v5 = vmul.f32 0.3275911, %v15639_v22  ;;  %v15648_v31 = vmul.f32 0.70710677, %v7684_v50  ;;  %9429 = vmatmul.bf16.vlgmr.msrb.gmra.mxu3 %v8317_v21  ;;  %vm7876_vm3 = vweird.f32 %v15595_v47  ;;  %9489 = vmatpush.bf16.msrb.mxu1 %v13042_v19 }
0x1697   : > { %v8064_v15 = vadd.f32 -0.28449672, %v8048_v55  ;;  %v7986_v49 = vmul.f32 1.0614054, %v15645_v14  ;;  %v7874_v42 = vmul.f32 %v13423_v46, %v7873_v60  ;;  %v8172_v34 = vmul.f32 1.442695, %v8146_v54  ;;  %vm7878_vm4 = vmor %vm7876_vm3, %vm7877_vm1  ;;  %9463 = vmatpush.bf16.msrb.mxu0 %v13026_v53 }
0x1698   : > { %v8111_v45 = vmul.f32 %v8095_v62, %v15570_v23  ;;  %v8145_v11 = vmul.f32 %v8129_v8, %v15563_v6  ;;  %v15654_v38 = vadd.f32 1.0, %v7715_v5  ;;  %vm7881_vm5 = vcmp.eq.f32.partialorder %v7880_v56, 8.507059e+37  ;;  %v13035_v60 = vld [vmem:[#allocation9 + $0x268] sm:$0xff]  ;;  %v13050_v2 = vld [vmem:[#allocation9 + $0x2e0] sm:$0xff] }
0x1699   : > { %v8080_v3 = vmul.f32 %v8064_v15, %v15601_v25  ;;  %v8002_v28 = vadd.f32 -1.4531521, %v7986_v49  ;;  %v7875_v58 = vadd.f32 %v13423_v46, %v7874_v42  ;;  %v7883_v23 = vor.u32 1.1754944e-38, %v7882_v43  ;;  %v13051_v5 = vld [vmem:[#allocation9 + $0x2e8] sm:$0xff]  ;;  %9475 = vmatpush.bf16.msra.mxu3 %v13035_v60 }
0x169a   : > { %v8191_v44 = vmul.f32 %v13419_v33, %v8111_v45  ;;  %13424 = vrcp.f32 %v15654_v38  ;;  %v7716_v18 = vmul.f32 0.3275911, %v15648_v31  ;;  %vm8223_vm6 = vcmp.ge.f32.partialorder %v15478_v0, 0.0  ;;  %9501 = vmatpush.bf16.msra.mxu2 %v13051_v5  ;;  %v13023_v5 = vld [vmem:[#allocation9 + $0x208] sm:$0xff] }
0x169b   : > { %v8096_v1 = vadd.f32 0.2548296, %v8080_v3  ;;  %v8018_v6 = vmul.f32 %v8002_v28, %v15645_v14  ;;  %v7879_v17 = vsel %vm7878_vm4, %v13423_v46, %v7875_v58  ;;  %v8271_v54 = vmul.f32 0.5, %v15478_v0  ;;  %v7670_v0 = vpop.f32.mrf.mxu2  ;;  %v13025_v3 = vld [vmem:[#allocation9 + $0x218] sm:$0xff] }
0x169c   : > { %v8207_v47 = vsub.f32 1.0, %v8191_v44  ;;  %v15665_v10 = vsel %vm7881_vm5, %v7883_v23, %v7879_v17  ;;  %vm8224_vm7 = vcmp.ge.f32.partialorder %v15491_v40, 0.0  ;;  %v15671_v8 = vmul.f32 0.5, %v15491_v40  ;;  %v13041_v28 = vld [vmem:[#allocation9 + $0x298] sm:$0xff]  ;;  %9464 = vmatpush.bf16.msrb.mxu0 %v13025_v3  ;;  %v13048_v3 = vld [vmem:[#allocation9 + $0x2d0] sm:$0xff] }
0x169d   : > { %v8112_v16 = vmul.f32 %v8096_v1, %v15601_v25  ;;  %v8034_v33 = vadd.f32 1.4214138, %v8018_v6  ;;  %v7985_v59 = vmul.f32 1.0614054, %v15665_v10  ;;  %13426 = vpow2.f32 %v8172_v34  ;;  %9490 = vmatpush.bf16.msrb.mxu1 %v13041_v28 }
0x169e   : > { %v8239_v35 = vsub.f32 0.0, %v8207_v47  ;;  %v8170_v20 = vmul.f32 1.442695, %v8145_v11  ;;  %v15673_v36 = vadd.f32 1.0, %v7716_v18  ;;  %v7910_v41 = vand.u32 2147483647, %v15654_v38  ;;  %9502 = vmatpush.bf16.msra.mxu2 %v13050_v2 }
0x169f   : > { %v8192_v25 = vmul.f32 %v15624_v48, %v8112_v16  ;;  %v8050_v27 = vmul.f32 %v8034_v33, %v15645_v14  ;;  %v8001_v30 = vadd.f32 -1.4531521, %v7985_v59  ;;  %v8131_v13 = vsub.f32 0.0, %v15639_v22  ;;  %v13032_v11 = vld [vmem:[#allocation9 + $0x250] sm:$0xff]  ;;  %v13061_v2 = vld [vmem:[#allocation9 + $0x338] sm:$0xff] }
0x16a0   : > { %v8255_v46 = vsel %vm8223_vm6, %v8207_v47, %v8239_v35  ;;  %v15679_v56 = vpop.eup %13424  ;;  %13428 = vrcp.f32 %v15673_v36  ;;  %v15688_v55 = vmul.f32 0.5, %v15517_v24  ;;  %v7912_v12 = vand.u32 2147483648, %v15654_v38  ;;  %9465 = vmatpush.bf16.msrb.mxu0 %v13024_v52 }
0x16a1   : > { %v8287_v57 = vadd.f32 1.0, %v8255_v46  ;;  %v8208_v21 = vsub.f32 1.0, %v8192_v25  ;;  %v8066_v43 = vadd.f32 -0.28449672, %v8050_v27  ;;  %v8017_v48 = vmul.f32 %v8001_v30, %v15665_v10  ;;  %v13040_v46 = vld [vmem:[#allocation9 + $0x290] sm:$0xff] }
0x16a2   : > { %v7902_v50 = vmul.f32 %v15679_v56, %v15654_v38  ;;  %13430 = vpow2.f32 %v8170_v20  ;;  %vm7906_vm8 = vweird.f32 %v15654_v38  ;;  %vm15693_vm9 = vcmp.eq.f32.partialorder %v7910_v41, 8.507059e+37  ;;  %9491 = vmatpush.bf16.msrb.mxu1 %v13040_v46 }
0x16a3   : > { %v8303_v62 = vmul.f32 %v8287_v57, %v8271_v54  ;;  %v8240_v45 = vsub.f32 0.0, %v8208_v21  ;;  %v8082_v15 = vmul.f32 %v8066_v43, %v15645_v14  ;;  %v8033_v49 = vadd.f32 1.4214138, %v8017_v48  ;;  %v13427_v26 = vpop.eup %13426  ;;  %v13034_v54 = vld [vmem:[#allocation9 + $0x260] sm:$0xff] }
0x16a4   : > { %v7903_v42 = vsub.f32 1.0, %v7902_v50  ;;  %v15698_v44 = vmul.f32 %v8131_v13, %v15639_v22  ;;  %vm7907_vm2 = vweird.f32 %v15679_v56  ;;  %vm8226_vm10 = vcmp.ge.f32.partialorder %v15517_v24, 0.0  ;;  %9476 = vmatpush.bf16.msra.mxu3 %v13034_v54  ;;  %v13049_v13 = vld [vmem:[#allocation9 + $0x2d8] sm:$0xff]  ;;  %9466 = vmatpush.bf16.msrb.mxu0 %v13023_v5 }
0x16a5   : > { %v8319_v34 = vpack.c.bf16 %v8303_v62, %v8303_v62  ;;  %v8098_v58 = vadd.f32 0.2548296, %v8082_v15  ;;  %v8049_v23 = vmul.f32 %v8033_v49, %v15665_v10  ;;  %v8256_v1 = vsel %vm8224_vm7, %v8208_v21, %v8240_v45  ;;  %vm7908_vm11 = vmor %vm7906_vm8, %vm7907_vm2  ;;  %9503 = vmatpush.bf16.msra.mxu2 %v13049_v13  ;;  %v13039_v45 = vld [vmem:[#allocation9 + $0x288] sm:$0xff] }
0x16a6   : > { %v7904_v18 = vmul.f32 %v15679_v56, %v7903_v42  ;;  %v15703_v47 = vpop.eup %13428  ;;  %v7913_v22 = vor.u32 1.1754944e-38, %v7912_v12  ;;  %v6806_v6 = vperm.slane %v15466_v9, 6  ;;  %v6805_v17 = vperm.slane %v15466_v9, 5  ;;  %9492 = vmatpush.bf16.msrb.mxu1 %v13039_v45 }
0x16a7   : > { %v8114_v7 = vmul.f32 %v8098_v58, %v15645_v14  ;;  %v8065_v35 = vadd.f32 -0.28449672, %v8049_v23  ;;  %v7917_v40 = vmul.f32 %v15703_v47, %v15673_v36  ;;  %9455 = vmatmul.bf16.vlgmr.msrb.gmra.mxu2 %v8319_v34  ;;  %v7925_v59 = vand.u32 2147483647, %v15673_v36 }
0x16a8   : > { %v7905_v16 = vadd.f32 %v15679_v56, %v7904_v18  ;;  %v13431_v33 = vpop.eup %13430  ;;  %v7927_v20 = vand.u32 2147483648, %v15673_v36  ;;  %v15721_v29 = vadd.f32 %v15579_v37, %v6806_v6  ;;  %v15724_v14 = vadd.f32 %v15618_v51, %v6805_v17  ;;  %v13033_v51 = vld [vmem:[#allocation9 + $0x258] sm:$0xff]  ;;  %v13022_v18 = vld [vmem:[#allocation9 + $0x200] sm:$0xff] }
0x16a9   : > { %v8194_v25 = vmul.f32 %v13427_v26, %v8114_v7  ;;  %v8081_v27 = vmul.f32 %v8065_v35, %v15665_v10  ;;  %v7918_v30 = vsub.f32 1.0, %v7917_v40  ;;  %v8288_v57 = vadd.f32 1.0, %v8256_v1  ;;  %9477 = vmatpush.bf16.msra.mxu3 %v13033_v51  ;;  %v13038_v1 = vld [vmem:[#allocation9 + $0x280] sm:$0xff]  ;;  %9504 = vmatpush.bf16.msra.mxu2 %v13048_v3  ;;  %v13077_v7 = vld [vmem:[#allocation9 + $0x3b8] sm:$0xff]  ;;  %v13031_v35 = vld [vmem:[#allocation9 + $0x248] sm:$0xff] }
0x16aa   : > { %v7909_v38 = vsel %vm7908_vm11, %v15679_v56, %v7905_v16  ;;  %vm7922_vm12 = vweird.f32 %v15703_v47  ;;  %v7686_v37 = vand.u32 2147483647, %v15721_v29  ;;  %vm7921_vm13 = vweird.f32 %v15673_v36  ;;  %9467 = vmatpush.bf16.msrb.mxu0 %v13022_v18  ;;  %9493 = vmatpush.bf16.msrb.mxu1 %v13038_v1  ;;  %v13046_v51 = vld [vmem:[#allocation9 + $0x2c0] sm:$0xff] }
0x16ab   : > { %v15730_v41 = vsel %vm15693_vm9, %v7913_v22, %v7909_v38  ;;  %v8210_v53 = vsub.f32 1.0, %v8194_v25  ;;  %v8097_v19 = vadd.f32 0.2548296, %v8081_v27  ;;  %v7919_v56 = vmul.f32 %v15703_v47, %v7918_v30  ;;  %vm7923_vm14 = vmor %vm7921_vm13, %vm7922_vm12  ;;  %v13060_v27 = vld [vmem:[#allocation9 + $0x330] sm:$0xff]  ;;  %v13058_v18 = vld [vmem:[#allocation9 + $0x320] sm:$0xff] }
0x16ac   : > { %v7987_v0 = vmul.f32 1.0614054, %v15730_v41  ;;  %v8132_v21 = vsub.f32 0.0, %v15648_v31  ;;  %v15738_v43 = vmul.f32 0.70710677, %v7686_v37  ;;  %v8304_v15 = vmul.f32 %v8288_v57, %v15671_v8  ;;  %v13076_v38 = vld [vmem:[#allocation9 + $0x3b0] sm:$0xff] }
0x16ad   : > { %v7685_v48 = vand.u32 2147483647, %v15724_v14  ;;  %v8242_v50 = vsub.f32 0.0, %v8210_v53  ;;  %v8113_v62 = vmul.f32 %v8097_v19, %v15665_v10  ;;  %v7920_v60 = vadd.f32 %v15703_v47, %v7919_v56  ;;  %9478 = vmatpush.bf16.msra.mxu3 %v13032_v11  ;;  %v13085_v56 = vld [vmem:[#allocation9 + $0x3f8] sm:$0xff]  ;;  %v13074_v1 = vld [vmem:[#allocation9 + $0x3a0] sm:$0xff] }
0x16ae   : > { %v8003_v12 = vadd.f32 -1.4531521, %v7987_v0  ;;  %vm7926_vm15 = vcmp.eq.f32.partialorder %v7925_v59, 8.507059e+37  ;;  %v7928_v36 = vor.u32 1.1754944e-38, %v7927_v20  ;;  %v7718_v49 = vmul.f32 0.3275911, %v15738_v43  ;;  %9512 = vmatpush.bf16.msra.mxu0 %v13061_v2  ;;  %9538 = vmatpush.bf16.msra.mxu1 %v13077_v7 }
0x16af   : > { %v8258_v42 = vsel %vm8226_vm10, %v8210_v53, %v8242_v50  ;;  %v8193_v26 = vmul.f32 %v13431_v33, %v8113_v62  ;;  %v7924_v34 = vsel %vm7923_vm14, %v15703_v47, %v7920_v60  ;;  %v15755_v23 = vmul.f32 0.70710677, %v7685_v48  ;;  %v13047_v59 = vld [vmem:[#allocation9 + $0x2c8] sm:$0xff]  ;;  %v13069_v0 = vld [vmem:[#allocation9 + $0x378] sm:$0xff] }
0x16b0   : > { %v8019_v10 = vmul.f32 %v8003_v12, %v15730_v41  ;;  %v8290_v28 = vadd.f32 1.0, %v8258_v42  ;;  %v15751_v8 = vsel %vm7926_vm15, %v7928_v36, %v7924_v34  ;;  %v15753_v58 = vadd.f32 1.0, %v7718_v49  ;;  %9505 = vmatpush.bf16.msra.mxu2 %v13047_v59  ;;  %v13059_v60 = vld [vmem:[#allocation9 + $0x328] sm:$0xff]  ;;  %v13068_v42 = vld [vmem:[#allocation9 + $0x370] sm:$0xff] }
0x16b1   : > { %v8209_v24 = vsub.f32 1.0, %v8193_v26  ;;  %v7988_v6 = vmul.f32 1.0614054, %v15751_v8  ;;  %v8320_v47 = vpack.c.bf16 %v8304_v15, %v8304_v15  ;;  %v8174_v54 = vmul.f32 1.442695, %v15698_v44  ;;  %9479 = vmatpush.bf16.msra.mxu3 %v13031_v35  ;;  %v13084_v26 = vld [vmem:[#allocation9 + $0x3f0] sm:$0xff] }
0x16b2   : > { %v8035_v22 = vadd.f32 1.4214138, %v8019_v10  ;;  %v8306_v17 = vmul.f32 %v8290_v28, %v15688_v55  ;;  %13432 = vrcp.f32 %v15753_v58  ;;  %vm8225_vm1 = vcmp.ge.f32.partialorder %v15529_v32, 0.0  ;;  %9513 = vmatpush.bf16.msra.mxu0 %v13060_v27  ;;  %9539 = vmatpush.bf16.msra.mxu1 %v13076_v38  ;;  %v13067_v2 = vld [vmem:[#allocation9 + $0x368] sm:$0xff] }
0x16b3   : > { %v8241_v16 = vsub.f32 0.0, %v8209_v24  ;;  %v8004_v33 = vadd.f32 -1.4531521, %v7988_v6  ;;  %v8148_v52 = vmul.f32 %v8132_v21, %v15648_v31  ;;  %v7717_v55 = vmul.f32 0.3275911, %v15755_v23  ;;  %9468 = vmatmul.bf16.vlgmr.msrb.gmra.mxu0 %v8320_v47  ;;  %v13030_v31 = vld [vmem:[#allocation9 + $0x240] sm:$0xff] }
0x16b4   : > { %v8051_v40 = vmul.f32 %v8035_v22, %v15730_v41  ;;  %v8322_v20 = vpack.c.bf16 %v8306_v17, %v8306_v17  ;;  %v8273_v30 = vmul.f32 0.5, %v15529_v32  ;;  %13434 = vpow2.f32 %v8174_v54  ;;  %9506 = vmatpush.bf16.msra.mxu2 %v13046_v51  ;;  %v13083_v7 = vld [vmem:[#allocation9 + $0x3e8] sm:$0xff]  ;;  %v13082_v51 = vld [vmem:[#allocation9 + $0x3e0] sm:$0xff] }
0x16b5   : > { %v8257_v44 = vsel %vm8225_vm1, %v8209_v24, %v8241_v16  ;;  %v8020_v25 = vmul.f32 %v8004_v33, %v15751_v8  ;;  %v15767_v37 = vadd.f32 1.0, %v7717_v55  ;;  %v6807_v19 = vperm.slane %v15466_v9, 7  ;;  %9480 = vmatpush.bf16.msra.mxu3 %v13030_v31  ;;  %v13075_v9 = vld [vmem:[#allocation9 + $0x3a8] sm:$0xff]  ;;  %v13073_v55 = vld [vmem:[#allocation9 + $0x398] sm:$0xff]  ;;  %v13066_v31 = vld [vmem:[#allocation9 + $0x360] sm:$0xff] }
0x16b6   : > { %v8067_v46 = vadd.f32 -0.28449672, %v8051_v40  ;;  %v8289_v57 = vadd.f32 1.0, %v8257_v44  ;;  %9494 = vmatmul.bf16.vlgmr.msrb.gmra.mxu1 %v8322_v20  ;;  %v8176_v32 = vmul.f32 1.442695, %v8148_v52  ;;  %v7957_v11 = vand.u32 2147483648, %v15753_v58  ;;  %9514 = vmatpush.bf16.msra.mxu0 %v13059_v60 }
0x16b7   : > { %v8036_v53 = vadd.f32 1.4214138, %v8020_v25  ;;  %13436 = vrcp.f32 %v15767_v37  ;;  %v15779_v49 = vadd.f32 %v15656_v63, %v6807_v19  ;;  %v7955_v34 = vand.u32 2147483647, %v15753_v58  ;;  %9540 = vmatpush.bf16.msra.mxu1 %v13075_v9  ;;  %v13057_v52 = vld [vmem:[#allocation9 + $0x318] sm:$0xff] }
0x16b8   : > { %v8083_v13 = vmul.f32 %v8067_v46, %v15730_v41  ;;  %v15771_v21 = vpop.eup %13432  ;;  %v8305_v48 = vmul.f32 %v8289_v57, %v8273_v30  ;;  %9551 = vmatpush.bf16.msrb.mxu2 %v13085_v56  ;;  %13438 = vpow2.f32 %v8176_v32  ;;  %vm8227_vm4 = vcmp.ge.f32.partialorder %v15622_v61, 0.0  ;;  %v13072_v32 = vld [vmem:[#allocation9 + $0x390] sm:$0xff] }
0x16b9   : > { %v8052_v62 = vmul.f32 %v8036_v53, %v15751_v8  ;;  %v7947_v12 = vmul.f32 %v15771_v21, %v15753_v58  ;;  %9525 = vmatpush.bf16.msrb.mxu3 %v13069_v0  ;;  %vm7952_vm3 = vweird.f32 %v15771_v21  ;;  %v7687_v63 = vand.u32 2147483647, %v15779_v49 }
0x16ba   : > { %v8099_v50 = vadd.f32 0.2548296, %v8083_v13  ;;  %v8321_v5 = vpack.c.bf16 %v8305_v48, %v8305_v48  ;;  %v13435_v10 = vpop.eup %13434  ;;  %vm7951_vm5 = vweird.f32 %v15753_v58  ;;  %v8134_v22 = vsub.f32 0.0, %v15738_v43  ;;  %9515 = vmatpush.bf16.msra.mxu0 %v13058_v18  ;;  %v13056_v48 = vld [vmem:[#allocation9 + $0x310] sm:$0xff] }
0x16bb   : > { %v8068_v15 = vadd.f32 -0.28449672, %v8052_v62  ;;  %v7948_v36 = vsub.f32 1.0, %v7947_v12  ;;  %vm7953_vm6 = vmor %vm7951_vm5, %vm7952_vm3  ;;  %vm7956_vm7 = vcmp.eq.f32.partialorder %v7955_v34, 8.507059e+37  ;;  %v7958_v35 = vor.u32 1.1754944e-38, %v7957_v11  ;;  %9541 = vmatpush.bf16.msra.mxu1 %v13074_v1  ;;  %v13064_v18 = vld [vmem:[#allocation9 + $0x350] sm:$0xff] }
0x16bc   : > { %v8115_v45 = vmul.f32 %v8099_v50, %v15730_v41  ;;  %9481 = vmatmul.bf16.vlgmr.msra.gmra.mxu3 %v8321_v5  ;;  %9552 = vmatpush.bf16.msrb.mxu2 %v13084_v26  ;;  %v7940_v58 = vand.u32 2147483647, %v15767_v37  ;;  %v15798_v16 = vmul.f32 0.70710677, %v7687_v63  ;;  %v7942_v25 = vand.u32 2147483648, %v15767_v37  ;;  %v13081_v5 = vld [vmem:[#allocation9 + $0x3d8] sm:$0xff] }
0x16bd   : > { %v8084_v41 = vmul.f32 %v8068_v15, %v15751_v8  ;;  %v7949_v28 = vmul.f32 %v15771_v21, %v7948_v36  ;;  %v15787_v24 = vpop.eup %13436  ;;  %9526 = vmatpush.bf16.msrb.mxu3 %v13068_v42  ;;  %v8275_v13 = vmul.f32 0.5, %v15622_v61  ;;  %vm7936_vm9 = vweird.f32 %v15767_v37  ;;  %v13080_v1 = vld [vmem:[#allocation9 + $0x3d0] sm:$0xff] }
0x16be   : > { %v8195_v3 = vmul.f32 %v13435_v10, %v8115_v45  ;;  %v7932_v54 = vmul.f32 %v15787_v24, %v15767_v37  ;;  %v13439_v44 = vpop.eup %13438  ;;  %vm7937_vm8 = vweird.f32 %v15787_v24  ;;  %v7719_v27 = vmul.f32 0.3275911, %v15798_v16  ;;  %9516 = vmatpush.bf16.msra.mxu0 %v13057_v52  ;;  %v13065_v37 = vld [vmem:[#allocation9 + $0x358] sm:$0xff]  ;;  %v13055_v10 = vld [vmem:[#allocation9 + $0x308] sm:$0xff] }
0x16bf   : > { %v8100_v47 = vadd.f32 0.2548296, %v8084_v41  ;;  %v7950_v17 = vadd.f32 %v15771_v21, %v7949_v28  ;;  %9542 = vmatpush.bf16.msra.mxu1 %v13073_v55  ;;  %v8150_v62 = vmul.f32 %v8134_v22, %v15738_v43  ;;  %vm7938_vm2 = vmor %vm7936_vm9, %vm7937_vm8  ;;  %v7943_v61 = vor.u32 1.1754944e-38, %v7942_v25  ;;  %v13071_v41 = vld [vmem:[#allocation9 + $0x388] sm:$0xff] }
0x16c0   : > { %v8211_v6 = vsub.f32 1.0, %v8195_v3  ;;  %v7933_v20 = vsub.f32 1.0, %v7932_v54  ;;  %9553 = vmatpush.bf16.msrb.mxu2 %v13083_v7  ;;  %v15812_v19 = vadd.f32 1.0, %v7719_v27  ;;  %vm7941_vm10 = vcmp.eq.f32.partialorder %v7940_v58, 8.507059e+37  ;;  %v13054_v54 = vld [vmem:[#allocation9 + $0x300] sm:$0xff] }
0x16c1   : > { %v8116_v33 = vmul.f32 %v8100_v47, %v15751_v8  ;;  %v7954_v59 = vsel %vm7953_vm6, %v15771_v21, %v7950_v17  ;;  %9527 = vmatpush.bf16.msrb.mxu3 %v13067_v2  ;;  %vm8228_vm11 = vcmp.ge.f32.partialorder %v15628_v39, 0.0  ;;  %v8133_v15 = vsub.f32 0.0, %v15755_v23  ;;  %v13070_v2 = vld [vmem:[#allocation9 + $0x380] sm:$0xff] }
0x16c2   : > { %v8243_v40 = vsub.f32 0.0, %v8211_v6  ;;  %v15802_v46 = vsel %vm7956_vm7, %v7958_v35, %v7954_v59  ;;  %v7934_v57 = vmul.f32 %v15787_v24, %v7933_v20  ;;  %13440 = vrcp.f32 %v15812_v19  ;;  %9517 = vmatpush.bf16.msra.mxu0 %v13056_v48  ;;  %v13079_v59 = vld [vmem:[#allocation9 + $0x3c8] sm:$0xff] }
0x16c3   : > { %v8196_v8 = vmul.f32 %v13439_v44, %v8116_v33  ;;  %v7990_v30 = vmul.f32 1.0614054, %v15802_v46  ;;  %9543 = vmatpush.bf16.msra.mxu1 %v13072_v32  ;;  %v8276_v34 = vmul.f32 0.5, %v15628_v39  ;;  %v8180_v3 = vmul.f32 1.442695, %v8150_v62  ;;  %v13063_v33 = vld [vmem:[#allocation9 + $0x348] sm:$0xff] }
0x16c4   : > { %v8259_v38 = vsel %vm8227_vm4, %v8211_v6, %v8243_v40  ;;  %v7935_v21 = vadd.f32 %v15787_v24, %v7934_v57  ;;  %9554 = vmatpush.bf16.msrb.mxu2 %v13082_v51  ;;  %v8149_v6 = vmul.f32 %v8133_v15, %v15755_v23  ;;  %v7970_v20 = vand.u32 2147483647, %v15812_v19  ;;  %v13078_v57 = vld [vmem:[#allocation9 + $0x3c0] sm:$0xff] }
0x16c5   : > { %v8291_v53 = vadd.f32 1.0, %v8259_v38  ;;  %v8212_v0 = vsub.f32 1.0, %v8196_v8  ;;  %v8006_v56 = vadd.f32 -1.4531521, %v7990_v30  ;;  %9528 = vmatpush.bf16.msrb.mxu3 %v13066_v31  ;;  %13442 = vpow2.f32 %v8180_v3  ;;  %v13062_v30 = vld [vmem:[#allocation9 + $0x340] sm:$0xff] }
0x16c6   : > { %v7939_v9 = vsel %vm7938_vm2, %v15787_v24, %v7935_v21  ;;  %9518 = vmatpush.bf16.msra.mxu0 %v13055_v10  ;;  %v8178_v23 = vmul.f32 1.442695, %v8149_v6  ;;  %v7972_v52 = vand.u32 2147483648, %v15812_v19  ;;  %vm7966_vm13 = vweird.f32 %v15812_v19 }
0x16c7   : > { %v8307_v50 = vmul.f32 %v8291_v53, %v8275_v13  ;;  %v8244_v12 = vsub.f32 0.0, %v8212_v0  ;;  %v8022_v60 = vmul.f32 %v8006_v56, %v15802_v46  ;;  %v15823_v43 = vsel %vm7941_vm10, %v7943_v61, %v7939_v9  ;;  %9544 = vmatpush.bf16.msra.mxu1 %v13071_v41 }
0x16c8   : > { %v7989_v26 = vmul.f32 1.0614054, %v15823_v43  ;;  %9555 = vmatpush.bf16.msrb.mxu2 %v13081_v5  ;;  %v13441_v24 = vpop.eup %13440  ;;  %13444 = vpow2.f32 %v8178_v23  ;;  %v7973_v51 = vor.u32 1.1754944e-38, %v7972_v52  ;;  %vm7971_vm15 = vcmp.eq.f32.partialorder %v7970_v20, 8.507059e+37 }
0x16c9   : > { %v8323_v45 = vpack.c.bf16 %v8307_v50, %v8307_v50  ;;  %v8260_v36 = vsel %vm8228_vm11, %v8212_v0, %v8244_v12  ;;  %v8038_v42 = vadd.f32 1.4214138, %v8022_v60  ;;  %9529 = vmatpush.bf16.msrb.mxu3 %v13065_v37  ;;  %v7962_v39 = vmul.f32 %v13441_v24, %v15812_v19 }
0x16ca   : > { %v8292_v11 = vadd.f32 1.0, %v8260_v36  ;;  %v8005_v63 = vadd.f32 -1.4531521, %v7989_v26  ;;  %9519 = vmatpush.bf16.msra.mxu0 %v13054_v54  ;;  %vm7967_vm12 = vweird.f32 %v13441_v24  ;;  %vm8230_vm1 = vcmp.ge.f32.partialorder %v15721_v29, 0.0 }
0x16cb   : > { %9507 = vmatmul.bf16.vlgmr.msra.gmra.mxu2 %v8323_v45  ;;  %v8054_v28 = vmul.f32 %v8038_v42, %v15802_v46  ;;  %v7963_v40 = vsub.f32 1.0, %v7962_v39  ;;  %9545 = vmatpush.bf16.msra.mxu1 %v13070_v2  ;;  %v13443_v31 = vpop.eup %13442  ;;  %vm7968_vm14 = vmor %vm7966_vm13, %vm7967_vm12  ;;  %v8278_v5 = vmul.f32 0.5, %v15721_v29  ;;  %vm8229_vm3 = vcmp.ge.f32.partialorder %v15724_v14, 0.0 }
0x16cc   : > { %v8308_v22 = vmul.f32 %v8292_v11, %v8276_v34  ;;  %v8021_v17 = vmul.f32 %v8005_v63, %v15823_v43  ;;  %9556 = vmatpush.bf16.msrb.mxu2 %v13080_v1  ;;  %v8277_v41 = vmul.f32 0.5, %v15724_v14  ;;  %vm8231_vm4 = vcmp.ge.f32.partialorder %v15779_v49, 0.0 }
0x16cd   : > { %v8070_v47 = vadd.f32 -0.28449672, %v8054_v28  ;;  %9530 = vmatpush.bf16.msrb.mxu3 %v13064_v18  ;;  %v7964_v25 = vmul.f32 %v13441_v24, %v7963_v40 }
0x16ce   : > { %v8324_v7 = vpack.c.bf16 %v8308_v22, %v8308_v22  ;;  %v8037_v58 = vadd.f32 1.4214138, %v8021_v17  ;;  %v13445_v61 = vpop.eup %13444 }
0x16cf   : > { %v8086_v35 = vmul.f32 %v8070_v47, %v15802_v46  ;;  %v7965_v8 = vadd.f32 %v13441_v24, %v7964_v25 }
0x16d0   : > { %v8053_v44 = vmul.f32 %v8037_v58, %v15823_v43  ;;  %9557 = vmatpush.bf16.msrb.mxu2 %v13079_v59  ;;  %9520 = vmatmul.bf16.vlgmr.msra.gmra.mxu0 %v8324_v7  ;;  %v8279_v7 = vmul.f32 0.5, %v15779_v49  ;;  %v13251_v58 = vld [vmem:[%s15993_s7] ss:$0 sm:$0xff]  ;;  %s1241_s7 = scalar_lea.vmem [#allocation11], %s1240_s4 }
0x16d1   : > { %v8102_v55 = vadd.f32 0.2548296, %v8086_v35  ;;  %9531 = vmatpush.bf16.msrb.mxu3 %v13063_v33  ;;  %v7969_v0 = vsel %vm7968_vm14, %v13441_v24, %v7965_v8 }
0x16d2   : > { %v8069_v38 = vadd.f32 -0.28449672, %v8053_v44  ;;  %v7974_v56 = vsel %vm7971_vm15, %v7973_v51, %v7969_v0 }
0x16d3   : > { %v8118_v27 = vmul.f32 %v8102_v55, %v15802_v46  ;;  %v8135_v46 = vsub.f32 0.0, %v15798_v16  ;;  %v7991_v19 = vmul.f32 1.0614054, %v7974_v56 }
0x16d4   : > { %v8085_v53 = vmul.f32 %v8069_v38, %v15823_v43  ;;  %9558 = vmatpush.bf16.msrb.mxu2 %v13078_v57 }
0x16d5   : > { %v8198_v13 = vmul.f32 %v13443_v31, %v8118_v27  ;;  %9532 = vmatpush.bf16.msrb.mxu3 %v13062_v30  ;;  %v8007_v62 = vadd.f32 -1.4531521, %v7991_v19  ;;  %v8151_v12 = vmul.f32 %v8135_v46, %v15798_v16 }
0x16d6   : > { %v8101_v48 = vadd.f32 0.2548296, %v8085_v53 }
0x16d7   : > { %v8214_v21 = vsub.f32 1.0, %v8198_v13  ;;  %v8023_v37 = vmul.f32 %v8007_v62, %v7974_v56  ;;  %v8182_v26 = vmul.f32 1.442695, %v8151_v12 }
0x16d8   : > { %v8117_v50 = vmul.f32 %v8101_v48, %v15823_v43 }
0x16d9   : > { %v8246_v32 = vsub.f32 0.0, %v8214_v21  ;;  %v8039_v36 = vadd.f32 1.4214138, %v8023_v37  ;;  %13446 = vpow2.f32 %v8182_v26 }
0x16da   : > { %v8197_v9 = vmul.f32 %v13445_v61, %v8117_v50 }
0x16db   : > { %v8262_v60 = vsel %vm8230_vm1, %v8214_v21, %v8246_v32  ;;  %v8055_v34 = vmul.f32 %v8039_v36, %v7974_v56 }
0x16dc   : > { %v8294_v45 = vadd.f32 1.0, %v8262_v60  ;;  %v8213_v15 = vsub.f32 1.0, %v8197_v9 }
0x16dd   : > { %v8071_v3 = vadd.f32 -0.28449672, %v8055_v34 }
0x16de   : > { %v8310_v42 = vmul.f32 %v8294_v45, %v8278_v5  ;;  %v8245_v10 = vsub.f32 0.0, %v8213_v15 }
0x16df   : > { %v8087_v28 = vmul.f32 %v8071_v3, %v7974_v56  ;;  %v13447_v6 = vpop.eup %13446 }
0x16e0   : > { %v8326_v11 = vpack.c.bf16 %v8310_v42, %v8310_v42  ;;  %v8261_v43 = vsel %vm8229_vm3, %v8213_v15, %v8245_v10 }
0x16e1   : > { %v8293_v16 = vadd.f32 1.0, %v8261_v43  ;;  %v8103_v29 = vadd.f32 0.2548296, %v8087_v28 }
0x16e2   : > { %9546 = vmatmul.bf16.vlgmr.msra.gmra.mxu1 %v8326_v11 }
0x16e3   : > { %v8309_v63 = vmul.f32 %v8293_v16, %v8277_v41  ;;  %v8119_v22 = vmul.f32 %v8103_v29, %v7974_v56 }
0x16e5   : > { %v8325_v1 = vpack.c.bf16 %v8309_v63, %v8309_v63  ;;  %v8199_v47 = vmul.f32 %v13447_v6, %v8119_v22 }
0x16e7   : > { %9533 = vmatmul.bf16.vlgmr.msrb.gmra.mxu3 %v8325_v1  ;;  %v8215_v17 = vsub.f32 1.0, %v8199_v47 }
0x16e9   : > { %v9365_v18 = vpop.f32.mrf.mxu0  ;;  %v8247_v39 = vsub.f32 0.0, %v8215_v17 }
0x16ea   : > { %v9391_v24 = vpop.f32.mrf.mxu1  ;;  %v9366_v59 = vadd.f32 %v13251_v58, %v9365_v18 }
0x16eb   : > { %v8263_v2 = vsel %vm8231_vm4, %v8215_v17, %v8247_v39  ;;  %v13707_v39 = vmov 0  }
0x16ec   : > { %v8295_v35 = vadd.f32 1.0, %v8263_v2  ;;  %13238 = vset.pattern.permute.xlu1 %v13707_v39  ;;  %13239 = vset.pattern.permute.xlu0 %v13707_v39 }
0x16ee   : > { %v8311_v40 = vmul.f32 %v8295_v35, %v8279_v7 }
0x16f0   : > { %v8327_v33 = vpack.c.bf16 %v8311_v40, %v8311_v40 }
0x16f1   : > { %v9367_v54 = vpop.f32.mrf.mxu0 }
0x16f2   : > { %v9393_v14 = vpop.f32.mrf.mxu1  ;;  %9559 = vmatmul.bf16.vlgmr.msrb.gmra.mxu2 %v8327_v33  ;;  %v13252_v33 = vld [vmem:[%s15994_s26] ss:$0 sm:$0xff]  ;;  %s9667_s26 = sshll.u32 %s1241_s7, 4  ;;  %s9668_s26 = int_to_ptr.vmem [resolvable:$true] %s9667_s26 }
0x16f5   : > { %v9378_v23 = vpop.f32.mrf.mxu3 }
0x16f6   : > { %v9404_v20 = vpop.f32.mrf.mxu2  ;;  %v9379_v52 = vadd.f32 %v9378_v23, %v9366_v59 }
0x16f8   : > { %v9392_v55 = vadd.f32 %v9391_v24, %v9379_v52 }
0x16fa   : > { %v9405_v44 = vadd.f32 %v9404_v20, %v9392_v55  ;;  %v13253_v20 = vld [vmem:[%s15995_s11] ss:$0 sm:$0xff]  ;;  %s9669_s11 = sshll.u32 %s9665_s12, 4  ;;  %s9670_s11 = int_to_ptr.hbm [resolvable:$true] %s9669_s11 }
0x16fb   : > { %s13586_s1 = sshra.s32 %s9670_s11, 4  ;;  %s13587_s1 = int_to_ptr.hbm [resolvable:$true] %s13586_s1 }
0x16fc   : > { %s13588_s3 = scalar_lea.hbm %s13587_s1, 1  ;;  %p13593_p4 = scmp.lt.s32.totalorder %s13587_s1, %s15997_s2 }
0x16fd   : > { %v9380_v25 = vpop.f32.mrf.mxu3  ;;  %p13589_p9 = scmp.ne.s32.totalorder %s13587_s1, %s13588_s3  ;;  %p13594_p7 = scmp.lt.s32.totalorder %s13592_s0, %s13588_s3 }
0x16fe   : > { %v9406_v27 = vpop.f32.mrf.mxu2 }
0x16ff   : > { %p13590_p12 = pnand %p13589_p9, %p13949_p5  ;;  %p13595_p8 = por %p13594_p7, %p13593_p4 }
0x1701   : > { %v9417_v38 = vpop.f32.mrf.mxu0  ;;  %p13591_p0 = pneg %p13590_p12 }
0x1702   : > { %v9418_v30 = vadd.f32 %v9417_v38, %v9405_v44  ;;  %v9647_v38 = vld [vmem:[#allocation2] sm:$0x1] }
0x1703   : > { %p13596_p11 = pnand %p13595_p8, %p13591_p0 }
0x1705   : > { %v9443_v8 = vpop.f32.mrf.mxu1 }
0x1709   : > { %v9419_v57 = vpop.f32.mrf.mxu0 }
0x170d   : > { %v9445_v31 = vpop.f32.mrf.mxu1 }
0x1719   : > { %v9430_v51 = vpop.f32.mrf.mxu3 }
0x171a   : > { %v9431_v49 = vadd.f32 %v9430_v51, %v9418_v30 }
0x171c   : > { %v9444_v13 = vadd.f32 %v9443_v8, %v9431_v49  ;;  %v9633_v8 = vld [vmem:[%s13901_s24] sm:$0xf] }
0x1721   : > { %v9432_v53 = vpop.f32.mrf.mxu3 }
0x172a   : > { %v9456_v0 = vpop.f32.mrf.mxu2 }
0x172b   : > { %v9457_v37 = vadd.f32 %v9456_v0, %v9444_v13 }
0x1730   : > { %v9469_v46 = vpop.f32.mrf.mxu0 }
0x1731   : > { %v9470_v5 = vadd.f32 %v9469_v46, %v9457_v37 }
0x1732   : > { %v9458_v56 = vpop.f32.mrf.mxu2 }
0x1733   : > { %v9495_v21 = vpop.f32.mrf.mxu1 }
0x1738   : > { %v9471_v48 = vpop.f32.mrf.mxu0 }
0x173b   : > { %v9497_v19 = vpop.f32.mrf.mxu1 }
0x173f   : > { %v9482_v32 = vpop.f32.mrf.mxu3 }
0x1740   : > { %v9483_v45 = vadd.f32 %v9482_v32, %v9470_v5 }
0x1742   : > { %v9496_v36 = vadd.f32 %v9495_v21, %v9483_v45 }
0x1747   : > { %v9484_v50 = vpop.f32.mrf.mxu3 }
0x1748   : > { %v13254_v50 = vld [vmem:[%s15996_s28] ss:$0 sm:$0xff]  ;;  %s9657_s28 = scalar_lea.sflag [#allocation5], %s1240_s4 }
0x174d   : > { %v9521_v61 = vpop.f32.mrf.mxu0 }
0x174e   : > { %v9508_v62 = vpop.f32.mrf.mxu2 }
0x174f   : > { %v9509_v26 = vadd.f32 %v9508_v62, %v9496_v36 }
0x1751   : > { %v9522_v10 = vadd.f32 %v9521_v61, %v9509_v26 }
0x1755   : > { %v9523_v60 = vpop.f32.mrf.mxu0 }
0x1756   : > { %v9510_v12 = vpop.f32.mrf.mxu2 }
0x1757   : > { %v13255_v12 = vld [vmem:[%s13896_s27] ss:$0 sm:$0xff] }
0x175f   : > { %v9547_v9 = vpop.f32.mrf.mxu1 }
0x1767   : > { %v9549_v15 = vpop.f32.mrf.mxu1 }
0x176a   : > { %v9534_v42 = vpop.f32.mrf.mxu3 }
0x176b   : > { %v9535_v34 = vadd.f32 %v9534_v42, %v9522_v10 }
0x176d   : > { %v9548_v43 = vadd.f32 %v9547_v9, %v9535_v34 }
0x1772   : > { %v9536_v11 = vpop.f32.mrf.mxu3 }
0x1775   : > { %v9560_v3 = vpop.f32.mrf.mxu2 }
0x1776   : > { %v9561_v41 = vadd.f32 %v9560_v3, %v9548_v43 }
0x1778   : > { %v9564_v16 = vadd.f32 %v9561_v41, %v15222_v4 }
0x177a   : > { %v9567_v28 = vsel %vm1269_vm0, %v9564_v16, 0.0  ;;  %v9571_v63 = vmul.f32 %v9564_v16, %v9564_v16 }
0x177b   : > { %9568 = vadd.xlane.f32.xlu2 %v9567_v28 }
0x177c   : > { %v9572_v29 = vsel %vm1269_vm0, %v9571_v63, 0.0 }
0x177d   : > { %v9562_v18 = vpop.f32.mrf.mxu2  ;;  %9573 = vadd.xlane.f32.xlu0 %v9572_v29 }
0x17ee   : > { %v9569_v1 = vpop.xlane.xlu2 %9568 }
0x17ef   : > { %v9570_v24 = vmul.f32 0.007936508, %v9569_v1 }
0x17f0   : > { %v9574_v22 = vpop.xlane.xlu0 %9573 }
0x17f1   : > { %v9576_v6 = vmul.f32 %v9570_v24, %v9570_v24  ;;  %v9575_v47 = vmul.f32 0.007936508, %v9574_v22  ;;  %v9578_v40 = vsub.f32 %v9564_v16, %v9570_v24 }
0x17f3   : > { %v9577_v17 = vsub.f32 %v9575_v47, %v9576_v6 }
0x17f5   : > { %v9579_v4 = vadd.f32 1e-05, %v9577_v17 }
0x17f7   : > { %13448 = vrsqrt.f32 %v9579_v4  ;;  %vm9586_vm6 = vweird.f32 %v9579_v4 }
0x17fd   : > { %v13449_v54 = vpop.eup %13448 }
0x17fe   : > { %v9581_v14 = vmul.f32 %v13449_v54, %v9579_v4  ;;  %vm9587_vm5 = vweird.f32 %v13449_v54 }
0x17ff   : > { %vm9588_vm7 = vmor %vm9586_vm6, %vm9587_vm5 }
0x1800   : > { %v9582_v2 = vmul.f32 %v13449_v54, %v9581_v14 }
0x1802   : > { %v9583_v7 = vmul.f32 0.5, %v9582_v2 }
0x1804   : > { %v9584_v35 = vsub.f32 1.5, %v9583_v7 }
0x1806   : > { %v9585_v58 = vmul.f32 %v13449_v54, %v9584_v35 }
0x1808   : > { %v9589_v59 = vsel %vm9588_vm7, %v13449_v54, %v9585_v58 }
0x1809   : > { %v9590_v23 = vmul.f32 %v9589_v59, %v9578_v40 }
0x180b   : > { %v9594_v52 = vmul.f32 %v13252_v33, %v9590_v23 }
0x180d   : > { %v9598_v55 = vadd.f32 %v13253_v20, %v9594_v52 }
0x180f   : > { %v9601_v44 = vsel %vm1269_vm0, %v9598_v55, 0.0  ;;  %v9605_v25 = vmul.f32 %v9598_v55, %v9598_v55 }
0x1810   : > { %9602 = vadd.xlane.f32.xlu1 %v9601_v44 }
0x1811   : > { %v9606_v27 = vsel %vm1269_vm0, %v9605_v25, 0.0 }
0x1812   : > { %9607 = vadd.xlane.f32.xlu0 %v9606_v27 }
0x1826   : > { %9650 = vperm.xlu0 %13239, %v9647_v38  }
0x1829   : > { %9636 = vperm.xlu1 %13238, %v9633_v8  }
0x1883   : > { %v9603_v30 = vpop.xlane.xlu1 %9602 }
0x1884   : > { %v9604_v57 = vmul.f32 0.007936508, %v9603_v30 }
0x1885   : > { %v9608_v31 = vpop.xlane.xlu0 %9607 }
0x1886   : > { %v9610_v51 = vmul.f32 %v9604_v57, %v9604_v57  ;;  %v9609_v49 = vmul.f32 0.007936508, %v9608_v31  ;;  %v9612_v32 = vsub.f32 %v9598_v55, %v9604_v57 }
0x1888   : > { %v9611_v13 = vsub.f32 %v9609_v49, %v9610_v51 }
0x188a   : > { %v9613_v53 = vadd.f32 1e-05, %v9611_v13 }
0x188c   : > { %13450 = vrsqrt.f32 %v9613_v53  ;;  %vm9620_vm9 = vweird.f32 %v9613_v53 }
0x1892   : > { %v13451_v0 = vpop.eup %13450 }
0x1893   : > { %v9615_v56 = vmul.f32 %v13451_v0, %v9613_v53  ;;  %vm9621_vm8 = vweird.f32 %v13451_v0 }
0x1894   : > { %vm9622_vm2 = vmor %vm9620_vm9, %vm9621_vm8 }
0x1895   : > { %v9616_v46 = vmul.f32 %v13451_v0, %v9615_v56 }
0x1897   : > { %v9617_v21 = vmul.f32 0.5, %v9616_v46 }
0x1898   : > { %v9651_v26 = vpop.permute.xlu0 %9650 }
0x1899   : > { %v9618_v48 = vsub.f32 1.5, %v9617_v21  ;;  %v9653_v11 = vperm.slane %v9651_v26, 0 }
0x189b   : > { %v9619_v19 = vmul.f32 %v13451_v0, %v9618_v48  ;;  %v9637_v9 = vpop.permute.xlu1 %9636 }
0x189d   : > { %v9623_v62 = vsel %vm9622_vm2, %v13451_v0, %v9619_v19 }
0x189e   : > { %v9624_v61 = vmul.f32 %v9623_v62, %v9612_v32 }
0x18a0   : > { %v9628_v60 = vmul.f32 %v13254_v50, %v9624_v61 }
0x18a2   : > { %v9632_v37 = vadd.f32 %v13255_v12, %v9628_v60 }
0x18a4   : > { %v9639_v5 = vmul.f32 %v9637_v9, %v9632_v37 }
0x18a6   : > { %v9640_v45 = vsel %vm1269_vm0, %v9639_v5, 0.0 }
0x18a7   : > { %v9641_v15 = vrot.slane %v9640_v45, 4 }
0x18a9   : > { %v9642_v36 = vadd.f32 %v9641_v15, %v9640_v45 }
0x18ab   : > { %v9643_v42 = vrot.slane %v9642_v36, 2 }
0x18ad   : > { %v9644_v10 = vadd.f32 %v9643_v42, %v9642_v36 }
0x18af   : > { %v9645_v34 = vrot.slane %v9644_v10, 1 }
0x18b1   : > { %v9646_v43 = vadd.f32 %v9645_v34, %v9644_v10 }
0x18b3   : > { %v9654_v3 = vadd.f32 %v9653_v11, %v9646_v43 }
0x18b5   : > { %9655 = vst [vmem:[%s1241_s7] sm:$0x1] %v9654_v3 }
0x18b6   : > { %13599 = shalt.err (!%p13596_p11)
}
0x18b7   : > { %13116 = dma.vmem_to_hbm [thread:$0]  (%p13949_p5), %s9668_s26, 16, %s9670_s11, %s9657_s28  }
0x18b8 PF: > { %s15999_s12 = sld [smem:[#allocation45_spill]] }
0x18b9   : > { %s16000_s7 = sld [smem:[#allocation43_spill]] }
0x18be   : > { %p13143_p13 = scmp.ge.s32.totalorder %s15999_s12, 2 }
0x18bf   : > { %s9681_s5 = sand.u32 1, %s16000_s7  }
0x18c0   : > { %p13132_p1 = pnand %p13143_p13, %p13953_p6  ;;  %s9682_s6 = scalar_lea.sflag [#allocation5], %s9681_s5 }
0x18c2   : > { %p13133_p2 = pneg %p13132_p1 }
0x18c4   : > { %13629 = dma.done.wait (%p13133_p2), %s9682_s6, 16  }
0x18c5   : > { %13631 = vsyncadd (%p13133_p2), %s9682_s6, 4294967280  ;;  %s16002_s28 = sld [smem:[#allocation46_spill]]  ;;  %s16005_s22 = smov %s13638_s23 }
0x18c6   : > { %s16003_s3 = sld [smem:[#allocation44_spill]] }
0x18c7   : > { %s16004_s26 = sld [smem:[#allocation47_spill]] }
0x18cb   : > { %p94_p3 = scmp.ge.s32.totalorder %s16002_s28, 4  }
0x18cc   : > { %s16006_s23 = smov %s16003_s3 }
0x18cd   :  { %96 = sbr.rel (!%p94_p3) target bundleno = 81 (0x51), region = 267 }
0x18d2   :  { %9687 = vsyncpa [#allocation4], 1 }
0x18d3   :  { %9689 = vsyncpa [#allocation4 + $0x1], 1 }
0x18d4   :  { %9690 = vsyncpa [#allocation7], 1 }
0x18d5   :  { %9691 = vsyncpa [#allocation10], 1 }
0x18d6   :  { %9692 = vsyncpa [#allocation5], 1 }
0x18d7   :  { %9694 = vsyncpa [#allocation5 + $0x1], 1 }

</bundles_post_ra>
